<compile_context>
chip_gen: v7x
topology: tpu7x:2x2x1
jax: 0.10.0
libtpu: 0.0.40
codegen_flags: <defaults>
</compile_context>

<pallas_src>
import functools
import math

import jax
import jax.numpy as jnp
from jax.experimental import pallas as pl
from jax.experimental.pallas import tpu as pltpu

_BN_EPS = 1e-5


# ----------------------------------------------------------------------------
# Pallas kernels
# ----------------------------------------------------------------------------
def _convT_bn_relu_kernel(a_ref, b_ref, q_ref, qt_ref, g_ref, beta_ref, o_ref,
                          *, inv_count):
    """Fused transposed-conv (im2col matmul) + BatchNorm(batch stats) + ReLU.

    a:  (M, K)       im2col patch rows (rows = N*H_in*W_in)
    b:  (K, G*C)     phase-packed transposed-conv weight
    q:  (G*C, C)     lane-group reduce matrix   q[i, c] = [i % C == c]
    qt: (C, G*C)     lane-group broadcast matrix (q transposed)
    g, beta: (1, G*C)  BN affine params tiled over the G phase groups
    inv_count = 1 / (G*M) : reciprocal element count per BN channel
    """
    y = jnp.dot(a_ref[...], b_ref[...], preferred_element_type=jnp.float32)

    # Column sums of y and y*y (XLU sublane reduce), stacked so folding the G
    # phase groups into per-channel sums and broadcasting back to (1, G*C)
    # lanes costs ONE pair of tiny MXU matmuls for both statistics.
    stats = jnp.concatenate(
        [jnp.sum(y, axis=0, keepdims=True),
         jnp.sum(y * y, axis=0, keepdims=True)], axis=0)            # (2, G*C)
    ch = jnp.dot(jnp.dot(stats, q_ref[...],
                         preferred_element_type=jnp.float32),
                 qt_ref[...], preferred_element_type=jnp.float32)   # (2, G*C)

    mean = ch[0:1, :] * inv_count
    var = jnp.maximum(ch[1:2, :] * inv_count - mean * mean, 0.0)    # clamp >=0
    scale = jax.lax.rsqrt(var + _BN_EPS) * g_ref[...]               # EUP rsqrt
    shift = beta_ref[...] - mean * scale

    o_ref[...] = jnp.maximum(y * scale + shift, 0.0).astype(o_ref.dtype)


def _convT_tanh_kernel(a_ref, b_ref, o_ref):
    """Final transposed conv (phase-packed matmul) + tanh, no BatchNorm."""
    y = jnp.dot(a_ref[...], b_ref[...], preferred_element_type=jnp.float32)
    o_ref[...] = jnp.tanh(y).astype(o_ref.dtype)


# ----------------------------------------------------------------------------
# Pallas wrappers (grid-less: whole operands live in VMEM, single step)
# ----------------------------------------------------------------------------
def _vmem_spec():
    return pl.BlockSpec(memory_space=pltpu.MemorySpace.VMEM)


def pallas_convT_bn_relu(a, b, q, qt, gamma, beta):
    m = a.shape[0]
    gc = b.shape[1]
    c = q.shape[1]
    groups = gc // c
    inv_count = 1.0 / float(groups * m)                 # elems per BN channel
    return pl.pallas_call(
        functools.partial(_convT_bn_relu_kernel, inv_count=inv_count),
        out_shape=jax.ShapeDtypeStruct((m, gc), jnp.float32),
        in_specs=[_vmem_spec()] * 6,
        out_specs=_vmem_spec(),
    )(a, b, q, qt, gamma, beta)


def pallas_convT_tanh(a, b):
    m = a.shape[0]
    n = b.shape[1]
    return pl.pallas_call(
        _convT_tanh_kernel,
        out_shape=jax.ShapeDtypeStruct((m, n), jnp.float32),
        in_specs=[_vmem_spec()] * 2,
        out_specs=_vmem_spec(),
    )(a, b)


# ----------------------------------------------------------------------------
# Glue: patch extraction / pixel shuffle / weight repacking (plain JAX)
# ----------------------------------------------------------------------------
def upsample_cols(x):
    """NHWC image -> 3x3-patch im2col rows for a fused k=4,s=2,p=1 ConvTranspose.

    Row r = (n*H + y)*W + x ; column = (dy*3 + dx)*C + ci with dy,dx in [0,3).
    """
    n, h, w, c = x.shape
    xp = jnp.pad(x, ((0, 0), (1, 1), (1, 1), (0, 0)))
    patches = [xp[:, dy:dy + h, dx:dx + w, :]
               for dy in range(3) for dx in range(3)]
    cols = jnp.stack(patches, axis=3)                   # (N, H, W, 9, C)
    return cols.reshape(n * h * w, 9 * c)


def phases_to_image(y, n, h, w, c):
    """(N*H*W, 4*C) lanes ordered (py, px, c) -> NHWC (N, 2H, 2W, C)."""
    y = y.reshape(n, h, w, 2, 2, c)
    y = jnp.transpose(y, (0, 1, 3, 2, 4, 5))
    return y.reshape(n, 2 * h, 2 * w, c)


def convT_s2_weight_to_mat(w):
    """PyTorch ConvTranspose2d weight (Cin, Cout, 4, 4), stride=2, pad=1
    -> phase-packed matmul weight (9*Cin, 4*Cout).

    out[2m+py, 2n+px, co] = sum_{a,b in {0,1}, ci}
        pad(x)[m+py+a, n+px+b, ci] * W[ci, co, 3-py-2a, 3-px-2b]
    """
    cin, cout = w.shape[0], w.shape[1]
    mat = jnp.zeros((9 * cin, 4 * cout), jnp.float32)
    for py in range(2):
        for px in range(2):
            for a in range(2):
                for b in range(2):
                    dy, dx = py + a, px + b
                    ky, kx = 3 - py - 2 * a, 3 - px - 2 * b
                    r0 = (dy * 3 + dx) * cin
                    c0 = (py * 2 + px) * cout
                    mat = mat.at[r0:r0 + cin, c0:c0 + cout].set(w[:, :, ky, kx])
    return mat


def convT_s1_1x1in_weight_to_mat(w):
    """ConvTranspose2d(nz, C, 4, 1, 0) on a 1x1 input == plain matmul:
    (Cin, Cout, 4, 4) -> (Cin, 16*Cout), lanes ordered (oy, ox, c)."""
    cin, cout = w.shape[0], w.shape[1]
    return jnp.transpose(w, (0, 2, 3, 1)).reshape(cin, 16 * cout)


def group_reduce_mats(groups, c):
    idx = jnp.arange(groups * c) % c
    q = (idx[:, None] == jnp.arange(c)[None, :]).astype(jnp.float32)
    return q, q.T


def init_convT(key, cin, cout, k=4):
    fan_in = cout * k * k
    bound = 1.0 / math.sqrt(fan_in)
    return jax.random.uniform(key, (cin, cout, k, k), jnp.float32, -bound, bound)


def init_params(key, nz=16, ngf=8, nc=3):
    ks = jax.random.split(key, 5)
    c1, c2, c3, c4 = ngf * 8, ngf * 4, ngf * 2, ngf
    p = {
        "w1": convT_s1_1x1in_weight_to_mat(init_convT(ks[0], nz, c1)),
        "w2": convT_s2_weight_to_mat(init_convT(ks[1], c1, c2)),
        "w3": convT_s2_weight_to_mat(init_convT(ks[2], c2, c3)),
        "w4": convT_s2_weight_to_mat(init_convT(ks[3], c3, c4)),
        "w5": convT_s2_weight_to_mat(init_convT(ks[4], c4, nc)),
    }
    # BatchNorm affine params (PyTorch default: weight=1, bias=0), pre-tiled to
    # the phase-packed lane layout, plus the group reduce/broadcast matrices.
    for name, c, g in (("1", c1, 16), ("2", c2, 4), ("3", c3, 4), ("4", c4, 4)):
        p["g" + name] = jnp.ones((1, g * c), jnp.float32)
        p["b" + name] = jnp.zeros((1, g * c), jnp.float32)
        q, qt = group_reduce_mats(g, c)
        p["q" + name] = q
        p["qt" + name] = qt
    return p


# ----------------------------------------------------------------------------
# Forward pass (NCHW in, NCHW out)
# ----------------------------------------------------------------------------
def forward(z_nchw, params, nz, ngf, nc):
    n = z_nchw.shape[0]
    c1, c2, c3, c4 = ngf * 8, ngf * 4, ngf * 2, ngf

    # Layer 1: ConvT(nz, 8g, 4, 1, 0) on a 1x1 input == matmul; fused BN+ReLU.
    a1 = z_nchw.reshape(n, nz).astype(jnp.float32)
    y1 = pallas_convT_bn_relu(a1, params["w1"], params["q1"], params["qt1"],
                              params["g1"], params["b1"])
    x1 = y1.reshape(n, 4, 4, c1)                                 # NHWC

    # Layers 2-4: ConvT(k=4, s=2, p=1) + BN + ReLU, one fused pallas_call each.
    def up_bn_relu(x, w, q, qt, g, b, cout):
        nb, h, wd, _ = x.shape
        y = pallas_convT_bn_relu(upsample_cols(x), w, q, qt, g, b)
        return phases_to_image(y, nb, h, wd, cout)

    x2 = up_bn_relu(x1, params["w2"], params["q2"], params["qt2"],
                    params["g2"], params["b2"], c2)
    x3 = up_bn_relu(x2, params["w3"], params["q3"], params["qt3"],
                    params["g3"], params["b3"], c3)
    x4 = up_bn_relu(x3, params["w4"], params["q4"], params["qt4"],
                    params["g4"], params["b4"], c4)

    # Layer 5: ConvT(g, nc, 4, 2, 1) + Tanh (no BatchNorm).
    nb, h, wd, _ = x4.shape
    y5 = pallas_convT_tanh(upsample_cols(x4), params["w5"])
    x5 = phases_to_image(y5, nb, h, wd, nc)
    return jnp.transpose(x5, (0, 3, 1, 2))                       # NCHW


# ----------------------------------------------------------------------------
if __name__ == "__main__":
    key = jax.random.PRNGKey(0)
    k_params, k_z = jax.random.split(key)

    nz, ngf, nc, batch = 16, 8, 3, 2     # small synthetic configuration
    params = init_params(k_params, nz=nz, ngf=ngf, nc=nc)
    z = jax.random.normal(k_z, (batch, nz, 1, 1), dtype=jnp.float32)

    fwd = jax.jit(functools.partial(forward, nz=nz, ngf=ngf, nc=nc))
    out = jax.block_until_ready(fwd(z, params))

    assert out.shape == (batch, nc, 64, 64), out.shape
    assert bool(jnp.all(jnp.isfinite(out)))
    assert bool(jnp.all((out >= -1.0) & (out <= 1.0)))           # tanh range
    print("KERNEL_OK")
</pallas_src>

<mosaic_0001>
module attributes {stable_mosaic.version = 11 : i64} {
  func.func @_convT_bn_relu_kernel(%arg0: memref<2x16xf32, #tpu.memory_space<vmem>>, %arg1: memref<16x1024xf32, #tpu.memory_space<vmem>>, %arg2: memref<1024x64xf32, #tpu.memory_space<vmem>>, %arg3: memref<64x1024xf32, #tpu.memory_space<vmem>>, %arg4: memref<1x1024xf32, #tpu.memory_space<vmem>>, %arg5: memref<1x1024xf32, #tpu.memory_space<vmem>>, %arg6: memref<2x1024xf32, #tpu.memory_space<vmem>>) attributes {dimension_semantics = [], scalar_prefetch = 0 : i64, scratch_operands = 0 : i64, tpu.core_type = #tpu.core_type<tc>} {
    %c0 = arith.constant 0 : index
    %c0_0 = arith.constant 0 : index
    %0 = vector.load %arg0[%c0, %c0_0] : memref<2x16xf32, #tpu.memory_space<vmem>>, vector<2x16xf32>
    %c0_1 = arith.constant 0 : index
    %c0_2 = arith.constant 0 : index
    %1 = vector.load %arg1[%c0_1, %c0_2] : memref<16x1024xf32, #tpu.memory_space<vmem>>, vector<16x1024xf32>
    %cst = arith.constant dense<0.000000e+00> : vector<2x1024xf32>
    %2 = tpu.matmul %0, %1, %cst {dimension_numbers = #tpu.dot_dimension_numbers<[1], [0], [0], [1], [0, 0, 1, 1], [], []>} : vector<2x16xf32>, vector<16x1024xf32>, vector<2x1024xf32> -> vector<2x1024xf32>
    %cst_3 = arith.constant dense<0.000000e+00> : vector<1024xf32>
    %3 = vector.multi_reduction <add>, %2, %cst_3 [0] : vector<2x1024xf32> to vector<1024xf32>
    %4 = vector.shape_cast %3 : vector<1024xf32> to vector<1x1024xf32>
    %5 = arith.mulf %2, %2 : vector<2x1024xf32>
    %cst_4 = arith.constant dense<0.000000e+00> : vector<1024xf32>
    %6 = vector.multi_reduction <add>, %5, %cst_4 [0] : vector<2x1024xf32> to vector<1024xf32>
    %7 = vector.shape_cast %6 : vector<1024xf32> to vector<1x1024xf32>
    %8 = tpu.concatenate %4, %7 in 0 : vector<1x1024xf32>, vector<1x1024xf32> -> vector<2x1024xf32>
    %c0_5 = arith.constant 0 : index
    %c0_6 = arith.constant 0 : index
    %9 = vector.load %arg2[%c0_5, %c0_6] : memref<1024x64xf32, #tpu.memory_space<vmem>>, vector<1024x64xf32>
    %cst_7 = arith.constant dense<0.000000e+00> : vector<2x64xf32>
    %10 = tpu.matmul %8, %9, %cst_7 {dimension_numbers = #tpu.dot_dimension_numbers<[1], [0], [0], [1], [0, 0, 1, 1], [], []>} : vector<2x1024xf32>, vector<1024x64xf32>, vector<2x64xf32> -> vector<2x64xf32>
    %c0_8 = arith.constant 0 : index
    %c0_9 = arith.constant 0 : index
    %11 = vector.load %arg3[%c0_8, %c0_9] : memref<64x1024xf32, #tpu.memory_space<vmem>>, vector<64x1024xf32>
    %cst_10 = arith.constant dense<0.000000e+00> : vector<2x1024xf32>
    %12 = tpu.matmul %10, %11, %cst_10 {dimension_numbers = #tpu.dot_dimension_numbers<[1], [0], [0], [1], [0, 0, 1, 1], [], []>} : vector<2x64xf32>, vector<64x1024xf32>, vector<2x1024xf32> -> vector<2x1024xf32>
    %13 = vector.extract_strided_slice %12 {offsets = [0, 0], sizes = [1, 1024], strides = [1, 1]} : vector<2x1024xf32> to vector<1x1024xf32>
    %cst_11 = arith.constant 3.125000e-02 : f32
    %14 = vector.broadcast %cst_11 : f32 to vector<1x1024xf32>
    %15 = arith.mulf %13, %14 : vector<1x1024xf32>
    %16 = vector.extract_strided_slice %12 {offsets = [1, 0], sizes = [1, 1024], strides = [1, 1]} : vector<2x1024xf32> to vector<1x1024xf32>
    %cst_12 = arith.constant 3.125000e-02 : f32
    %17 = vector.broadcast %cst_12 : f32 to vector<1x1024xf32>
    %18 = arith.mulf %16, %17 : vector<1x1024xf32>
    %19 = arith.mulf %15, %15 : vector<1x1024xf32>
    %20 = arith.subf %18, %19 : vector<1x1024xf32>
    %cst_13 = arith.constant 0.000000e+00 : f32
    %21 = vector.broadcast %cst_13 : f32 to vector<1x1024xf32>
    %22 = arith.maximumf %20, %21 : vector<1x1024xf32>
    %cst_14 = arith.constant 9.99999974E-6 : f32
    %23 = vector.broadcast %cst_14 : f32 to vector<1x1024xf32>
    %24 = arith.addf %22, %23 : vector<1x1024xf32>
    %25 = math.rsqrt %24 : vector<1x1024xf32>
    %c0_15 = arith.constant 0 : index
    %c0_16 = arith.constant 0 : index
    %26 = vector.load %arg4[%c0_15, %c0_16] : memref<1x1024xf32, #tpu.memory_space<vmem>>, vector<1x1024xf32>
    %27 = arith.mulf %25, %26 : vector<1x1024xf32>
    %c0_17 = arith.constant 0 : index
    %c0_18 = arith.constant 0 : index
    %28 = vector.load %arg5[%c0_17, %c0_18] : memref<1x1024xf32, #tpu.memory_space<vmem>>, vector<1x1024xf32>
    %29 = arith.mulf %15, %27 : vector<1x1024xf32>
    %30 = arith.subf %28, %29 : vector<1x1024xf32>
    %31 = vector.broadcast %27 : vector<1x1024xf32> to vector<2x1024xf32>
    %32 = arith.mulf %2, %31 : vector<2x1024xf32>
    %33 = vector.broadcast %30 : vector<1x1024xf32> to vector<2x1024xf32>
    %34 = arith.addf %32, %33 : vector<2x1024xf32>
    %cst_19 = arith.constant 0.000000e+00 : f32
    %35 = vector.broadcast %cst_19 : f32 to vector<2x1024xf32>
    %36 = arith.maximumf %34, %35 : vector<2x1024xf32>
    %c0_20 = arith.constant 0 : index
    %c0_21 = arith.constant 0 : index
    %37 = vector.load %arg6[%c0_20, %c0_21] : memref<2x1024xf32, #tpu.memory_space<vmem>>, vector<2x1024xf32>
    tpu.vector_store %arg6[%c0_20, %c0_21], %36 {strides = array<i32>} : memref<2x1024xf32, #tpu.memory_space<vmem>>, vector<2x1024xf32>,
    return
  }
}

module attributes {stable_mosaic.version = 11 : i64} {
  func.func @_convT_bn_relu_kernel(%arg0: memref<32x576xf32, #tpu.memory_space<vmem>>, %arg1: memref<576x128xf32, #tpu.memory_space<vmem>>, %arg2: memref<128x32xf32, #tpu.memory_space<vmem>>, %arg3: memref<32x128xf32, #tpu.memory_space<vmem>>, %arg4: memref<1x128xf32, #tpu.memory_space<vmem>>, %arg5: memref<1x128xf32, #tpu.memory_space<vmem>>, %arg6: memref<32x128xf32, #tpu.memory_space<vmem>>) attributes {dimension_semantics = [], scalar_prefetch = 0 : i64, scratch_operands = 0 : i64, tpu.core_type = #tpu.core_type<tc>} {
    %c0 = arith.constant 0 : index
    %c0_0 = arith.constant 0 : index
    %0 = vector.load %arg0[%c0, %c0_0] : memref<32x576xf32, #tpu.memory_space<vmem>>, vector<32x576xf32>
    %c0_1 = arith.constant 0 : index
    %c0_2 = arith.constant 0 : index
    %1 = vector.load %arg1[%c0_1, %c0_2] : memref<576x128xf32, #tpu.memory_space<vmem>>, vector<576x128xf32>
    %cst = arith.constant dense<0.000000e+00> : vector<32x128xf32>
    %2 = tpu.matmul %0, %1, %cst {dimension_numbers = #tpu.dot_dimension_numbers<[1], [0], [0], [1], [0, 0, 1, 1], [], []>} : vector<32x576xf32>, vector<576x128xf32>, vector<32x128xf32> -> vector<32x128xf32>
    %cst_3 = arith.constant dense<0.000000e+00> : vector<128xf32>
    %3 = vector.multi_reduction <add>, %2, %cst_3 [0] : vector<32x128xf32> to vector<128xf32>
    %4 = vector.shape_cast %3 : vector<128xf32> to vector<1x128xf32>
    %5 = arith.mulf %2, %2 : vector<32x128xf32>
    %cst_4 = arith.constant dense<0.000000e+00> : vector<128xf32>
    %6 = vector.multi_reduction <add>, %5, %cst_4 [0] : vector<32x128xf32> to vector<128xf32>
    %7 = vector.shape_cast %6 : vector<128xf32> to vector<1x128xf32>
    %8 = tpu.concatenate %4, %7 in 0 : vector<1x128xf32>, vector<1x128xf32> -> vector<2x128xf32>
    %c0_5 = arith.constant 0 : index
    %c0_6 = arith.constant 0 : index
    %9 = vector.load %arg2[%c0_5, %c0_6] : memref<128x32xf32, #tpu.memory_space<vmem>>, vector<128x32xf32>
    %cst_7 = arith.constant dense<0.000000e+00> : vector<2x32xf32>
    %10 = tpu.matmul %8, %9, %cst_7 {dimension_numbers = #tpu.dot_dimension_numbers<[1], [0], [0], [1], [0, 0, 1, 1], [], []>} : vector<2x128xf32>, vector<128x32xf32>, vector<2x32xf32> -> vector<2x32xf32>
    %c0_8 = arith.constant 0 : index
    %c0_9 = arith.constant 0 : index
    %11 = vector.load %arg3[%c0_8, %c0_9] : memref<32x128xf32, #tpu.memory_space<vmem>>, vector<32x128xf32>
    %cst_10 = arith.constant dense<0.000000e+00> : vector<2x128xf32>
    %12 = tpu.matmul %10, %11, %cst_10 {dimension_numbers = #tpu.dot_dimension_numbers<[1], [0], [0], [1], [0, 0, 1, 1], [], []>} : vector<2x32xf32>, vector<32x128xf32>, vector<2x128xf32> -> vector<2x128xf32>
    %13 = vector.extract_strided_slice %12 {offsets = [0, 0], sizes = [1, 128], strides = [1, 1]} : vector<2x128xf32> to vector<1x128xf32>
    %cst_11 = arith.constant 7.812500e-03 : f32
    %14 = vector.broadcast %cst_11 : f32 to vector<1x128xf32>
    %15 = arith.mulf %13, %14 : vector<1x128xf32>
    %16 = vector.extract_strided_slice %12 {offsets = [1, 0], sizes = [1, 128], strides = [1, 1]} : vector<2x128xf32> to vector<1x128xf32>
    %cst_12 = arith.constant 7.812500e-03 : f32
    %17 = vector.broadcast %cst_12 : f32 to vector<1x128xf32>
    %18 = arith.mulf %16, %17 : vector<1x128xf32>
    %19 = arith.mulf %15, %15 : vector<1x128xf32>
    %20 = arith.subf %18, %19 : vector<1x128xf32>
    %cst_13 = arith.constant 0.000000e+00 : f32
    %21 = vector.broadcast %cst_13 : f32 to vector<1x128xf32>
    %22 = arith.maximumf %20, %21 : vector<1x128xf32>
    %cst_14 = arith.constant 9.99999974E-6 : f32
    %23 = vector.broadcast %cst_14 : f32 to vector<1x128xf32>
    %24 = arith.addf %22, %23 : vector<1x128xf32>
    %25 = math.rsqrt %24 : vector<1x128xf32>
    %c0_15 = arith.constant 0 : index
    %c0_16 = arith.constant 0 : index
    %26 = vector.load %arg4[%c0_15, %c0_16] : memref<1x128xf32, #tpu.memory_space<vmem>>, vector<1x128xf32>
    %27 = arith.mulf %25, %26 : vector<1x128xf32>
    %c0_17 = arith.constant 0 : index
    %c0_18 = arith.constant 0 : index
    %28 = vector.load %arg5[%c0_17, %c0_18] : memref<1x128xf32, #tpu.memory_space<vmem>>, vector<1x128xf32>
    %29 = arith.mulf %15, %27 : vector<1x128xf32>
    %30 = arith.subf %28, %29 : vector<1x128xf32>
    %31 = vector.broadcast %27 : vector<1x128xf32> to vector<32x128xf32>
    %32 = arith.mulf %2, %31 : vector<32x128xf32>
    %33 = vector.broadcast %30 : vector<1x128xf32> to vector<32x128xf32>
    %34 = arith.addf %32, %33 : vector<32x128xf32>
    %cst_19 = arith.constant 0.000000e+00 : f32
    %35 = vector.broadcast %cst_19 : f32 to vector<32x128xf32>
    %36 = arith.maximumf %34, %35 : vector<32x128xf32>
    %c0_20 = arith.constant 0 : index
    %c0_21 = arith.constant 0 : index
    %37 = vector.load %arg6[%c0_20, %c0_21] : memref<32x128xf32, #tpu.memory_space<vmem>>, vector<32x128xf32>
    tpu.vector_store %arg6[%c0_20, %c0_21], %36 {strides = array<i32>} : memref<32x128xf32, #tpu.memory_space<vmem>>, vector<32x128xf32>,
    return
  }
}

module attributes {stable_mosaic.version = 11 : i64} {
  func.func @_convT_bn_relu_kernel(%arg0: memref<128x288xf32, #tpu.memory_space<vmem>>, %arg1: memref<288x64xf32, #tpu.memory_space<vmem>>, %arg2: memref<64x16xf32, #tpu.memory_space<vmem>>, %arg3: memref<16x64xf32, #tpu.memory_space<vmem>>, %arg4: memref<1x64xf32, #tpu.memory_space<vmem>>, %arg5: memref<1x64xf32, #tpu.memory_space<vmem>>, %arg6: memref<128x64xf32, #tpu.memory_space<vmem>>) attributes {dimension_semantics = [], scalar_prefetch = 0 : i64, scratch_operands = 0 : i64, tpu.core_type = #tpu.core_type<tc>} {
    %c0 = arith.constant 0 : index
    %c0_0 = arith.constant 0 : index
    %0 = vector.load %arg0[%c0, %c0_0] : memref<128x288xf32, #tpu.memory_space<vmem>>, vector<128x288xf32>
    %c0_1 = arith.constant 0 : index
    %c0_2 = arith.constant 0 : index
    %1 = vector.load %arg1[%c0_1, %c0_2] : memref<288x64xf32, #tpu.memory_space<vmem>>, vector<288x64xf32>
    %cst = arith.constant dense<0.000000e+00> : vector<128x64xf32>
    %2 = tpu.matmul %0, %1, %cst {dimension_numbers = #tpu.dot_dimension_numbers<[1], [0], [0], [1], [0, 0, 1, 1], [], []>} : vector<128x288xf32>, vector<288x64xf32>, vector<128x64xf32> -> vector<128x64xf32>
    %cst_3 = arith.constant dense<0.000000e+00> : vector<64xf32>
    %3 = vector.multi_reduction <add>, %2, %cst_3 [0] : vector<128x64xf32> to vector<64xf32>
    %4 = vector.shape_cast %3 : vector<64xf32> to vector<1x64xf32>
    %5 = arith.mulf %2, %2 : vector<128x64xf32>
    %cst_4 = arith.constant dense<0.000000e+00> : vector<64xf32>
    %6 = vector.multi_reduction <add>, %5, %cst_4 [0] : vector<128x64xf32> to vector<64xf32>
    %7 = vector.shape_cast %6 : vector<64xf32> to vector<1x64xf32>
    %8 = tpu.concatenate %4, %7 in 0 : vector<1x64xf32>, vector<1x64xf32> -> vector<2x64xf32>
    %c0_5 = arith.constant 0 : index
    %c0_6 = arith.constant 0 : index
    %9 = vector.load %arg2[%c0_5, %c0_6] : memref<64x16xf32, #tpu.memory_space<vmem>>, vector<64x16xf32>
    %cst_7 = arith.constant dense<0.000000e+00> : vector<2x16xf32>
    %10 = tpu.matmul %8, %9, %cst_7 {dimension_numbers = #tpu.dot_dimension_numbers<[1], [0], [0], [1], [0, 0, 1, 1], [], []>} : vector<2x64xf32>, vector<64x16xf32>, vector<2x16xf32> -> vector<2x16xf32>
    %c0_8 = arith.constant 0 : index
    %c0_9 = arith.constant 0 : index
    %11 = vector.load %arg3[%c0_8, %c0_9] : memref<16x64xf32, #tpu.memory_space<vmem>>, vector<16x64xf32>
    %cst_10 = arith.constant dense<0.000000e+00> : vector<2x64xf32>
    %12 = tpu.matmul %10, %11, %cst_10 {dimension_numbers = #tpu.dot_dimension_numbers<[1], [0], [0], [1], [0, 0, 1, 1], [], []>} : vector<2x16xf32>, vector<16x64xf32>, vector<2x64xf32> -> vector<2x64xf32>
    %13 = vector.extract_strided_slice %12 {offsets = [0, 0], sizes = [1, 64], strides = [1, 1]} : vector<2x64xf32> to vector<1x64xf32>
    %cst_11 = arith.constant 0.001953125 : f32
    %14 = vector.broadcast %cst_11 : f32 to vector<1x64xf32>
    %15 = arith.mulf %13, %14 : vector<1x64xf32>
    %16 = vector.extract_strided_slice %12 {offsets = [1, 0], sizes = [1, 64], strides = [1, 1]} : vector<2x64xf32> to vector<1x64xf32>
    %cst_12 = arith.constant 0.001953125 : f32
    %17 = vector.broadcast %cst_12 : f32 to vector<1x64xf32>
    %18 = arith.mulf %16, %17 : vector<1x64xf32>
    %19 = arith.mulf %15, %15 : vector<1x64xf32>
    %20 = arith.subf %18, %19 : vector<1x64xf32>
    %cst_13 = arith.constant 0.000000e+00 : f32
    %21 = vector.broadcast %cst_13 : f32 to vector<1x64xf32>
    %22 = arith.maximumf %20, %21 : vector<1x64xf32>
    %cst_14 = arith.constant 9.99999974E-6 : f32
    %23 = vector.broadcast %cst_14 : f32 to vector<1x64xf32>
    %24 = arith.addf %22, %23 : vector<1x64xf32>
    %25 = math.rsqrt %24 : vector<1x64xf32>
    %c0_15 = arith.constant 0 : index
    %c0_16 = arith.constant 0 : index
    %26 = vector.load %arg4[%c0_15, %c0_16] : memref<1x64xf32, #tpu.memory_space<vmem>>, vector<1x64xf32>
    %27 = arith.mulf %25, %26 : vector<1x64xf32>
    %c0_17 = arith.constant 0 : index
    %c0_18 = arith.constant 0 : index
    %28 = vector.load %arg5[%c0_17, %c0_18] : memref<1x64xf32, #tpu.memory_space<vmem>>, vector<1x64xf32>
    %29 = arith.mulf %15, %27 : vector<1x64xf32>
    %30 = arith.subf %28, %29 : vector<1x64xf32>
    %31 = vector.broadcast %27 : vector<1x64xf32> to vector<128x64xf32>
    %32 = arith.mulf %2, %31 : vector<128x64xf32>
    %33 = vector.broadcast %30 : vector<1x64xf32> to vector<128x64xf32>
    %34 = arith.addf %32, %33 : vector<128x64xf32>
    %cst_19 = arith.constant 0.000000e+00 : f32
    %35 = vector.broadcast %cst_19 : f32 to vector<128x64xf32>
    %36 = arith.maximumf %34, %35 : vector<128x64xf32>
    %c0_20 = arith.constant 0 : index
    %c0_21 = arith.constant 0 : index
    %37 = vector.load %arg6[%c0_20, %c0_21] : memref<128x64xf32, #tpu.memory_space<vmem>>, vector<128x64xf32>
    tpu.vector_store %arg6[%c0_20, %c0_21], %36 {strides = array<i32>} : memref<128x64xf32, #tpu.memory_space<vmem>>, vector<128x64xf32>,
    return
  }
}

module attributes {stable_mosaic.version = 11 : i64} {
  func.func @_convT_bn_relu_kernel(%arg0: memref<512x144xf32, #tpu.memory_space<vmem>>, %arg1: memref<144x32xf32, #tpu.memory_space<vmem>>, %arg2: memref<32x8xf32, #tpu.memory_space<vmem>>, %arg3: memref<8x32xf32, #tpu.memory_space<vmem>>, %arg4: memref<1x32xf32, #tpu.memory_space<vmem>>, %arg5: memref<1x32xf32, #tpu.memory_space<vmem>>, %arg6: memref<512x32xf32, #tpu.memory_space<vmem>>) attributes {dimension_semantics = [], scalar_prefetch = 0 : i64, scratch_operands = 0 : i64, tpu.core_type = #tpu.core_type<tc>} {
    %c0 = arith.constant 0 : index
    %c0_0 = arith.constant 0 : index
    %0 = vector.load %arg0[%c0, %c0_0] : memref<512x144xf32, #tpu.memory_space<vmem>>, vector<512x144xf32>
    %c0_1 = arith.constant 0 : index
    %c0_2 = arith.constant 0 : index
    %1 = vector.load %arg1[%c0_1, %c0_2] : memref<144x32xf32, #tpu.memory_space<vmem>>, vector<144x32xf32>
    %cst = arith.constant dense<0.000000e+00> : vector<512x32xf32>
    %2 = tpu.matmul %0, %1, %cst {dimension_numbers = #tpu.dot_dimension_numbers<[1], [0], [0], [1], [0, 0, 1, 1], [], []>} : vector<512x144xf32>, vector<144x32xf32>, vector<512x32xf32> -> vector<512x32xf32>
    %cst_3 = arith.constant dense<0.000000e+00> : vector<32xf32>
    %3 = vector.multi_reduction <add>, %2, %cst_3 [0] : vector<512x32xf32> to vector<32xf32>
    %4 = vector.shape_cast %3 : vector<32xf32> to vector<1x32xf32>
    %5 = arith.mulf %2, %2 : vector<512x32xf32>
    %cst_4 = arith.constant dense<0.000000e+00> : vector<32xf32>
    %6 = vector.multi_reduction <add>, %5, %cst_4 [0] : vector<512x32xf32> to vector<32xf32>
    %7 = vector.shape_cast %6 : vector<32xf32> to vector<1x32xf32>
    %8 = tpu.concatenate %4, %7 in 0 : vector<1x32xf32>, vector<1x32xf32> -> vector<2x32xf32>
    %c0_5 = arith.constant 0 : index
    %c0_6 = arith.constant 0 : index
    %9 = vector.load %arg2[%c0_5, %c0_6] : memref<32x8xf32, #tpu.memory_space<vmem>>, vector<32x8xf32>
    %cst_7 = arith.constant dense<0.000000e+00> : vector<2x8xf32>
    %10 = tpu.matmul %8, %9, %cst_7 {dimension_numbers = #tpu.dot_dimension_numbers<[1], [0], [0], [1], [0, 0, 1, 1], [], []>} : vector<2x32xf32>, vector<32x8xf32>, vector<2x8xf32> -> vector<2x8xf32>
    %c0_8 = arith.constant 0 : index
    %c0_9 = arith.constant 0 : index
    %11 = vector.load %arg3[%c0_8, %c0_9] : memref<8x32xf32, #tpu.memory_space<vmem>>, vector<8x32xf32>
    %cst_10 = arith.constant dense<0.000000e+00> : vector<2x32xf32>
    %12 = tpu.matmul %10, %11, %cst_10 {dimension_numbers = #tpu.dot_dimension_numbers<[1], [0], [0], [1], [0, 0, 1, 1], [], []>} : vector<2x8xf32>, vector<8x32xf32>, vector<2x32xf32> -> vector<2x32xf32>
    %13 = vector.extract_strided_slice %12 {offsets = [0, 0], sizes = [1, 32], strides = [1, 1]} : vector<2x32xf32> to vector<1x32xf32>
    %cst_11 = arith.constant 4.8828125E-4 : f32
    %14 = vector.broadcast %cst_11 : f32 to vector<1x32xf32>
    %15 = arith.mulf %13, %14 : vector<1x32xf32>
    %16 = vector.extract_strided_slice %12 {offsets = [1, 0], sizes = [1, 32], strides = [1, 1]} : vector<2x32xf32> to vector<1x32xf32>
    %cst_12 = arith.constant 4.8828125E-4 : f32
    %17 = vector.broadcast %cst_12 : f32 to vector<1x32xf32>
    %18 = arith.mulf %16, %17 : vector<1x32xf32>
    %19 = arith.mulf %15, %15 : vector<1x32xf32>
    %20 = arith.subf %18, %19 : vector<1x32xf32>
    %cst_13 = arith.constant 0.000000e+00 : f32
    %21 = vector.broadcast %cst_13 : f32 to vector<1x32xf32>
    %22 = arith.maximumf %20, %21 : vector<1x32xf32>
    %cst_14 = arith.constant 9.99999974E-6 : f32
    %23 = vector.broadcast %cst_14 : f32 to vector<1x32xf32>
    %24 = arith.addf %22, %23 : vector<1x32xf32>
    %25 = math.rsqrt %24 : vector<1x32xf32>
    %c0_15 = arith.constant 0 : index
    %c0_16 = arith.constant 0 : index
    %26 = vector.load %arg4[%c0_15, %c0_16] : memref<1x32xf32, #tpu.memory_space<vmem>>, vector<1x32xf32>
    %27 = arith.mulf %25, %26 : vector<1x32xf32>
    %c0_17 = arith.constant 0 : index
    %c0_18 = arith.constant 0 : index
    %28 = vector.load %arg5[%c0_17, %c0_18] : memref<1x32xf32, #tpu.memory_space<vmem>>, vector<1x32xf32>
    %29 = arith.mulf %15, %27 : vector<1x32xf32>
    %30 = arith.subf %28, %29 : vector<1x32xf32>
    %31 = vector.broadcast %27 : vector<1x32xf32> to vector<512x32xf32>
    %32 = arith.mulf %2, %31 : vector<512x32xf32>
    %33 = vector.broadcast %30 : vector<1x32xf32> to vector<512x32xf32>
    %34 = arith.addf %32, %33 : vector<512x32xf32>
    %cst_19 = arith.constant 0.000000e+00 : f32
    %35 = vector.broadcast %cst_19 : f32 to vector<512x32xf32>
    %36 = arith.maximumf %34, %35 : vector<512x32xf32>
    %c0_20 = arith.constant 0 : index
    %c0_21 = arith.constant 0 : index
    %37 = vector.load %arg6[%c0_20, %c0_21] : memref<512x32xf32, #tpu.memory_space<vmem>>, vector<512x32xf32>
    tpu.vector_store %arg6[%c0_20, %c0_21], %36 {strides = array<i32>} : memref<512x32xf32, #tpu.memory_space<vmem>>, vector<512x32xf32>,
    return
  }
}

module attributes {stable_mosaic.version = 11 : i64} {
  func.func @_convT_tanh_kernel(%arg0: memref<2048x72xf32, #tpu.memory_space<vmem>>, %arg1: memref<72x12xf32, #tpu.memory_space<vmem>>, %arg2: memref<2048x12xf32, #tpu.memory_space<vmem>>) attributes {dimension_semantics = [], scalar_prefetch = 0 : i64, scratch_operands = 0 : i64, tpu.core_type = #tpu.core_type<tc>} {
    %c0 = arith.constant 0 : index
    %c0_0 = arith.constant 0 : index
    %0 = vector.load %arg0[%c0, %c0_0] : memref<2048x72xf32, #tpu.memory_space<vmem>>, vector<2048x72xf32>
    %c0_1 = arith.constant 0 : index
    %c0_2 = arith.constant 0 : index
    %1 = vector.load %arg1[%c0_1, %c0_2] : memref<72x12xf32, #tpu.memory_space<vmem>>, vector<72x12xf32>
    %cst = arith.constant dense<0.000000e+00> : vector<2048x12xf32>
    %2 = tpu.matmul %0, %1, %cst {dimension_numbers = #tpu.dot_dimension_numbers<[1], [0], [0], [1], [0, 0, 1, 1], [], []>} : vector<2048x72xf32>, vector<72x12xf32>, vector<2048x12xf32> -> vector<2048x12xf32>
    %3 = math.tanh %2 : vector<2048x12xf32>
    %c0_3 = arith.constant 0 : index
    %c0_4 = arith.constant 0 : index
    %4 = vector.load %arg2[%c0_3, %c0_4] : memref<2048x12xf32, #tpu.memory_space<vmem>>, vector<2048x12xf32>
    tpu.vector_store %arg2[%c0_3, %c0_4], %3 {strides = array<i32>} : memref<2048x12xf32, #tpu.memory_space<vmem>>, vector<2048x12xf32>,
    return
  }
}

</mosaic_0001>

<bundles_post_ra>
// kernel: forward.6
= control target key start
LH: loop header
LB: loop body
LE: loop exit
PB: predicated region body
PF: predicated region fallthrough
CT: control target
= control target key end

     0   :  { %vm115_vm0 = vcmask 523264   ;;  %vm936_vm1 = vmmov 0   ;;  %vm405_vm2 = vcmask 1040384   ;;  %vm497_vm3 = vcmask 261120   ;;  %s1327_s1 = inlined_call_operand.vmem [shape: f32[576,128], index: 1, kind: input, shape index: {}]   ;;  %s1328_s0 = inlined_call_operand.vmem [shape: f32[32,576], index: 0, kind: input, shape index: {}]   ;;  %s1329_s2 = inlined_call_operand.vmem [shape: f32[128,32], index: 2, kind: input, shape index: {}]   ;;  %s1330_s3 = inlined_call_operand.vmem [shape: f32[32,128], index: 3, kind: input, shape index: {}]   ;;  %s1331_s4 = inlined_call_operand.vmem [shape: f32[1,128], index: 4, kind: input, shape index: {}]   ;;  %s1332_s5 = inlined_call_operand.vmem [shape: f32[1,128], index: 5, kind: input, shape index: {}]   ;;  %s1333_s6 = inlined_call_operand.vmem [shape: f32[32,128], index: 6, kind: output, shape index: {}]  }
   0x1   :  { %v59_v0 = vld [vmem:[%s1327_s1 + $0x80] sm:$0xff]  ;;  %v60_v1 = vld [vmem:[%s1327_s1 + $0x88] sm:$0xff]  ;;  %v61_v11 = vld [vmem:[%s1327_s1 + $0x90] sm:$0xff] }
   0x2   :  { %v91_v2 = vld [vmem:[%s1327_s1 + $0x180] sm:$0xff]  ;;  %v820_v3 = vpack.c.bf16 %v60_v1, %v59_v0  ;;  %v92_v4 = vld [vmem:[%s1327_s1 + $0x188] sm:$0xff]  ;;  %v62_v13 = vld [vmem:[%s1327_s1 + $0x98] sm:$0xff] }
   0x3   :  { %v43_v5 = vld [vmem:[%s1327_s1] sm:$0xff]  ;;  %v44_v6 = vld [vmem:[%s1327_s1 + $0x8] sm:$0xff]  ;;  %v852_v7 = vpack.c.bf16 %v92_v4, %v91_v2  ;;  %v93_v14 = vld [vmem:[%s1327_s1 + $0x190] sm:$0xff]  ;;  %v824_v16 = vpack.c.bf16 %v62_v13, %v61_v11 }
   0x4   :  { %v822_v8 = vpack.c.bf16 %v44_v6, %v43_v5  ;;  %v75_v9 = vld [vmem:[%s1327_s1 + $0x100] sm:$0xff]  ;;  %v76_v10 = vld [vmem:[%s1327_s1 + $0x108] sm:$0xff]  ;;  %821 = vmatprep.subr.bf16.mxu0 %v820_v3  ;;  %v94_v15 = vld [vmem:[%s1327_s1 + $0x198] sm:$0xff] }
   0x5   :  { %v854_v12 = vpack.c.bf16 %v76_v10, %v75_v9  ;;  %853 = vmatprep.subr.bf16.mxu1 %v852_v7  ;;  %v856_v17 = vpack.c.bf16 %v94_v15, %v93_v14  ;;  %v45_v18 = vld [vmem:[%s1327_s1 + $0x10] sm:$0xff]  ;;  %v46_v19 = vld [vmem:[%s1327_s1 + $0x18] sm:$0xff]  ;;  %v63_v23 = vld [vmem:[%s1327_s1 + $0xa0] sm:$0xff] }
   0x6   :  { %823 = vmatpush3.bf16.msra.mxu0 %v822_v8  ;;  %v77_v20 = vld [vmem:[%s1327_s1 + $0x110] sm:$0xff]  ;;  %v826_v21 = vpack.c.bf16 %v46_v19, %v45_v18  ;;  %v78_v22 = vld [vmem:[%s1327_s1 + $0x118] sm:$0xff]  ;;  %v64_v24 = vld [vmem:[%s1327_s1 + $0xa8] sm:$0xff] }
   0x7   :  { %855 = vmatpush3.bf16.msra.mxu1 %v854_v12  ;;  %825 = vmatprep.subr.bf16.mxu0 %v824_v16  ;;  %v858_v25 = vpack.c.bf16 %v78_v22, %v77_v20  ;;  %v828_v26 = vpack.c.bf16 %v64_v24, %v63_v23  ;;  %v95_v27 = vld [vmem:[%s1327_s1 + $0x1a0] sm:$0xff]  ;;  %v96_v28 = vld [vmem:[%s1327_s1 + $0x1a8] sm:$0xff]  ;;  %v65_v35 = vld [vmem:[%s1327_s1 + $0xb0] sm:$0xff] }
   0x8   :  { %857 = vmatprep.subr.bf16.mxu1 %v856_v17  ;;  %v47_v29 = vld [vmem:[%s1327_s1 + $0x20] sm:$0xff]  ;;  %v860_v30 = vpack.c.bf16 %v96_v28, %v95_v27  ;;  %v48_v31 = vld [vmem:[%s1327_s1 + $0x28] sm:$0xff]  ;;  %v66_v36 = vld [vmem:[%s1327_s1 + $0xb8] sm:$0xff] }
   0x9   :  { %v79_v32 = vld [vmem:[%s1327_s1 + $0x120] sm:$0xff]  ;;  %v80_v33 = vld [vmem:[%s1327_s1 + $0x128] sm:$0xff]  ;;  %v830_v34 = vpack.c.bf16 %v48_v31, %v47_v29  ;;  %v97_v37 = vld [vmem:[%s1327_s1 + $0x1b0] sm:$0xff]  ;;  %v832_v39 = vpack.c.bf16 %v66_v36, %v65_v35 }
   0xa   :  { %827 = vmatpush3.bf16.msra.mxu0 %v826_v21  ;;  %v862_v38 = vpack.c.bf16 %v80_v33, %v79_v32  ;;  %v98_v40 = vld [vmem:[%s1327_s1 + $0x1b8] sm:$0xff]  ;;  %v49_v41 = vld [vmem:[%s1327_s1 + $0x30] sm:$0xff]  ;;  %v67_v46 = vld [vmem:[%s1327_s1 + $0xc0] sm:$0xff] }
   0xb   :  { %859 = vmatpush3.bf16.msra.mxu1 %v858_v25  ;;  %829 = vmatprep.subr.bf16.mxu0 %v828_v26  ;;  %v50_v42 = vld [vmem:[%s1327_s1 + $0x38] sm:$0xff]  ;;  %v864_v43 = vpack.c.bf16 %v98_v40, %v97_v37  ;;  %v81_v44 = vld [vmem:[%s1327_s1 + $0x130] sm:$0xff]  ;;  %v68_v47 = vld [vmem:[%s1327_s1 + $0xc8] sm:$0xff] }
   0xc   :  { %861 = vmatprep.subr.bf16.mxu1 %v860_v30  ;;  %v82_v45 = vld [vmem:[%s1327_s1 + $0x138] sm:$0xff]  ;;  %v99_v48 = vld [vmem:[%s1327_s1 + $0x1c0] sm:$0xff]  ;;  %v100_v49 = vld [vmem:[%s1327_s1 + $0x1c8] sm:$0xff]  ;;  %v834_v50 = vpack.c.bf16 %v50_v42, %v49_v41  ;;  %v836_v52 = vpack.c.bf16 %v68_v47, %v67_v46 }
   0xd   :  { %v866_v51 = vpack.c.bf16 %v82_v45, %v81_v44  ;;  %v51_v53 = vld [vmem:[%s1327_s1 + $0x40] sm:$0xff]  ;;  %v52_v54 = vld [vmem:[%s1327_s1 + $0x48] sm:$0xff]  ;;  %v868_v56 = vpack.c.bf16 %v100_v49, %v99_v48  ;;  %v69_v58 = vld [vmem:[%s1327_s1 + $0xd0] sm:$0xff] }
   0xe   :  { %831 = vmatpush3.bf16.msra.mxu0 %v830_v34  ;;  %v83_v55 = vld [vmem:[%s1327_s1 + $0x140] sm:$0xff]  ;;  %v84_v57 = vld [vmem:[%s1327_s1 + $0x148] sm:$0xff]  ;;  %v70_v59 = vld [vmem:[%s1327_s1 + $0xd8] sm:$0xff]  ;;  %v838_v62 = vpack.c.bf16 %v52_v54, %v51_v53 }
   0xf   :  { %863 = vmatpush3.bf16.msra.mxu1 %v862_v38  ;;  %833 = vmatprep.subr.bf16.mxu0 %v832_v39  ;;  %v101_v60 = vld [vmem:[%s1327_s1 + $0x1d0] sm:$0xff]  ;;  %v102_v61 = vld [vmem:[%s1327_s1 + $0x1d8] sm:$0xff]  ;;  %v870_v63 = vpack.c.bf16 %v84_v57, %v83_v55  ;;  %v840_v0 = vpack.c.bf16 %v70_v59, %v69_v58  ;;  %v71_v6 = vld [vmem:[%s1327_s1 + $0xe0] sm:$0xff] }
  0x10   :  { %865 = vmatprep.subr.bf16.mxu1 %v864_v43  ;;  %v53_v1 = vld [vmem:[%s1327_s1 + $0x50] sm:$0xff]  ;;  %v54_v2 = vld [vmem:[%s1327_s1 + $0x58] sm:$0xff]  ;;  %v872_v4 = vpack.c.bf16 %v102_v61, %v101_v60  ;;  %v72_v7 = vld [vmem:[%s1327_s1 + $0xe8] sm:$0xff] }
  0x11   :  { %v85_v3 = vld [vmem:[%s1327_s1 + $0x150] sm:$0xff]  ;;  %v86_v5 = vld [vmem:[%s1327_s1 + $0x158] sm:$0xff]  ;;  %v103_v8 = vld [vmem:[%s1327_s1 + $0x1e0] sm:$0xff]  ;;  %v842_v10 = vpack.c.bf16 %v54_v2, %v53_v1  ;;  %v844_v14 = vpack.c.bf16 %v72_v7, %v71_v6 }
  0x12   :  { %835 = vmatpush3.bf16.msra.mxu0 %v834_v50  ;;  %v104_v9 = vld [vmem:[%s1327_s1 + $0x1e8] sm:$0xff]  ;;  %v55_v11 = vld [vmem:[%s1327_s1 + $0x60] sm:$0xff]  ;;  %v874_v13 = vpack.c.bf16 %v86_v5, %v85_v3  ;;  %v26_v17 = vld [vmem:[%s1328_s0 + $0x18] sm:$0xff]  ;;  %v935_v3 = vmov 0.0|0.0  }
  0x13   :  { %867 = vmatpush3.bf16.msra.mxu1 %v866_v51  ;;  %837 = vmatprep.subr.bf16.mxu0 %v836_v52  ;;  %v56_v12 = vld [vmem:[%s1327_s1 + $0x68] sm:$0xff]  ;;  %v87_v15 = vld [vmem:[%s1327_s1 + $0x160] sm:$0xff]  ;;  %v876_v18 = vpack.c.bf16 %v104_v9, %v103_v8  ;;  %v73_v20 = vld [vmem:[%s1327_s1 + $0xf0] sm:$0xff] }
  0x14   :  { %869 = vmatprep.subr.bf16.mxu1 %v868_v56  ;;  %v24_v16 = vld [vmem:[%s1328_s0 + $0x8] sm:$0xff]  ;;  %v74_v21 = vld [vmem:[%s1327_s1 + $0xf8] sm:$0xff]  ;;  %v105_v22 = vld [vmem:[%s1327_s1 + $0x1f0] sm:$0xff]  ;;  %277 = vmatprep.mubr.f32.mxu1 %v26_v17  ;;  %v846_v24 = vpack.c.bf16 %v56_v12, %v55_v11 }
  0x15   :  { %v88_v19 = vld [vmem:[%s1327_s1 + $0x168] sm:$0xff]  ;;  %192 = vmatprep.mubr.f32.mxu0 %v24_v16  ;;  %v106_v23 = vld [vmem:[%s1327_s1 + $0x1f8] sm:$0xff]  ;;  %v848_v26 = vpack.c.bf16 %v74_v21, %v73_v20  ;;  %v57_v27 = vld [vmem:[%s1327_s1 + $0x70] sm:$0xff] }
  0x16   :  { %839 = vmatpush3.bf16.msra.mxu0 %v838_v62  ;;  %v878_v25 = vpack.c.bf16 %v88_v19, %v87_v15  ;;  %v58_v28 = vld [vmem:[%s1327_s1 + $0x78] sm:$0xff]  ;;  %v89_v29 = vld [vmem:[%s1327_s1 + $0x170] sm:$0xff]  ;;  %v880_v30 = vpack.c.bf16 %v106_v23, %v105_v22  ;;  %v107_v32 = vld [vmem:[%s1327_s1 + $0x200] sm:$0xff] }
  0x17   :  { %871 = vmatpush3.bf16.msra.mxu1 %v870_v63  ;;  %841 = vmatprep.subr.bf16.mxu0 %v840_v0  ;;  %v90_v31 = vld [vmem:[%s1327_s1 + $0x178] sm:$0xff]  ;;  %v108_v33 = vld [vmem:[%s1327_s1 + $0x208] sm:$0xff]  ;;  %v850_v34 = vpack.c.bf16 %v58_v28, %v57_v27  ;;  %v109_v37 = vld [vmem:[%s1327_s1 + $0x210] sm:$0xff] }
  0x18   :  { %873 = vmatprep.subr.bf16.mxu1 %v872_v4  ;;  %v882_v35 = vpack.c.bf16 %v90_v31, %v89_v29  ;;  %v884_v36 = vpack.c.bf16 %v108_v33, %v107_v32  ;;  %v110_v38 = vld [vmem:[%s1327_s1 + $0x218] sm:$0xff]  ;;  %v23_v39 = vld [vmem:[%s1328_s0] sm:$0xff]  ;;  %v25_v40 = vld [vmem:[%s1328_s0 + $0x10] sm:$0xff] }
  0x19   :  { %v29_v41 = vld [vmem:[%s1328_s0 + $0x30] sm:$0xff]  ;;  %v31_v42 = vld [vmem:[%s1328_s0 + $0x40] sm:$0xff]  ;;  %v888_v43 = vpack.c.bf16 %v110_v38, %v109_v37  ;;  %v112_v45 = vld [vmem:[%s1327_s1 + $0x228] sm:$0xff] }
  0x1a   :  { %843 = vmatpush3.bf16.msra.mxu0 %v842_v10  ;;  %v111_v44 = vld [vmem:[%s1327_s1 + $0x220] sm:$0xff]  ;;  %v28_v46 = vld [vmem:[%s1328_s0 + $0x28] sm:$0xff]  ;;  %v30_v47 = vld [vmem:[%s1328_s0 + $0x38] sm:$0xff] }
  0x1b   :  { %875 = vmatpush3.bf16.msra.mxu1 %v874_v13  ;;  %845 = vmatprep.subr.bf16.mxu0 %v844_v14  ;;  %v34_v48 = vld [vmem:[%s1328_s0 + $0x58] sm:$0xff]  ;;  %v36_v49 = vld [vmem:[%s1328_s0 + $0x68] sm:$0xff]  ;;  %v892_v50 = vpack.c.bf16 %v112_v45, %v111_v44  ;;  %v113_v51 = vld [vmem:[%s1327_s1 + $0x230] sm:$0xff] }
  0x1c   :  { %877 = vmatprep.subr.bf16.mxu1 %v876_v18  ;;  %v114_v52 = vld [vmem:[%s1327_s1 + $0x238] sm:$0xff]  ;;  %v33_v53 = vld [vmem:[%s1328_s0 + $0x50] sm:$0xff]  ;;  %v35_v54 = vld [vmem:[%s1328_s0 + $0x60] sm:$0xff] }
  0x1d   :  { %v39_v55 = vld [vmem:[%s1328_s0 + $0x80] sm:$0xff]  ;;  %v41_v56 = vld [vmem:[%s1328_s0 + $0x90] sm:$0xff]  ;;  %v896_v57 = vpack.c.bf16 %v114_v52, %v113_v51  ;;  %v38_v58 = vld [vmem:[%s1328_s0 + $0x78] sm:$0xff] }
  0x1e   :  { %847 = vmatpush3.bf16.msra.mxu0 %v846_v24  ;;  %v40_v59 = vld [vmem:[%s1328_s0 + $0x88] sm:$0xff]  ;;  %v27_v60 = vld [vmem:[%s1328_s0 + $0x20] sm:$0xff]  ;;  %v37_v62 = vld [vmem:[%s1328_s0 + $0x70] sm:$0xff]  ;;  %v937_v24 = vmov 0.0  }
  0x1f   :  { %879 = vmatpush3.bf16.msra.mxu1 %v878_v25  ;;  %849 = vmatprep.subr.bf16.mxu0 %v848_v26  ;;  %v32_v61 = vld [vmem:[%s1328_s0 + $0x48] sm:$0xff]  ;;  %v42_v63 = vld [vmem:[%s1328_s0 + $0x98] sm:$0xff]  ;;  %v407_v0 = vld [vmem:[%s1329_s2] sm:$0xff] }
  0x20   :  { %881 = vmatprep.subr.bf16.mxu1 %v880_v30  ;;  %v408_v1 = vld [vmem:[%s1329_s2 + $0x8] sm:$0xff]  ;;  %v409_v4 = vld [vmem:[%s1329_s2 + $0x10] sm:$0xff]  ;;  %v410_v5 = vld [vmem:[%s1329_s2 + $0x18] sm:$0xff] }
  0x21   :  { %v901_v2 = vpack.c.bf16 %v408_v1, %v407_v0  ;;  %v904_v6 = vpack.c.bf16 %v410_v5, %v409_v4  ;;  %v411_v7 = vld [vmem:[%s1329_s2 + $0x20] sm:$0xff]  ;;  %v412_v8 = vld [vmem:[%s1329_s2 + $0x28] sm:$0xff]  ;;  %v413_v10 = vld [vmem:[%s1329_s2 + $0x30] sm:$0xff] }
  0x22   :  { %851 = vmatpush3.bf16.msra.mxu0 %v850_v34  ;;  %v907_v9 = vpack.c.bf16 %v412_v8, %v411_v7  ;;  %v414_v11 = vld [vmem:[%s1329_s2 + $0x38] sm:$0xff]  ;;  %v415_v13 = vld [vmem:[%s1329_s2 + $0x40] sm:$0xff]  ;;  %v416_v14 = vld [vmem:[%s1329_s2 + $0x48] sm:$0xff] }
  0x23   :  { %883 = vmatpush3.bf16.msra.mxu1 %v882_v35  ;;  %885 = vmatprep.subr.bf16.mxu0 %v884_v36  ;;  %v910_v12 = vpack.c.bf16 %v414_v11, %v413_v10  ;;  %v913_v15 = vpack.c.bf16 %v416_v14, %v415_v13  ;;  %v417_v16 = vld [vmem:[%s1329_s2 + $0x50] sm:$0xff]  ;;  %v418_v17 = vld [vmem:[%s1329_s2 + $0x58] sm:$0xff]  ;;  %v419_v19 = vld [vmem:[%s1329_s2 + $0x60] sm:$0xff] }
  0x24   :  { %900 = vmatprep.subr.bf16.mxu1 %v935_v3  ;;  %v916_v18 = vpack.c.bf16 %v418_v17, %v417_v16  ;;  %v420_v20 = vld [vmem:[%s1329_s2 + $0x68] sm:$0xff]  ;;  %v421_v21 = vld [vmem:[%s1329_s2 + $0x70] sm:$0xff]  ;;  %v422_v23 = vld [vmem:[%s1329_s2 + $0x78] sm:$0xff] }
  0x25   :  { %193 = vmatmul.mubr.f32.vlgmr.msra.gmra.mrb[0].mxu0 %v23_v39  ;;  %v919_v22 = vpack.c.bf16 %v420_v20, %v419_v19  ;;  %v922_v25 = vpack.c.bf16 %v422_v23, %v421_v21  ;;  %v493_v26 = vld [vmem:[%s1330_s3] sm:$0xff]  ;;  %v494_v27 = vld [vmem:[%s1330_s3 + $0x8] sm:$0xff]  ;;  %v495_v28 = vld [vmem:[%s1330_s3 + $0x10] sm:$0xff] }
  0x26   :  { %278 = vmatmul.mubr.f32.vlgmr.msra.gmra.mrb[0].mxu1 %v25_v40  ;;  %887 = vmatpush3.bf16.msra.mxu0 %v884_v36  ;;  %v925_v29 = vpack.c.bf16 %v494_v27, %v493_v26  ;;  %v496_v30 = vld [vmem:[%s1330_s3 + $0x18] sm:$0xff] }
  0x27   :  { %197 = vmatprep.mubr.f32.mxu0 %v29_v41  ;;  %282 = vmatprep.mubr.f32.mxu1 %v31_v42  ;;  %v928_v31 = vpack.c.bf16 %v496_v30, %v495_v28 }
  0x28   :  { %889 = vmatprep.subr.bf16.mxu0 %v888_v43  ;;  %902 = vmatpush3.bf16.msra.mxu1 %v901_v2 }
  0x29   :  { %198 = vmatmul.mubr.f32.gmra.mrb[2].mxu0 %v28_v46  ;;  %903 = vmatprep.subr.bf16.mxu1 %v935_v3 }
  0x2a   :  { %283 = vmatmul.mubr.f32.gmra.mrb[2].mxu1 %v30_v47  ;;  %891 = vmatpush3.bf16.msra.mxu0 %v888_v43 }
  0x2b   :  { %202 = vmatprep.mubr.f32.mxu0 %v34_v48  ;;  %287 = vmatprep.mubr.f32.mxu1 %v36_v49 }
  0x2c   :  { %893 = vmatprep.subr.bf16.mxu0 %v892_v50  ;;  %905 = vmatpush3.bf16.msra.mxu1 %v904_v6 }
  0x2d   :  { %203 = vmatmul.mubr.f32.gmra.mrb[4].mxu0 %v33_v53  ;;  %906 = vmatprep.subr.bf16.mxu1 %v935_v3 }
  0x2e   :  { %288 = vmatmul.mubr.f32.gmra.mrb[4].mxu1 %v35_v54  ;;  %895 = vmatpush3.bf16.msra.mxu0 %v892_v50 }
  0x2f   :  { %207 = vmatprep.mubr.f32.mxu0 %v39_v55  ;;  %292 = vmatprep.mubr.f32.mxu1 %v41_v56 }
  0x30   :  { %897 = vmatprep.subr.bf16.mxu0 %v896_v57  ;;  %908 = vmatpush3.bf16.msra.mxu1 %v907_v9 }
  0x31   :  { %208 = vmatmul.mubr.f32.gmra.mrb[6].mxu0 %v38_v58  ;;  %909 = vmatprep.subr.bf16.mxu1 %v935_v3 }
  0x32   :  { %293 = vmatmul.mubr.f32.gmra.mrb[6].mxu1 %v40_v59  ;;  %899 = vmatpush3.bf16.msra.mxu0 %v896_v57 }
  0x33   :  { %768 = vmatprep.mubr.msk.f32.mxu0 %vm115_vm0, %v27_v60  ;;  %924 = vmatprep.subr.bf16.mxu0 %v935_v3 }
  0x34   :  { %911 = vmatpush3.bf16.msra.mxu1 %v910_v12  ;;  %806 = vmatprep.mubr.msk.f32.mxu1 %vm936_vm1, %v937_v24 }
  0x35   :  { %769 = vmatmul.mubr.msk.f32.vlgmr.msra.gmra.mrb[8].mxu0 %vm115_vm0, %v32_v61  ;;  %912 = vmatprep.subr.bf16.mxu1 %v935_v3 }
  0x36   :  { %771 = vmatprep.mubr.msk.f32.mxu0 %vm115_vm0, %v37_v62  ;;  %926 = vmatpush3.bf16.msra.mxu0 %v925_v29 }
  0x37   :  { %927 = vmatprep.subr.bf16.mxu0 %v935_v3 }
  0x38   :  { %914 = vmatpush3.bf16.msra.mxu1 %v913_v15 }
  0x39   :  { %772 = vmatmul.mubr.msk.f32.gmra.mrb[10].mxu0 %vm115_vm0, %v42_v63  ;;  %915 = vmatprep.subr.bf16.mxu1 %v935_v3 }
  0x3a   :  { %817 = vmatprep.mubr.msk.f32.mxu0 %vm936_vm1, %v937_v24  ;;  %929 = vmatpush3.bf16.msra.mxu0 %v928_v31 }
  0x3c   :  { %917 = vmatpush3.bf16.msra.mxu1 %v916_v18 }
  0x3d   :  { %918 = vmatprep.subr.bf16.mxu1 %v935_v3 }
  0x40   :  { %920 = vmatpush3.bf16.msra.mxu1 %v919_v22 }
  0x41   :  { %921 = vmatprep.subr.bf16.mxu1 %v935_v3 }
  0x44   :  { %923 = vmatpush3.bf16.msra.mxu1 %v922_v25 }
  0xf8   :  { %v662_v32 = vpop.f32.mrb[0].mxu0 }
  0xf9   :  { %v706_v33 = vpop.f32.mrb[0].mxu1  ;;  %v663_v34 = vpop.f32.mrb[1].mxu0 }
  0xfa   :  { %v664_v35 = vadd.f32 %v663_v34, %v662_v32  ;;  %v707_v36 = vpop.f32.mrb[1].mxu1 }
  0xfb   :  { %v708_v37 = vadd.f32 %v707_v36, %v706_v33 }
  0xfc   :  { %v665_v38 = vpop.f32.mrb[2].mxu0 }
  0xfd   :  { %v709_v39 = vpop.f32.mrb[2].mxu1  ;;  %v666_v40 = vpop.f32.mrb[3].mxu0  ;;  %v280_v41 = vadd.f32 %v708_v37, %v664_v35  ;;  %v594_v37 = vlaneseq }
  0xfe   :  { %v667_v42 = vadd.f32 %v666_v40, %v665_v38  ;;  %v710_v43 = vpop.f32.mrb[3].mxu1 }
  0xff   :  { %v711_v44 = vadd.f32 %v710_v43, %v709_v39  ;;  %v595_v38 = vshrl.u32 %v594_v37, 7  ;;  %v629_v39 = vld [vmem:[%s1331_s4] ss:$0 sm:$0xff] }
 0x100   :  { %v668_v45 = vpop.f32.mrb[4].mxu0 }
 0x101   :  { %v712_v46 = vpop.f32.mrb[4].mxu1  ;;  %v669_v47 = vpop.f32.mrb[5].mxu0  ;;  %v285_v48 = vadd.f32 %v711_v44, %v667_v42  ;;  %v588_v44 = vld [vmem:[%s1332_s5] sm:$0x1] }
 0x102   :  { %v670_v49 = vadd.f32 %v669_v47, %v668_v45  ;;  %v713_v50 = vpop.f32.mrb[5].mxu1  ;;  %v605_v47 = vsub.s32 0, %v595_v38 }
 0x103   :  { %v714_v51 = vadd.f32 %v713_v50, %v712_v46 }
 0x104   :  { %v671_v52 = vpop.f32.mrb[6].mxu0 }
 0x105   :  { %v715_v53 = vpop.f32.mrb[6].mxu1  ;;  %v672_v54 = vpop.f32.mrb[7].mxu0  ;;  %v290_v55 = vadd.f32 %v714_v51, %v670_v49 }
 0x106   :  { %v673_v56 = vadd.f32 %v672_v54, %v671_v52  ;;  %v716_v57 = vpop.f32.mrb[7].mxu1 }
 0x107   :  { %v717_v58 = vadd.f32 %v716_v57, %v715_v53 }
 0x108   :  { %v770_v59 = vpop.f32.mrb[8].mxu0 }
 0x109   :  { %v370_v60 = vadd.f32 %v770_v59, %v285_v48  ;;  %v364_v61 = vpop.f32.mrb[9].mxu0  ;;  %v295_v62 = vadd.f32 %v717_v58, %v673_v56 }
 0x10a   :  { %v365_v63 = vadd.f32 %v364_v61, %v280_v41  ;;  %v596_v41 = vsub.s32 1, %v595_v38 }
 0x10b   :  { %v393_v0 = vmul.f32 %v370_v60, %v370_v60 }
 0x10c   :  { %v392_v1 = vmul.f32 %v365_v63, %v365_v63  ;;  %v773_v2 = vpop.f32.mrb[10].mxu0  ;;  %v383_v5 = vadd.f32 %v370_v60, %v365_v63 }
 0x10d   :  { %v380_v3 = vadd.f32 %v773_v2, %v295_v62  ;;  %v374_v4 = vpop.f32.mrb[11].mxu0 }
 0x10e   :  { %v375_v6 = vadd.f32 %v374_v4, %v290_v55  ;;  %v396_v7 = vadd.f32 %v393_v0, %v392_v1 }
 0x10f   :  { %v395_v10 = vmul.f32 %v380_v3, %v380_v3 }
 0x110   :  { %v384_v8 = vadd.f32 %v383_v5, %v375_v6  ;;  %v394_v9 = vmul.f32 %v375_v6, %v375_v6 }
 0x112   :  { %v385_v11 = vadd.f32 %v384_v8, %v380_v3  ;;  %v397_v12 = vadd.f32 %v396_v7, %v394_v9 }
 0x114   :  { %v386_v13 = vrot.slane %v385_v11, 4  ;;  %v398_v14 = vadd.f32 %v397_v12, %v395_v10 }
 0x116   :  { %v387_v15 = vadd.f32 %v386_v13, %v385_v11  ;;  %v399_v16 = vrot.slane %v398_v14, 4 }
 0x118   :  { %v388_v17 = vrot.slane %v387_v15, 2  ;;  %v400_v18 = vadd.f32 %v399_v16, %v398_v14 }
 0x11a   :  { %v389_v19 = vadd.f32 %v388_v17, %v387_v15  ;;  %v401_v20 = vrot.slane %v400_v18, 2 }
 0x11c   :  { %v390_v21 = vrot.slane %v389_v19, 1  ;;  %v402_v22 = vadd.f32 %v401_v20, %v400_v18 }
 0x11e   :  { %v403_v23 = vrot.slane %v402_v22, 1  ;;  %v391_v24 = vadd.f32 %v390_v21, %v389_v19 }
 0x120   :  { %v404_v25 = vadd.f32 %v403_v23, %v402_v22 }
 0x122   :  { %v406_v26 = vsel %vm405_vm2, %v391_v24, %v404_v25 }
 0x123   :  { %807 = vmatmul.mubr.f32.vlgmr.msra.gmra.mrb[8].mxu1 %v406_v26 }
 0x1f6   :  { %v489_v27 = vpop.f32.mrb[8].mxu1 }
 0x1f7   :  { %v808_v28 = vpop.f32.mrb[9].mxu1  ;;  %818 = vmatmul.mubr.msk.f32.vlgmr.msra.gmra.mrb[12].mxu0 %vm497_vm3, %v489_v27 }
 0x2ca   :  { %v567_v29 = vpop.f32.mrb[12].mxu0 }
 0x2cb   :  { %v571_v30 = vmul.f32 0.0078125, %v567_v29  ;;  %v819_v31 = vpop.f32.mrb[13].mxu0 }
 0x2cd   :  { %v572_v32 = vmul.f32 %v571_v30, %v571_v30 }
 0x2cf   :  { %v574_v33 = vrot.slane %v572_v32, 7 }
 0x2d1   :  { %v576_v34 = vsub.f32 %v571_v30, %v574_v33 }
 0x2d3   :  { %v577_v35 = vmax.f32 %v576_v34, 0.0 }
 0x2d5   :  { %v578_v36 = vadd.f32 1e-05, %v577_v35 }
 0x2d7   :  { %933 = vrsqrt.f32 %v578_v36 }
 0x2e1   :  { %v934_v40 = vpop.eup %933 }
 0x2e2   :  { %v587_v42 = vmul.f32 %v934_v40, %v629_v39 }
 0x2e4   :  { %v590_v43 = vrot.slane %v587_v42, 1  ;;  %v597_v45 = vrot.slane %v587_v42, %v596_v41 }
 0x2e6   :  { %v592_v46 = vmul.f32 %v590_v43, %v571_v30  ;;  %v598_v49 = vmul.f32 %v597_v45, %v365_v63  ;;  %v599_v50 = vmul.f32 %v597_v45, %v370_v60  ;;  %v600_v51 = vmul.f32 %v597_v45, %v375_v6 }
 0x2e7   :  { %v601_v52 = vmul.f32 %v597_v45, %v380_v3 }
 0x2e8   :  { %v593_v48 = vsub.f32 %v588_v44, %v592_v46 }
 0x2ea   :  { %v606_v53 = vrot.slane %v593_v48, %v605_v47 }
 0x2ec   :  { %v608_v54 = vadd.f32 %v606_v53, %v598_v49  ;;  %v609_v55 = vadd.f32 %v606_v53, %v599_v50  ;;  %v610_v56 = vadd.f32 %v606_v53, %v600_v51  ;;  %v611_v57 = vadd.f32 %v606_v53, %v601_v52 }
 0x2ee   :  { %v612_v58 = vmax.f32 %v608_v54, 0.0  ;;  %v613_v59 = vmax.f32 %v609_v55, 0.0  ;;  %v614_v61 = vmax.f32 %v610_v56, 0.0  ;;  %v615_v62 = vmax.f32 %v611_v57, 0.0 }
 0x2f0   :  { %616 = vst [vmem:[%s1333_s6] sm:$0xff] %v612_v58  ;;  %617 = vst [vmem:[%s1333_s6 + $0x8] sm:$0xff] %v613_v59 }
 0x2f1   :  { %618 = vst [vmem:[%s1333_s6 + $0x10] sm:$0xff] %v614_v61  ;;  %619 = vst [vmem:[%s1333_s6 + $0x18] sm:$0xff] %v615_v62 }

// kernel: forward.5
= control target key start
LH: loop header
LB: loop body
LE: loop exit
PB: predicated region body
PF: predicated region fallthrough
CT: control target
= control target key end

     0   :  { %11 = vsyncpa [#allocation3], 0  ;;  %s2863_s0 = inlined_call_operand.hbm [shape: f32[2,16], index: 0, kind: input, shape index: {}]   ;;  %s2864_s1 = inlined_call_operand.hbm [shape: f32[16,1024], index: 1, kind: input, shape index: {}]   ;;  %s2865_s2 = inlined_call_operand.vmem [shape: f32[1024,64], index: 2, kind: input, shape index: {}]   ;;  %s2866_s3 = inlined_call_operand.hbm [shape: f32[64,1024], index: 3, kind: input, shape index: {}]   ;;  %s2867_s4 = inlined_call_operand.hbm [shape: f32[1,1024], index: 4, kind: input, shape index: {}]   ;;  %s2868_s5 = inlined_call_operand.hbm [shape: f32[1,1024], index: 5, kind: input, shape index: {}]   ;;  %s2869_s6 = inlined_call_operand.vmem [shape: f32[2,1024], index: 6, kind: output, shape index: {}]  }
   0x1   :  { %12 = vsyncpa [#allocation5], 0 }
   0x2   :  { %13 = vsyncpa [#allocation8], 0  ;;  %s2142_s21 = smov [#allocation4]   ;;  %s2026_s25 = scalar_lea.hbm %s2864_s1, 2048 }
   0x3   :  { %s29_s22 = sshll.u32 %s2142_s21, 4  ;;  %p2027_p0 = scmp.ne.s32.totalorder %s2864_s1, %s2026_s25  ;;  %s30_s22 = int_to_ptr.vmem [resolvable:$true] %s29_s22 }
   0x4   :  { %p2030_p1 = scmp.lt.u32.totalorder %s2026_s25, %s2864_s1 }
   0x6   :  { %p2032_p2 = pnand %p2030_p1, %p2027_p0 }
   0x8   :  { %2035 = shalt.err (!%p2032_p2)
}
   0x9   :  { %s2036_s30 = scalar_lea.vmem %s30_s22, 2048  ;;  %p2041_p4 = scmp.lt.s32.totalorder %s30_s22, %s30_s22 }
   0xa   :  { %p2037_p3 = scmp.ne.s32.totalorder %s30_s22, %s2036_s30  ;;  %p2042_p5 = scmp.lt.s32.totalorder %s2036_s30, %s2036_s30 }
   0xc   :  { %p2043_p6 = por %p2042_p5, %p2041_p4 }
   0xe   :  { %p2044_p7 = pnand %p2043_p6, %p2037_p3 }
  0x10   :  { %2047 = shalt.err (!%p2044_p7)
}
  0x11   :  { %s2143_s7 = smov 1024   ;;  %s2144_s8 = smov 64  }
  0x12   :  { %35 = dma.hbm_to_vmem [thread:$0]  %s2864_s1, 2048, %s30_s22, [#allocation5], %s2143_s7, %s2143_s7, %s2144_s8  }
  0x13   :  { %s2145_s11 = smov [#allocation7]   ;;  %s2146_s13 = smov [#allocation2]  }
  0x14   :  { %s56_s12 = sshll.u32 %s2145_s11, 4  ;;  %s20_s14 = sshll.u32 %s2146_s13, 4  ;;  %s57_s12 = int_to_ptr.vmem [resolvable:$true] %s56_s12  ;;  %s21_s14 = int_to_ptr.vmem [resolvable:$true] %s20_s14 }
  0x15   :  { %s2048_s17 = scalar_lea.hbm %s2867_s4, 128 }
  0x16   :  { %p2049_p8 = scmp.ne.s32.totalorder %s2867_s4, %s2048_s17  ;;  %p2052_p9 = scmp.lt.u32.totalorder %s2048_s17, %s2867_s4 }
  0x18   :  { %p2054_p10 = pnand %p2052_p9, %p2049_p8 }
  0x1a   :  { %2057 = shalt.err (!%p2054_p10)
}
  0x1b   :  { %s2058_s1 = scalar_lea.vmem %s57_s12, 128  ;;  %p2063_p12 = scmp.lt.s32.totalorder %s57_s12, %s57_s12 }
  0x1c   :  { %p2059_p11 = scmp.ne.s32.totalorder %s57_s12, %s2058_s1  ;;  %p2064_p13 = scmp.lt.s32.totalorder %s2058_s1, %s2058_s1 }
  0x1e   :  { %p2065_p0 = por %p2064_p13, %p2063_p12 }
  0x20   :  { %p2066_p1 = pnand %p2065_p0, %p2059_p11 }
  0x22   :  { %2069 = shalt.err (!%p2066_p1)
}
  0x23   :  { %59 = dma.hbm_to_vmem [thread:$0]  %s2867_s4, 128, %s57_s12, [#allocation8]  }
  0x24   :  { %s2070_s26 = scalar_lea.hbm %s2863_s0, 32 }
  0x25   :  { %p2071_p2 = scmp.ne.s32.totalorder %s2863_s0, %s2070_s26  ;;  %p2074_p3 = scmp.lt.u32.totalorder %s2070_s26, %s2863_s0 }
  0x27   :  { %p2076_p4 = pnand %p2074_p3, %p2071_p2 }
  0x29   :  { %2079 = shalt.err (!%p2076_p4)
}
  0x2a   :  { %s2080_s9 = scalar_lea.vmem %s21_s14, 32  ;;  %p2085_p6 = scmp.lt.s32.totalorder %s21_s14, %s21_s14 }
  0x2b   :  { %p2081_p5 = scmp.ne.s32.totalorder %s21_s14, %s2080_s9  ;;  %p2086_p7 = scmp.lt.s32.totalorder %s2080_s9, %s2080_s9 }
  0x2d   :  { %p2087_p8 = por %p2086_p7, %p2085_p6 }
  0x2f   :  { %p2088_p9 = pnand %p2087_p8, %p2081_p5 }
  0x31   :  { %2091 = shalt.err (!%p2088_p9)
}
  0x32   :  { %23 = dma.hbm_to_vmem [thread:$0]  %s2863_s0, 32, %s21_s14, [#allocation3]  }
  0x33   :  { %s2147_s11 = smov [#allocation6]   ;;  %s2148_s13 = smov [#allocation9]  }
  0x34   :  { %s43_s12 = sshll.u32 %s2147_s11, 4  ;;  %s66_s15 = sshll.u32 %s2148_s13, 4  ;;  %s44_s12 = int_to_ptr.vmem [resolvable:$true] %s43_s12  ;;  %s67_s15 = int_to_ptr.vmem [resolvable:$true] %s66_s15 }
  0x35   :  { %s2092_s18 = scalar_lea.hbm %s2866_s3, 8192 }
  0x36   :  { %p2093_p10 = scmp.ne.s32.totalorder %s2866_s3, %s2092_s18  ;;  %p2096_p11 = scmp.lt.u32.totalorder %s2092_s18, %s2866_s3 }
  0x38   :  { %p2098_p12 = pnand %p2096_p11, %p2093_p10 }
  0x3a   :  { %2101 = shalt.err (!%p2098_p12)
}
  0x3b   :  { %s2102_s0 = scalar_lea.vmem %s44_s12, 8192  ;;  %p2107_p0 = scmp.lt.s32.totalorder %s44_s12, %s44_s12 }
  0x3c   :  { %p2103_p13 = scmp.ne.s32.totalorder %s44_s12, %s2102_s0  ;;  %p2108_p1 = scmp.lt.s32.totalorder %s2102_s0, %s2102_s0 }
  0x3e   :  { %p2109_p2 = por %p2108_p1, %p2107_p0 }
  0x40   :  { %p2110_p3 = pnand %p2109_p2, %p2103_p13 }
  0x42   :  { %2113 = shalt.err (!%p2110_p3)
}
  0x43   :  { %49 = dma.hbm_to_vmem [thread:$0]  %s2866_s3, 8192, %s44_s12, [#allocation5], %s2143_s7, %s2143_s7, %s2144_s8  }
  0x44   :  { %s2114_s25 = scalar_lea.hbm %s2868_s5, 128 }
  0x45   :  { %p2115_p4 = scmp.ne.s32.totalorder %s2868_s5, %s2114_s25  ;;  %p2118_p5 = scmp.lt.u32.totalorder %s2114_s25, %s2868_s5 }
  0x47   :  { %p2120_p6 = pnand %p2118_p5, %p2115_p4 }
  0x49   :  { %2123 = shalt.err (!%p2120_p6)
}
  0x4a   :  { %s2124_s30 = scalar_lea.vmem %s67_s15, 128  ;;  %p2129_p8 = scmp.lt.s32.totalorder %s67_s15, %s67_s15 }
  0x4b   :  { %p2125_p7 = scmp.ne.s32.totalorder %s67_s15, %s2124_s30  ;;  %p2130_p9 = scmp.lt.s32.totalorder %s2124_s30, %s2124_s30 }
  0x4d   :  { %p2131_p10 = por %p2130_p9, %p2129_p8 }
  0x4f   :  { %p2132_p11 = pnand %p2131_p10, %p2125_p7 }
  0x51   :  { %2135 = shalt.err (!%p2132_p11)
}
  0x52   :  { %69 = dma.hbm_to_vmem [thread:$0]  %s2868_s5, 128, %s67_s15, [#allocation8]  }
  0x53   :  { %2136 = dma.done.wait [#allocation3], 32  }
  0x54   :  { %2137 = vsyncadd [#allocation3], 4294967264 }
  0x55   :  { %2138 = dma.done.wait [#allocation5], 10240  }
  0x56   :  { %2139 = vsyncadd [#allocation5], 4294957056 }
  0x57   :  { %2140 = dma.done.wait [#allocation8], 256  }
  0x58   :  { %2141 = vsyncadd [#allocation8], 4294967040  ;;  %v2149_v0 = vmov 0.0   ;;  %v87_v1 = vld [vmem:[#allocation4 + $0x8] sm:$0xff]  ;;  %v89_v3 = vld [vmem:[#allocation4 + $0x18] sm:$0xff]  ;;  %vm102_vm0 = vcmask 130048  }
  0x59   :  { %170 = vmatprep.mubr.f32.mxu0 %v2149_v0  ;;  %241 = vmatprep.mubr.f32.mxu1 %v2149_v0  ;;  %v95_v2 = vld [vmem:[#allocation4 + $0x48] sm:$0xff]  ;;  %v97_v5 = vld [vmem:[#allocation4 + $0x58] sm:$0xff]  ;;  %v86_v6 = vld [vmem:[#allocation4] sm:$0xff]  ;;  %vm390_vm1 = vcmask 1041408   ;;  %vm511_vm2 = vcmask 1040384   ;;  %vm992_vm3 = vcmask 523264  }
  0x5a   :  { %v1792_v4 = vpack.c.bf16 %v95_v2, %v87_v1  ;;  %v94_v7 = vld [vmem:[#allocation4 + $0x40] sm:$0xff]  ;;  %v1796_v8 = vpack.c.bf16 %v97_v5, %v89_v3  ;;  %v88_v10 = vld [vmem:[#allocation4 + $0x10] sm:$0xff]  ;;  %v85_v12 = vld [vmem:[#allocation2] sm:$0x3] }
  0x5b   :  { %v1794_v9 = vpack.c.bf16 %v94_v7, %v86_v6  ;;  %v96_v11 = vld [vmem:[#allocation4 + $0x50] sm:$0xff]  ;;  %v91_v14 = vld [vmem:[#allocation4 + $0x28] sm:$0xff]  ;;  %v90_v16 = vld [vmem:[#allocation4 + $0x20] sm:$0xff] }
  0x5c   :  { %1793 = vmatprep.subr.bf16.mxu0 %v1792_v4  ;;  %v1798_v13 = vpack.c.bf16 %v96_v11, %v88_v10  ;;  %v99_v15 = vld [vmem:[#allocation4 + $0x68] sm:$0xff]  ;;  %1797 = vmatprep.subr.bf16.mxu1 %v1796_v8  ;;  %v98_v18 = vld [vmem:[#allocation4 + $0x60] sm:$0xff]  ;;  %v93_v19 = vld [vmem:[#allocation4 + $0x38] sm:$0xff] }
  0x5d   :  { %1795 = vmatpush1.bf16.msra.mxu0 %v1794_v9  ;;  %v1800_v17 = vpack.c.bf16 %v99_v15, %v91_v14  ;;  %v101_v20 = vld [vmem:[#allocation4 + $0x78] sm:$0xff]  ;;  %v1802_v21 = vpack.c.bf16 %v98_v18, %v90_v16  ;;  %v92_v23 = vld [vmem:[#allocation4 + $0x30] sm:$0xff]  ;;  %v537_v27 = vld [vmem:[%s2865_s2 + $0x88] sm:$0xff] }
  0x5e   :  { %1799 = vmatpush1.bf16.msra.mxu1 %v1798_v13  ;;  %v1804_v22 = vpack.c.bf16 %v101_v20, %v93_v19  ;;  %v100_v24 = vld [vmem:[#allocation4 + $0x70] sm:$0xff]  ;;  %v536_v25 = vld [vmem:[%s2865_s2 + $0x80] sm:$0xff]  ;;  %v569_v29 = vld [vmem:[%s2865_s2 + $0x188] sm:$0xff] }
  0x5f   :  { %1801 = vmatprep.subr.bf16.mxu0 %v1800_v17  ;;  %v1806_v26 = vpack.c.bf16 %v100_v24, %v92_v23  ;;  %v568_v28 = vld [vmem:[%s2865_s2 + $0x180] sm:$0xff]  ;;  %v1808_v30 = vpack.c.bf16 %v537_v27, %v536_v25  ;;  %v521_v33 = vld [vmem:[%s2865_s2 + $0x8] sm:$0xff]  ;;  %v538_v37 = vld [vmem:[%s2865_s2 + $0x90] sm:$0xff] }
  0x60   :  { %1644 = vmatmul.mubr.msk.f32.vlgmr.msra.gmra.mrb[0].mxu0 %vm102_vm0, %v85_v12  ;;  %1805 = vmatprep.subr.bf16.mxu1 %v1804_v22  ;;  %v1840_v31 = vpack.c.bf16 %v569_v29, %v568_v28  ;;  %v520_v32 = vld [vmem:[%s2865_s2] sm:$0xff]  ;;  %v553_v36 = vld [vmem:[%s2865_s2 + $0x108] sm:$0xff]  ;;  %v539_v38 = vld [vmem:[%s2865_s2 + $0x98] sm:$0xff] }
  0x61   :  { %v552_v34 = vld [vmem:[%s2865_s2 + $0x100] sm:$0xff]  ;;  %1645 = vmatmul.mubr.msk.f32.vlgmr.msra.gmra.mrb[0].mxu1 %vm102_vm0, %v85_v12  ;;  %1803 = vmatpush1.bf16.msra.mxu0 %v1802_v21  ;;  %v1810_v35 = vpack.c.bf16 %v521_v33, %v520_v32  ;;  %v1812_v40 = vpack.c.bf16 %v539_v38, %v538_v37  ;;  %v570_v41 = vld [vmem:[%s2865_s2 + $0x190] sm:$0xff]  ;;  %v571_v42 = vld [vmem:[%s2865_s2 + $0x198] sm:$0xff] }
  0x62   :  { %312 = vmatprep.mubr.f32.mxu0 %v2149_v0  ;;  %1807 = vmatpush1.bf16.msra.mxu1 %v1806_v26  ;;  %v1842_v39 = vpack.c.bf16 %v553_v36, %v552_v34  ;;  %v522_v43 = vld [vmem:[%s2865_s2 + $0x10] sm:$0xff]  ;;  %v1844_v44 = vpack.c.bf16 %v571_v42, %v570_v41  ;;  %v523_v45 = vld [vmem:[%s2865_s2 + $0x18] sm:$0xff]  ;;  %v540_v48 = vld [vmem:[%s2865_s2 + $0xa0] sm:$0xff] }
  0x63   :  { %383 = vmatprep.mubr.f32.mxu1 %v2149_v0  ;;  %1809 = vmatprep.subr.bf16.mxu0 %v1808_v30  ;;  %v554_v46 = vld [vmem:[%s2865_s2 + $0x110] sm:$0xff]  ;;  %v555_v47 = vld [vmem:[%s2865_s2 + $0x118] sm:$0xff]  ;;  %v541_v49 = vld [vmem:[%s2865_s2 + $0xa8] sm:$0xff]  ;;  %v1814_v51 = vpack.c.bf16 %v523_v45, %v522_v43 }
  0x64   :  { %1646 = vmatmul.mubr.msk.f32.vlgmr.msra.gmra.mrb[2].mxu0 %vm102_vm0, %v85_v12  ;;  %1841 = vmatprep.subr.bf16.mxu1 %v1840_v31  ;;  %v572_v50 = vld [vmem:[%s2865_s2 + $0x1a0] sm:$0xff]  ;;  %v573_v52 = vld [vmem:[%s2865_s2 + $0x1a8] sm:$0xff]  ;;  %v1846_v53 = vpack.c.bf16 %v555_v47, %v554_v46  ;;  %v1816_v54 = vpack.c.bf16 %v541_v49, %v540_v48  ;;  %v542_v60 = vld [vmem:[%s2865_s2 + $0xb0] sm:$0xff] }
  0x65   :  { %1647 = vmatmul.mubr.msk.f32.vlgmr.msra.gmra.mrb[2].mxu1 %vm102_vm0, %v85_v12  ;;  %1811 = vmatpush3.bf16.msra.mxu0 %v1810_v35  ;;  %v524_v55 = vld [vmem:[%s2865_s2 + $0x20] sm:$0xff]  ;;  %v525_v56 = vld [vmem:[%s2865_s2 + $0x28] sm:$0xff]  ;;  %v1848_v58 = vpack.c.bf16 %v573_v52, %v572_v50  ;;  %v543_v61 = vld [vmem:[%s2865_s2 + $0xb8] sm:$0xff] }
  0x66   :  { %1843 = vmatpush3.bf16.msra.mxu1 %v1842_v39  ;;  %1813 = vmatprep.subr.bf16.mxu0 %v1812_v40  ;;  %v556_v57 = vld [vmem:[%s2865_s2 + $0x120] sm:$0xff]  ;;  %v557_v59 = vld [vmem:[%s2865_s2 + $0x128] sm:$0xff]  ;;  %v574_v62 = vld [vmem:[%s2865_s2 + $0x1b0] sm:$0xff]  ;;  %v1818_v1 = vpack.c.bf16 %v525_v56, %v524_v55  ;;  %v1820_v3 = vpack.c.bf16 %v543_v61, %v542_v60 }
  0x67   :  { %1845 = vmatprep.subr.bf16.mxu1 %v1844_v44  ;;  %v575_v63 = vld [vmem:[%s2865_s2 + $0x1b8] sm:$0xff]  ;;  %v1850_v2 = vpack.c.bf16 %v557_v59, %v556_v57  ;;  %v526_v4 = vld [vmem:[%s2865_s2 + $0x30] sm:$0xff]  ;;  %v544_v11 = vld [vmem:[%s2865_s2 + $0xc0] sm:$0xff] }
  0x68   :  { %v527_v5 = vld [vmem:[%s2865_s2 + $0x38] sm:$0xff]  ;;  %v1852_v6 = vpack.c.bf16 %v575_v63, %v574_v62  ;;  %v558_v7 = vld [vmem:[%s2865_s2 + $0x130] sm:$0xff]  ;;  %v545_v12 = vld [vmem:[%s2865_s2 + $0xc8] sm:$0xff] }
  0x69   :  { %1815 = vmatpush3.bf16.msra.mxu0 %v1814_v51  ;;  %v559_v8 = vld [vmem:[%s2865_s2 + $0x138] sm:$0xff]  ;;  %v1822_v9 = vpack.c.bf16 %v527_v5, %v526_v4  ;;  %v576_v13 = vld [vmem:[%s2865_s2 + $0x1c0] sm:$0xff]  ;;  %v1824_v14 = vpack.c.bf16 %v545_v12, %v544_v11  ;;  %v577_v15 = vld [vmem:[%s2865_s2 + $0x1c8] sm:$0xff] }
  0x6a   :  { %1847 = vmatpush3.bf16.msra.mxu1 %v1846_v53  ;;  %1817 = vmatprep.subr.bf16.mxu0 %v1816_v54  ;;  %v1854_v10 = vpack.c.bf16 %v559_v8, %v558_v7  ;;  %v528_v16 = vld [vmem:[%s2865_s2 + $0x40] sm:$0xff]  ;;  %v529_v17 = vld [vmem:[%s2865_s2 + $0x48] sm:$0xff]  ;;  %v1856_v18 = vpack.c.bf16 %v577_v15, %v576_v13  ;;  %v546_v23 = vld [vmem:[%s2865_s2 + $0xd0] sm:$0xff] }
  0x6b   :  { %1849 = vmatprep.subr.bf16.mxu1 %v1848_v58  ;;  %v1826_v19 = vpack.c.bf16 %v529_v17, %v528_v16  ;;  %v560_v20 = vld [vmem:[%s2865_s2 + $0x140] sm:$0xff]  ;;  %v561_v21 = vld [vmem:[%s2865_s2 + $0x148] sm:$0xff]  ;;  %v547_v24 = vld [vmem:[%s2865_s2 + $0xd8] sm:$0xff] }
  0x6c   :  { %v1858_v22 = vpack.c.bf16 %v561_v21, %v560_v20  ;;  %v578_v25 = vld [vmem:[%s2865_s2 + $0x1d0] sm:$0xff]  ;;  %v1828_v26 = vpack.c.bf16 %v547_v24, %v546_v23  ;;  %v579_v27 = vld [vmem:[%s2865_s2 + $0x1d8] sm:$0xff]  ;;  %v548_v35 = vld [vmem:[%s2865_s2 + $0xe0] sm:$0xff] }
  0x6d   :  { %1819 = vmatpush3.bf16.msra.mxu0 %v1818_v1  ;;  %v530_v28 = vld [vmem:[%s2865_s2 + $0x50] sm:$0xff]  ;;  %v531_v29 = vld [vmem:[%s2865_s2 + $0x58] sm:$0xff]  ;;  %v1860_v30 = vpack.c.bf16 %v579_v27, %v578_v25  ;;  %v549_v36 = vld [vmem:[%s2865_s2 + $0xe8] sm:$0xff] }
  0x6e   :  { %1851 = vmatpush3.bf16.msra.mxu1 %v1850_v2  ;;  %1821 = vmatprep.subr.bf16.mxu0 %v1820_v3  ;;  %v1830_v31 = vpack.c.bf16 %v531_v29, %v530_v28  ;;  %v562_v32 = vld [vmem:[%s2865_s2 + $0x150] sm:$0xff]  ;;  %v563_v33 = vld [vmem:[%s2865_s2 + $0x158] sm:$0xff]  ;;  %v580_v37 = vld [vmem:[%s2865_s2 + $0x1e0] sm:$0xff]  ;;  %v1832_v38 = vpack.c.bf16 %v549_v36, %v548_v35 }
  0x6f   :  { %1853 = vmatprep.subr.bf16.mxu1 %v1852_v6  ;;  %v1862_v34 = vpack.c.bf16 %v563_v33, %v562_v32  ;;  %v581_v39 = vld [vmem:[%s2865_s2 + $0x1e8] sm:$0xff]  ;;  %v532_v40 = vld [vmem:[%s2865_s2 + $0x60] sm:$0xff]  ;;  %v550_v46 = vld [vmem:[%s2865_s2 + $0xf0] sm:$0xff] }
  0x70   :  { %v533_v41 = vld [vmem:[%s2865_s2 + $0x68] sm:$0xff]  ;;  %v1864_v42 = vpack.c.bf16 %v581_v39, %v580_v37  ;;  %v564_v44 = vld [vmem:[%s2865_s2 + $0x160] sm:$0xff]  ;;  %v551_v48 = vld [vmem:[%s2865_s2 + $0xf8] sm:$0xff] }
  0x71   :  { %1823 = vmatpush3.bf16.msra.mxu0 %v1822_v9  ;;  %v1834_v43 = vpack.c.bf16 %v533_v41, %v532_v40  ;;  %v565_v45 = vld [vmem:[%s2865_s2 + $0x168] sm:$0xff]  ;;  %v582_v49 = vld [vmem:[%s2865_s2 + $0x1f0] sm:$0xff]  ;;  %v583_v50 = vld [vmem:[%s2865_s2 + $0x1f8] sm:$0xff]  ;;  %v1836_v51 = vpack.c.bf16 %v551_v48, %v550_v46 }
  0x72   :  { %1855 = vmatpush3.bf16.msra.mxu1 %v1854_v10  ;;  %1825 = vmatprep.subr.bf16.mxu0 %v1824_v14  ;;  %v1866_v47 = vpack.c.bf16 %v565_v45, %v564_v44  ;;  %v1868_v52 = vpack.c.bf16 %v583_v50, %v582_v49  ;;  %v534_v53 = vld [vmem:[%s2865_s2 + $0x70] sm:$0xff]  ;;  %v535_v54 = vld [vmem:[%s2865_s2 + $0x78] sm:$0xff]  ;;  %v600_v59 = vld [vmem:[%s2865_s2 + $0x280] sm:$0xff] }
  0x73   :  { %1857 = vmatprep.subr.bf16.mxu1 %v1856_v18  ;;  %v566_v55 = vld [vmem:[%s2865_s2 + $0x170] sm:$0xff]  ;;  %v1838_v56 = vpack.c.bf16 %v535_v54, %v534_v53  ;;  %v567_v57 = vld [vmem:[%s2865_s2 + $0x178] sm:$0xff]  ;;  %v601_v60 = vld [vmem:[%s2865_s2 + $0x288] sm:$0xff] }
  0x74   :  { %v1870_v58 = vpack.c.bf16 %v567_v57, %v566_v55  ;;  %v632_v61 = vld [vmem:[%s2865_s2 + $0x380] sm:$0xff]  ;;  %v1872_v62 = vpack.c.bf16 %v601_v60, %v600_v59  ;;  %v633_v63 = vld [vmem:[%s2865_s2 + $0x388] sm:$0xff]  ;;  %v603_v59 = vld [vmem:[%s2865_s2 + $0x298] sm:$0xff] }
  0x75   :  { %1827 = vmatpush3.bf16.msra.mxu0 %v1826_v19  ;;  %v1904_v1 = vpack.c.bf16 %v633_v63, %v632_v61  ;;  %v2516_v63 = vld [vmem:[%s2865_s2 + $0x300] sm:$0xff] }
  0x76   :  { %1859 = vmatpush3.bf16.msra.mxu1 %v1858_v22  ;;  %1829 = vmatprep.subr.bf16.mxu0 %v1828_v26 }
  0x77   :  { %1861 = vmatprep.subr.bf16.mxu1 %v1860_v30 }
  0x79   :  { %1831 = vmatpush3.bf16.msra.mxu0 %v1830_v31 }
  0x7a   :  { %1863 = vmatpush3.bf16.msra.mxu1 %v1862_v34  ;;  %1833 = vmatprep.subr.bf16.mxu0 %v1832_v38 }
  0x7b   :  { %1865 = vmatprep.subr.bf16.mxu1 %v1864_v42 }
  0x7d   :  { %1835 = vmatpush3.bf16.msra.mxu0 %v1834_v43 }
  0x7e   :  { %1867 = vmatpush3.bf16.msra.mxu1 %v1866_v47  ;;  %1837 = vmatprep.subr.bf16.mxu0 %v1836_v51  ;;  %v584_v51 = vld [vmem:[%s2865_s2 + $0x200] sm:$0xff] }
  0x7f   :  { %1869 = vmatprep.subr.bf16.mxu1 %v1868_v52  ;;  %v585_v52 = vld [vmem:[%s2865_s2 + $0x208] sm:$0xff] }
  0x81   :  { %1839 = vmatpush3.bf16.msra.mxu0 %v1838_v56 }
  0x82   :  { %1871 = vmatpush3.bf16.msra.mxu1 %v1870_v58  ;;  %1873 = vmatprep.subr.bf16.mxu0 %v1872_v62  ;;  %v602_v58 = vld [vmem:[%s2865_s2 + $0x290] sm:$0xff]  ;;  %v1874_v62 = vpack.c.bf16 %v585_v52, %v584_v51 }
  0x83   :  { %1905 = vmatprep.subr.bf16.mxu1 %v1904_v1 }
 0x133   :  { %v2465_v2 = vpop.f32.mrb[0].mxu0 }
 0x134   :  { %v391_v3 = vsel %vm390_vm1, %v2465_v2, 0.0  ;;  %v447_v4 = vmul.f32 %v2465_v2, %v2465_v2  ;;  %v2471_v5 = vpop.f32.mrb[0].mxu1  ;;  %v2473_v6 = vpop.f32.mrb[1].mxu0 }
 0x135   :  { %v392_v7 = vrot.slane %v391_v3, 4  ;;  %v405_v8 = vsel %vm390_vm1, %v2471_v5, 0.0  ;;  %v449_v9 = vmul.f32 %v2471_v5, %v2471_v5  ;;  %v398_v10 = vsel %vm390_vm1, %v2473_v6, 0.0  ;;  %v2481_v11 = vpop.f32.mrb[1].mxu1 }
 0x136   :  { %v455_v12 = vsel %vm390_vm1, %v447_v4, 0.0  ;;  %v406_v13 = vrot.slane %v405_v8, 4  ;;  %v399_v14 = vrot.slane %v398_v10, 4  ;;  %v448_v15 = vmul.f32 %v2473_v6, %v2473_v6 }
 0x137   :  { %v393_v16 = vadd.f32 %v392_v7, %v391_v3  ;;  %v456_v17 = vrot.slane %v455_v12, 4  ;;  %v469_v18 = vsel %vm390_vm1, %v449_v9, 0.0  ;;  %v412_v19 = vsel %vm390_vm1, %v2481_v11, 0.0  ;;  %v2489_v20 = vpop.f32.mrb[2].mxu0  ;;  %v2521_v7 = vld [vmem:[%s2865_s2 + $0x308] sm:$0xff]  ;;  %v2531_v9 = vld [vmem:[%s2865_s2 + $0x398] sm:$0xff] }
 0x138   :  { %v407_v21 = vadd.f32 %v406_v13, %v405_v8  ;;  %v470_v22 = vrot.slane %v469_v18, 4  ;;  %v400_v23 = vadd.f32 %v399_v14, %v398_v10  ;;  %v462_v24 = vsel %vm390_vm1, %v448_v15, 0.0  ;;  %v2492_v25 = vpop.f32.mrb[3].mxu0  ;;  %v2494_v26 = vpop.f32.mrb[2].mxu1  ;;  %v2526_v8 = vld [vmem:[%s2865_s2 + $0x390] sm:$0xff] }
 0x139   :  { %v394_v27 = vrot.slane %v393_v16, 2  ;;  %v457_v28 = vadd.f32 %v456_v17, %v455_v12  ;;  %v463_v29 = vrot.slane %v462_v24, 4  ;;  %v413_v30 = vrot.slane %v412_v19, 4  ;;  %v2496_v31 = vpop.f32.mrb[3].mxu1 }
 0x13a   :  { %v471_v32 = vadd.f32 %v470_v22, %v469_v18  ;;  %v401_v33 = vrot.slane %v400_v23, 2  ;;  %v450_v34 = vmul.f32 %v2481_v11, %v2481_v11  ;;  %v408_v43 = vrot.slane %v407_v21, 2  ;;  %v587_v22 = vld [vmem:[%s2865_s2 + $0x218] sm:$0xff] }
 0x13b   :  { %v458_v35 = vrot.slane %v457_v28, 2  ;;  %v464_v36 = vadd.f32 %v463_v29, %v462_v24  ;;  %v414_v37 = vadd.f32 %v413_v30, %v412_v19  ;;  %v395_v38 = vadd.f32 %v394_v27, %v393_v16  ;;  %v2557_v30 = vld [vmem:[%s2865_s2 + $0x318] sm:$0xff] }
 0x13c   :  { %v472_v39 = vrot.slane %v471_v32, 2  ;;  %v402_v40 = vadd.f32 %v401_v33, %v400_v23  ;;  %v476_v41 = vsel %vm390_vm1, %v450_v34, 0.0  ;;  %v409_v56 = vadd.f32 %v408_v43, %v407_v21  ;;  %v586_v21 = vld [vmem:[%s2865_s2 + $0x210] sm:$0xff]  ;;  %v605_v33 = vld [vmem:[%s2865_s2 + $0x2a8] sm:$0xff] }
 0x13d   :  { %v459_v42 = vadd.f32 %v458_v35, %v457_v28  ;;  %v465_v44 = vrot.slane %v464_v36, 2  ;;  %v415_v45 = vrot.slane %v414_v37, 2  ;;  %v477_v46 = vrot.slane %v476_v41, 4  ;;  %v2547_v23 = vld [vmem:[%s2865_s2 + $0x310] sm:$0xff]  ;;  %v589_v43 = vld [vmem:[%s2865_s2 + $0x228] sm:$0xff] }
 0x13e   :  { %v473_v47 = vadd.f32 %v472_v39, %v471_v32  ;;  %v403_v48 = vrot.slane %v402_v40, 1  ;;  %v396_v53 = vrot.slane %v395_v38, 1  ;;  %v426_v10 = vsel %vm390_vm1, %v2492_v25, 0.0  ;;  %v604_v32 = vld [vmem:[%s2865_s2 + $0x2a0] sm:$0xff] }
 0x13f   :  { %v466_v49 = vadd.f32 %v465_v44, %v464_v36  ;;  %v460_v50 = vrot.slane %v459_v42, 1  ;;  %v416_v54 = vadd.f32 %v415_v45, %v414_v37  ;;  %v478_v55 = vadd.f32 %v477_v46, %v476_v41 }
 0x140   :  { %v404_v1 = vadd.f32 %v403_v48, %v402_v40  ;;  %v474_v4 = vrot.slane %v473_v47, 1  ;;  %v397_v14 = vadd.f32 %v396_v53, %v395_v38  ;;  %v1876_v15 = vpack.c.bf16 %v603_v59, %v602_v58  ;;  %v636_v48 = vld [vmem:[%s2865_s2 + $0x3a0] sm:$0xff]  ;;  %v637_v53 = vld [vmem:[%s2865_s2 + $0x3a8] sm:$0xff] }
 0x141   :  { %v467_v57 = vrot.slane %v466_v49, 1  ;;  %v479_v60 = vrot.slane %v478_v55, 2  ;;  %v461_v61 = vadd.f32 %v460_v50, %v459_v42  ;;  %v417_v12 = vrot.slane %v416_v54, 1  ;;  %v588_v42 = vld [vmem:[%s2865_s2 + $0x220] sm:$0xff] }
 0x142   :  { %v410_v16 = vrot.slane %v409_v56, 1  ;;  %v427_v18 = vrot.slane %v426_v10, 4  ;;  %v452_v19 = vmul.f32 %v2492_v25, %v2492_v25  ;;  %v1906_v28 = vpack.c.bf16 %v2521_v7, %v2516_v63  ;;  %v591_v7 = vld [vmem:[%s2865_s2 + $0x238] sm:$0xff] }
 0x143   :  { %v468_v3 = vadd.f32 %v467_v57, %v466_v49  ;;  %v480_v13 = vadd.f32 %v479_v60, %v478_v55  ;;  %v512_v27 = vsel %vm511_vm2, %v397_v14, %v461_v61  ;;  %v1908_v29 = vpack.c.bf16 %v2531_v9, %v2526_v8  ;;  %v607_v55 = vld [vmem:[%s2865_s2 + $0x2b8] sm:$0xff]  ;;  %v620_v60 = vld [vmem:[%s2865_s2 + $0x320] sm:$0xff] }
 0x144   :  { %v475_v34 = vadd.f32 %v474_v4, %v473_v47  ;;  %v451_v35 = vmul.f32 %v2489_v20, %v2489_v20  ;;  %v428_v36 = vadd.f32 %v427_v18, %v426_v10  ;;  %v490_v37 = vsel %vm390_vm1, %v452_v19, 0.0  ;;  %v590_v4 = vld [vmem:[%s2865_s2 + $0x230] sm:$0xff]  ;;  %v608_v18 = vld [vmem:[%s2865_s2 + $0x2c0] sm:$0xff]  ;;  %v609_v19 = vld [vmem:[%s2865_s2 + $0x2c8] sm:$0xff] }
 0x145   :  { %v513_v17 = vsel %vm511_vm2, %v404_v1, %v468_v3  ;;  %v481_v24 = vrot.slane %v480_v13, 1  ;;  %v418_v38 = vadd.f32 %v417_v12, %v416_v54  ;;  %v491_v40 = vrot.slane %v490_v37, 4  ;;  %v606_v54 = vld [vmem:[%s2865_s2 + $0x2b0] sm:$0xff]  ;;  %v621_v3 = vld [vmem:[%s2865_s2 + $0x328] sm:$0xff] }
 0x146   :  { %712 = vmatprep.mubr.f32.mxu0 %v513_v17  ;;  %v1878_v41 = vpack.c.bf16 %v587_v22, %v586_v21  ;;  %v411_v44 = vadd.f32 %v410_v16, %v409_v56  ;;  %v429_v45 = vrot.slane %v428_v36, 2  ;;  %v1910_v46 = vpack.c.bf16 %v2557_v30, %v2547_v23  ;;  %v638_v12 = vld [vmem:[%s2865_s2 + $0x3b0] sm:$0xff]  ;;  %v639_v17 = vld [vmem:[%s2865_s2 + $0x3b8] sm:$0xff] }
 0x147   :  { %713 = vmatmul.mubr.f32.vlgmr.msra.gmra.mrb[4].mxu0 %v512_v27  ;;  %v482_v39 = vadd.f32 %v481_v24, %v480_v13  ;;  %v1880_v47 = vpack.c.bf16 %v605_v33, %v604_v32  ;;  %v419_v50 = vsel %vm390_vm1, %v2489_v20, 0.0  ;;  %v492_v51 = vadd.f32 %v491_v40, %v490_v37  ;;  %v592_v37 = vld [vmem:[%s2865_s2 + $0x240] sm:$0xff] }
 0x148   :  { %1875 = vmatpush3.bf16.msra.mxu0 %v1874_v62  ;;  %v440_v52 = vsel %vm390_vm1, %v2496_v31, 0.0  ;;  %v514_v56 = vsel %vm511_vm2, %v411_v44, %v475_v34  ;;  %v483_v57 = vsel %vm390_vm1, %v451_v35, 0.0  ;;  %v430_v58 = vadd.f32 %v429_v45, %v428_v36  ;;  %v622_v35 = vld [vmem:[%s2865_s2 + $0x330] sm:$0xff]  ;;  %v611_v44 = vld [vmem:[%s2865_s2 + $0x2d8] sm:$0xff] }
 0x149   :  { %1877 = vmatprep.subr.bf16.mxu0 %v1876_v15  ;;  %v515_v49 = vsel %vm511_vm2, %v418_v38, %v482_v39  ;;  %v1882_v59 = vpack.c.bf16 %v589_v43, %v588_v42  ;;  %v493_v61 = vrot.slane %v492_v51, 2  ;;  %v453_v62 = vmul.f32 %v2494_v26, %v2494_v26  ;;  %v593_v38 = vld [vmem:[%s2865_s2 + $0x248] sm:$0xff]  ;;  %v623_v42 = vld [vmem:[%s2865_s2 + $0x338] sm:$0xff]  ;;  %v610_v43 = vld [vmem:[%s2865_s2 + $0x2d0] sm:$0xff] }
 0x14a   :  { %782 = vmatprep.mubr.f32.mxu1 %v515_v49  ;;  %v441_v63 = vrot.slane %v440_v52, 4  ;;  %v454_v1 = vmul.f32 %v2496_v31, %v2496_v31  ;;  %v420_v8 = vrot.slane %v419_v50, 4  ;;  %v1912_v9 = vpack.c.bf16 %v637_v53, %v636_v48  ;;  %v640_v49 = vld [vmem:[%s2865_s2 + $0x3c0] sm:$0xff] }
 0x14b   :  { %783 = vmatmul.mubr.f32.vlgmr.msra.gmra.mrb[4].mxu1 %v514_v56  ;;  %v1884_v10 = vpack.c.bf16 %v607_v55, %v606_v54  ;;  %v431_v13 = vrot.slane %v430_v58, 1  ;;  %v484_v14 = vrot.slane %v483_v57, 4  ;;  %v494_v21 = vadd.f32 %v493_v61, %v492_v51  ;;  %v624_v55 = vld [vmem:[%s2865_s2 + $0x340] sm:$0xff] }
 0x14c   :  { %1879 = vmatpush3.bf16.msra.mxu0 %v1878_v41  ;;  %1907 = vmatpush3.bf16.msra.mxu1 %v1906_v28  ;;  %v442_v15 = vadd.f32 %v441_v63, %v440_v52  ;;  %v504_v16 = vsel %vm390_vm1, %v454_v1, 0.0  ;;  %v433_v22 = vsel %vm390_vm1, %v2494_v26, 0.0  ;;  %v1914_v24 = vpack.c.bf16 %v621_v3, %v620_v60  ;;  %v625_v63 = vld [vmem:[%s2865_s2 + $0x348] sm:$0xff]  ;;  %v612_v1 = vld [vmem:[%s2865_s2 + $0x2e0] sm:$0xff] }
 0x14d   :  { %1881 = vmatprep.subr.bf16.mxu0 %v1880_v47  ;;  %1909 = vmatprep.subr.bf16.mxu1 %v1908_v29  ;;  %v505_v23 = vrot.slane %v504_v16, 4  ;;  %v1886_v27 = vpack.c.bf16 %v591_v7, %v590_v4  ;;  %v497_v28 = vsel %vm390_vm1, %v453_v62, 0.0  ;;  %v432_v30 = vadd.f32 %v431_v13, %v430_v58  ;;  %v595_v58 = vld [vmem:[%s2865_s2 + $0x258] sm:$0xff]  ;;  %v613_v3 = vld [vmem:[%s2865_s2 + $0x2e8] sm:$0xff] }
 0x14e   :  { %v443_v29 = vrot.slane %v442_v15, 2  ;;  %v495_v32 = vrot.slane %v494_v21, 1  ;;  %v1916_v34 = vpack.c.bf16 %v639_v17, %v638_v12  ;;  %v1888_v36 = vpack.c.bf16 %v609_v19, %v608_v18  ;;  %v596_v18 = vld [vmem:[%s2865_s2 + $0x260] sm:$0xff]  ;;  %v597_v19 = vld [vmem:[%s2865_s2 + $0x268] sm:$0xff] }
 0x14f   :  { %v506_v33 = vadd.f32 %v505_v23, %v504_v16  ;;  %v421_v39 = vadd.f32 %v420_v8, %v419_v50  ;;  %v485_v40 = vadd.f32 %v484_v14, %v483_v57  ;;  %v498_v47 = vrot.slane %v497_v28, 4  ;;  %v641_v50 = vld [vmem:[%s2865_s2 + $0x3c8] sm:$0xff]  ;;  %v594_v57 = vld [vmem:[%s2865_s2 + $0x250] sm:$0xff] }
 0x150   :  { %1883 = vmatpush3.bf16.msra.mxu0 %v1882_v59  ;;  %1911 = vmatpush3.bf16.msra.mxu1 %v1910_v46  ;;  %v444_v41 = vadd.f32 %v443_v29, %v442_v15  ;;  %v496_v45 = vadd.f32 %v495_v32, %v494_v21  ;;  %v434_v46 = vrot.slane %v433_v22, 4  ;;  %v1890_v51 = vpack.c.bf16 %v593_v38, %v592_v37  ;;  %v642_v8 = vld [vmem:[%s2865_s2 + $0x3d0] sm:$0xff]  ;;  %v644_v32 = vld [vmem:[%s2865_s2 + $0x3e0] sm:$0xff] }
 0x151   :  { %1885 = vmatprep.subr.bf16.mxu0 %v1884_v10  ;;  %1913 = vmatprep.subr.bf16.mxu1 %v1912_v9  ;;  %v507_v48 = vrot.slane %v506_v33, 2  ;;  %v1918_v54 = vpack.c.bf16 %v623_v42, %v622_v35  ;;  %v1892_v56 = vpack.c.bf16 %v611_v44, %v610_v43  ;;  %v422_v60 = vrot.slane %v421_v39, 2  ;;  %v643_v9 = vld [vmem:[%s2865_s2 + $0x3d8] sm:$0xff]  ;;  %v626_v15 = vld [vmem:[%s2865_s2 + $0x350] sm:$0xff]  ;;  %v628_v42 = vld [vmem:[%s2865_s2 + $0x360] sm:$0xff] }
 0x152   :  { %v517_v52 = vsel %vm511_vm2, %v432_v30, %v496_v45  ;;  %v445_v53 = vrot.slane %v444_v41, 1  ;;  %v486_v61 = vrot.slane %v485_v40, 2  ;;  %v1920_v62 = vpack.c.bf16 %v641_v50, %v640_v49  ;;  %v598_v38 = vld [vmem:[%s2865_s2 + $0x270] sm:$0xff]  ;;  %v629_v43 = vld [vmem:[%s2865_s2 + $0x368] sm:$0xff] }
 0x153   :  { %v508_v59 = vadd.f32 %v507_v48, %v506_v33  ;;  %852 = vmatprep.mubr.f32.mxu0 %v517_v52  ;;  %v435_v4 = vadd.f32 %v434_v46, %v433_v22  ;;  %v499_v7 = vadd.f32 %v498_v47, %v497_v28  ;;  %v1894_v13 = vpack.c.bf16 %v595_v58, %v594_v57  ;;  %v615_v28 = vld [vmem:[%s2865_s2 + $0x2f8] sm:$0xff]  ;;  %v645_v33 = vld [vmem:[%s2865_s2 + $0x3e8] sm:$0xff]  ;;  %v646_v47 = vld [vmem:[%s2865_s2 + $0x3f0] sm:$0xff] }
 0x154   :  { %1887 = vmatpush3.bf16.msra.mxu0 %v1886_v27  ;;  %1915 = vmatpush3.bf16.msra.mxu1 %v1914_v24  ;;  %v446_v10 = vadd.f32 %v445_v53, %v444_v41  ;;  %v1922_v14 = vpack.c.bf16 %v625_v63, %v624_v55  ;;  %v1896_v16 = vpack.c.bf16 %v613_v3, %v612_v1  ;;  %v627_v24 = vld [vmem:[%s2865_s2 + $0x358] sm:$0xff]  ;;  %v614_v27 = vld [vmem:[%s2865_s2 + $0x2f0] sm:$0xff] }
 0x155   :  { %1889 = vmatprep.subr.bf16.mxu0 %v1888_v36  ;;  %1917 = vmatprep.subr.bf16.mxu1 %v1916_v34  ;;  %v509_v12 = vrot.slane %v508_v59, 1  ;;  %v423_v21 = vadd.f32 %v422_v60, %v421_v39  ;;  %v487_v22 = vadd.f32 %v486_v61, %v485_v40  ;;  %v1924_v23 = vpack.c.bf16 %v643_v9, %v642_v8  ;;  %v599_v39 = vld [vmem:[%s2865_s2 + $0x278] sm:$0xff]  ;;  %v630_v52 = vld [vmem:[%s2865_s2 + $0x370] sm:$0xff]  ;;  %v928_v8 = vld [vmem:[#allocation6] sm:$0xff] }
 0x156   :  { %v436_v29 = vrot.slane %v435_v4, 2  ;;  %v500_v30 = vrot.slane %v499_v7, 2  ;;  %v1898_v35 = vpack.c.bf16 %v597_v19, %v596_v18  ;;  %v1926_v36 = vpack.c.bf16 %v627_v24, %v626_v15  ;;  %v647_v48 = vld [vmem:[%s2865_s2 + $0x3f8] sm:$0xff]  ;;  %v929_v63 = vld [vmem:[#allocation6 + $0x8] sm:$0xff]  ;;  %v936_v9 = vld [vmem:[#allocation6 + $0x40] sm:$0xff] }
 0x157   :  { %v510_v17 = vadd.f32 %v509_v12, %v508_v59  ;;  %v1900_v37 = vpack.c.bf16 %v615_v28, %v614_v27  ;;  %v424_v40 = vrot.slane %v423_v21, 1  ;;  %v1928_v41 = vpack.c.bf16 %v645_v33, %v644_v32  ;;  %v631_v53 = vld [vmem:[%s2865_s2 + $0x378] sm:$0xff]  ;;  %v937_v1 = vld [vmem:[#allocation6 + $0x48] sm:$0xff]  ;;  %v952_v24 = vld [vmem:[#allocation6 + $0xc0] sm:$0xff] }
 0x158   :  { %1891 = vmatpush3.bf16.msra.mxu0 %v1890_v51  ;;  %1919 = vmatpush3.bf16.msra.mxu1 %v1918_v54  ;;  %v488_v44 = vrot.slane %v487_v22, 1  ;;  %v437_v45 = vadd.f32 %v436_v29, %v435_v4  ;;  %v501_v46 = vadd.f32 %v500_v30, %v499_v7  ;;  %v1902_v49 = vpack.c.bf16 %v599_v39, %v598_v38  ;;  %v931_v3 = vld [vmem:[#allocation6 + $0x18] sm:$0xff]  ;;  %v945_v15 = vld [vmem:[#allocation6 + $0x88] sm:$0xff]  ;;  %v946_v27 = vld [vmem:[#allocation6 + $0x90] sm:$0xff] }
 0x159   :  { %1893 = vmatprep.subr.bf16.mxu0 %v1892_v56  ;;  %1921 = vmatprep.subr.bf16.mxu1 %v1920_v62  ;;  %v519_v34 = vsel %vm511_vm2, %v446_v10, %v510_v17  ;;  %v1930_v50 = vpack.c.bf16 %v629_v43, %v628_v42  ;;  %v1932_v51 = vpack.c.bf16 %v647_v48, %v646_v47  ;;  %v939_v7 = vld [vmem:[#allocation6 + $0x58] sm:$0xff]  ;;  %v953_v17 = vld [vmem:[#allocation6 + $0xc8] sm:$0xff]  ;;  %v954_v29 = vld [vmem:[#allocation6 + $0xd0] sm:$0xff] }
 0x15a   :  { %922 = vmatprep.mubr.f32.mxu1 %v519_v34  ;;  %v425_v54 = vadd.f32 %v424_v40, %v423_v21  ;;  %v489_v55 = vadd.f32 %v488_v44, %v487_v22  ;;  %v438_v56 = vrot.slane %v437_v45, 1  ;;  %v502_v57 = vrot.slane %v501_v46, 1  ;;  %v947_v18 = vld [vmem:[#allocation6 + $0x98] sm:$0xff]  ;;  %v961_v30 = vld [vmem:[#allocation6 + $0x108] sm:$0xff]  ;;  %v960_v38 = vld [vmem:[#allocation6 + $0x100] sm:$0xff] }
 0x15b   :  { %v1934_v58 = vpack.c.bf16 %v631_v53, %v630_v52  ;;  %v1936_v4 = vpack.c.bf16 %v937_v1, %v929_v63  ;;  %v1952_v10 = vpack.c.bf16 %v939_v7, %v931_v3  ;;  %v1938_v12 = vpack.c.bf16 %v936_v9, %v928_v8  ;;  %v955_v19 = vld [vmem:[#allocation6 + $0xd8] sm:$0xff]  ;;  %v969_v32 = vld [vmem:[#allocation6 + $0x148] sm:$0xff]  ;;  %v968_v39 = vld [vmem:[#allocation6 + $0x140] sm:$0xff] }
 0x15c   :  { %1895 = vmatpush3.bf16.msra.mxu0 %v1894_v13  ;;  %1923 = vmatpush3.bf16.msra.mxu1 %v1922_v14  ;;  %v516_v59 = vsel %vm511_vm2, %v425_v54, %v489_v55  ;;  %v439_v60 = vadd.f32 %v438_v56, %v437_v45  ;;  %v503_v61 = vadd.f32 %v502_v57, %v501_v46  ;;  %v930_v13 = vld [vmem:[#allocation6 + $0x10] sm:$0xff]  ;;  %v977_v44 = vld [vmem:[#allocation6 + $0x188] sm:$0xff]  ;;  %v979_v46 = vld [vmem:[#allocation6 + $0x198] sm:$0xff] }
 0x15d   :  { %1897 = vmatprep.subr.bf16.mxu0 %v1896_v16  ;;  %1925 = vmatprep.subr.bf16.mxu1 %v1924_v23  ;;  %v938_v14 = vld [vmem:[#allocation6 + $0x50] sm:$0xff]  ;;  %v1940_v21 = vpack.c.bf16 %v953_v17, %v945_v15  ;;  %v1956_v22 = vpack.c.bf16 %v955_v19, %v947_v18  ;;  %v944_v23 = vld [vmem:[#allocation6 + $0x80] sm:$0xff]  ;;  %v1958_v33 = vpack.c.bf16 %v954_v29, %v946_v27  ;;  %v985_v45 = vld [vmem:[#allocation6 + $0x1c8] sm:$0xff] }
 0x15e   :  { %v518_v62 = vsel %vm511_vm2, %v439_v60, %v503_v61  ;;  %v1954_v16 = vpack.c.bf16 %v938_v14, %v930_v13  ;;  %v1942_v28 = vpack.c.bf16 %v952_v24, %v944_v23  ;;  %v1944_v34 = vpack.c.bf16 %v969_v32, %v961_v30  ;;  %v962_v40 = vld [vmem:[#allocation6 + $0x110] sm:$0xff]  ;;  %v987_v48 = vld [vmem:[#allocation6 + $0x1d8] sm:$0xff]  ;;  %v933_v56 = vld [vmem:[#allocation6 + $0x28] sm:$0xff] }
 0x15f   :  { %v970_v42 = vld [vmem:[#allocation6 + $0x150] sm:$0xff]  ;;  %v1948_v47 = vpack.c.bf16 %v985_v45, %v977_v44  ;;  %v941_v57 = vld [vmem:[#allocation6 + $0x68] sm:$0xff]  ;;  %v943_v60 = vld [vmem:[#allocation6 + $0x78] sm:$0xff] }
 0x160   :  { %1899 = vmatpush3.bf16.msra.mxu0 %v1898_v35  ;;  %1927 = vmatpush3.bf16.msra.mxu1 %v1926_v36  ;;  %v963_v35 = vld [vmem:[#allocation6 + $0x118] sm:$0xff]  ;;  %v1962_v43 = vpack.c.bf16 %v970_v42, %v962_v40  ;;  %v978_v53 = vld [vmem:[#allocation6 + $0x190] sm:$0xff]  ;;  %v932_v14 = vld [vmem:[#allocation6 + $0x20] sm:$0xff] }
 0x161   :  { %1901 = vmatprep.subr.bf16.mxu0 %v1900_v37  ;;  %1929 = vmatprep.subr.bf16.mxu1 %v1928_v41  ;;  %v971_v36 = vld [vmem:[#allocation6 + $0x158] sm:$0xff]  ;;  %v1946_v41 = vpack.c.bf16 %v968_v39, %v960_v38  ;;  %v986_v54 = vld [vmem:[#allocation6 + $0x1d0] sm:$0xff]  ;;  %v940_v15 = vld [vmem:[#allocation6 + $0x60] sm:$0xff] }
 0x162   :  { %v1960_v37 = vpack.c.bf16 %v971_v36, %v963_v35  ;;  %v1966_v55 = vpack.c.bf16 %v986_v54, %v978_v53  ;;  %v934_v17 = vld [vmem:[#allocation6 + $0x30] sm:$0xff]  ;;  %v949_v19 = vld [vmem:[#allocation6 + $0xa8] sm:$0xff]  ;;  %v951_v23 = vld [vmem:[#allocation6 + $0xb8] sm:$0xff] }
 0x163   :  { %v942_v18 = vld [vmem:[#allocation6 + $0x70] sm:$0xff]  ;;  %v959_v24 = vld [vmem:[#allocation6 + $0xf8] sm:$0xff]  ;;  %v948_v30 = vld [vmem:[#allocation6 + $0xa0] sm:$0xff] }
 0x164   :  { %1903 = vmatpush3.bf16.msra.mxu0 %v1902_v49  ;;  %1931 = vmatpush3.bf16.msra.mxu1 %v1930_v50  ;;  %v976_v49 = vld [vmem:[#allocation6 + $0x180] sm:$0xff]  ;;  %v1986_v29 = vpack.c.bf16 %v942_v18, %v934_v17  ;;  %v1988_v35 = vpack.c.bf16 %v959_v24, %v951_v23  ;;  %v950_v36 = vld [vmem:[#allocation6 + $0xb0] sm:$0xff]  ;;  %v965_v38 = vld [vmem:[#allocation6 + $0x128] sm:$0xff]  ;;  %v1354_v23 = vlaneseq }
 0x165   :  { %1933 = vmatprep.subr.bf16.mxu1 %v1932_v51  ;;  %1937 = vmatprep.subr.bf16.mxu0 %v1936_v4  ;;  %v984_v50 = vld [vmem:[#allocation6 + $0x1c0] sm:$0xff]  ;;  %v1964_v51 = vpack.c.bf16 %v987_v48, %v979_v46  ;;  %v973_v39 = vld [vmem:[#allocation6 + $0x168] sm:$0xff]  ;;  %v967_v40 = vld [vmem:[#allocation6 + $0x138] sm:$0xff] }
 0x166   :  { %v1950_v52 = vpack.c.bf16 %v984_v50, %v976_v49  ;;  %v956_v32 = vld [vmem:[#allocation6 + $0xe0] sm:$0xff]  ;;  %v1976_v46 = vpack.c.bf16 %v973_v39, %v965_v38  ;;  %v966_v48 = vld [vmem:[#allocation6 + $0x130] sm:$0xff]  ;;  %v981_v50 = vld [vmem:[#allocation6 + $0x1a8] sm:$0xff]  ;;  %v2150_v39 = vmov 1966171168  }
 0x167   :  { %853 = vmatmul.mubr.f32.vlgmr.msra.gmra.mrb[6].mxu0 %v516_v59  ;;  %v1968_v59 = vpack.c.bf16 %v941_v57, %v933_v56  ;;  %v1974_v42 = vpack.c.bf16 %v956_v32, %v948_v30  ;;  %v964_v44 = vld [vmem:[#allocation6 + $0x120] sm:$0xff]  ;;  %v974_v49 = vld [vmem:[#allocation6 + $0x170] sm:$0xff]  ;;  %v991_v53 = vld [vmem:[#allocation6 + $0x1f8] sm:$0xff] }
 0x168   :  { %1060 = vmatprep.mubr.f32.mxu0 %v2149_v0  ;;  %1935 = vmatpush3.bf16.msra.mxu1 %v1934_v58  ;;  %v935_v58 = vld [vmem:[#allocation6 + $0x38] sm:$0xff]  ;;  %v972_v45 = vld [vmem:[#allocation6 + $0x160] sm:$0xff] }
 0x169   :  { %1953 = vmatprep.subr.bf16.mxu1 %v1952_v10  ;;  %1939 = vmatpush1.bf16.msra.mxu0 %v1938_v12  ;;  %v1984_v61 = vpack.c.bf16 %v943_v60, %v935_v58  ;;  %v1978_v54 = vpack.c.bf16 %v972_v45, %v964_v44  ;;  %v980_v56 = vld [vmem:[#allocation6 + $0x1a0] sm:$0xff]  ;;  %v982_v60 = vld [vmem:[#allocation6 + $0x1b0] sm:$0xff] }
 0x16a   :  { %1941 = vmatprep.subr.bf16.mxu0 %v1940_v21 }
 0x16b   :  { %923 = vmatmul.mubr.f32.vlgmr.msra.gmra.mrb[6].mxu1 %v518_v62 }
 0x16c   :  { %1131 = vmatprep.mubr.f32.mxu1 %v2149_v0  ;;  %1955 = vmatpush1.bf16.msra.mxu1 %v1954_v16 }
 0x16d   :  { %1957 = vmatprep.subr.bf16.mxu1 %v1956_v22  ;;  %1943 = vmatpush1.bf16.msra.mxu0 %v1942_v28  ;;  %v957_v22 = vld [vmem:[#allocation6 + $0xe8] sm:$0xff]  ;;  %v1970_v28 = vpack.c.bf16 %v940_v15, %v932_v14 }
 0x16e   :  { %1945 = vmatprep.subr.bf16.mxu0 %v1944_v34  ;;  %v1972_v34 = vpack.c.bf16 %v957_v22, %v949_v19 }
 0x170   :  { %1959 = vmatpush1.bf16.msra.mxu1 %v1958_v33 }
 0x171   :  { %1961 = vmatprep.subr.bf16.mxu1 %v1960_v37  ;;  %1947 = vmatpush1.bf16.msra.mxu0 %v1946_v41  ;;  %v958_v37 = vld [vmem:[#allocation6 + $0xf0] sm:$0xff]  ;;  %v975_v41 = vld [vmem:[#allocation6 + $0x178] sm:$0xff] }
 0x172   :  { %1949 = vmatprep.subr.bf16.mxu0 %v1948_v47  ;;  %v1992_v47 = vpack.c.bf16 %v975_v41, %v967_v40  ;;  %v1448_v40 = vunpack.c.l.s4 %v2150_v39 }
 0x174   :  { %1963 = vmatpush1.bf16.msra.mxu1 %v1962_v43  ;;  %v1990_v43 = vpack.c.bf16 %v958_v37, %v950_v36 }
 0x175   :  { %1965 = vmatprep.subr.bf16.mxu1 %v1964_v51  ;;  %1951 = vmatpush1.bf16.msra.mxu0 %v1950_v52  ;;  %v989_v51 = vld [vmem:[#allocation6 + $0x1e8] sm:$0xff]  ;;  %v983_v52 = vld [vmem:[#allocation6 + $0x1b8] sm:$0xff] }
 0x176   :  { %1969 = vmatprep.subr.bf16.mxu0 %v1968_v59  ;;  %v1980_v57 = vpack.c.bf16 %v989_v51, %v981_v50  ;;  %v1996_v58 = vpack.c.bf16 %v991_v53, %v983_v52  ;;  %v988_v59 = vld [vmem:[#allocation6 + $0x1e0] sm:$0xff] }
 0x178   :  { %1967 = vmatpush1.bf16.msra.mxu1 %v1966_v55  ;;  %v1994_v55 = vpack.c.bf16 %v974_v49, %v966_v48 }
 0x179   :  { %1985 = vmatprep.subr.bf16.mxu1 %v1984_v61  ;;  %v990_v61 = vld [vmem:[#allocation6 + $0x1f0] sm:$0xff] }
 0x21a   :  { %v1684_v62 = vpop.f32.mrb[4].mxu0 }
 0x21b   :  { %v1685_v63 = vpop.f32.mrb[5].mxu0 }
 0x21c   :  { %v1686_v1 = vadd.f32 %v1685_v63, %v1684_v62  ;;  %v1982_v62 = vpack.c.bf16 %v988_v59, %v980_v56  ;;  %v1998_v63 = vpack.c.bf16 %v990_v61, %v982_v60  ;;  %v1449_v56 = vunpack.c.0.s8 %v1448_v40 }
 0x21e   :  { %v1719_v3 = vpop.f32.mrb[4].mxu1 }
 0x21f   :  { %v1720_v4 = vpop.f32.mrb[5].mxu1 }
 0x220   :  { %v1721_v7 = vadd.f32 %v1720_v4, %v1719_v3 }
 0x222   :  { %v785_v8 = vadd.f32 %v1721_v7, %v1686_v1 }
 0x23a   :  { %v1754_v9 = vpop.f32.mrb[6].mxu0 }
 0x23b   :  { %v1755_v10 = vpop.f32.mrb[7].mxu0 }
 0x23c   :  { %v1756_v12 = vadd.f32 %v1755_v10, %v1754_v9 }
 0x23e   :  { %v855_v13 = vadd.f32 %v1756_v12, %v785_v8  ;;  %v1789_v16 = vpop.f32.mrb[6].mxu1 }
 0x23f   :  { %v1790_v21 = vpop.f32.mrb[7].mxu1 }
 0x240   :  { %v1791_v27 = vadd.f32 %v1790_v21, %v1789_v16 }
 0x242   :  { %v925_v33 = vadd.f32 %v1791_v27, %v855_v13 }
 0x244   :  { %1648 = vmatmul.mubr.msk.f32.vlgmr.msra.gmra.mrb[8].mxu0 %vm992_vm3, %v925_v33  ;;  %1649 = vmatmul.mubr.msk.f32.vlgmr.msra.gmra.mrb[8].mxu1 %vm992_vm3, %v925_v33 }
 0x245   :  { %1971 = vmatpush1.bf16.msra.mxu0 %v1970_v28  ;;  %1987 = vmatpush1.bf16.msra.mxu1 %v1986_v29 }
 0x246   :  { %1973 = vmatprep.subr.bf16.mxu0 %v1972_v34  ;;  %1989 = vmatprep.subr.bf16.mxu1 %v1988_v35  ;;  %v2755_v35 = vshrl.u32 %v1354_v23, 7 }
 0x247   :  { %1202 = vmatprep.mubr.f32.mxu0 %v2149_v0  ;;  %1273 = vmatprep.mubr.f32.mxu1 %v2149_v0 }
 0x248   :  { %v1356_v38 = vsub.s32 0, %v2755_v35  ;;  %v1364_v44 = vsub.s32 2, %v2755_v35  ;;  %v2766_v49 = vsub.s32 1, %v2755_v35  ;;  %v1368_v52 = vsub.s32 3, %v2755_v35 }
 0x249   :  { %1975 = vmatpush1.bf16.msra.mxu0 %v1974_v42  ;;  %1991 = vmatpush1.bf16.msra.mxu1 %v1990_v43  ;;  %v2758_v43 = vld [vmem:[#allocation7] sm:$0xff] }
 0x24a   :  { %1977 = vmatprep.subr.bf16.mxu0 %v1976_v46  ;;  %1993 = vmatprep.subr.bf16.mxu1 %v1992_v47  ;;  %v1365_v59 = vrot.slane %v2758_v43, %v1364_v44 }
 0x24d   :  { %1979 = vmatpush1.bf16.msra.mxu0 %v1978_v54  ;;  %1995 = vmatpush1.bf16.msra.mxu1 %v1994_v55  ;;  %v1357_v55 = vrot.slane %v2758_v43, %v1356_v38 }
 0x24e   :  { %1981 = vmatprep.subr.bf16.mxu0 %v1980_v57  ;;  %1997 = vmatprep.subr.bf16.mxu1 %v1996_v58 }
 0x251   :  { %1983 = vmatpush1.bf16.msra.mxu0 %v1982_v62  ;;  %1999 = vmatpush1.bf16.msra.mxu1 %v1998_v63  ;;  %v1361_v62 = vrot.slane %v2758_v43, %v2766_v49 }
 0x254   :  { %1650 = vmatmul.mubr.msk.f32.vlgmr.msra.gmra.mrb[10].mxu0 %vm992_vm3, %v925_v33  ;;  %1651 = vmatmul.mubr.msk.f32.vlgmr.msra.gmra.mrb[10].mxu1 %vm992_vm3, %v925_v33 }
 0x317   :  { %v1062_v0 = vpop.f32.mrb[8].mxu0  ;;  %v1133_v1 = vpop.f32.mrb[8].mxu1 }
 0x318   :  { %v2735_v3 = vmul.f32 0.03125, %v1062_v0  ;;  %v2737_v4 = vmul.f32 0.03125, %v1133_v1  ;;  %v1064_v7 = vpop.f32.mrb[9].mxu0  ;;  %v1135_v8 = vpop.f32.mrb[9].mxu1 }
 0x319   :  { %v2739_v9 = vmul.f32 0.03125, %v1064_v7  ;;  %v2741_v10 = vmul.f32 0.03125, %v1135_v8  ;;  %v1369_v7 = vrot.slane %v2758_v43, %v1368_v52 }
 0x31a   :  { %v1288_v12 = vmul.f32 %v2735_v3, %v2735_v3  ;;  %v1290_v13 = vmul.f32 %v2737_v4, %v2737_v4 }
 0x31b   :  { %v1289_v14 = vmul.f32 %v2739_v9, %v2739_v9  ;;  %v1291_v15 = vmul.f32 %v2741_v10, %v2741_v10 }
 0x31c   :  { %v1304_v16 = vrot.slane %v1288_v12, 7  ;;  %v1306_v17 = vrot.slane %v1290_v13, 7 }
 0x31d   :  { %v1305_v18 = vrot.slane %v1289_v14, 7  ;;  %v1307_v19 = vrot.slane %v1291_v15, 7  ;;  %v2795_v15 = vsub.s32 %v1449_v56, %v2755_v35 }
 0x31e   :  { %v1320_v21 = vsub.f32 %v2735_v3, %v1304_v16  ;;  %v1322_v22 = vsub.f32 %v2737_v4, %v1306_v17 }
 0x31f   :  { %v1321_v24 = vsub.f32 %v2739_v9, %v1305_v18  ;;  %v1323_v27 = vsub.f32 %v2741_v10, %v1307_v19 }
 0x320   :  { %v1328_v28 = vmax.f32 %v1320_v21, 0.0  ;;  %v1330_v29 = vmax.f32 %v1322_v22, 0.0 }
 0x321   :  { %v1329_v30 = vmax.f32 %v1321_v24, 0.0  ;;  %v1331_v32 = vmax.f32 %v1323_v27, 0.0 }
 0x322   :  { %v1336_v33 = vadd.f32 1e-05, %v1328_v28  ;;  %v1338_v34 = vadd.f32 1e-05, %v1330_v29 }
 0x323   :  { %v1337_v36 = vadd.f32 1e-05, %v1329_v30  ;;  %v1339_v37 = vadd.f32 1e-05, %v1331_v32 }
 0x324   :  { %2010 = vrsqrt.f32 %v1336_v33 }
 0x325   :  { %2012 = vrsqrt.f32 %v1338_v34 }
 0x326   :  { %2014 = vrsqrt.f32 %v1337_v36 }
 0x327   :  { %2016 = vrsqrt.f32 %v1339_v37  ;;  %v1204_v41 = vpop.f32.mrb[10].mxu0  ;;  %v1275_v42 = vpop.f32.mrb[10].mxu1 }
 0x328   :  { %v2761_v45 = vmul.f32 0.03125, %v1204_v41  ;;  %v2763_v46 = vmul.f32 0.03125, %v1275_v42  ;;  %v1206_v47 = vpop.f32.mrb[11].mxu0  ;;  %v1277_v48 = vpop.f32.mrb[11].mxu1 }
 0x329   :  { %v2768_v50 = vmul.f32 0.03125, %v1206_v47  ;;  %v2770_v51 = vmul.f32 0.03125, %v1277_v48 }
 0x32a   :  { %v1292_v53 = vmul.f32 %v2761_v45, %v2761_v45  ;;  %v1294_v54 = vmul.f32 %v2763_v46, %v2763_v46 }
 0x32b   :  { %v1293_v57 = vmul.f32 %v2768_v50, %v2768_v50  ;;  %v1295_v58 = vmul.f32 %v2770_v51, %v2770_v51 }
 0x32c   :  { %v1308_v60 = vrot.slane %v1292_v53, 7  ;;  %v1310_v61 = vrot.slane %v1294_v54, 7 }
 0x32d   :  { %v1309_v63 = vrot.slane %v1293_v57, 7  ;;  %v1311_v0 = vrot.slane %v1295_v58, 7  ;;  %v1372_v58 = vsub.s32 4, %v2755_v35 }
 0x32e   :  { %v2011_v1 = vpop.eup %2010  ;;  %v1324_v8 = vsub.f32 %v2761_v45, %v1308_v60  ;;  %v1326_v12 = vsub.f32 %v2763_v46, %v1310_v61  ;;  %v1380_v60 = vsub.s32 6, %v2755_v35 }
 0x32f   :  { %v2013_v13 = vpop.eup %2012  ;;  %v1394_v14 = vmul.f32 %v2011_v1, %v1357_v55  ;;  %v1325_v16 = vsub.f32 %v2768_v50, %v1309_v63  ;;  %v1327_v22 = vsub.f32 %v2770_v51, %v1311_v0  ;;  %v1373_v61 = vrot.slane %v2758_v43, %v1372_v58 }
 0x330   :  { %v2015_v17 = vpop.eup %2014  ;;  %v1396_v18 = vmul.f32 %v2013_v13, %v1365_v59  ;;  %v1332_v19 = vmax.f32 %v1324_v8, 0.0  ;;  %v1334_v21 = vmax.f32 %v1326_v12, 0.0  ;;  %v1381_v63 = vrot.slane %v2758_v43, %v1380_v60 }
 0x331   :  { %v2017_v23 = vpop.eup %2016  ;;  %v1411_v24 = vrot.slane %v1394_v14, 1  ;;  %v1497_v27 = vrot.slane %v1394_v14, %v2766_v49  ;;  %v1395_v28 = vmul.f32 %v2015_v17, %v1361_v62  ;;  %v1333_v29 = vmax.f32 %v1325_v16, 0.0 }
 0x332   :  { %v1413_v30 = vrot.slane %v1396_v18, 1  ;;  %v1505_v32 = vrot.slane %v1396_v18, %v2766_v49  ;;  %v1397_v33 = vmul.f32 %v2017_v23, %v1369_v7  ;;  %v1340_v34 = vadd.f32 1e-05, %v1332_v19 }
 0x333   :  { %v1427_v36 = vmul.f32 %v1411_v24, %v2735_v3  ;;  %v2803_v37 = vmul.f32 %v1497_v27, %v2465_v2  ;;  %v1412_v39 = vrot.slane %v1395_v28, 1  ;;  %v1501_v40 = vrot.slane %v1395_v28, %v2766_v49 }
 0x334   :  { %v1429_v41 = vmul.f32 %v1413_v30, %v2737_v4  ;;  %v2808_v42 = vmul.f32 %v1505_v32, %v2471_v5  ;;  %v1414_v47 = vrot.slane %v1397_v33, 1  ;;  %v1509_v48 = vrot.slane %v1397_v33, %v2766_v49 }
 0x335   :  { %v1428_v53 = vmul.f32 %v1412_v39, %v2739_v9  ;;  %v2813_v54 = vmul.f32 %v1501_v40, %v2473_v6  ;;  %2018 = vrsqrt.f32 %v1340_v34  ;;  %v1342_v3 = vadd.f32 1e-05, %v1334_v21 }
 0x336   :  { %v1430_v2 = vmul.f32 %v1414_v47, %v2741_v10  ;;  %v2817_v55 = vmul.f32 %v1509_v48, %v2481_v11  ;;  %v1341_v56 = vadd.f32 1e-05, %v1333_v29  ;;  %v1335_v4 = vmax.f32 %v1327_v22, 0.0 }
 0x337   :  { %v1443_v57 = vcombine.low %v1427_v36, %v1428_v53  ;;  %2020 = vrsqrt.f32 %v1342_v3  ;;  %v1376_v10 = vsub.s32 5, %v2755_v35  ;;  %v1384_v62 = vsub.s32 7, %v2755_v35  ;;  %v1402_v53 = vld [vmem:[#allocation9] sm:$0xff] }
 0x338   :  { %v1444_v5 = vcombine.low %v1429_v41, %v1430_v2  ;;  %2022 = vrsqrt.f32 %v1341_v56  ;;  %v1343_v59 = vadd.f32 1e-05, %v1335_v4 }
 0x339   :  { %v1453_v9 = vrot.slane %v1443_v57, %v2795_v15  ;;  %v1377_v1 = vrot.slane %v2758_v43, %v1376_v10  ;;  %v1385_v12 = vrot.slane %v2758_v43, %v1384_v62 }
 0x33a   :  { %v1460_v6 = vrot.slane %v1444_v5, %v2795_v15  ;;  %2024 = vrsqrt.f32 %v1343_v59 }
 0x33c   :  { %v1475_v11 = vcombine.low %v1453_v9, %v1460_v6 }
 0x33f   :  { %v2019_v0 = vpop.eup %2018 }
 0x340   :  { %v1398_v7 = vmul.f32 %v2019_v0, %v1373_v61 }
 0x341   :  { %v2021_v8 = vpop.eup %2020 }
 0x342   :  { %v2023_v13 = vpop.eup %2022  ;;  %v1415_v14 = vrot.slane %v1398_v7, 1  ;;  %v1513_v16 = vrot.slane %v1398_v7, %v2766_v49  ;;  %v1400_v17 = vmul.f32 %v2021_v8, %v1381_v63 }
 0x343   :  { %v1399_v18 = vmul.f32 %v2023_v13, %v1377_v1 }
 0x344   :  { %v2025_v19 = vpop.eup %2024  ;;  %v1530_v21 = vmul.f32 %v1513_v16, %v2489_v20  ;;  %v1417_v22 = vrot.slane %v1400_v17, 1  ;;  %v1521_v23 = vrot.slane %v1400_v17, %v2766_v49  ;;  %v1431_v24 = vmul.f32 %v1415_v14, %v2761_v45 }
 0x345   :  { %v1416_v27 = vrot.slane %v1399_v18, 1  ;;  %v1517_v28 = vrot.slane %v1399_v18, %v2766_v49  ;;  %v1401_v29 = vmul.f32 %v2025_v19, %v1385_v12 }
 0x346   :  { %v1433_v43 = vmul.f32 %v1417_v22, %v2763_v46  ;;  %v1532_v30 = vmul.f32 %v1521_v23, %v2494_v26  ;;  %v2151_v46 = vmov 1983009808  }
 0x347   :  { %v1432_v32 = vmul.f32 %v1416_v27, %v2768_v50  ;;  %v1531_v33 = vmul.f32 %v1517_v28, %v2492_v25  ;;  %v1418_v34 = vrot.slane %v1401_v29, 1  ;;  %v1525_v20 = vrot.slane %v1401_v29, %v2766_v49 }
 0x348   :  { %v1602_v48 = vunpack.c.l.s4 %v2151_v46  ;;  %v1483_v50 = vrot.slane %v1475_v11, %v2795_v15 }
 0x349   :  { %v1445_v36 = vcombine.low %v1431_v24, %v1432_v32  ;;  %v1434_v39 = vmul.f32 %v1418_v34, %v2770_v51  ;;  %v1533_v45 = vmul.f32 %v1525_v20, %v2496_v31 }
 0x34a   :  { %v1603_v3 = vunpack.c.0.s8 %v1602_v48 }
 0x34b   :  { %v1467_v40 = vrot.slane %v1445_v36, %v2795_v15  ;;  %v1446_v41 = vcombine.low %v1433_v43, %v1434_v39 }
 0x34c   :  { %v1606_v51 = vsub.s32 %v1603_v3, %v2755_v35 }
 0x34d   :  { %v1474_v47 = vrot.slane %v1446_v41, %v2795_v15 }
 0x34f   :  { %v1476_v26 = vcombine.low %v1467_v40, %v1474_v47 }
 0x351   :  { %v1490_v25 = vrot.slane %v1476_v26, %v2795_v15 }
 0x353   :  { %v1491_v2 = vcombine.low %v1483_v50, %v1490_v25 }
 0x355   :  { %v1493_v56 = vsub.f32 %v1402_v53, %v1491_v2 }
 0x357   :  { %v1538_v31 = vrot.slane %v1493_v56, %v1356_v38  ;;  %v1542_v4 = vrot.slane %v1493_v56, %v2766_v49  ;;  %v1546_v57 = vrot.slane %v1493_v56, %v1364_v44  ;;  %v1550_v5 = vrot.slane %v1493_v56, %v1368_v52 }
 0x358   :  { %v1554_v59 = vrot.slane %v1493_v56, %v1372_v58  ;;  %v1558_v9 = vrot.slane %v1493_v56, %v1376_v10  ;;  %v1562_v15 = vrot.slane %v1493_v56, %v1380_v60  ;;  %v1566_v6 = vrot.slane %v1493_v56, %v1384_v62 }
 0x359   :  { %v1575_v11 = vadd.f32 %v1538_v31, %v2803_v37  ;;  %v1576_v61 = vadd.f32 %v1542_v4, %v2813_v54  ;;  %v1577_v63 = vadd.f32 %v1546_v57, %v2808_v42  ;;  %v1578_v38 = vadd.f32 %v1550_v5, %v2817_v55 }
 0x35a   :  { %v1579_v0 = vadd.f32 %v1554_v59, %v1530_v21  ;;  %v1580_v49 = vadd.f32 %v1558_v9, %v1531_v33  ;;  %v1581_v1 = vadd.f32 %v1562_v15, %v1532_v30  ;;  %v1582_v7 = vadd.f32 %v1566_v6, %v1533_v45 }
 0x35b   :  { %v1583_v44 = vmax.f32 %v1575_v11, 0.0  ;;  %v1584_v8 = vmax.f32 %v1576_v61, 0.0  ;;  %v1585_v35 = vmax.f32 %v1577_v63, 0.0  ;;  %v1586_v52 = vmax.f32 %v1578_v38, 0.0 }
 0x35c   :  { %v1587_v58 = vmax.f32 %v1579_v0, 0.0  ;;  %v1588_v10 = vmax.f32 %v1580_v49, 0.0  ;;  %v1589_v60 = vmax.f32 %v1581_v1, 0.0  ;;  %v1590_v62 = vmax.f32 %v1582_v7, 0.0 }
 0x35d   :  { %v1599_v12 = vcombine.low %v1583_v44, %v1584_v8  ;;  %v1600_v37 = vcombine.low %v1585_v35, %v1586_v52 }
 0x35e   :  { %v1616_v13 = vcombine.low %v1587_v58, %v1588_v10  ;;  %v1617_v54 = vcombine.low %v1589_v60, %v1590_v62 }
 0x35f   :  { %v1607_v14 = vrot.slane %v1599_v12, %v1606_v51  ;;  %v1614_v42 = vrot.slane %v1600_v37, %v1606_v51 }
 0x360   :  { %v1624_v16 = vrot.slane %v1616_v13, %v1606_v51  ;;  %v1631_v55 = vrot.slane %v1617_v54, %v1606_v51 }
 0x361   :  { %v1615_v17 = vcombine.low %v1607_v14, %v1614_v42 }
 0x362   :  { %v1632_v18 = vcombine.low %v1624_v16, %v1631_v55 }
 0x363   :  { %1635 = vst [vmem:[%s2869_s6] sm:$0xff] %v1615_v17 }
 0x364   :  { %1636 = vst [vmem:[%s2869_s6 + $0x8] sm:$0xff] %v1632_v18 }
 0x365   :  { %1641 = vsyncpa [#allocation3], 1 }
 0x366   :  { %1642 = vsyncpa [#allocation5], 1 }
 0x367   :  { %1643 = vsyncpa [#allocation8], 1 }

// kernel: forward.7
= control target key start
LH: loop header
LB: loop body
LE: loop exit
PB: predicated region body
PF: predicated region fallthrough
CT: control target
= control target key end

     0   :  { %vm107_vm0 = vcmask 261120   ;;  %vm1063_vm1 = vmmov 0   ;;  %vm446_vm2 = vcmask 523264   ;;  %vm537_vm3 = vcmask 1040384   ;;  %s1610_s1 = inlined_call_operand.vmem [shape: f32[288,64], index: 1, kind: input, shape index: {}]   ;;  %s1611_s0 = inlined_call_operand.vmem [shape: f32[128,288], index: 0, kind: input, shape index: {}]   ;;  %s1612_s2 = inlined_call_operand.vmem [shape: f32[64,16], index: 2, kind: input, shape index: {}]   ;;  %s1613_s3 = inlined_call_operand.vmem [shape: f32[16,64], index: 3, kind: input, shape index: {}]   ;;  %s1614_s4 = inlined_call_operand.vmem [shape: f32[1,64], index: 4, kind: input, shape index: {}]   ;;  %s1615_s5 = inlined_call_operand.vmem [shape: f32[1,64], index: 5, kind: input, shape index: {}]   ;;  %s1616_s6 = inlined_call_operand.vmem [shape: f32[128,64], index: 6, kind: output, shape index: {}]  }
   0x1   :  { %v87_v0 = vld [vmem:[%s1610_s1 + $0x80] sm:$0xff]  ;;  %v88_v1 = vld [vmem:[%s1610_s1 + $0x88] sm:$0xff]  ;;  %v89_v5 = vld [vmem:[%s1610_s1 + $0x90] sm:$0xff]  ;;  %vm622_vm4 = vcmask 130048  }
   0x2   :  { %v71_v2 = vld [vmem:[%s1610_s1] sm:$0xff]  ;;  %v986_v3 = vpack.c.bf16 %v88_v1, %v87_v0  ;;  %v72_v4 = vld [vmem:[%s1610_s1 + $0x8] sm:$0xff]  ;;  %v90_v6 = vld [vmem:[%s1610_s1 + $0x98] sm:$0xff] }
   0x3   :  { %v988_v7 = vpack.c.bf16 %v72_v4, %v71_v2  ;;  %v990_v8 = vpack.c.bf16 %v90_v6, %v89_v5  ;;  %v73_v9 = vld [vmem:[%s1610_s1 + $0x10] sm:$0xff]  ;;  %v74_v10 = vld [vmem:[%s1610_s1 + $0x18] sm:$0xff]  ;;  %v91_v11 = vld [vmem:[%s1610_s1 + $0xa0] sm:$0xff] }
   0x4   :  { %987 = vmatprep.subr.bf16.mxu0 %v986_v3  ;;  %1041 = vmatprep.subr.bf16.mxu1 %v986_v3  ;;  %v92_v12 = vld [vmem:[%s1610_s1 + $0xa8] sm:$0xff]  ;;  %v992_v13 = vpack.c.bf16 %v74_v10, %v73_v9  ;;  %v75_v15 = vld [vmem:[%s1610_s1 + $0x20] sm:$0xff]  ;;  %v93_v17 = vld [vmem:[%s1610_s1 + $0xb0] sm:$0xff] }
   0x5   :  { %989 = vmatpush3.bf16.msra.mxu0 %v988_v7  ;;  %1049 = vmatpush3.bf16.msra.mxu1 %v988_v7  ;;  %v994_v14 = vpack.c.bf16 %v92_v12, %v91_v11  ;;  %v76_v16 = vld [vmem:[%s1610_s1 + $0x28] sm:$0xff]  ;;  %v94_v18 = vld [vmem:[%s1610_s1 + $0xb8] sm:$0xff]  ;;  %v77_v21 = vld [vmem:[%s1610_s1 + $0x30] sm:$0xff] }
   0x6   :  { %991 = vmatprep.subr.bf16.mxu0 %v990_v8  ;;  %1042 = vmatprep.subr.bf16.mxu1 %v990_v8  ;;  %v996_v19 = vpack.c.bf16 %v76_v16, %v75_v15  ;;  %v998_v20 = vpack.c.bf16 %v94_v18, %v93_v17  ;;  %v78_v22 = vld [vmem:[%s1610_s1 + $0x38] sm:$0xff]  ;;  %v95_v23 = vld [vmem:[%s1610_s1 + $0xc0] sm:$0xff]  ;;  %v96_v24 = vld [vmem:[%s1610_s1 + $0xc8] sm:$0xff] }
   0x7   :  { %v24_v25 = vld [vmem:[%s1611_s0 + $0x8] sm:$0xff]  ;;  %v63_v26 = vld [vmem:[%s1611_s0 + $0x140] sm:$0xff]  ;;  %v1000_v27 = vpack.c.bf16 %v78_v22, %v77_v21  ;;  %v1002_v28 = vpack.c.bf16 %v96_v24, %v95_v23  ;;  %v97_v31 = vld [vmem:[%s1610_s1 + $0xd0] sm:$0xff] }
   0x8   :  { %220 = vmatprep.mubr.f32.mxu0 %v24_v25  ;;  %v79_v29 = vld [vmem:[%s1610_s1 + $0x40] sm:$0xff]  ;;  %v80_v30 = vld [vmem:[%s1610_s1 + $0x48] sm:$0xff]  ;;  %v98_v32 = vld [vmem:[%s1610_s1 + $0xd8] sm:$0xff]  ;;  %285 = vmatprep.mubr.f32.mxu1 %v63_v26 }
   0x9   :  { %993 = vmatpush3.bf16.msra.mxu0 %v992_v13  ;;  %1050 = vmatpush3.bf16.msra.mxu1 %v992_v13  ;;  %v1004_v33 = vpack.c.bf16 %v80_v30, %v79_v29  ;;  %v1006_v34 = vpack.c.bf16 %v98_v32, %v97_v31  ;;  %v81_v35 = vld [vmem:[%s1610_s1 + $0x50] sm:$0xff]  ;;  %v82_v36 = vld [vmem:[%s1610_s1 + $0x58] sm:$0xff]  ;;  %v99_v37 = vld [vmem:[%s1610_s1 + $0xe0] sm:$0xff] }
   0xa   :  { %995 = vmatprep.subr.bf16.mxu0 %v994_v14  ;;  %1043 = vmatprep.subr.bf16.mxu1 %v994_v14  ;;  %v100_v38 = vld [vmem:[%s1610_s1 + $0xe8] sm:$0xff]  ;;  %v1008_v39 = vpack.c.bf16 %v82_v36, %v81_v35  ;;  %v83_v41 = vld [vmem:[%s1610_s1 + $0x60] sm:$0xff]  ;;  %v101_v43 = vld [vmem:[%s1610_s1 + $0xf0] sm:$0xff] }
   0xb   :  { %v1010_v40 = vpack.c.bf16 %v100_v38, %v99_v37  ;;  %v84_v42 = vld [vmem:[%s1610_s1 + $0x68] sm:$0xff]  ;;  %v102_v44 = vld [vmem:[%s1610_s1 + $0xf8] sm:$0xff]  ;;  %v85_v47 = vld [vmem:[%s1610_s1 + $0x70] sm:$0xff]  ;;  %v1062_v38 = vmov 0.0|0.0  }
   0xc   :  { %v1012_v45 = vpack.c.bf16 %v84_v42, %v83_v41  ;;  %v1014_v46 = vpack.c.bf16 %v102_v44, %v101_v43  ;;  %v86_v48 = vld [vmem:[%s1610_s1 + $0x78] sm:$0xff]  ;;  %v103_v49 = vld [vmem:[%s1610_s1 + $0x100] sm:$0xff]  ;;  %v104_v50 = vld [vmem:[%s1610_s1 + $0x108] sm:$0xff] }
   0xd   :  { %997 = vmatpush3.bf16.msra.mxu0 %v996_v19  ;;  %1051 = vmatpush3.bf16.msra.mxu1 %v996_v19  ;;  %v1016_v51 = vpack.c.bf16 %v86_v48, %v85_v47  ;;  %v1018_v52 = vpack.c.bf16 %v104_v50, %v103_v49  ;;  %v105_v53 = vld [vmem:[%s1610_s1 + $0x110] sm:$0xff]  ;;  %v106_v54 = vld [vmem:[%s1610_s1 + $0x118] sm:$0xff]  ;;  %v23_v55 = vld [vmem:[%s1611_s0] sm:$0xff]  ;;  %v1064_v47 = vmov 0.0  }
   0xe   :  { %999 = vmatprep.subr.bf16.mxu0 %v998_v20  ;;  %1044 = vmatprep.subr.bf16.mxu1 %v998_v20  ;;  %v62_v56 = vld [vmem:[%s1611_s0 + $0x138] sm:$0xff]  ;;  %v27_v57 = vld [vmem:[%s1611_s0 + $0x20] sm:$0xff]  ;;  %v1022_v59 = vpack.c.bf16 %v106_v54, %v105_v53  ;;  %v65_v61 = vld [vmem:[%s1611_s0 + $0x150] sm:$0xff] }
   0xf   :  { %v66_v58 = vld [vmem:[%s1611_s0 + $0x158] sm:$0xff]  ;;  %v69_v63 = vld [vmem:[%s1611_s0 + $0x170] sm:$0xff]  ;;  %v68_v1 = vld [vmem:[%s1611_s0 + $0x168] sm:$0xff] }
  0x10   :  { %v26_v60 = vld [vmem:[%s1611_s0 + $0x18] sm:$0xff]  ;;  %v29_v0 = vld [vmem:[%s1611_s0 + $0x30] sm:$0xff]  ;;  %v32_v4 = vld [vmem:[%s1611_s0 + $0x48] sm:$0xff] }
  0x11   :  { %1001 = vmatpush3.bf16.msra.mxu0 %v1000_v27  ;;  %1052 = vmatpush3.bf16.msra.mxu1 %v1000_v27  ;;  %v30_v62 = vld [vmem:[%s1611_s0 + $0x38] sm:$0xff]  ;;  %v33_v2 = vld [vmem:[%s1611_s0 + $0x50] sm:$0xff]  ;;  %v28_v5 = vld [vmem:[%s1611_s0 + $0x28] sm:$0xff] }
  0x12   :  { %1003 = vmatprep.subr.bf16.mxu0 %v1002_v28  ;;  %1045 = vmatprep.subr.bf16.mxu1 %v1002_v28  ;;  %v25_v3 = vld [vmem:[%s1611_s0 + $0x10] sm:$0xff]  ;;  %v36_v6 = vld [vmem:[%s1611_s0 + $0x68] sm:$0xff]  ;;  %v31_v7 = vld [vmem:[%s1611_s0 + $0x40] sm:$0xff] }
  0x13   :  { %v35_v8 = vld [vmem:[%s1611_s0 + $0x60] sm:$0xff]  ;;  %v34_v9 = vld [vmem:[%s1611_s0 + $0x58] sm:$0xff]  ;;  %v37_v11 = vld [vmem:[%s1611_s0 + $0x70] sm:$0xff] }
  0x14   :  { %v39_v10 = vld [vmem:[%s1611_s0 + $0x80] sm:$0xff]  ;;  %v38_v12 = vld [vmem:[%s1611_s0 + $0x78] sm:$0xff]  ;;  %v40_v13 = vld [vmem:[%s1611_s0 + $0x88] sm:$0xff] }
  0x15   :  { %1005 = vmatpush3.bf16.msra.mxu0 %v1004_v33  ;;  %1053 = vmatpush3.bf16.msra.mxu1 %v1004_v33  ;;  %v42_v14 = vld [vmem:[%s1611_s0 + $0x98] sm:$0xff]  ;;  %v43_v15 = vld [vmem:[%s1611_s0 + $0xa0] sm:$0xff]  ;;  %v41_v16 = vld [vmem:[%s1611_s0 + $0x90] sm:$0xff] }
  0x16   :  { %1007 = vmatprep.subr.bf16.mxu0 %v1006_v34  ;;  %1046 = vmatprep.subr.bf16.mxu1 %v1006_v34  ;;  %v46_v17 = vld [vmem:[%s1611_s0 + $0xb8] sm:$0xff]  ;;  %v45_v18 = vld [vmem:[%s1611_s0 + $0xb0] sm:$0xff]  ;;  %v44_v20 = vld [vmem:[%s1611_s0 + $0xa8] sm:$0xff] }
  0x17   :  { %v49_v19 = vld [vmem:[%s1611_s0 + $0xd0] sm:$0xff]  ;;  %v52_v21 = vld [vmem:[%s1611_s0 + $0xe8] sm:$0xff]  ;;  %v55_v23 = vld [vmem:[%s1611_s0 + $0x100] sm:$0xff] }
  0x18   :  { %v48_v22 = vld [vmem:[%s1611_s0 + $0xc8] sm:$0xff]  ;;  %v47_v24 = vld [vmem:[%s1611_s0 + $0xc0] sm:$0xff]  ;;  %v58_v25 = vld [vmem:[%s1611_s0 + $0x118] sm:$0xff] }
  0x19   :  { %1009 = vmatpush3.bf16.msra.mxu0 %v1008_v39  ;;  %1054 = vmatpush3.bf16.msra.mxu1 %v1008_v39  ;;  %v51_v26 = vld [vmem:[%s1611_s0 + $0xe0] sm:$0xff]  ;;  %v61_v27 = vld [vmem:[%s1611_s0 + $0x130] sm:$0xff]  ;;  %v50_v28 = vld [vmem:[%s1611_s0 + $0xd8] sm:$0xff] }
  0x1a   :  { %1011 = vmatprep.subr.bf16.mxu0 %v1010_v40  ;;  %1047 = vmatprep.subr.bf16.mxu1 %v1010_v40  ;;  %v64_v29 = vld [vmem:[%s1611_s0 + $0x148] sm:$0xff]  ;;  %v54_v30 = vld [vmem:[%s1611_s0 + $0xf8] sm:$0xff]  ;;  %v67_v31 = vld [vmem:[%s1611_s0 + $0x160] sm:$0xff] }
  0x1b   :  { %v53_v32 = vld [vmem:[%s1611_s0 + $0xf0] sm:$0xff]  ;;  %v70_v33 = vld [vmem:[%s1611_s0 + $0x178] sm:$0xff]  ;;  %v56_v35 = vld [vmem:[%s1611_s0 + $0x108] sm:$0xff] }
  0x1c   :  { %v57_v34 = vld [vmem:[%s1611_s0 + $0x110] sm:$0xff]  ;;  %v60_v36 = vld [vmem:[%s1611_s0 + $0x128] sm:$0xff]  ;;  %v59_v37 = vld [vmem:[%s1611_s0 + $0x120] sm:$0xff] }
  0x1d   :  { %1013 = vmatpush3.bf16.msra.mxu0 %v1012_v45  ;;  %1055 = vmatpush3.bf16.msra.mxu1 %v1012_v45  ;;  %v539_v39 = vld [vmem:[%s1612_s2] sm:$0xff]  ;;  %v540_v40 = vld [vmem:[%s1612_s2 + $0x8] sm:$0xff]  ;;  %v541_v42 = vld [vmem:[%s1612_s2 + $0x10] sm:$0xff] }
  0x1e   :  { %1015 = vmatprep.subr.bf16.mxu0 %v1014_v46  ;;  %1048 = vmatprep.subr.bf16.mxu1 %v1014_v46  ;;  %v1027_v41 = vpack.c.bf16 %v540_v40, %v539_v39  ;;  %v542_v43 = vld [vmem:[%s1612_s2 + $0x18] sm:$0xff]  ;;  %v543_v45 = vld [vmem:[%s1612_s2 + $0x20] sm:$0xff]  ;;  %v544_v46 = vld [vmem:[%s1612_s2 + $0x28] sm:$0xff] }
  0x1f   :  { %v1030_v44 = vpack.c.bf16 %v542_v43, %v541_v42  ;;  %v1033_v48 = vpack.c.bf16 %v544_v46, %v543_v45  ;;  %v545_v49 = vld [vmem:[%s1612_s2 + $0x30] sm:$0xff]  ;;  %v546_v50 = vld [vmem:[%s1612_s2 + $0x38] sm:$0xff] }
  0x21   :  { %1017 = vmatpush3.bf16.msra.mxu0 %v1016_v51  ;;  %1056 = vmatpush3.bf16.msra.mxu1 %v1016_v51  ;;  %v1036_v51 = vpack.c.bf16 %v546_v50, %v545_v49 }
  0x22   :  { %1019 = vmatprep.subr.bf16.mxu1 %v1018_v52 }
  0x24   :  { %221 = vmatmul.mubr.f32.vlgmr.msra.gmra.mrb[0].mxu0 %v23_v55  ;;  %286 = vmatmul.mubr.f32.vlgmr.msra.gmra.mrb[0].mxu1 %v62_v56 }
  0x25   :  { %225 = vmatprep.mubr.f32.mxu0 %v27_v57  ;;  %290 = vmatprep.mubr.f32.mxu1 %v66_v58 }
  0x26   :  { %1021 = vmatpush3.bf16.msra.mxu1 %v1018_v52 }
  0x27   :  { %1023 = vmatprep.subr.bf16.mxu1 %v1022_v59 }
  0x28   :  { %226 = vmatmul.mubr.f32.gmra.mrb[2].mxu0 %v26_v60  ;;  %291 = vmatmul.mubr.f32.gmra.mrb[2].mxu1 %v65_v61 }
  0x29   :  { %230 = vmatprep.mubr.f32.mxu0 %v30_v62  ;;  %295 = vmatprep.mubr.f32.mxu1 %v69_v63 }
  0x2a   :  { %1025 = vmatpush3.bf16.msra.mxu1 %v1022_v59 }
  0x2b   :  { %1026 = vmatprep.subr.bf16.mxu1 %v1062_v38 }
  0x2c   :  { %231 = vmatmul.mubr.f32.gmra.mrb[4].mxu0 %v29_v0  ;;  %296 = vmatmul.mubr.f32.gmra.mrb[4].mxu1 %v68_v1 }
  0x2d   :  { %235 = vmatprep.mubr.f32.mxu0 %v33_v2  ;;  %936 = vmatprep.mubr.msk.f32.mxu1 %vm107_vm0, %v25_v3 }
  0x30   :  { %236 = vmatmul.mubr.f32.gmra.mrb[6].mxu0 %v32_v4  ;;  %937 = vmatmul.mubr.msk.f32.vlgmr.msra.gmra.mrb[6].mxu1 %vm107_vm0, %v28_v5 }
  0x31   :  { %240 = vmatprep.mubr.f32.mxu0 %v36_v6  ;;  %939 = vmatprep.mubr.msk.f32.mxu1 %vm107_vm0, %v31_v7 }
  0x32   :  { %1028 = vmatpush3.bf16.msra.mxu1 %v1027_v41 }
  0x33   :  { %1029 = vmatprep.subr.bf16.mxu1 %v1062_v38 }
  0x34   :  { %241 = vmatmul.mubr.f32.gmra.mrb[8].mxu0 %v35_v8  ;;  %940 = vmatmul.mubr.msk.f32.gmra.mrb[8].mxu1 %vm107_vm0, %v34_v9 }
  0x35   :  { %245 = vmatprep.mubr.f32.mxu0 %v39_v10  ;;  %942 = vmatprep.mubr.msk.f32.mxu1 %vm107_vm0, %v37_v11 }
  0x36   :  { %1031 = vmatpush3.bf16.msra.mxu1 %v1030_v44 }
  0x37   :  { %1032 = vmatprep.subr.bf16.mxu1 %v1062_v38 }
  0x38   :  { %246 = vmatmul.mubr.f32.gmra.mrb[10].mxu0 %v38_v12  ;;  %943 = vmatmul.mubr.msk.f32.gmra.mrb[10].mxu1 %vm107_vm0, %v40_v13 }
  0x39   :  { %250 = vmatprep.mubr.f32.mxu0 %v42_v14  ;;  %945 = vmatprep.mubr.msk.f32.mxu1 %vm107_vm0, %v43_v15 }
  0x3a   :  { %1034 = vmatpush3.bf16.msra.mxu1 %v1033_v48 }
  0x3b   :  { %1035 = vmatprep.subr.bf16.mxu1 %v1062_v38 }
  0x3c   :  { %251 = vmatmul.mubr.f32.gmra.mrb[12].mxu0 %v41_v16  ;;  %946 = vmatmul.mubr.msk.f32.gmra.mrb[12].mxu1 %vm107_vm0, %v46_v17 }
  0x3d   :  { %255 = vmatprep.mubr.f32.mxu0 %v45_v18  ;;  %948 = vmatprep.mubr.msk.f32.mxu1 %vm107_vm0, %v49_v19 }
  0x3e   :  { %1037 = vmatpush3.bf16.msra.mxu1 %v1036_v51 }
  0x3f   :  { %1038 = vmatprep.subr.bf16.mxu1 %v1062_v38 }
  0x40   :  { %256 = vmatmul.mubr.f32.gmra.mrb[14].mxu0 %v44_v20  ;;  %949 = vmatmul.mubr.msk.f32.gmra.mrb[14].mxu1 %vm107_vm0, %v52_v21 }
  0x41   :  { %260 = vmatprep.mubr.f32.mxu0 %v48_v22  ;;  %951 = vmatprep.mubr.msk.f32.mxu1 %vm107_vm0, %v55_v23 }
  0x44   :  { %261 = vmatmul.mubr.f32.gmra.mrb[16].mxu0 %v47_v24  ;;  %952 = vmatmul.mubr.msk.f32.gmra.mrb[16].mxu1 %vm107_vm0, %v58_v25 }
  0x45   :  { %265 = vmatprep.mubr.f32.mxu0 %v51_v26  ;;  %954 = vmatprep.mubr.msk.f32.mxu1 %vm107_vm0, %v61_v27 }
  0x48   :  { %266 = vmatmul.mubr.f32.gmra.mrb[18].mxu0 %v50_v28  ;;  %955 = vmatmul.mubr.msk.f32.gmra.mrb[18].mxu1 %vm107_vm0, %v64_v29 }
  0x49   :  { %270 = vmatprep.mubr.f32.mxu0 %v54_v30  ;;  %957 = vmatprep.mubr.msk.f32.mxu1 %vm107_vm0, %v67_v31 }
  0x4c   :  { %271 = vmatmul.mubr.f32.gmra.mrb[20].mxu0 %v53_v32  ;;  %958 = vmatmul.mubr.msk.f32.gmra.mrb[20].mxu1 %vm107_vm0, %v70_v33 }
  0x4d   :  { %275 = vmatprep.mubr.f32.mxu0 %v57_v34  ;;  %976 = vmatprep.mubr.msk.f32.mxu1 %vm1063_vm1, %v1064_v47 }
  0x50   :  { %276 = vmatmul.mubr.f32.gmra.mrb[22].mxu0 %v56_v35 }
  0x51   :  { %280 = vmatprep.mubr.f32.mxu0 %v60_v36 }
  0x54   :  { %281 = vmatmul.mubr.f32.gmra.mrb[24].mxu0 %v59_v37 }
  0xf7   :  { %v848_v52 = vpop.f32.mrb[0].mxu0  ;;  %v887_v53 = vpop.f32.mrb[0].mxu1 }
  0xf8   :  { %v849_v54 = vpop.f32.mrb[1].mxu0  ;;  %v888_v55 = vpop.f32.mrb[1].mxu1 }
  0xf9   :  { %v850_v56 = vadd.f32 %v849_v54, %v848_v52  ;;  %v1394_v57 = vadd.f32 %v888_v55, %v887_v53 }
  0xfb   :  { %v851_v58 = vpop.f32.mrb[2].mxu0  ;;  %v890_v59 = vpop.f32.mrb[2].mxu1 }
  0xfc   :  { %v852_v60 = vpop.f32.mrb[3].mxu0  ;;  %v891_v61 = vpop.f32.mrb[3].mxu1 }
  0xfd   :  { %v853_v62 = vadd.f32 %v852_v60, %v851_v58  ;;  %v1396_v63 = vadd.f32 %v891_v61, %v890_v59 }
  0xff   :  { %v854_v0 = vpop.f32.mrb[4].mxu0  ;;  %v893_v1 = vpop.f32.mrb[4].mxu1 }
 0x100   :  { %v855_v2 = vpop.f32.mrb[5].mxu0  ;;  %v894_v3 = vpop.f32.mrb[5].mxu1 }
 0x101   :  { %v856_v4 = vadd.f32 %v855_v2, %v854_v0  ;;  %v1398_v5 = vadd.f32 %v894_v3, %v893_v1 }
 0x103   :  { %v857_v6 = vpop.f32.mrb[6].mxu0  ;;  %v938_v7 = vpop.f32.mrb[6].mxu1 }
 0x104   :  { %v1400_v8 = vadd.f32 %v938_v7, %v853_v62  ;;  %v858_v9 = vpop.f32.mrb[7].mxu0  ;;  %v367_v10 = vpop.f32.mrb[7].mxu1 }
 0x105   :  { %v859_v11 = vadd.f32 %v858_v9, %v857_v6  ;;  %v1402_v12 = vadd.f32 %v850_v56, %v367_v10 }
 0x106   :  { %v485_v24 = vmul.f32 %v1400_v8, %v1400_v8  ;;  %v448_v28 = vsel %vm446_vm2, %v1400_v8, 0.0 }
 0x107   :  { %v860_v13 = vpop.f32.mrb[8].mxu0  ;;  %v941_v14 = vpop.f32.mrb[8].mxu1  ;;  %v484_v25 = vmul.f32 %v1402_v12, %v1402_v12  ;;  %v447_v29 = vsel %vm446_vm2, %v1402_v12, 0.0 }
 0x108   :  { %v1404_v15 = vadd.f32 %v941_v14, %v859_v11  ;;  %v861_v16 = vpop.f32.mrb[9].mxu0  ;;  %v377_v17 = vpop.f32.mrb[9].mxu1  ;;  %v501_v36 = vsel %vm446_vm2, %v485_v24, 0.0  ;;  %v449_v40 = vadd.f32 %v448_v28, %v447_v29 }
 0x109   :  { %v862_v18 = vadd.f32 %v861_v16, %v860_v13  ;;  %v1406_v19 = vadd.f32 %v856_v4, %v377_v17  ;;  %v500_v37 = vsel %vm446_vm2, %v484_v25, 0.0 }
 0x10a   :  { %v502_v45 = vadd.f32 %v501_v36, %v500_v37  ;;  %v487_v50 = vmul.f32 %v1404_v15, %v1404_v15  ;;  %v452_v53 = vsel %vm446_vm2, %v1404_v15, 0.0 }
 0x10b   :  { %v863_v20 = vpop.f32.mrb[10].mxu0  ;;  %v944_v21 = vpop.f32.mrb[10].mxu1  ;;  %v486_v30 = vmul.f32 %v1406_v19, %v1406_v19  ;;  %v450_v38 = vsel %vm446_vm2, %v1406_v19, 0.0 }
 0x10c   :  { %v864_v22 = vpop.f32.mrb[11].mxu0  ;;  %v387_v23 = vpop.f32.mrb[11].mxu1  ;;  %v451_v46 = vadd.f32 %v450_v38, %v449_v40  ;;  %v505_v62 = vsel %vm446_vm2, %v487_v50, 0.0 }
 0x10d   :  { %v865_v26 = vadd.f32 %v864_v22, %v863_v20  ;;  %v1412_v27 = vadd.f32 %v862_v18, %v387_v23  ;;  %v503_v41 = vsel %vm446_vm2, %v486_v30, 0.0 }
 0x10e   :  { %v504_v52 = vadd.f32 %v503_v41, %v502_v45  ;;  %v453_v59 = vadd.f32 %v452_v53, %v451_v46 }
 0x10f   :  { %v1420_v31 = vadd.f32 %v944_v21, %v865_v26  ;;  %v866_v32 = vpop.f32.mrb[12].mxu0  ;;  %v947_v33 = vpop.f32.mrb[12].mxu1  ;;  %v488_v54 = vmul.f32 %v1412_v27, %v1412_v27  ;;  %v454_v0 = vsel %vm446_vm2, %v1412_v27, 0.0 }
 0x110   :  { %v867_v34 = vpop.f32.mrb[13].mxu0  ;;  %v397_v35 = vpop.f32.mrb[13].mxu1  ;;  %v506_v2 = vadd.f32 %v505_v62, %v504_v52  ;;  %v455_v10 = vadd.f32 %v454_v0, %v453_v59 }
 0x111   :  { %v868_v39 = vadd.f32 %v867_v34, %v866_v32  ;;  %v489_v3 = vmul.f32 %v1420_v31, %v1420_v31  ;;  %v507_v4 = vsel %vm446_vm2, %v488_v54, 0.0  ;;  %v456_v17 = vsel %vm446_vm2, %v1420_v31, 0.0 }
 0x112   :  { %v508_v20 = vadd.f32 %v507_v4, %v506_v2  ;;  %v457_v26 = vadd.f32 %v456_v17, %v455_v10 }
 0x113   :  { %v1427_v42 = vadd.f32 %v868_v39, %v397_v35  ;;  %v869_v43 = vpop.f32.mrb[14].mxu0  ;;  %v950_v44 = vpop.f32.mrb[14].mxu1  ;;  %v509_v21 = vsel %vm446_vm2, %v489_v3, 0.0 }
 0x114   :  { %v870_v48 = vpop.f32.mrb[15].mxu0  ;;  %v407_v49 = vpop.f32.mrb[15].mxu1  ;;  %v510_v38 = vadd.f32 %v509_v21, %v508_v20 }
 0x115   :  { %v871_v51 = vadd.f32 %v870_v48, %v869_v43  ;;  %v490_v11 = vmul.f32 %v1427_v42, %v1427_v42  ;;  %v458_v22 = vsel %vm446_vm2, %v1427_v42, 0.0 }
 0x116   :  { %v459_v37 = vadd.f32 %v458_v22, %v457_v26 }
 0x117   :  { %v1435_v55 = vadd.f32 %v947_v33, %v871_v51  ;;  %v872_v56 = vpop.f32.mrb[16].mxu0  ;;  %v953_v58 = vpop.f32.mrb[16].mxu1  ;;  %v511_v28 = vsel %vm446_vm2, %v490_v11, 0.0 }
 0x118   :  { %v873_v60 = vpop.f32.mrb[17].mxu0  ;;  %v417_v61 = vpop.f32.mrb[17].mxu1 }
 0x119   :  { %v874_v1 = vadd.f32 %v873_v60, %v872_v56  ;;  %v491_v23 = vmul.f32 %v1435_v55, %v1435_v55  ;;  %v460_v33 = vsel %vm446_vm2, %v1435_v55, 0.0 }
 0x11a   :  { %v461_v45 = vadd.f32 %v460_v33, %v459_v37 }
 0x11b   :  { %v1443_v6 = vadd.f32 %v874_v1, %v407_v49  ;;  %v875_v7 = vpop.f32.mrb[18].mxu0  ;;  %v956_v9 = vpop.f32.mrb[18].mxu1  ;;  %v513_v39 = vsel %vm446_vm2, %v491_v23, 0.0 }
 0x11c   :  { %v1448_v13 = vadd.f32 %v956_v9, %v1394_v57  ;;  %v876_v14 = vpop.f32.mrb[19].mxu0  ;;  %v427_v16 = vpop.f32.mrb[19].mxu1 }
 0x11d   :  { %v877_v18 = vadd.f32 %v876_v14, %v875_v7  ;;  %v492_v34 = vmul.f32 %v1443_v6, %v1443_v6 }
 0x11e   :  { %v497_v14 = vmul.f32 %v1448_v13, %v1448_v13  ;;  %v472_v22 = vsel %vm446_vm2, %v1448_v13, 0.0 }
 0x11f   :  { %v1457_v24 = vadd.f32 %v950_v44, %v877_v18  ;;  %v878_v25 = vpop.f32.mrb[20].mxu0  ;;  %v959_v57 = vpop.f32.mrb[20].mxu1  ;;  %v512_v44 = vadd.f32 %v511_v28, %v510_v38  ;;  %v515_v48 = vsel %vm446_vm2, %v492_v34, 0.0 }
 0x120   :  { %v1461_v29 = vadd.f32 %v959_v57, %v1398_v5  ;;  %v879_v30 = vpop.f32.mrb[21].mxu0  ;;  %v437_v32 = vpop.f32.mrb[21].mxu1  ;;  %v462_v5 = vsel %vm446_vm2, %v1443_v6, 0.0  ;;  %v525_v26 = vsel %vm446_vm2, %v497_v14, 0.0  ;;  %v719_v14 = vlaneseq }
 0x121   :  { %v880_v35 = vadd.f32 %v879_v30, %v878_v25  ;;  %v1468_v36 = vadd.f32 %v1396_v63, %v437_v32  ;;  %v493_v40 = vmul.f32 %v1457_v24, %v1457_v24  ;;  %v464_v63 = vsel %vm446_vm2, %v1457_v24, 0.0 }
 0x122   :  { %v463_v51 = vadd.f32 %v462_v5, %v461_v45  ;;  %v514_v52 = vadd.f32 %v513_v39, %v512_v44  ;;  %v499_v28 = vmul.f32 %v1461_v29, %v1461_v29  ;;  %v476_v34 = vsel %vm446_vm2, %v1461_v29, 0.0 }
 0x123   :  { %v1475_v41 = vadd.f32 %v880_v35, %v417_v61  ;;  %v881_v43 = vpop.f32.mrb[22].mxu0  ;;  %v517_v53 = vsel %vm446_vm2, %v493_v40, 0.0  ;;  %v474_v30 = vsel %vm446_vm2, %v1468_v36, 0.0 }
 0x124   :  { %v882_v46 = vpop.f32.mrb[23].mxu0  ;;  %v516_v60 = vadd.f32 %v515_v48, %v514_v52  ;;  %v465_v61 = vadd.f32 %v464_v63, %v463_v51  ;;  %v529_v39 = vsel %vm446_vm2, %v499_v28, 0.0  ;;  %v620_v51 = vld [vmem:[%s1613_s3] sm:$0xff]  ;;  %v621_v52 = vld [vmem:[%s1613_s3 + $0x8] sm:$0xff] }
 0x125   :  { %v494_v49 = vmul.f32 %v1475_v41, %v1475_v41  ;;  %v883_v50 = vadd.f32 %v882_v46, %v881_v43  ;;  %v466_v54 = vsel %vm446_vm2, %v1475_v41, 0.0 }
 0x126   :  { %v518_v4 = vadd.f32 %v517_v53, %v516_v60  ;;  %v467_v7 = vadd.f32 %v466_v54, %v465_v61  ;;  %v1039_v60 = vpack.c.bf16 %v621_v52, %v620_v51 }
 0x127   :  { %v1485_v56 = vadd.f32 %v953_v58, %v883_v50  ;;  %v884_v59 = vpop.f32.mrb[24].mxu0  ;;  %v519_v0 = vsel %vm446_vm2, %v494_v49, 0.0 }
 0x128   :  { %v885_v62 = vpop.f32.mrb[25].mxu0  ;;  %v520_v58 = vadd.f32 %v519_v0, %v518_v4 }
 0x129   :  { %v468_v1 = vsel %vm446_vm2, %v1485_v56, 0.0  ;;  %v495_v2 = vmul.f32 %v1485_v56, %v1485_v56  ;;  %v886_v3 = vadd.f32 %v885_v62, %v884_v59 }
 0x12a   :  { %v469_v11 = vadd.f32 %v468_v1, %v467_v7 }
 0x12b   :  { %v521_v9 = vsel %vm446_vm2, %v495_v2, 0.0  ;;  %v1493_v10 = vadd.f32 %v886_v3, %v427_v16  ;;  %v498_v16 = vmul.f32 %v1468_v36, %v1468_v36 }
 0x12c   :  { %v522_v20 = vadd.f32 %v521_v9, %v520_v58 }
 0x12d   :  { %v470_v17 = vsel %vm446_vm2, %v1493_v10, 0.0  ;;  %v496_v18 = vmul.f32 %v1493_v10, %v1493_v10  ;;  %v527_v35 = vsel %vm446_vm2, %v498_v16, 0.0 }
 0x12e   :  { %v471_v21 = vadd.f32 %v470_v17, %v469_v11  ;;  %v720_v17 = vshrl.u32 %v719_v14, 7 }
 0x12f   :  { %v523_v23 = vsel %vm446_vm2, %v496_v18, 0.0  ;;  %v815_v18 = vld [vmem:[%s1614_s4] ss:$0 sm:$0xff] }
 0x130   :  { %v473_v25 = vadd.f32 %v472_v22, %v471_v21  ;;  %v524_v57 = vadd.f32 %v523_v23, %v522_v20  ;;  %v713_v23 = vld [vmem:[%s1615_s5] sm:$0x1] }
 0x132   :  { %v475_v32 = vadd.f32 %v474_v30, %v473_v25  ;;  %v526_v33 = vadd.f32 %v525_v26, %v524_v57  ;;  %v742_v57 = vsub.s32 0, %v720_v17 }
 0x134   :  { %v477_v37 = vadd.f32 %v476_v34, %v475_v32  ;;  %v528_v38 = vadd.f32 %v527_v35, %v526_v33 }
 0x136   :  { %v478_v5 = vrot.slane %v477_v37, 4  ;;  %v530_v40 = vadd.f32 %v529_v39, %v528_v38 }
 0x138   :  { %v479_v43 = vadd.f32 %v478_v5, %v477_v37  ;;  %v531_v44 = vrot.slane %v530_v40, 4 }
 0x13a   :  { %v480_v45 = vrot.slane %v479_v43, 2  ;;  %v532_v46 = vadd.f32 %v531_v44, %v530_v40 }
 0x13c   :  { %v481_v48 = vadd.f32 %v480_v45, %v479_v43  ;;  %v533_v63 = vrot.slane %v532_v46, 2 }
 0x13e   :  { %v482_v49 = vrot.slane %v481_v48, 1  ;;  %v534_v50 = vadd.f32 %v533_v63, %v532_v46 }
 0x140   :  { %v535_v53 = vrot.slane %v534_v50, 1  ;;  %v483_v54 = vadd.f32 %v482_v49, %v481_v48 }
 0x142   :  { %v536_v59 = vadd.f32 %v535_v53, %v534_v50 }
 0x144   :  { %v538_v61 = vsel %vm537_vm3, %v483_v54, %v536_v59 }
 0x145   :  { %977 = vmatmul.mubr.msk.f32.vlgmr.msra.gmra.mrb[22].mxu1 %vm446_vm2, %v538_v61 }
 0x146   :  { %1040 = vmatpush3.bf16.msra.mxu1 %v1039_v60  ;;  %983 = vmatprep.mubr.msk.f32.mxu1 %vm1063_vm1, %v1064_v47  ;;  %v721_v47 = vsub.s32 1, %v720_v17 }
 0x218   :  { %v616_v62 = vpop.f32.mrb[22].mxu1 }
 0x219   :  { %v978_v0 = vpop.f32.mrb[23].mxu1  ;;  %984 = vmatmul.mubr.msk.f32.vlgmr.msra.gmra.mrb[24].mxu1 %vm622_vm4, %v616_v62 }
 0x2ec   :  { %v692_v1 = vpop.f32.mrb[24].mxu1 }
 0x2ed   :  { %v696_v2 = vmul.f32 0.001953125, %v692_v1  ;;  %v985_v3 = vpop.f32.mrb[25].mxu1 }
 0x2ef   :  { %v697_v4 = vmul.f32 %v696_v2, %v696_v2 }
 0x2f1   :  { %v699_v7 = vrot.slane %v697_v4, 7 }
 0x2f3   :  { %v701_v9 = vsub.f32 %v696_v2, %v699_v7 }
 0x2f5   :  { %v702_v58 = vmax.f32 %v701_v9, 0.0 }
 0x2f7   :  { %v703_v11 = vadd.f32 1e-05, %v702_v58 }
 0x2f9   :  { %1060 = vrsqrt.f32 %v703_v11 }
 0x303   :  { %v1061_v20 = vpop.eup %1060 }
 0x304   :  { %v712_v21 = vmul.f32 %v1061_v20, %v815_v18 }
 0x306   :  { %v715_v22 = vrot.slane %v712_v21, 1  ;;  %v722_v16 = vrot.slane %v712_v21, %v721_v47 }
 0x308   :  { %v717_v25 = vmul.f32 %v715_v22, %v696_v2  ;;  %v723_v26 = vmul.f32 %v722_v16, %v1402_v12  ;;  %v724_v28 = vmul.f32 %v722_v16, %v1400_v8  ;;  %v725_v32 = vmul.f32 %v722_v16, %v1406_v19 }
 0x309   :  { %v726_v33 = vmul.f32 %v722_v16, %v1404_v15  ;;  %v727_v34 = vmul.f32 %v722_v16, %v1412_v27  ;;  %v728_v35 = vmul.f32 %v722_v16, %v1420_v31  ;;  %v729_v37 = vmul.f32 %v722_v16, %v1427_v42 }
 0x30a   :  { %v718_v30 = vsub.f32 %v713_v23, %v717_v25  ;;  %v730_v38 = vmul.f32 %v722_v16, %v1435_v55  ;;  %v731_v39 = vmul.f32 %v722_v16, %v1443_v6  ;;  %v732_v5 = vmul.f32 %v722_v16, %v1457_v24 }
 0x30b   :  { %v733_v12 = vmul.f32 %v722_v16, %v1475_v41  ;;  %v734_v8 = vmul.f32 %v722_v16, %v1485_v56  ;;  %v735_v19 = vmul.f32 %v722_v16, %v1493_v10  ;;  %v736_v15 = vmul.f32 %v722_v16, %v1448_v13 }
 0x30c   :  { %v743_v40 = vrot.slane %v718_v30, %v742_v57  ;;  %v737_v27 = vmul.f32 %v722_v16, %v1468_v36  ;;  %v738_v31 = vmul.f32 %v722_v16, %v1461_v29 }
 0x30e   :  { %v745_v42 = vadd.f32 %v743_v40, %v723_v26  ;;  %v746_v43 = vadd.f32 %v743_v40, %v724_v28  ;;  %v747_v55 = vadd.f32 %v743_v40, %v725_v32  ;;  %v748_v44 = vadd.f32 %v743_v40, %v726_v33 }
 0x30f   :  { %v749_v6 = vadd.f32 %v743_v40, %v727_v34  ;;  %v750_v45 = vadd.f32 %v743_v40, %v728_v35  ;;  %v751_v24 = vadd.f32 %v743_v40, %v729_v37  ;;  %v752_v46 = vadd.f32 %v743_v40, %v730_v38 }
 0x310   :  { %v753_v41 = vadd.f32 %v743_v40, %v731_v39  ;;  %v754_v48 = vadd.f32 %v743_v40, %v732_v5  ;;  %v755_v56 = vadd.f32 %v743_v40, %v733_v12  ;;  %v756_v63 = vadd.f32 %v743_v40, %v734_v8 }
 0x311   :  { %v757_v49 = vadd.f32 %v743_v40, %v735_v19  ;;  %v758_v10 = vadd.f32 %v743_v40, %v736_v15  ;;  %v759_v50 = vadd.f32 %v743_v40, %v737_v27  ;;  %v760_v13 = vadd.f32 %v743_v40, %v738_v31 }
 0x312   :  { %v761_v51 = vmax.f32 %v745_v42, 0.0  ;;  %v762_v36 = vmax.f32 %v746_v43, 0.0  ;;  %v763_v52 = vmax.f32 %v747_v55, 0.0  ;;  %v764_v29 = vmax.f32 %v748_v44, 0.0 }
 0x313   :  { %v765_v53 = vmax.f32 %v749_v6, 0.0  ;;  %v766_v54 = vmax.f32 %v750_v45, 0.0  ;;  %v767_v59 = vmax.f32 %v751_v24, 0.0  ;;  %v768_v60 = vmax.f32 %v752_v46, 0.0 }
 0x314   :  { %v769_v61 = vmax.f32 %v753_v41, 0.0  ;;  %v770_v62 = vmax.f32 %v754_v48, 0.0  ;;  %v771_v0 = vmax.f32 %v755_v56, 0.0  ;;  %v772_v1 = vmax.f32 %v756_v63, 0.0  ;;  %777 = vst.msk [vmem:[%s1616_s6] sm:$0xff] %vm446_vm2, %v761_v51  ;;  %778 = vst.msk [vmem:[%s1616_s6 + $0x8] sm:$0xff] %vm446_vm2, %v762_v36 }
 0x315   :  { %779 = vst.msk [vmem:[%s1616_s6 + $0x10] sm:$0xff] %vm446_vm2, %v763_v52  ;;  %780 = vst.msk [vmem:[%s1616_s6 + $0x18] sm:$0xff] %vm446_vm2, %v764_v29  ;;  %v773_v2 = vmax.f32 %v757_v49, 0.0  ;;  %v774_v3 = vmax.f32 %v758_v10, 0.0  ;;  %v775_v4 = vmax.f32 %v759_v50, 0.0  ;;  %v776_v7 = vmax.f32 %v760_v13, 0.0 }
 0x316   :  { %781 = vst.msk [vmem:[%s1616_s6 + $0x20] sm:$0xff] %vm446_vm2, %v765_v53  ;;  %782 = vst.msk [vmem:[%s1616_s6 + $0x28] sm:$0xff] %vm446_vm2, %v766_v54 }
 0x317   :  { %783 = vst.msk [vmem:[%s1616_s6 + $0x30] sm:$0xff] %vm446_vm2, %v767_v59  ;;  %784 = vst.msk [vmem:[%s1616_s6 + $0x38] sm:$0xff] %vm446_vm2, %v768_v60 }
 0x318   :  { %785 = vst.msk [vmem:[%s1616_s6 + $0x40] sm:$0xff] %vm446_vm2, %v769_v61  ;;  %786 = vst.msk [vmem:[%s1616_s6 + $0x48] sm:$0xff] %vm446_vm2, %v770_v62 }
 0x319   :  { %787 = vst.msk [vmem:[%s1616_s6 + $0x50] sm:$0xff] %vm446_vm2, %v771_v0  ;;  %788 = vst.msk [vmem:[%s1616_s6 + $0x58] sm:$0xff] %vm446_vm2, %v772_v1 }
 0x31a   :  { %789 = vst.msk [vmem:[%s1616_s6 + $0x60] sm:$0xff] %vm446_vm2, %v773_v2  ;;  %790 = vst.msk [vmem:[%s1616_s6 + $0x68] sm:$0xff] %vm446_vm2, %v774_v3 }
 0x31b   :  { %791 = vst.msk [vmem:[%s1616_s6 + $0x70] sm:$0xff] %vm446_vm2, %v775_v4  ;;  %792 = vst.msk [vmem:[%s1616_s6 + $0x78] sm:$0xff] %vm446_vm2, %v776_v7 }

// kernel: forward.8
= control target key start
LH: loop header
LB: loop body
LE: loop exit
PB: predicated region body
PF: predicated region fallthrough
CT: control target
= control target key end

     0   :  { %v1671_v0 = vmov 0.0|0.0   ;;  %vm169_vm0 = vcmask 130048   ;;  %vm747_vm1 = vcmask 261120   ;;  %vm1672_vm2 = vmmov 0   ;;  %s3554_s1 = inlined_call_operand.vmem [shape: f32[144,32], index: 1, kind: input, shape index: {}]   ;;  %s3555_s0 = inlined_call_operand.vmem [shape: f32[512,144], index: 0, kind: input, shape index: {}]   ;;  %s3556_s2 = inlined_call_operand.vmem [shape: f32[32,8], index: 2, kind: input, shape index: {}]   ;;  %s3557_s3 = inlined_call_operand.vmem [shape: f32[8,32], index: 3, kind: input, shape index: {}]   ;;  %s3558_s4 = inlined_call_operand.vmem [shape: f32[1,32], index: 4, kind: input, shape index: {}]   ;;  %s3559_s5 = inlined_call_operand.vmem [shape: f32[1,32], index: 5, kind: input, shape index: {}]   ;;  %s3560_s6 = inlined_call_operand.vmem [shape: f32[512,32], index: 6, kind: output, shape index: {}]  }
   0x1   :  { %1615 = vmatprep.subr.bf16.mxu0 %v1671_v0  ;;  %v151_v1 = vld [vmem:[%s3554_s1] sm:$0xff]  ;;  %v152_v2 = vld [vmem:[%s3554_s1 + $0x8] sm:$0xff]  ;;  %v153_v3 = vld [vmem:[%s3554_s1 + $0x10] sm:$0xff]  ;;  %1648 = vmatprep.subr.bf16.mxu1 %v1671_v0  ;;  %vm1078_vm3 = vcmask 1040384   ;;  %vm1158_vm4 = vcmask 64512  }
   0x2   :  { %v1616_v4 = vpack.c.bf16 %v152_v2, %v151_v1  ;;  %v154_v5 = vld [vmem:[%s3554_s1 + $0x18] sm:$0xff]  ;;  %v155_v7 = vld [vmem:[%s3554_s1 + $0x20] sm:$0xff]  ;;  %v156_v8 = vld [vmem:[%s3554_s1 + $0x28] sm:$0xff] }
   0x3   :  { %v1619_v6 = vpack.c.bf16 %v154_v5, %v153_v3  ;;  %v24_v9 = vld [vmem:[%s3555_s0 + $0x8] sm:$0xff]  ;;  %v1622_v10 = vpack.c.bf16 %v156_v8, %v155_v7  ;;  %v157_v11 = vld [vmem:[%s3554_s1 + $0x30] sm:$0xff]  ;;  %v158_v12 = vld [vmem:[%s3554_s1 + $0x38] sm:$0xff] }
   0x4   :  { %1617 = vmatpush1.bf16.msra.mxu0 %v1616_v4  ;;  %1657 = vmatpush1.bf16.msra.mxu1 %v1616_v4  ;;  %v1625_v13 = vpack.c.bf16 %v158_v12, %v157_v11  ;;  %v159_v14 = vld [vmem:[%s3554_s1 + $0x40] sm:$0xff]  ;;  %v160_v15 = vld [vmem:[%s3554_s1 + $0x48] sm:$0xff]  ;;  %v161_v17 = vld [vmem:[%s3554_s1 + $0x50] sm:$0xff] }
   0x5   :  { %1618 = vmatprep.subr.bf16.mxu0 %v1671_v0  ;;  %1649 = vmatprep.subr.bf16.mxu1 %v1671_v0  ;;  %v1628_v16 = vpack.c.bf16 %v160_v15, %v159_v14  ;;  %v162_v18 = vld [vmem:[%s3554_s1 + $0x58] sm:$0xff]  ;;  %v163_v21 = vld [vmem:[%s3554_s1 + $0x60] sm:$0xff]  ;;  %v164_v22 = vld [vmem:[%s3554_s1 + $0x68] sm:$0xff] }
   0x6   :  { %1525 = vmatprep.mubr.msk.f32.mxu0 %vm169_vm0, %v24_v9  ;;  %v90_v19 = vld [vmem:[%s3555_s0 + $0x218] sm:$0xff]  ;;  %v1631_v20 = vpack.c.bf16 %v162_v18, %v161_v17  ;;  %v1634_v23 = vpack.c.bf16 %v164_v22, %v163_v21  ;;  %v165_v24 = vld [vmem:[%s3554_s1 + $0x70] sm:$0xff]  ;;  %v167_v27 = vld [vmem:[%s3554_s1 + $0x80] sm:$0xff] }
   0x7   :  { %1558 = vmatprep.mubr.msk.f32.mxu1 %vm169_vm0, %v90_v19  ;;  %v166_v25 = vld [vmem:[%s3554_s1 + $0x78] sm:$0xff]  ;;  %v168_v28 = vld [vmem:[%s3554_s1 + $0x88] sm:$0xff]  ;;  %v23_v30 = vld [vmem:[%s3555_s0] sm:$0xff] }
   0x8   :  { %1620 = vmatpush1.bf16.msra.mxu0 %v1619_v6  ;;  %1658 = vmatpush1.bf16.msra.mxu1 %v1619_v6  ;;  %v1637_v26 = vpack.c.bf16 %v166_v25, %v165_v24  ;;  %v1640_v29 = vpack.c.bf16 %v168_v28, %v167_v27  ;;  %v26_v31 = vld [vmem:[%s3555_s0 + $0x18] sm:$0xff]  ;;  %v89_v32 = vld [vmem:[%s3555_s0 + $0x210] sm:$0xff]  ;;  %v92_v33 = vld [vmem:[%s3555_s0 + $0x228] sm:$0xff] }
   0x9   :  { %1621 = vmatprep.subr.bf16.mxu0 %v1671_v0  ;;  %1650 = vmatprep.subr.bf16.mxu1 %v1671_v0  ;;  %v25_v34 = vld [vmem:[%s3555_s0 + $0x10] sm:$0xff]  ;;  %v28_v35 = vld [vmem:[%s3555_s0 + $0x28] sm:$0xff]  ;;  %v91_v36 = vld [vmem:[%s3555_s0 + $0x220] sm:$0xff] }
   0xa   :  { %v94_v37 = vld [vmem:[%s3555_s0 + $0x238] sm:$0xff]  ;;  %v27_v38 = vld [vmem:[%s3555_s0 + $0x20] sm:$0xff]  ;;  %v93_v40 = vld [vmem:[%s3555_s0 + $0x230] sm:$0xff] }
   0xb   :  { %v30_v39 = vld [vmem:[%s3555_s0 + $0x38] sm:$0xff]  ;;  %v96_v41 = vld [vmem:[%s3555_s0 + $0x248] sm:$0xff]  ;;  %v29_v42 = vld [vmem:[%s3555_s0 + $0x30] sm:$0xff] }
   0xc   :  { %1623 = vmatpush1.bf16.msra.mxu0 %v1622_v10  ;;  %1659 = vmatpush1.bf16.msra.mxu1 %v1622_v10  ;;  %v32_v43 = vld [vmem:[%s3555_s0 + $0x48] sm:$0xff]  ;;  %v95_v44 = vld [vmem:[%s3555_s0 + $0x240] sm:$0xff]  ;;  %v98_v45 = vld [vmem:[%s3555_s0 + $0x258] sm:$0xff] }
   0xd   :  { %1624 = vmatprep.subr.bf16.mxu0 %v1671_v0  ;;  %1651 = vmatprep.subr.bf16.mxu1 %v1671_v0  ;;  %v31_v46 = vld [vmem:[%s3555_s0 + $0x40] sm:$0xff]  ;;  %v34_v47 = vld [vmem:[%s3555_s0 + $0x58] sm:$0xff]  ;;  %v97_v48 = vld [vmem:[%s3555_s0 + $0x250] sm:$0xff] }
   0xe   :  { %v100_v49 = vld [vmem:[%s3555_s0 + $0x268] sm:$0xff]  ;;  %v33_v50 = vld [vmem:[%s3555_s0 + $0x50] sm:$0xff]  ;;  %v99_v52 = vld [vmem:[%s3555_s0 + $0x260] sm:$0xff] }
   0xf   :  { %v36_v51 = vld [vmem:[%s3555_s0 + $0x68] sm:$0xff]  ;;  %v102_v53 = vld [vmem:[%s3555_s0 + $0x278] sm:$0xff]  ;;  %v35_v54 = vld [vmem:[%s3555_s0 + $0x60] sm:$0xff] }
  0x10   :  { %1626 = vmatpush1.bf16.msra.mxu0 %v1625_v13  ;;  %1660 = vmatpush1.bf16.msra.mxu1 %v1625_v13  ;;  %v38_v55 = vld [vmem:[%s3555_s0 + $0x78] sm:$0xff]  ;;  %v101_v56 = vld [vmem:[%s3555_s0 + $0x270] sm:$0xff]  ;;  %v104_v57 = vld [vmem:[%s3555_s0 + $0x288] sm:$0xff] }
  0x11   :  { %1627 = vmatprep.subr.bf16.mxu0 %v1671_v0  ;;  %1652 = vmatprep.subr.bf16.mxu1 %v1671_v0  ;;  %v37_v58 = vld [vmem:[%s3555_s0 + $0x70] sm:$0xff]  ;;  %v40_v59 = vld [vmem:[%s3555_s0 + $0x88] sm:$0xff]  ;;  %v103_v60 = vld [vmem:[%s3555_s0 + $0x280] sm:$0xff] }
  0x12   :  { %v106_v61 = vld [vmem:[%s3555_s0 + $0x298] sm:$0xff]  ;;  %v39_v62 = vld [vmem:[%s3555_s0 + $0x80] sm:$0xff]  ;;  %v105_v1 = vld [vmem:[%s3555_s0 + $0x290] sm:$0xff] }
  0x13   :  { %v42_v63 = vld [vmem:[%s3555_s0 + $0x98] sm:$0xff]  ;;  %v108_v2 = vld [vmem:[%s3555_s0 + $0x2a8] sm:$0xff]  ;;  %v41_v3 = vld [vmem:[%s3555_s0 + $0x90] sm:$0xff] }
  0x14   :  { %1629 = vmatpush1.bf16.msra.mxu0 %v1628_v16  ;;  %1661 = vmatpush1.bf16.msra.mxu1 %v1628_v16  ;;  %v44_v4 = vld [vmem:[%s3555_s0 + $0xa8] sm:$0xff]  ;;  %v107_v5 = vld [vmem:[%s3555_s0 + $0x2a0] sm:$0xff]  ;;  %v110_v6 = vld [vmem:[%s3555_s0 + $0x2b8] sm:$0xff] }
  0x15   :  { %1630 = vmatprep.subr.bf16.mxu0 %v1671_v0  ;;  %1653 = vmatprep.subr.bf16.mxu1 %v1671_v0  ;;  %v43_v7 = vld [vmem:[%s3555_s0 + $0xa0] sm:$0xff]  ;;  %v46_v8 = vld [vmem:[%s3555_s0 + $0xb8] sm:$0xff]  ;;  %v109_v9 = vld [vmem:[%s3555_s0 + $0x2b0] sm:$0xff] }
  0x16   :  { %v112_v10 = vld [vmem:[%s3555_s0 + $0x2c8] sm:$0xff]  ;;  %v45_v11 = vld [vmem:[%s3555_s0 + $0xb0] sm:$0xff]  ;;  %v111_v13 = vld [vmem:[%s3555_s0 + $0x2c0] sm:$0xff] }
  0x17   :  { %v48_v12 = vld [vmem:[%s3555_s0 + $0xc8] sm:$0xff]  ;;  %v114_v14 = vld [vmem:[%s3555_s0 + $0x2d8] sm:$0xff]  ;;  %v47_v15 = vld [vmem:[%s3555_s0 + $0xc0] sm:$0xff] }
  0x18   :  { %1632 = vmatpush1.bf16.msra.mxu0 %v1631_v20  ;;  %1662 = vmatpush1.bf16.msra.mxu1 %v1631_v20  ;;  %v50_v16 = vld [vmem:[%s3555_s0 + $0xd8] sm:$0xff]  ;;  %v113_v17 = vld [vmem:[%s3555_s0 + $0x2d0] sm:$0xff]  ;;  %v116_v18 = vld [vmem:[%s3555_s0 + $0x2e8] sm:$0xff] }
  0x19   :  { %1633 = vmatprep.subr.bf16.mxu0 %v1671_v0  ;;  %1654 = vmatprep.subr.bf16.mxu1 %v1671_v0  ;;  %v49_v19 = vld [vmem:[%s3555_s0 + $0xd0] sm:$0xff]  ;;  %v52_v20 = vld [vmem:[%s3555_s0 + $0xe8] sm:$0xff]  ;;  %v115_v21 = vld [vmem:[%s3555_s0 + $0x2e0] sm:$0xff] }
  0x1a   :  { %v118_v22 = vld [vmem:[%s3555_s0 + $0x2f8] sm:$0xff]  ;;  %v117_v25 = vld [vmem:[%s3555_s0 + $0x2f0] sm:$0xff]  ;;  %v56_v28 = vld [vmem:[%s3555_s0 + $0x108] sm:$0xff] }
  0x1b   :  { %v54_v24 = vld [vmem:[%s3555_s0 + $0xf8] sm:$0xff]  ;;  %v53_v27 = vld [vmem:[%s3555_s0 + $0xf0] sm:$0xff] }
  0x1c   :  { %1635 = vmatpush1.bf16.msra.mxu0 %v1634_v23  ;;  %1663 = vmatpush1.bf16.msra.mxu1 %v1634_v23  ;;  %v51_v23 = vld [vmem:[%s3555_s0 + $0xe0] sm:$0xff] }
  0x1d   :  { %1636 = vmatprep.subr.bf16.mxu0 %v1671_v0  ;;  %1655 = vmatprep.subr.bf16.mxu1 %v1671_v0 }
  0x20   :  { %1638 = vmatpush1.bf16.msra.mxu0 %v1637_v26  ;;  %1664 = vmatpush1.bf16.msra.mxu1 %v1637_v26  ;;  %v120_v26 = vld [vmem:[%s3555_s0 + $0x308] sm:$0xff] }
  0x21   :  { %1639 = vmatprep.subr.bf16.mxu0 %v1671_v0  ;;  %1656 = vmatprep.subr.bf16.mxu1 %v1671_v0 }
  0x24   :  { %1641 = vmatpush1.bf16.msra.mxu0 %v1640_v29  ;;  %1665 = vmatpush1.bf16.msra.mxu1 %v1640_v29  ;;  %v119_v29 = vld [vmem:[%s3555_s0 + $0x300] sm:$0xff] }
  0x25   :  { %1642 = vmatprep.subr.bf16.mxu1 %v1671_v0 }
  0x27   :  { %427 = vmatmul.mubr.f32.vlgmr.msra.gmra.mrb[0].mxu0 %v23_v30  ;;  %592 = vmatmul.mubr.f32.vlgmr.msra.gmra.mrb[0].mxu1 %v89_v32  ;;  %v122_v30 = vld [vmem:[%s3555_s0 + $0x318] sm:$0xff] }
  0x28   :  { %1526 = vmatprep.mubr.msk.f32.mxu0 %vm169_vm0, %v26_v31  ;;  %1559 = vmatprep.mubr.msk.f32.mxu1 %vm169_vm0, %v92_v33  ;;  %v55_v31 = vld [vmem:[%s3555_s0 + $0x100] sm:$0xff]  ;;  %v58_v32 = vld [vmem:[%s3555_s0 + $0x118] sm:$0xff]  ;;  %v121_v33 = vld [vmem:[%s3555_s0 + $0x310] sm:$0xff] }
  0x2b   :  { %432 = vmatmul.mubr.f32.gmra.mrb[2].mxu0 %v25_v34  ;;  %597 = vmatmul.mubr.f32.gmra.mrb[2].mxu1 %v91_v36  ;;  %v124_v34 = vld [vmem:[%s3555_s0 + $0x328] sm:$0xff] }
  0x2c   :  { %1527 = vmatprep.mubr.msk.f32.mxu0 %vm169_vm0, %v28_v35  ;;  %1560 = vmatprep.mubr.msk.f32.mxu1 %vm169_vm0, %v94_v37  ;;  %v57_v35 = vld [vmem:[%s3555_s0 + $0x110] sm:$0xff]  ;;  %v60_v36 = vld [vmem:[%s3555_s0 + $0x128] sm:$0xff]  ;;  %v123_v37 = vld [vmem:[%s3555_s0 + $0x320] sm:$0xff] }
  0x2f   :  { %437 = vmatmul.mubr.f32.gmra.mrb[4].mxu0 %v27_v38  ;;  %602 = vmatmul.mubr.f32.gmra.mrb[4].mxu1 %v93_v40  ;;  %v126_v38 = vld [vmem:[%s3555_s0 + $0x338] sm:$0xff] }
  0x30   :  { %1528 = vmatprep.mubr.msk.f32.mxu0 %vm169_vm0, %v30_v39  ;;  %1561 = vmatprep.mubr.msk.f32.mxu1 %vm169_vm0, %v96_v41  ;;  %v59_v39 = vld [vmem:[%s3555_s0 + $0x120] sm:$0xff]  ;;  %v62_v40 = vld [vmem:[%s3555_s0 + $0x138] sm:$0xff]  ;;  %v125_v41 = vld [vmem:[%s3555_s0 + $0x330] sm:$0xff] }
  0x33   :  { %442 = vmatmul.mubr.f32.gmra.mrb[6].mxu0 %v29_v42  ;;  %607 = vmatmul.mubr.f32.gmra.mrb[6].mxu1 %v95_v44  ;;  %v128_v42 = vld [vmem:[%s3555_s0 + $0x348] sm:$0xff] }
  0x34   :  { %1529 = vmatprep.mubr.msk.f32.mxu0 %vm169_vm0, %v32_v43  ;;  %1562 = vmatprep.mubr.msk.f32.mxu1 %vm169_vm0, %v98_v45  ;;  %v61_v43 = vld [vmem:[%s3555_s0 + $0x130] sm:$0xff]  ;;  %v64_v44 = vld [vmem:[%s3555_s0 + $0x148] sm:$0xff]  ;;  %v127_v45 = vld [vmem:[%s3555_s0 + $0x340] sm:$0xff] }
  0x37   :  { %447 = vmatmul.mubr.f32.gmra.mrb[8].mxu0 %v31_v46  ;;  %612 = vmatmul.mubr.f32.gmra.mrb[8].mxu1 %v97_v48  ;;  %v130_v46 = vld [vmem:[%s3555_s0 + $0x358] sm:$0xff] }
  0x38   :  { %1530 = vmatprep.mubr.msk.f32.mxu0 %vm169_vm0, %v34_v47  ;;  %1563 = vmatprep.mubr.msk.f32.mxu1 %vm169_vm0, %v100_v49  ;;  %v63_v47 = vld [vmem:[%s3555_s0 + $0x140] sm:$0xff]  ;;  %v66_v48 = vld [vmem:[%s3555_s0 + $0x158] sm:$0xff]  ;;  %v129_v49 = vld [vmem:[%s3555_s0 + $0x350] sm:$0xff] }
  0x3b   :  { %452 = vmatmul.mubr.f32.gmra.mrb[10].mxu0 %v33_v50  ;;  %617 = vmatmul.mubr.f32.gmra.mrb[10].mxu1 %v99_v52  ;;  %v132_v50 = vld [vmem:[%s3555_s0 + $0x368] sm:$0xff] }
  0x3c   :  { %1531 = vmatprep.mubr.msk.f32.mxu0 %vm169_vm0, %v36_v51  ;;  %1564 = vmatprep.mubr.msk.f32.mxu1 %vm169_vm0, %v102_v53  ;;  %v65_v51 = vld [vmem:[%s3555_s0 + $0x150] sm:$0xff]  ;;  %v68_v52 = vld [vmem:[%s3555_s0 + $0x168] sm:$0xff]  ;;  %v131_v53 = vld [vmem:[%s3555_s0 + $0x360] sm:$0xff] }
  0x3f   :  { %457 = vmatmul.mubr.f32.gmra.mrb[12].mxu0 %v35_v54  ;;  %622 = vmatmul.mubr.f32.gmra.mrb[12].mxu1 %v101_v56  ;;  %v134_v54 = vld [vmem:[%s3555_s0 + $0x378] sm:$0xff] }
  0x40   :  { %1532 = vmatprep.mubr.msk.f32.mxu0 %vm169_vm0, %v38_v55  ;;  %1565 = vmatprep.mubr.msk.f32.mxu1 %vm169_vm0, %v104_v57  ;;  %v67_v55 = vld [vmem:[%s3555_s0 + $0x160] sm:$0xff]  ;;  %v70_v56 = vld [vmem:[%s3555_s0 + $0x178] sm:$0xff]  ;;  %v133_v57 = vld [vmem:[%s3555_s0 + $0x370] sm:$0xff] }
  0x43   :  { %462 = vmatmul.mubr.f32.gmra.mrb[14].mxu0 %v37_v58  ;;  %627 = vmatmul.mubr.f32.gmra.mrb[14].mxu1 %v103_v60  ;;  %v136_v58 = vld [vmem:[%s3555_s0 + $0x388] sm:$0xff] }
  0x44   :  { %1533 = vmatprep.mubr.msk.f32.mxu0 %vm169_vm0, %v40_v59  ;;  %1566 = vmatprep.mubr.msk.f32.mxu1 %vm169_vm0, %v106_v61  ;;  %v69_v59 = vld [vmem:[%s3555_s0 + $0x170] sm:$0xff]  ;;  %v72_v60 = vld [vmem:[%s3555_s0 + $0x188] sm:$0xff]  ;;  %v135_v61 = vld [vmem:[%s3555_s0 + $0x380] sm:$0xff] }
  0x47   :  { %467 = vmatmul.mubr.f32.gmra.mrb[16].mxu0 %v39_v62  ;;  %632 = vmatmul.mubr.f32.gmra.mrb[16].mxu1 %v105_v1  ;;  %v138_v62 = vld [vmem:[%s3555_s0 + $0x398] sm:$0xff] }
  0x48   :  { %1534 = vmatprep.mubr.msk.f32.mxu0 %vm169_vm0, %v42_v63  ;;  %1567 = vmatprep.mubr.msk.f32.mxu1 %vm169_vm0, %v108_v2  ;;  %v71_v63 = vld [vmem:[%s3555_s0 + $0x180] sm:$0xff]  ;;  %v74_v1 = vld [vmem:[%s3555_s0 + $0x198] sm:$0xff]  ;;  %v137_v2 = vld [vmem:[%s3555_s0 + $0x390] sm:$0xff] }
  0x4b   :  { %472 = vmatmul.mubr.f32.gmra.mrb[18].mxu0 %v41_v3  ;;  %637 = vmatmul.mubr.f32.gmra.mrb[18].mxu1 %v107_v5  ;;  %v140_v3 = vld [vmem:[%s3555_s0 + $0x3a8] sm:$0xff] }
  0x4c   :  { %1535 = vmatprep.mubr.msk.f32.mxu0 %vm169_vm0, %v44_v4  ;;  %1568 = vmatprep.mubr.msk.f32.mxu1 %vm169_vm0, %v110_v6  ;;  %v73_v4 = vld [vmem:[%s3555_s0 + $0x190] sm:$0xff]  ;;  %v76_v5 = vld [vmem:[%s3555_s0 + $0x1a8] sm:$0xff]  ;;  %v139_v6 = vld [vmem:[%s3555_s0 + $0x3a0] sm:$0xff] }
  0x4f   :  { %477 = vmatmul.mubr.f32.gmra.mrb[20].mxu0 %v43_v7  ;;  %642 = vmatmul.mubr.f32.gmra.mrb[20].mxu1 %v109_v9  ;;  %v142_v7 = vld [vmem:[%s3555_s0 + $0x3b8] sm:$0xff] }
  0x50   :  { %1536 = vmatprep.mubr.msk.f32.mxu0 %vm169_vm0, %v46_v8  ;;  %1569 = vmatprep.mubr.msk.f32.mxu1 %vm169_vm0, %v112_v10  ;;  %v75_v8 = vld [vmem:[%s3555_s0 + $0x1a0] sm:$0xff]  ;;  %v78_v9 = vld [vmem:[%s3555_s0 + $0x1b8] sm:$0xff]  ;;  %v141_v10 = vld [vmem:[%s3555_s0 + $0x3b0] sm:$0xff] }
  0x53   :  { %482 = vmatmul.mubr.f32.gmra.mrb[22].mxu0 %v45_v11  ;;  %647 = vmatmul.mubr.f32.gmra.mrb[22].mxu1 %v111_v13  ;;  %v144_v11 = vld [vmem:[%s3555_s0 + $0x3c8] sm:$0xff] }
  0x54   :  { %1537 = vmatprep.mubr.msk.f32.mxu0 %vm169_vm0, %v48_v12  ;;  %1570 = vmatprep.mubr.msk.f32.mxu1 %vm169_vm0, %v114_v14  ;;  %v77_v12 = vld [vmem:[%s3555_s0 + $0x1b0] sm:$0xff]  ;;  %v80_v13 = vld [vmem:[%s3555_s0 + $0x1c8] sm:$0xff]  ;;  %v143_v14 = vld [vmem:[%s3555_s0 + $0x3c0] sm:$0xff] }
  0x57   :  { %487 = vmatmul.mubr.f32.gmra.mrb[24].mxu0 %v47_v15  ;;  %652 = vmatmul.mubr.f32.gmra.mrb[24].mxu1 %v113_v17  ;;  %v146_v15 = vld [vmem:[%s3555_s0 + $0x3d8] sm:$0xff] }
  0x58   :  { %1538 = vmatprep.mubr.msk.f32.mxu0 %vm169_vm0, %v50_v16  ;;  %1571 = vmatprep.mubr.msk.f32.mxu1 %vm169_vm0, %v116_v18  ;;  %v79_v16 = vld [vmem:[%s3555_s0 + $0x1c0] sm:$0xff]  ;;  %v82_v17 = vld [vmem:[%s3555_s0 + $0x1d8] sm:$0xff]  ;;  %v145_v18 = vld [vmem:[%s3555_s0 + $0x3d0] sm:$0xff] }
  0x5b   :  { %492 = vmatmul.mubr.f32.gmra.mrb[26].mxu0 %v49_v19  ;;  %657 = vmatmul.mubr.f32.gmra.mrb[26].mxu1 %v115_v21  ;;  %v148_v19 = vld [vmem:[%s3555_s0 + $0x3e8] sm:$0xff] }
  0x5c   :  { %1539 = vmatprep.mubr.msk.f32.mxu0 %vm169_vm0, %v52_v20  ;;  %1572 = vmatprep.mubr.msk.f32.mxu1 %vm169_vm0, %v118_v22  ;;  %v81_v20 = vld [vmem:[%s3555_s0 + $0x1d0] sm:$0xff]  ;;  %v84_v21 = vld [vmem:[%s3555_s0 + $0x1e8] sm:$0xff]  ;;  %v147_v22 = vld [vmem:[%s3555_s0 + $0x3e0] sm:$0xff] }
  0x5f   :  { %497 = vmatmul.mubr.f32.gmra.mrb[28].mxu0 %v51_v23  ;;  %662 = vmatmul.mubr.f32.gmra.mrb[28].mxu1 %v117_v25  ;;  %v150_v23 = vld [vmem:[%s3555_s0 + $0x3f8] sm:$0xff] }
  0x60   :  { %1540 = vmatprep.mubr.msk.f32.mxu0 %vm169_vm0, %v54_v24  ;;  %1573 = vmatprep.mubr.msk.f32.mxu1 %vm169_vm0, %v120_v26  ;;  %v83_v24 = vld [vmem:[%s3555_s0 + $0x1e0] sm:$0xff]  ;;  %v86_v25 = vld [vmem:[%s3555_s0 + $0x1f8] sm:$0xff]  ;;  %v149_v26 = vld [vmem:[%s3555_s0 + $0x3f0] sm:$0xff] }
  0x63   :  { %502 = vmatmul.mubr.f32.gmra.mrb[30].mxu0 %v53_v27  ;;  %667 = vmatmul.mubr.f32.gmra.mrb[30].mxu1 %v119_v29  ;;  %v85_v27 = vld [vmem:[%s3555_s0 + $0x1f0] sm:$0xff]  ;;  %v87_v29 = vld [vmem:[%s3555_s0 + $0x200] sm:$0xff] }
  0x64   :  { %1541 = vmatprep.mubr.msk.f32.mxu0 %vm169_vm0, %v56_v28  ;;  %1574 = vmatprep.mubr.msk.f32.mxu1 %vm169_vm0, %v122_v30  ;;  %v88_v28 = vld [vmem:[%s3555_s0 + $0x208] sm:$0xff]  ;;  %v1080_v30 = vld [vmem:[%s3556_s2] sm:$0xff] }
  0x67   :  { %507 = vmatmul.mubr.f32.gmra.mrb[32].mxu0 %v55_v31  ;;  %672 = vmatmul.mubr.f32.gmra.mrb[32].mxu1 %v121_v33  ;;  %v1081_v31 = vld [vmem:[%s3556_s2 + $0x8] sm:$0xff] }
  0x68   :  { %1542 = vmatprep.mubr.msk.f32.mxu0 %vm169_vm0, %v58_v32  ;;  %1575 = vmatprep.mubr.msk.f32.mxu1 %vm169_vm0, %v124_v34  ;;  %v1643_v32 = vpack.c.bf16 %v1081_v31, %v1080_v30 }
  0x6a   :  { %1644 = vmatpush3.bf16.msra.mxu1 %v1643_v32 }
  0x6b   :  { %512 = vmatmul.mubr.f32.gmra.mrb[34].mxu0 %v57_v35  ;;  %677 = vmatmul.mubr.f32.gmra.mrb[34].mxu1 %v123_v37 }
  0x6c   :  { %1543 = vmatprep.mubr.msk.f32.mxu0 %vm169_vm0, %v60_v36  ;;  %1576 = vmatprep.mubr.msk.f32.mxu1 %vm169_vm0, %v126_v38 }
  0x6d   :  { %1645 = vmatprep.subr.bf16.mxu1 %v1671_v0 }
  0x6f   :  { %517 = vmatmul.mubr.f32.gmra.mrb[36].mxu0 %v59_v39  ;;  %682 = vmatmul.mubr.f32.gmra.mrb[36].mxu1 %v125_v41 }
  0x70   :  { %1544 = vmatprep.mubr.msk.f32.mxu0 %vm169_vm0, %v62_v40  ;;  %1577 = vmatprep.mubr.msk.f32.mxu1 %vm169_vm0, %v128_v42 }
  0x73   :  { %522 = vmatmul.mubr.f32.gmra.mrb[38].mxu0 %v61_v43  ;;  %687 = vmatmul.mubr.f32.gmra.mrb[38].mxu1 %v127_v45 }
  0x74   :  { %1545 = vmatprep.mubr.msk.f32.mxu0 %vm169_vm0, %v64_v44  ;;  %1578 = vmatprep.mubr.msk.f32.mxu1 %vm169_vm0, %v130_v46 }
  0x77   :  { %527 = vmatmul.mubr.f32.gmra.mrb[40].mxu0 %v63_v47  ;;  %692 = vmatmul.mubr.f32.gmra.mrb[40].mxu1 %v129_v49 }
  0x78   :  { %1546 = vmatprep.mubr.msk.f32.mxu0 %vm169_vm0, %v66_v48  ;;  %1579 = vmatprep.mubr.msk.f32.mxu1 %vm169_vm0, %v132_v50 }
  0x7b   :  { %532 = vmatmul.mubr.f32.gmra.mrb[42].mxu0 %v65_v51  ;;  %697 = vmatmul.mubr.f32.gmra.mrb[42].mxu1 %v131_v53 }
  0x7c   :  { %1547 = vmatprep.mubr.msk.f32.mxu0 %vm169_vm0, %v68_v52  ;;  %1580 = vmatprep.mubr.msk.f32.mxu1 %vm169_vm0, %v134_v54 }
  0x7f   :  { %537 = vmatmul.mubr.f32.gmra.mrb[44].mxu0 %v67_v55  ;;  %702 = vmatmul.mubr.f32.gmra.mrb[44].mxu1 %v133_v57 }
  0x80   :  { %1548 = vmatprep.mubr.msk.f32.mxu0 %vm169_vm0, %v70_v56  ;;  %1581 = vmatprep.mubr.msk.f32.mxu1 %vm169_vm0, %v136_v58 }
  0x83   :  { %542 = vmatmul.mubr.f32.gmra.mrb[46].mxu0 %v69_v59  ;;  %707 = vmatmul.mubr.f32.gmra.mrb[46].mxu1 %v135_v61 }
  0x84   :  { %1549 = vmatprep.mubr.msk.f32.mxu0 %vm169_vm0, %v72_v60  ;;  %1582 = vmatprep.mubr.msk.f32.mxu1 %vm169_vm0, %v138_v62 }
  0x87   :  { %547 = vmatmul.mubr.f32.gmra.mrb[48].mxu0 %v71_v63  ;;  %712 = vmatmul.mubr.f32.gmra.mrb[48].mxu1 %v137_v2 }
  0x88   :  { %1550 = vmatprep.mubr.msk.f32.mxu0 %vm169_vm0, %v74_v1  ;;  %1583 = vmatprep.mubr.msk.f32.mxu1 %vm169_vm0, %v140_v3 }
  0x8b   :  { %552 = vmatmul.mubr.f32.gmra.mrb[50].mxu0 %v73_v4  ;;  %717 = vmatmul.mubr.f32.gmra.mrb[50].mxu1 %v139_v6 }
  0x8c   :  { %1551 = vmatprep.mubr.msk.f32.mxu0 %vm169_vm0, %v76_v5  ;;  %1584 = vmatprep.mubr.msk.f32.mxu1 %vm169_vm0, %v142_v7 }
  0x8f   :  { %557 = vmatmul.mubr.f32.gmra.mrb[52].mxu0 %v75_v8  ;;  %722 = vmatmul.mubr.f32.gmra.mrb[52].mxu1 %v141_v10 }
  0x90   :  { %1552 = vmatprep.mubr.msk.f32.mxu0 %vm169_vm0, %v78_v9  ;;  %1585 = vmatprep.mubr.msk.f32.mxu1 %vm169_vm0, %v144_v11 }
  0x93   :  { %562 = vmatmul.mubr.f32.gmra.mrb[54].mxu0 %v77_v12  ;;  %727 = vmatmul.mubr.f32.gmra.mrb[54].mxu1 %v143_v14 }
  0x94   :  { %1553 = vmatprep.mubr.msk.f32.mxu0 %vm169_vm0, %v80_v13  ;;  %1586 = vmatprep.mubr.msk.f32.mxu1 %vm169_vm0, %v146_v15 }
  0x97   :  { %567 = vmatmul.mubr.f32.gmra.mrb[56].mxu0 %v79_v16  ;;  %732 = vmatmul.mubr.f32.gmra.mrb[56].mxu1 %v145_v18 }
  0x98   :  { %1554 = vmatprep.mubr.msk.f32.mxu0 %vm169_vm0, %v82_v17  ;;  %1587 = vmatprep.mubr.msk.f32.mxu1 %vm169_vm0, %v148_v19 }
  0x9b   :  { %572 = vmatmul.mubr.f32.gmra.mrb[58].mxu0 %v81_v20  ;;  %737 = vmatmul.mubr.f32.gmra.mrb[58].mxu1 %v147_v22 }
  0x9c   :  { %1555 = vmatprep.mubr.msk.f32.mxu0 %vm169_vm0, %v84_v21  ;;  %1588 = vmatprep.mubr.msk.f32.mxu1 %vm169_vm0, %v150_v23 }
  0x9f   :  { %577 = vmatmul.mubr.f32.gmra.mrb[60].mxu0 %v83_v24  ;;  %742 = vmatmul.mubr.f32.gmra.mrb[60].mxu1 %v149_v26 }
  0xa0   :  { %1556 = vmatprep.mubr.msk.f32.mxu0 %vm169_vm0, %v86_v25 }
  0xa3   :  { %582 = vmatmul.mubr.f32.gmra.mrb[62].mxu0 %v85_v27 }
  0xa4   :  { %1557 = vmatprep.mubr.msk.f32.mxu0 %vm169_vm0, %v88_v28 }
  0xa7   :  { %587 = vmatmul.mubr.f32.gmra.mrb[64].mxu0 %v87_v29 }
  0xfa   :  { %v2237_v33 = vpop.f32.mrb[0].mxu0  ;;  %v2239_v35 = vpop.f32.mrb[0].mxu1 }
  0xfb   :  { %v430_v34 = vpop.f32.mrb[1].mxu0  ;;  %3586 = vst [vmem:[#allocation2_spill] sm:$0xff] %v2239_v35  ;;  %v595_v36 = vpop.f32.mrb[1].mxu1  ;;  %v881_v37 = vmul.f32 %v2237_v33, %v2237_v33  ;;  %v748_v39 = vsel %vm747_vm1, %v2237_v33, 0.0 }
  0xfd   :  { %v945_v45 = vsel %vm747_vm1, %v881_v37, 0.0 }
  0xfe   :  { %v2243_v38 = vpop.f32.mrb[2].mxu0  ;;  %v2251_v42 = vpop.f32.mrb[2].mxu1 }
  0xff   :  { %v749_v40 = vsel %vm747_vm1, %v2243_v38, 0.0  ;;  %v882_v0 = vmul.f32 %v2243_v38, %v2243_v38  ;;  %v435_v41 = vpop.f32.mrb[3].mxu0  ;;  %v600_v44 = vpop.f32.mrb[3].mxu1 }
 0x100   :  { %v750_v43 = vadd.f32 %v749_v40, %v748_v39 }
 0x101   :  { %v946_v46 = vsel %vm747_vm1, %v882_v0, 0.0 }
 0x102   :  { %v947_v47 = vadd.f32 %v946_v46, %v945_v45  ;;  %v2255_v48 = vpop.f32.mrb[4].mxu0  ;;  %v2261_v52 = vpop.f32.mrb[4].mxu1 }
 0x103   :  { %v751_v49 = vsel %vm747_vm1, %v2255_v48, 0.0  ;;  %v883_v50 = vmul.f32 %v2255_v48, %v2255_v48  ;;  %v440_v51 = vpop.f32.mrb[5].mxu0  ;;  %v605_v54 = vpop.f32.mrb[5].mxu1 }
 0x104   :  { %v752_v53 = vadd.f32 %v751_v49, %v750_v43 }
 0x105   :  { %v948_v55 = vsel %vm747_vm1, %v883_v50, 0.0 }
 0x106   :  { %v949_v56 = vadd.f32 %v948_v55, %v947_v47  ;;  %v2264_v57 = vpop.f32.mrb[6].mxu0  ;;  %v2270_v61 = vpop.f32.mrb[6].mxu1 }
 0x107   :  { %v753_v58 = vsel %vm747_vm1, %v2264_v57, 0.0  ;;  %v884_v59 = vmul.f32 %v2264_v57, %v2264_v57  ;;  %v445_v60 = vpop.f32.mrb[7].mxu0  ;;  %v610_v63 = vpop.f32.mrb[7].mxu1 }
 0x108   :  { %v754_v62 = vadd.f32 %v753_v58, %v752_v53 }
 0x109   :  { %v950_v1 = vsel %vm747_vm1, %v884_v59, 0.0 }
 0x10a   :  { %v951_v2 = vadd.f32 %v950_v1, %v949_v56  ;;  %v2273_v3 = vpop.f32.mrb[8].mxu0  ;;  %v2279_v7 = vpop.f32.mrb[8].mxu1 }
 0x10b   :  { %v755_v4 = vsel %vm747_vm1, %v2273_v3, 0.0  ;;  %v885_v5 = vmul.f32 %v2273_v3, %v2273_v3  ;;  %v450_v6 = vpop.f32.mrb[9].mxu0  ;;  %v615_v9 = vpop.f32.mrb[9].mxu1 }
 0x10c   :  { %v756_v8 = vadd.f32 %v755_v4, %v754_v62 }
 0x10d   :  { %v952_v10 = vsel %vm747_vm1, %v885_v5, 0.0 }
 0x10e   :  { %v953_v11 = vadd.f32 %v952_v10, %v951_v2  ;;  %v2282_v12 = vpop.f32.mrb[10].mxu0  ;;  %v2288_v16 = vpop.f32.mrb[10].mxu1 }
 0x10f   :  { %v757_v13 = vsel %vm747_vm1, %v2282_v12, 0.0  ;;  %v886_v14 = vmul.f32 %v2282_v12, %v2282_v12  ;;  %v455_v15 = vpop.f32.mrb[11].mxu0  ;;  %v620_v18 = vpop.f32.mrb[11].mxu1 }
 0x110   :  { %v758_v17 = vadd.f32 %v757_v13, %v756_v8  ;;  %v1083_v15 = vld [vmem:[%s3556_s2 + $0x18] sm:$0xff] }
 0x111   :  { %v954_v19 = vsel %vm747_vm1, %v886_v14, 0.0  ;;  %v1082_v14 = vld [vmem:[%s3556_s2 + $0x10] sm:$0xff] }
 0x112   :  { %v955_v20 = vadd.f32 %v954_v19, %v953_v11  ;;  %v2291_v21 = vpop.f32.mrb[12].mxu0  ;;  %v2297_v25 = vpop.f32.mrb[12].mxu1 }
 0x113   :  { %v759_v22 = vsel %vm747_vm1, %v2291_v21, 0.0  ;;  %v887_v23 = vmul.f32 %v2291_v21, %v2291_v21  ;;  %v460_v24 = vpop.f32.mrb[13].mxu0  ;;  %v625_v27 = vpop.f32.mrb[13].mxu1 }
 0x114   :  { %v760_v26 = vadd.f32 %v759_v22, %v758_v17  ;;  %v1646_v22 = vpack.c.bf16 %v1083_v15, %v1082_v14 }
 0x115   :  { %v956_v28 = vsel %vm747_vm1, %v887_v23, 0.0 }
 0x116   :  { %v957_v29 = vadd.f32 %v956_v28, %v955_v20  ;;  %v2300_v30 = vpop.f32.mrb[14].mxu0  ;;  %v2306_v36 = vpop.f32.mrb[14].mxu1  ;;  %1647 = vmatpush3.bf16.msra.mxu1 %v1646_v22 }
 0x117   :  { %v761_v31 = vsel %vm747_vm1, %v2300_v30, 0.0  ;;  %v888_v32 = vmul.f32 %v2300_v30, %v2300_v30  ;;  %v465_v34 = vpop.f32.mrb[15].mxu0  ;;  %v630_v39 = vpop.f32.mrb[15].mxu1 }
 0x118   :  { %v762_v37 = vadd.f32 %v761_v31, %v760_v26 }
 0x119   :  { %v958_v40 = vsel %vm747_vm1, %v888_v32, 0.0 }
 0x11a   :  { %v959_v0 = vadd.f32 %v958_v40, %v957_v29  ;;  %v2309_v41 = vpop.f32.mrb[16].mxu0  ;;  %v2315_v46 = vpop.f32.mrb[16].mxu1 }
 0x11b   :  { %v763_v43 = vsel %vm747_vm1, %v2309_v41, 0.0  ;;  %v889_v44 = vmul.f32 %v2309_v41, %v2309_v41  ;;  %v470_v45 = vpop.f32.mrb[17].mxu0  ;;  %v635_v49 = vpop.f32.mrb[17].mxu1 }
 0x11c   :  { %v764_v47 = vadd.f32 %v763_v43, %v762_v37 }
 0x11d   :  { %v960_v50 = vsel %vm747_vm1, %v889_v44, 0.0 }
 0x11e   :  { %v961_v51 = vadd.f32 %v960_v50, %v959_v0  ;;  %v2318_v53 = vpop.f32.mrb[18].mxu0  ;;  %v2324_v58 = vpop.f32.mrb[18].mxu1 }
 0x11f   :  { %v765_v54 = vsel %vm747_vm1, %v2318_v53, 0.0  ;;  %v890_v55 = vmul.f32 %v2318_v53, %v2318_v53  ;;  %v475_v56 = vpop.f32.mrb[19].mxu0  ;;  %v640_v60 = vpop.f32.mrb[19].mxu1 }
 0x120   :  { %v766_v59 = vadd.f32 %v765_v54, %v764_v47 }
 0x121   :  { %v962_v62 = vsel %vm747_vm1, %v890_v55, 0.0 }
 0x122   :  { %v963_v63 = vadd.f32 %v962_v62, %v961_v51  ;;  %v2327_v1 = vpop.f32.mrb[20].mxu0  ;;  %v2333_v6 = vpop.f32.mrb[20].mxu1 }
 0x123   :  { %v767_v2 = vsel %vm747_vm1, %v2327_v1, 0.0  ;;  %v891_v4 = vmul.f32 %v2327_v1, %v2327_v1  ;;  %v480_v5 = vpop.f32.mrb[21].mxu0  ;;  %v645_v9 = vpop.f32.mrb[21].mxu1 }
 0x124   :  { %v768_v8 = vadd.f32 %v767_v2, %v766_v59 }
 0x125   :  { %v964_v10 = vsel %vm747_vm1, %v891_v4, 0.0 }
 0x126   :  { %v965_v11 = vadd.f32 %v964_v10, %v963_v63  ;;  %v2336_v13 = vpop.f32.mrb[22].mxu0  ;;  %v2348_v20 = vpop.f32.mrb[22].mxu1 }
 0x127   :  { %v769_v17 = vsel %vm747_vm1, %v2336_v13, 0.0  ;;  %v892_v18 = vmul.f32 %v2336_v13, %v2336_v13  ;;  %v485_v19 = vpop.f32.mrb[23].mxu0  ;;  %v650_v24 = vpop.f32.mrb[23].mxu1 }
 0x128   :  { %v770_v23 = vadd.f32 %v769_v17, %v768_v8 }
 0x129   :  { %v966_v26 = vsel %vm747_vm1, %v892_v18, 0.0 }
 0x12a   :  { %v967_v27 = vadd.f32 %v966_v26, %v965_v11  ;;  %v2351_v28 = vpop.f32.mrb[24].mxu0  ;;  %v2357_v34 = vpop.f32.mrb[24].mxu1 }
 0x12b   :  { %v771_v29 = vsel %vm747_vm1, %v2351_v28, 0.0  ;;  %v893_v31 = vmul.f32 %v2351_v28, %v2351_v28  ;;  %v490_v32 = vpop.f32.mrb[25].mxu0  ;;  %v655_v39 = vpop.f32.mrb[25].mxu1 }
 0x12c   :  { %v772_v37 = vadd.f32 %v771_v29, %v770_v23 }
 0x12d   :  { %v968_v40 = vsel %vm747_vm1, %v893_v31, 0.0 }
 0x12e   :  { %v969_v0 = vadd.f32 %v968_v40, %v967_v27  ;;  %v2360_v43 = vpop.f32.mrb[26].mxu0  ;;  %v2366_v49 = vpop.f32.mrb[26].mxu1 }
 0x12f   :  { %v773_v44 = vsel %vm747_vm1, %v2360_v43, 0.0  ;;  %v894_v45 = vmul.f32 %v2360_v43, %v2360_v43  ;;  %v495_v47 = vpop.f32.mrb[27].mxu0  ;;  %v660_v51 = vpop.f32.mrb[27].mxu1 }
 0x130   :  { %v774_v50 = vadd.f32 %v773_v44, %v772_v37 }
 0x131   :  { %v970_v54 = vsel %vm747_vm1, %v894_v45, 0.0 }
 0x132   :  { %v971_v55 = vadd.f32 %v970_v54, %v969_v0  ;;  %v2369_v56 = vpop.f32.mrb[28].mxu0  ;;  %v2375_v63 = vpop.f32.mrb[28].mxu1 }
 0x133   :  { %v775_v59 = vsel %vm747_vm1, %v2369_v56, 0.0  ;;  %v895_v60 = vmul.f32 %v2369_v56, %v2369_v56  ;;  %v500_v62 = vpop.f32.mrb[29].mxu0  ;;  %v665_v4 = vpop.f32.mrb[29].mxu1 }
 0x134   :  { %v776_v2 = vadd.f32 %v775_v59, %v774_v50 }
 0x135   :  { %v972_v5 = vsel %vm747_vm1, %v895_v60, 0.0 }
 0x136   :  { %v973_v8 = vadd.f32 %v972_v5, %v971_v55  ;;  %v2378_v9 = vpop.f32.mrb[30].mxu0  ;;  %v2384_v15 = vpop.f32.mrb[30].mxu1 }
 0x137   :  { %v777_v10 = vsel %vm747_vm1, %v2378_v9, 0.0  ;;  %v896_v11 = vmul.f32 %v2378_v9, %v2378_v9  ;;  %v505_v14 = vpop.f32.mrb[31].mxu0  ;;  %v670_v18 = vpop.f32.mrb[31].mxu1 }
 0x138   :  { %v778_v17 = vadd.f32 %v777_v10, %v776_v2 }
 0x139   :  { %v974_v19 = vsel %vm747_vm1, %v896_v11, 0.0 }
 0x13a   :  { %v975_v22 = vadd.f32 %v974_v19, %v973_v8  ;;  %v2387_v23 = vpop.f32.mrb[32].mxu0  ;;  %v2393_v29 = vpop.f32.mrb[32].mxu1 }
 0x13b   :  { %v779_v24 = vsel %vm747_vm1, %v2387_v23, 0.0  ;;  %v897_v26 = vmul.f32 %v2387_v23, %v2387_v23  ;;  %v510_v27 = vpop.f32.mrb[33].mxu0  ;;  %v675_v32 = vpop.f32.mrb[33].mxu1 }
 0x13c   :  { %v780_v31 = vadd.f32 %v779_v24, %v778_v17 }
 0x13d   :  { %v976_v37 = vsel %vm747_vm1, %v897_v26, 0.0 }
 0x13e   :  { %v977_v39 = vadd.f32 %v976_v37, %v975_v22  ;;  %v2396_v40 = vpop.f32.mrb[34].mxu0  ;;  %v2402_v47 = vpop.f32.mrb[34].mxu1  ;;  %v3561_v37 = vmov 0.0  }
 0x13f   :  { %3587 = vst [vmem:[#allocation3_spill] sm:$0xff] %v2396_v40  ;;  %v781_v0 = vsel %vm747_vm1, %v2396_v40, 0.0  ;;  %v898_v44 = vmul.f32 %v2396_v40, %v2396_v40  ;;  %v515_v45 = vpop.f32.mrb[35].mxu0  ;;  %v680_v51 = vpop.f32.mrb[35].mxu1  ;;  %1607 = vmatprep.mubr.msk.f32.mxu1 %vm1672_vm2, %v3561_v37  ;;  %1610 = vmatprep.subr.mxu1 %v3561_v37 }
 0x140   :  { %v782_v50 = vadd.f32 %v781_v0, %v780_v31 }
 0x141   :  { %v978_v54 = vsel %vm747_vm1, %v898_v44, 0.0 }
 0x142   :  { %v979_v55 = vadd.f32 %v978_v54, %v977_v39  ;;  %v2405_v59 = vpop.f32.mrb[36].mxu0  ;;  %v2411_v4 = vpop.f32.mrb[36].mxu1 }
 0x143   :  { %3588 = vst [vmem:[#allocation4_spill] sm:$0xff] %v2405_v59  ;;  %v783_v60 = vsel %vm747_vm1, %v2405_v59, 0.0  ;;  %v899_v62 = vmul.f32 %v2405_v59, %v2405_v59  ;;  %v520_v2 = vpop.f32.mrb[37].mxu0  ;;  %v685_v8 = vpop.f32.mrb[37].mxu1 }
 0x144   :  { %v784_v5 = vadd.f32 %v783_v60, %v782_v50 }
 0x145   :  { %v980_v10 = vsel %vm747_vm1, %v899_v62, 0.0 }
 0x146   :  { %v981_v11 = vadd.f32 %v980_v10, %v979_v55  ;;  %v2414_v14 = vpop.f32.mrb[38].mxu0  ;;  %v2420_v22 = vpop.f32.mrb[38].mxu1 }
 0x147   :  { %3589 = vst [vmem:[#allocation5_spill] sm:$0xff] %v2414_v14  ;;  %v785_v17 = vsel %vm747_vm1, %v2414_v14, 0.0  ;;  %v900_v18 = vmul.f32 %v2414_v14, %v2414_v14  ;;  %v525_v19 = vpop.f32.mrb[39].mxu0  ;;  %v690_v26 = vpop.f32.mrb[39].mxu1 }
 0x148   :  { %v786_v24 = vadd.f32 %v785_v17, %v784_v5 }
 0x149   :  { %v982_v27 = vsel %vm747_vm1, %v900_v18, 0.0 }
 0x14a   :  { %v983_v31 = vadd.f32 %v982_v27, %v981_v11  ;;  %v2423_v32 = vpop.f32.mrb[40].mxu0  ;;  %v2432_v45 = vpop.f32.mrb[40].mxu1 }
 0x14b   :  { %3590 = vst [vmem:[#allocation6_spill] sm:$0xff] %v2423_v32  ;;  %v787_v39 = vsel %vm747_vm1, %v2423_v32, 0.0  ;;  %v901_v0 = vmul.f32 %v2423_v32, %v2423_v32  ;;  %v530_v44 = vpop.f32.mrb[41].mxu0  ;;  %v695_v51 = vpop.f32.mrb[41].mxu1 }
 0x14c   :  { %v788_v50 = vadd.f32 %v787_v39, %v786_v24 }
 0x14d   :  { %v984_v54 = vsel %vm747_vm1, %v901_v0, 0.0 }
 0x14e   :  { %v985_v55 = vadd.f32 %v984_v54, %v983_v31  ;;  %v2435_v60 = vpop.f32.mrb[42].mxu0  ;;  %v2441_v8 = vpop.f32.mrb[42].mxu1 }
 0x14f   :  { %3591 = vst [vmem:[#allocation7_spill] sm:$0xff] %v2435_v60  ;;  %v789_v62 = vsel %vm747_vm1, %v2435_v60, 0.0  ;;  %v902_v2 = vmul.f32 %v2435_v60, %v2435_v60  ;;  %v535_v5 = vpop.f32.mrb[43].mxu0  ;;  %v700_v11 = vpop.f32.mrb[43].mxu1 }
 0x150   :  { %v790_v10 = vadd.f32 %v789_v62, %v788_v50 }
 0x151   :  { %v986_v17 = vsel %vm747_vm1, %v902_v2, 0.0 }
 0x152   :  { %v987_v18 = vadd.f32 %v986_v17, %v985_v55  ;;  %v2444_v19 = vpop.f32.mrb[44].mxu0  ;;  %v2450_v31 = vpop.f32.mrb[44].mxu1 }
 0x153   :  { %3592 = vst [vmem:[#allocation8_spill] sm:$0xff] %v2444_v19  ;;  %v791_v24 = vsel %vm747_vm1, %v2444_v19, 0.0  ;;  %v903_v26 = vmul.f32 %v2444_v19, %v2444_v19  ;;  %v540_v27 = vpop.f32.mrb[45].mxu0  ;;  %3593 = vst [vmem:[#allocation9_spill] sm:$0xff] %v2450_v31  ;;  %v705_v0 = vpop.f32.mrb[45].mxu1 }
 0x154   :  { %v792_v39 = vadd.f32 %v791_v24, %v790_v10 }
 0x155   :  { %v988_v44 = vsel %vm747_vm1, %v903_v26, 0.0 }
 0x156   :  { %v989_v50 = vadd.f32 %v988_v44, %v987_v18  ;;  %v2453_v51 = vpop.f32.mrb[46].mxu0  ;;  %v2459_v2 = vpop.f32.mrb[46].mxu1 }
 0x157   :  { %3594 = vst [vmem:[#allocation10_spill] sm:$0xff] %v2453_v51  ;;  %v793_v54 = vsel %vm747_vm1, %v2453_v51, 0.0  ;;  %v904_v55 = vmul.f32 %v2453_v51, %v2453_v51  ;;  %v545_v62 = vpop.f32.mrb[47].mxu0  ;;  %3595 = vst [vmem:[#allocation11_spill] sm:$0xff] %v2459_v2  ;;  %v710_v11 = vpop.f32.mrb[47].mxu1 }
 0x158   :  { %v794_v5 = vadd.f32 %v793_v54, %v792_v39 }
 0x159   :  { %v990_v17 = vsel %vm747_vm1, %v904_v55, 0.0 }
 0x15a   :  { %v991_v10 = vadd.f32 %v990_v17, %v989_v50  ;;  %v2462_v24 = vpop.f32.mrb[48].mxu0  ;;  %v2468_v0 = vpop.f32.mrb[48].mxu1 }
 0x15b   :  { %3596 = vst [vmem:[#allocation12_spill] sm:$0xff] %v2462_v24  ;;  %v795_v18 = vsel %vm747_vm1, %v2462_v24, 0.0  ;;  %v905_v26 = vmul.f32 %v2462_v24, %v2462_v24  ;;  %v550_v27 = vpop.f32.mrb[49].mxu0  ;;  %3597 = vst [vmem:[#allocation13_spill] sm:$0xff] %v2468_v0  ;;  %v715_v62 = vpop.f32.mrb[49].mxu1 }
 0x15c   :  { %v796_v44 = vadd.f32 %v795_v18, %v794_v5 }
 0x15d   :  { %v992_v37 = vsel %vm747_vm1, %v905_v26, 0.0 }
 0x15e   :  { %v993_v39 = vadd.f32 %v992_v37, %v991_v10  ;;  %v2471_v54 = vpop.f32.mrb[50].mxu0  ;;  %v2477_v17 = vpop.f32.mrb[50].mxu1 }
 0x15f   :  { %3598 = vst [vmem:[#allocation14_spill] sm:$0xff] %v2471_v54  ;;  %v797_v50 = vsel %vm747_vm1, %v2471_v54, 0.0  ;;  %v906_v55 = vmul.f32 %v2471_v54, %v2471_v54  ;;  %v555_v11 = vpop.f32.mrb[51].mxu0  ;;  %3599 = vst [vmem:[#allocation15_spill] sm:$0xff] %v2477_v17  ;;  %v720_v27 = vpop.f32.mrb[51].mxu1 }
 0x160   :  { %v798_v24 = vadd.f32 %v797_v50, %v796_v44 }
 0x161   :  { %v994_v51 = vsel %vm747_vm1, %v906_v55, 0.0 }
 0x162   :  { %v995_v5 = vadd.f32 %v994_v51, %v993_v39  ;;  %v2480_v18 = vpop.f32.mrb[52].mxu0  ;;  %v2486_v62 = vpop.f32.mrb[52].mxu1 }
 0x163   :  { %3600 = vst [vmem:[#allocation16_spill] sm:$0xff] %v2480_v18  ;;  %v799_v37 = vsel %vm747_vm1, %v2480_v18, 0.0  ;;  %v907_v10 = vmul.f32 %v2480_v18, %v2480_v18  ;;  %v560_v26 = vpop.f32.mrb[53].mxu0  ;;  %3601 = vst [vmem:[#allocation17_spill] sm:$0xff] %v2486_v62  ;;  %v725_v11 = vpop.f32.mrb[53].mxu1 }
 0x164   :  { %v800_v54 = vadd.f32 %v799_v37, %v798_v24 }
 0x165   :  { %v996_v19 = vsel %vm747_vm1, %v907_v10, 0.0 }
 0x166   :  { %v997_v44 = vadd.f32 %v996_v19, %v995_v5  ;;  %v2489_v50 = vpop.f32.mrb[54].mxu0  ;;  %v2495_v27 = vpop.f32.mrb[54].mxu1 }
 0x167   :  { %3602 = vst [vmem:[#allocation18_spill] sm:$0xff] %v2489_v50  ;;  %v801_v51 = vsel %vm747_vm1, %v2489_v50, 0.0  ;;  %v908_v39 = vmul.f32 %v2489_v50, %v2489_v50  ;;  %v565_v55 = vpop.f32.mrb[55].mxu0  ;;  %3603 = vst [vmem:[#allocation19_spill] sm:$0xff] %v2495_v27  ;;  %v730_v26 = vpop.f32.mrb[55].mxu1 }
 0x168   :  { %v802_v18 = vadd.f32 %v801_v51, %v800_v54 }
 0x169   :  { %v998_v60 = vsel %vm747_vm1, %v908_v39, 0.0 }
 0x16a   :  { %v999_v24 = vadd.f32 %v998_v60, %v997_v44  ;;  %v2498_v37 = vpop.f32.mrb[56].mxu0  ;;  %v2504_v11 = vpop.f32.mrb[56].mxu1 }
 0x16b   :  { %3604 = vst [vmem:[#allocation20_spill] sm:$0xff] %v2498_v37  ;;  %v803_v19 = vsel %vm747_vm1, %v2498_v37, 0.0  ;;  %v909_v5 = vmul.f32 %v2498_v37, %v2498_v37  ;;  %v570_v10 = vpop.f32.mrb[57].mxu0  ;;  %3605 = vst [vmem:[#allocation21_spill] sm:$0xff] %v2504_v11  ;;  %v735_v55 = vpop.f32.mrb[57].mxu1 }
 0x16c   :  { %v804_v50 = vadd.f32 %v803_v19, %v802_v18 }
 0x16d   :  { %v1000_v32 = vsel %vm747_vm1, %v909_v5, 0.0 }
 0x16e   :  { %v1001_v54 = vadd.f32 %v1000_v32, %v999_v24  ;;  %v2507_v51 = vpop.f32.mrb[58].mxu0  ;;  %v2513_v26 = vpop.f32.mrb[58].mxu1 }
 0x16f   :  { %3606 = vst [vmem:[#allocation22_spill] sm:$0xff] %v2507_v51  ;;  %v805_v60 = vsel %vm747_vm1, %v2507_v51, 0.0  ;;  %v910_v44 = vmul.f32 %v2507_v51, %v2507_v51  ;;  %v575_v39 = vpop.f32.mrb[59].mxu0  ;;  %3607 = vst [vmem:[#allocation23_spill] sm:$0xff] %v2513_v26  ;;  %v740_v10 = vpop.f32.mrb[59].mxu1 }
 0x170   :  { %v806_v37 = vadd.f32 %v805_v60, %v804_v50 }
 0x171   :  { %v1002_v14 = vsel %vm747_vm1, %v910_v44, 0.0 }
 0x172   :  { %v1003_v18 = vadd.f32 %v1002_v14, %v1001_v54  ;;  %v2516_v19 = vpop.f32.mrb[60].mxu0  ;;  %v2522_v55 = vpop.f32.mrb[60].mxu1 }
 0x173   :  { %3608 = vst [vmem:[#allocation24_spill] sm:$0xff] %v2516_v19  ;;  %v807_v32 = vsel %vm747_vm1, %v2516_v19, 0.0  ;;  %v911_v24 = vmul.f32 %v2516_v19, %v2516_v19  ;;  %v580_v5 = vpop.f32.mrb[61].mxu0  ;;  %v745_v39 = vpop.f32.mrb[61].mxu1 }
 0x174   :  { %v808_v51 = vadd.f32 %v807_v32, %v806_v37  ;;  %v914_v37 = vmul.f32 %v2239_v35, %v2239_v35  ;;  %v813_v39 = vsel %vm747_vm1, %v2239_v35, 0.0  ;;  %v817_v35 = vsel %vm747_vm1, %v2261_v52, 0.0 }
 0x175   :  { %v1004_v59 = vsel %vm747_vm1, %v911_v24, 0.0 }
 0x176   :  { %v1005_v50 = vadd.f32 %v1004_v59, %v1003_v18  ;;  %v2525_v60 = vpop.f32.mrb[62].mxu0 }
 0x177   :  { %v809_v14 = vsel %vm747_vm1, %v2525_v60, 0.0  ;;  %v912_v54 = vmul.f32 %v2525_v60, %v2525_v60  ;;  %v585_v44 = vpop.f32.mrb[63].mxu0 }
 0x178   :  { %v810_v10 = vadd.f32 %v809_v14, %v808_v51  ;;  %v915_v51 = vmul.f32 %v2251_v42, %v2251_v42  ;;  %v815_v44 = vsel %vm747_vm1, %v2251_v42, 0.0 }
 0x179   :  { %v1006_v19 = vsel %vm747_vm1, %v912_v54, 0.0  ;;  %v1010_v54 = vsel %vm747_vm1, %v914_v37, 0.0 }
 0x17a   :  { %v1007_v5 = vadd.f32 %v1006_v19, %v1005_v50  ;;  %v2532_v40 = vpop.f32.mrb[64].mxu0 }
 0x17b   :  { %3609 = vst [vmem:[#allocation25_spill] sm:$0xff] %v2532_v40  ;;  %v811_v59 = vsel %vm747_vm1, %v2532_v40, 0.0  ;;  %v913_v18 = vmul.f32 %v2532_v40, %v2532_v40  ;;  %v590_v32 = vpop.f32.mrb[65].mxu0  ;;  %v916_v40 = vmul.f32 %v2261_v52, %v2261_v52 }
 0x17c   :  { %v812_v24 = vadd.f32 %v811_v59, %v810_v10  ;;  %v1012_v59 = vsel %vm747_vm1, %v915_v51, 0.0 }
 0x17d   :  { %v1008_v19 = vsel %vm747_vm1, %v913_v18, 0.0  ;;  %v917_v18 = vmul.f32 %v2270_v61, %v2270_v61  ;;  %v1014_v37 = vsel %vm747_vm1, %v916_v40, 0.0 }
 0x17e   :  { %v814_v50 = vadd.f32 %v813_v39, %v812_v24  ;;  %v1009_v14 = vadd.f32 %v1008_v19, %v1007_v5  ;;  %v819_v39 = vsel %vm747_vm1, %v2270_v61, 0.0  ;;  %v918_v19 = vmul.f32 %v2279_v7, %v2279_v7 }
 0x17f   :  { %v1016_v51 = vsel %vm747_vm1, %v917_v18, 0.0 }
 0x180   :  { %v816_v32 = vadd.f32 %v815_v44, %v814_v50  ;;  %v1011_v10 = vadd.f32 %v1010_v54, %v1009_v14  ;;  %v821_v54 = vsel %vm747_vm1, %v2279_v7, 0.0  ;;  %v919_v44 = vmul.f32 %v2288_v16, %v2288_v16 }
 0x181   :  { %v1018_v40 = vsel %vm747_vm1, %v918_v19, 0.0 }
 0x182   :  { %v818_v24 = vadd.f32 %v817_v35, %v816_v32  ;;  %v1013_v5 = vadd.f32 %v1012_v59, %v1011_v10  ;;  %v823_v10 = vsel %vm747_vm1, %v2288_v16, 0.0  ;;  %v920_v59 = vmul.f32 %v2297_v25, %v2297_v25 }
 0x183   :  { %v1020_v18 = vsel %vm747_vm1, %v919_v44, 0.0 }
 0x184   :  { %v820_v50 = vadd.f32 %v819_v39, %v818_v24  ;;  %v1015_v14 = vadd.f32 %v1014_v37, %v1013_v5  ;;  %v825_v37 = vsel %vm747_vm1, %v2297_v25, 0.0  ;;  %v921_v39 = vmul.f32 %v2306_v36, %v2306_v36 }
 0x185   :  { %v1022_v19 = vsel %vm747_vm1, %v920_v59, 0.0 }
 0x186   :  { %v822_v35 = vadd.f32 %v821_v54, %v820_v50  ;;  %v1017_v32 = vadd.f32 %v1016_v51, %v1015_v14  ;;  %v827_v51 = vsel %vm747_vm1, %v2306_v36, 0.0  ;;  %v922_v54 = vmul.f32 %v2315_v46, %v2315_v46 }
 0x187   :  { %v1024_v44 = vsel %vm747_vm1, %v921_v39, 0.0 }
 0x188   :  { %v824_v24 = vadd.f32 %v823_v10, %v822_v35  ;;  %v1019_v5 = vadd.f32 %v1018_v40, %v1017_v32  ;;  %v829_v40 = vsel %vm747_vm1, %v2315_v46, 0.0  ;;  %v923_v10 = vmul.f32 %v2324_v58, %v2324_v58 }
 0x189   :  { %v1026_v59 = vsel %vm747_vm1, %v922_v54, 0.0 }
 0x18a   :  { %v826_v50 = vadd.f32 %v825_v37, %v824_v24  ;;  %v1021_v14 = vadd.f32 %v1020_v18, %v1019_v5  ;;  %v831_v18 = vsel %vm747_vm1, %v2324_v58, 0.0  ;;  %v924_v37 = vmul.f32 %v2333_v6, %v2333_v6 }
 0x18b   :  { %v1028_v39 = vsel %vm747_vm1, %v923_v10, 0.0 }
 0x18c   :  { %v1023_v35 = vadd.f32 %v1022_v19, %v1021_v14  ;;  %v828_v32 = vadd.f32 %v827_v51, %v826_v50  ;;  %v833_v19 = vsel %vm747_vm1, %v2333_v6, 0.0  ;;  %v925_v51 = vmul.f32 %v2348_v20, %v2348_v20 }
 0x18d   :  { %v1030_v54 = vsel %vm747_vm1, %v924_v37, 0.0 }
 0x18e   :  { %v830_v24 = vadd.f32 %v829_v40, %v828_v32  ;;  %v1025_v5 = vadd.f32 %v1024_v44, %v1023_v35  ;;  %v835_v44 = vsel %vm747_vm1, %v2348_v20, 0.0  ;;  %v926_v40 = vmul.f32 %v2357_v34, %v2357_v34 }
 0x18f   :  { %v1032_v10 = vsel %vm747_vm1, %v925_v51, 0.0 }
 0x190   :  { %v832_v14 = vadd.f32 %v831_v18, %v830_v24  ;;  %v1027_v50 = vadd.f32 %v1026_v59, %v1025_v5  ;;  %v837_v59 = vsel %vm747_vm1, %v2357_v34, 0.0  ;;  %v927_v18 = vmul.f32 %v2366_v49, %v2366_v49 }
 0x191   :  { %v1034_v37 = vsel %vm747_vm1, %v926_v40, 0.0 }
 0x192   :  { %v834_v32 = vadd.f32 %v833_v19, %v832_v14  ;;  %v1029_v35 = vadd.f32 %v1028_v39, %v1027_v50  ;;  %v839_v39 = vsel %vm747_vm1, %v2366_v49, 0.0  ;;  %v928_v19 = vmul.f32 %v2375_v63, %v2375_v63 }
 0x193   :  { %v1036_v51 = vsel %vm747_vm1, %v927_v18, 0.0 }
 0x194   :  { %v836_v24 = vadd.f32 %v835_v44, %v834_v32  ;;  %v1031_v5 = vadd.f32 %v1030_v54, %v1029_v35  ;;  %v841_v54 = vsel %vm747_vm1, %v2375_v63, 0.0  ;;  %v929_v44 = vmul.f32 %v2384_v15, %v2384_v15 }
 0x195   :  { %v1038_v40 = vsel %vm747_vm1, %v928_v19, 0.0 }
 0x196   :  { %v838_v14 = vadd.f32 %v837_v59, %v836_v24  ;;  %v1033_v50 = vadd.f32 %v1032_v10, %v1031_v5  ;;  %v843_v10 = vsel %vm747_vm1, %v2384_v15, 0.0  ;;  %v930_v59 = vmul.f32 %v2393_v29, %v2393_v29 }
 0x197   :  { %v1040_v18 = vsel %vm747_vm1, %v929_v44, 0.0 }
 0x198   :  { %v840_v32 = vadd.f32 %v839_v39, %v838_v14  ;;  %v1035_v35 = vadd.f32 %v1034_v37, %v1033_v50  ;;  %v845_v37 = vsel %vm747_vm1, %v2393_v29, 0.0  ;;  %v931_v39 = vmul.f32 %v2402_v47, %v2402_v47 }
 0x199   :  { %v1042_v19 = vsel %vm747_vm1, %v930_v59, 0.0 }
 0x19a   :  { %v842_v24 = vadd.f32 %v841_v54, %v840_v32  ;;  %v1037_v5 = vadd.f32 %v1036_v51, %v1035_v35  ;;  %v847_v51 = vsel %vm747_vm1, %v2402_v47, 0.0  ;;  %v932_v54 = vmul.f32 %v2411_v4, %v2411_v4 }
 0x19b   :  { %v1044_v44 = vsel %vm747_vm1, %v931_v39, 0.0 }
 0x19c   :  { %v844_v14 = vadd.f32 %v843_v10, %v842_v24  ;;  %v1039_v50 = vadd.f32 %v1038_v40, %v1037_v5  ;;  %v849_v40 = vsel %vm747_vm1, %v2411_v4, 0.0  ;;  %v933_v10 = vmul.f32 %v2420_v22, %v2420_v22 }
 0x19d   :  { %v1046_v59 = vsel %vm747_vm1, %v932_v54, 0.0 }
 0x19e   :  { %v1041_v32 = vadd.f32 %v1040_v18, %v1039_v50  ;;  %v846_v35 = vadd.f32 %v845_v37, %v844_v14  ;;  %v851_v18 = vsel %vm747_vm1, %v2420_v22, 0.0  ;;  %v934_v37 = vmul.f32 %v2432_v45, %v2432_v45 }
 0x19f   :  { %v1048_v39 = vsel %vm747_vm1, %v933_v10, 0.0 }
 0x1a0   :  { %v1043_v24 = vadd.f32 %v1042_v19, %v1041_v32  ;;  %v848_v5 = vadd.f32 %v847_v51, %v846_v35  ;;  %v853_v19 = vsel %vm747_vm1, %v2432_v45, 0.0  ;;  %v935_v51 = vmul.f32 %v2441_v8, %v2441_v8 }
 0x1a1   :  { %v1050_v54 = vsel %vm747_vm1, %v934_v37, 0.0 }
 0x1a2   :  { %v1045_v50 = vadd.f32 %v1044_v44, %v1043_v24  ;;  %v850_v14 = vadd.f32 %v849_v40, %v848_v5  ;;  %v855_v44 = vsel %vm747_vm1, %v2441_v8, 0.0  ;;  %v936_v40 = vmul.f32 %v2450_v31, %v2450_v31 }
 0x1a3   :  { %v1052_v10 = vsel %vm747_vm1, %v935_v51, 0.0 }
 0x1a4   :  { %v1047_v32 = vadd.f32 %v1046_v59, %v1045_v50  ;;  %v852_v35 = vadd.f32 %v851_v18, %v850_v14  ;;  %v857_v59 = vsel %vm747_vm1, %v2450_v31, 0.0  ;;  %v937_v18 = vmul.f32 %v2459_v2, %v2459_v2 }
 0x1a5   :  { %v1054_v37 = vsel %vm747_vm1, %v936_v40, 0.0 }
 0x1a6   :  { %v1049_v24 = vadd.f32 %v1048_v39, %v1047_v32  ;;  %v854_v5 = vadd.f32 %v853_v19, %v852_v35  ;;  %v859_v39 = vsel %vm747_vm1, %v2459_v2, 0.0  ;;  %v938_v19 = vmul.f32 %v2468_v0, %v2468_v0 }
 0x1a7   :  { %v1056_v51 = vsel %vm747_vm1, %v937_v18, 0.0 }
 0x1a8   :  { %v1051_v50 = vadd.f32 %v1050_v54, %v1049_v24  ;;  %v856_v14 = vadd.f32 %v855_v44, %v854_v5  ;;  %v861_v54 = vsel %vm747_vm1, %v2468_v0, 0.0  ;;  %v939_v44 = vmul.f32 %v2477_v17, %v2477_v17 }
 0x1a9   :  { %v1058_v40 = vsel %vm747_vm1, %v938_v19, 0.0 }
 0x1aa   :  { %v1053_v32 = vadd.f32 %v1052_v10, %v1051_v50  ;;  %v858_v35 = vadd.f32 %v857_v59, %v856_v14  ;;  %v863_v10 = vsel %vm747_vm1, %v2477_v17, 0.0  ;;  %v940_v59 = vmul.f32 %v2486_v62, %v2486_v62 }
 0x1ab   :  { %v1060_v18 = vsel %vm747_vm1, %v939_v44, 0.0 }
 0x1ac   :  { %v1055_v24 = vadd.f32 %v1054_v37, %v1053_v32  ;;  %v860_v5 = vadd.f32 %v859_v39, %v858_v35  ;;  %v865_v37 = vsel %vm747_vm1, %v2486_v62, 0.0  ;;  %v941_v39 = vmul.f32 %v2495_v27, %v2495_v27 }
 0x1ad   :  { %v1062_v19 = vsel %vm747_vm1, %v940_v59, 0.0 }
 0x1ae   :  { %v1057_v50 = vadd.f32 %v1056_v51, %v1055_v24  ;;  %v862_v14 = vadd.f32 %v861_v54, %v860_v5  ;;  %v867_v51 = vsel %vm747_vm1, %v2495_v27, 0.0  ;;  %v942_v54 = vmul.f32 %v2504_v11, %v2504_v11 }
 0x1af   :  { %v1064_v44 = vsel %vm747_vm1, %v941_v39, 0.0 }
 0x1b0   :  { %v1059_v32 = vadd.f32 %v1058_v40, %v1057_v50  ;;  %v864_v35 = vadd.f32 %v863_v10, %v862_v14  ;;  %v869_v40 = vsel %vm747_vm1, %v2504_v11, 0.0  ;;  %v943_v10 = vmul.f32 %v2513_v26, %v2513_v26 }
 0x1b2   :  { %v1061_v24 = vadd.f32 %v1060_v18, %v1059_v32  ;;  %v866_v5 = vadd.f32 %v865_v37, %v864_v35  ;;  %v944_v32 = vmul.f32 %v2522_v55, %v2522_v55  ;;  %v1066_v18 = vsel %vm747_vm1, %v942_v54, 0.0 }
 0x1b3   :  { %v871_v37 = vsel %vm747_vm1, %v2513_v26, 0.0 }
 0x1b4   :  { %v1063_v50 = vadd.f32 %v1062_v19, %v1061_v24  ;;  %v868_v14 = vadd.f32 %v867_v51, %v866_v5  ;;  %v873_v24 = vsel %vm747_vm1, %v2522_v55, 0.0  ;;  %v1068_v19 = vsel %vm747_vm1, %v943_v10, 0.0  ;;  %v1157_v10 = vld [vmem:[%s3557_s3] sm:$0xff] }
 0x1b5   :  { %v1070_v51 = vsel %vm747_vm1, %v944_v32, 0.0 }
 0x1b6   :  { %v1065_v59 = vadd.f32 %v1064_v44, %v1063_v50  ;;  %v870_v35 = vadd.f32 %v869_v40, %v868_v14 }
 0x1b8   :  { %v1067_v39 = vadd.f32 %v1066_v18, %v1065_v59  ;;  %v872_v5 = vadd.f32 %v871_v37, %v870_v35 }
 0x1ba   :  { %v1069_v11 = vadd.f32 %v1068_v19, %v1067_v39  ;;  %v874_v27 = vadd.f32 %v873_v24, %v872_v5  ;;  %v1255_v39 = vlaneseq  ;;  %v1591_v19 = vld [vmem:[%s3558_s4] ss:$0 sm:$0xff] }
 0x1bc   :  { %v875_v62 = vrot.slane %v874_v27, 4  ;;  %v1071_v17 = vadd.f32 %v1070_v51, %v1069_v11  ;;  %v2700_v5 = vshrl.u32 %v1255_v39, 7  ;;  %v3617_v39 = vld [vmem:[#allocation10_spill] sm:$0xff] }
 0x1be   :  { %v876_v50 = vadd.f32 %v875_v62, %v874_v27  ;;  %v1072_v14 = vrot.slane %v1071_v17, 4  ;;  %v3610_v62 = vmov 0.0   ;;  %v1257_v51 = vsub.s32 1, %v2700_v5 }
 0x1c0   :  { %v877_v44 = vrot.slane %v876_v50, 2  ;;  %v1073_v54 = vadd.f32 %v1072_v14, %v1071_v17 }
 0x1c2   :  { %v878_v40 = vadd.f32 %v877_v44, %v876_v50  ;;  %v1074_v0 = vrot.slane %v1073_v54, 2 }
 0x1c4   :  { %v879_v26 = vrot.slane %v878_v40, 1  ;;  %v1075_v2 = vadd.f32 %v1074_v0, %v1073_v54 }
 0x1c6   :  { %v1076_v31 = vrot.slane %v1075_v2, 1  ;;  %v880_v59 = vadd.f32 %v879_v26, %v878_v40  ;;  %v2711_v40 = vld [vmem:[%s3559_s5] sm:$0x1] }
 0x1c8   :  { %v1077_v35 = vadd.f32 %v1076_v31, %v1075_v2 }
 0x1ca   :  { %v1079_v32 = vsel %vm1078_vm3, %v880_v59, %v1077_v35  ;;  %v3626_v59 = vld [vmem:[#allocation2_spill] sm:$0xff] }
 0x1cb   :  { %1608 = vmatmul.mubr.msk.f32.vlgmr.msra.gmra.mrb[62].mxu1 %vm747_vm1, %v1079_v32 }
 0x1cc   :  { %1611 = vmatpush3.msra.mxu1 %v1157_v10  ;;  %1612 = vmatprep.mubr.msk.f32.mxu1 %vm1672_vm2, %v3610_v62 }
 0x29e   :  { %v1153_v17 = vpop.f32.mrb[62].mxu1 }
 0x29f   :  { %v1609_v27 = vpop.f32.mrb[63].mxu1  ;;  %1613 = vmatmul.mubr.msk.f32.vlgmr.msra.gmra.mrb[64].mxu1 %vm1158_vm4, %v1153_v17 }
 0x372   :  { %v1228_v0 = vpop.f32.mrb[64].mxu1 }
 0x373   :  { %v1232_v11 = vmul.f32 0.00048828125, %v1228_v0  ;;  %v1614_v18 = vpop.f32.mrb[65].mxu1 }
 0x374   :  { %v3612_v18 = vld [vmem:[#allocation4_spill] sm:$0xff] }
 0x375   :  { %v1233_v26 = vmul.f32 %v1232_v11, %v1232_v11 }
 0x377   :  { %v1235_v31 = vrot.slane %v1233_v26, 7  ;;  %v3613_v26 = vld [vmem:[#allocation5_spill] sm:$0xff] }
 0x379   :  { %v1237_v2 = vsub.f32 %v1232_v11, %v1235_v31  ;;  %v3614_v31 = vld [vmem:[#allocation6_spill] sm:$0xff] }
 0x37b   :  { %v1238_v37 = vmax.f32 %v1237_v2, 0.0  ;;  %v3615_v2 = vld [vmem:[#allocation7_spill] sm:$0xff] }
 0x37d   :  { %v1239_v24 = vadd.f32 1e-05, %v1238_v37  ;;  %v3616_v37 = vld [vmem:[#allocation8_spill] sm:$0xff] }
 0x37f   :  { %1669 = vrsqrt.f32 %v1239_v24 }
 0x389   :  { %v1670_v50 = vpop.eup %1669 }
 0x38a   :  { %v1248_v14 = vmul.f32 %v1670_v50, %v1591_v19 }
 0x38c   :  { %v1251_v44 = vrot.slane %v1248_v14, 1  ;;  %v2706_v54 = vrot.slane %v1248_v14, %v1257_v51  ;;  %v3618_v51 = vld [vmem:[#allocation12_spill] sm:$0xff]  ;;  %v3619_v14 = vld [vmem:[#allocation14_spill] sm:$0xff] }
 0x38e   :  { %v2714_v35 = vmul.f32 %v1251_v44, %v1232_v11  ;;  %v2718_v10 = vmul.f32 %v2706_v54, %v2237_v33  ;;  %v2722_v32 = vmul.f32 %v2706_v54, %v2243_v38  ;;  %v2726_v62 = vmul.f32 %v2706_v54, %v2255_v48  ;;  %v3611_v11 = vld [vmem:[#allocation3_spill] sm:$0xff] }
 0x38f   :  { %v2730_v17 = vmul.f32 %v2706_v54, %v2264_v57  ;;  %v2734_v27 = vmul.f32 %v2706_v54, %v2273_v3  ;;  %v2738_v33 = vmul.f32 %v2706_v54, %v2282_v12  ;;  %v2742_v38 = vmul.f32 %v2706_v54, %v2291_v21 }
 0x390   :  { %v1254_v48 = vsub.f32 %v2711_v40, %v2714_v35  ;;  %v2748_v0 = vmul.f32 %v2706_v54, %v2300_v30  ;;  %v2752_v57 = vmul.f32 %v2706_v54, %v2309_v41  ;;  %v2756_v3 = vmul.f32 %v2706_v54, %v2318_v53  ;;  %v3620_v40 = vld [vmem:[#allocation16_spill] sm:$0xff] }
 0x391   :  { %v2760_v12 = vmul.f32 %v2706_v54, %v2327_v1  ;;  %v2764_v21 = vmul.f32 %v2706_v54, %v2336_v13  ;;  %v2768_v30 = vmul.f32 %v2706_v54, %v2351_v28  ;;  %v2772_v41 = vmul.f32 %v2706_v54, %v2360_v43 }
 0x392   :  { %v2776_v53 = vmul.f32 %v2706_v54, %v2369_v56  ;;  %v2780_v1 = vmul.f32 %v2706_v54, %v2378_v9  ;;  %v2784_v13 = vmul.f32 %v2706_v54, %v2387_v23  ;;  %v2788_v28 = vmul.f32 %v2706_v54, %v3611_v11  ;;  %v3621_v11 = vld [vmem:[#allocation18_spill] sm:$0xff] }
 0x393   :  { %v2792_v43 = vmul.f32 %v2706_v54, %v3612_v18  ;;  %v2796_v56 = vmul.f32 %v2706_v54, %v3613_v26  ;;  %v2800_v9 = vmul.f32 %v2706_v54, %v3614_v31  ;;  %v2804_v23 = vmul.f32 %v2706_v54, %v3615_v2  ;;  %v3622_v26 = vld [vmem:[#allocation20_spill] sm:$0xff]  ;;  %v3623_v2 = vld [vmem:[#allocation22_spill] sm:$0xff] }
 0x394   :  { %v2808_v24 = vmul.f32 %v2706_v54, %v3616_v37  ;;  %v2812_v19 = vmul.f32 %v2706_v54, %v3617_v39  ;;  %v2816_v50 = vmul.f32 %v2706_v54, %v3618_v51  ;;  %v2820_v44 = vmul.f32 %v2706_v54, %v3619_v14  ;;  %v3624_v39 = vld [vmem:[#allocation24_spill] sm:$0xff] }
 0x395   :  { %v2824_v35 = vmul.f32 %v2706_v54, %v3620_v40  ;;  %v2828_v18 = vmul.f32 %v2706_v54, %v3621_v11  ;;  %v2832_v31 = vmul.f32 %v2706_v54, %v3622_v26  ;;  %v2836_v37 = vmul.f32 %v2706_v54, %v3623_v2  ;;  %v3625_v40 = vld [vmem:[#allocation25_spill] sm:$0xff] }
 0x396   :  { %v2840_v51 = vmul.f32 %v2706_v54, %v3624_v39  ;;  %v2844_v14 = vmul.f32 %v2706_v54, %v2525_v60  ;;  %v2848_v11 = vmul.f32 %v2706_v54, %v3625_v40  ;;  %v2852_v26 = vmul.f32 %v2706_v54, %v3626_v59 }
 0x397   :  { %v2856_v2 = vmul.f32 %v2706_v54, %v2251_v42  ;;  %v2860_v39 = vmul.f32 %v2706_v54, %v2261_v52  ;;  %v2864_v60 = vmul.f32 %v2706_v54, %v2270_v61  ;;  %v2868_v40 = vmul.f32 %v2706_v54, %v2279_v7 }
 0x398   :  { %v2872_v59 = vmul.f32 %v2706_v54, %v2288_v16  ;;  %v2876_v42 = vmul.f32 %v2706_v54, %v2297_v25  ;;  %v2880_v52 = vmul.f32 %v2706_v54, %v2306_v36  ;;  %v2884_v61 = vmul.f32 %v2706_v54, %v2315_v46 }
 0x399   :  { %v2888_v7 = vmul.f32 %v2706_v54, %v2324_v58  ;;  %v2892_v16 = vmul.f32 %v2706_v54, %v2333_v6  ;;  %v2896_v25 = vmul.f32 %v2706_v54, %v2348_v20  ;;  %v2900_v36 = vmul.f32 %v2706_v54, %v2357_v34 }
 0x39a   :  { %v2904_v46 = vmul.f32 %v2706_v54, %v2366_v49  ;;  %v2908_v58 = vmul.f32 %v2706_v54, %v2375_v63  ;;  %v2912_v6 = vmul.f32 %v2706_v54, %v2384_v15  ;;  %v2916_v20 = vmul.f32 %v2706_v54, %v2393_v29 }
 0x39b   :  { %v2920_v34 = vmul.f32 %v2706_v54, %v2402_v47  ;;  %v2924_v49 = vmul.f32 %v2706_v54, %v2411_v4  ;;  %v2928_v63 = vmul.f32 %v2706_v54, %v2420_v22  ;;  %v2932_v15 = vmul.f32 %v2706_v54, %v2432_v45 }
 0x39c   :  { %3627 = vst [vmem:[#allocation3_spill] sm:$0xff] %v2916_v20  ;;  %v2936_v29 = vmul.f32 %v2706_v54, %v2441_v8  ;;  %v3633_v20 = vld [vmem:[#allocation9_spill] sm:$0xff] }
 0x39d   :  { %3628 = vst [vmem:[#allocation4_spill] sm:$0xff] %v2920_v34  ;;  %3629 = vst [vmem:[#allocation5_spill] sm:$0xff] %v2924_v49  ;;  %v2940_v47 = vmul.f32 %v2706_v54, %v3633_v20  ;;  %v3635_v34 = vld [vmem:[#allocation11_spill] sm:$0xff]  ;;  %v3637_v49 = vld [vmem:[#allocation13_spill] sm:$0xff] }
 0x39e   :  { %3630 = vst [vmem:[#allocation6_spill] sm:$0xff] %v2928_v63  ;;  %3631 = vst [vmem:[#allocation7_spill] sm:$0xff] %v2932_v15  ;;  %v2944_v4 = vmul.f32 %v2706_v54, %v3635_v34  ;;  %v2948_v22 = vmul.f32 %v2706_v54, %v3637_v49  ;;  %v3638_v63 = vld [vmem:[#allocation15_spill] sm:$0xff]  ;;  %v3640_v15 = vld [vmem:[#allocation17_spill] sm:$0xff] }
 0x39f   :  { %3632 = vst [vmem:[#allocation8_spill] sm:$0xff] %v2936_v29  ;;  %3634 = vst [vmem:[#allocation10_spill] sm:$0xff] %v2940_v47  ;;  %v2952_v45 = vmul.f32 %v2706_v54, %v3638_v63  ;;  %v2956_v8 = vmul.f32 %v2706_v54, %v3640_v15  ;;  %v3641_v29 = vld [vmem:[#allocation19_spill] sm:$0xff]  ;;  %v3642_v47 = vld [vmem:[#allocation21_spill] sm:$0xff]  ;;  %v2972_v63 = vmul.f32 %v2706_v54, %v2522_v55 }
 0x3a0   :  { %3636 = vst [vmem:[#allocation12_spill] sm:$0xff] %v2944_v4  ;;  %v2960_v20 = vmul.f32 %v2706_v54, %v3641_v29  ;;  %v2964_v34 = vmul.f32 %v2706_v54, %v3642_v47  ;;  %v3643_v4 = vld [vmem:[#allocation23_spill] sm:$0xff] }
 0x3a1   :  { %3639 = vst [vmem:[#allocation14_spill] sm:$0xff] %v2952_v45  ;;  %v2968_v49 = vmul.f32 %v2706_v54, %v3643_v4  ;;  %v3644_v45 = vsub.s32 0, %v2700_v5 }
 0x3a3   :  { %v2976_v15 = vrot.slane %v1254_v48, %v3644_v45 }
 0x3a4   :  { %v3652_v45 = vld [vmem:[#allocation5_spill] sm:$0xff] }
 0x3a5   :  { %v2980_v29 = vadd.f32 %v2976_v15, %v2718_v10  ;;  %v2984_v47 = vadd.f32 %v2976_v15, %v2722_v32  ;;  %v2988_v4 = vadd.f32 %v2976_v15, %v2726_v62  ;;  %v2992_v55 = vadd.f32 %v2976_v15, %v2730_v17 }
 0x3a6   :  { %v2996_v5 = vadd.f32 %v2976_v15, %v2734_v27  ;;  %v3000_v54 = vadd.f32 %v2976_v15, %v2738_v33  ;;  %v3004_v10 = vadd.f32 %v2976_v15, %v2742_v38  ;;  %v3008_v32 = vadd.f32 %v2976_v15, %v2748_v0 }
 0x3a7   :  { %v3012_v62 = vadd.f32 %v2976_v15, %v2752_v57  ;;  %v3016_v17 = vadd.f32 %v2976_v15, %v2756_v3  ;;  %v3020_v27 = vadd.f32 %v2976_v15, %v2760_v12  ;;  %v3024_v33 = vadd.f32 %v2976_v15, %v2764_v21 }
 0x3a8   :  { %v3028_v38 = vadd.f32 %v2976_v15, %v2768_v30  ;;  %v3032_v48 = vadd.f32 %v2976_v15, %v2772_v41  ;;  %v3036_v0 = vadd.f32 %v2976_v15, %v2776_v53  ;;  %v3040_v57 = vadd.f32 %v2976_v15, %v2780_v1 }
 0x3a9   :  { %v3044_v3 = vadd.f32 %v2976_v15, %v2784_v13  ;;  %v3048_v12 = vadd.f32 %v2976_v15, %v2788_v28  ;;  %v3052_v21 = vadd.f32 %v2976_v15, %v2792_v43  ;;  %v3056_v30 = vadd.f32 %v2976_v15, %v2796_v56 }
 0x3aa   :  { %v3060_v41 = vadd.f32 %v2976_v15, %v2800_v9  ;;  %v3064_v53 = vadd.f32 %v2976_v15, %v2804_v23  ;;  %v3068_v1 = vadd.f32 %v2976_v15, %v2808_v24  ;;  %v3072_v13 = vadd.f32 %v2976_v15, %v2812_v19 }
 0x3ab   :  { %v3076_v28 = vadd.f32 %v2976_v15, %v2816_v50  ;;  %v3080_v43 = vadd.f32 %v2976_v15, %v2820_v44  ;;  %v3084_v56 = vadd.f32 %v2976_v15, %v2824_v35  ;;  %v3088_v9 = vadd.f32 %v2976_v15, %v2828_v18 }
 0x3ac   :  { %v3092_v23 = vadd.f32 %v2976_v15, %v2832_v31  ;;  %v3096_v24 = vadd.f32 %v2976_v15, %v2836_v37  ;;  %v3100_v19 = vadd.f32 %v2976_v15, %v2840_v51  ;;  %v3104_v50 = vadd.f32 %v2976_v15, %v2844_v14 }
 0x3ad   :  { %v3108_v44 = vadd.f32 %v2976_v15, %v2848_v11  ;;  %v3112_v35 = vadd.f32 %v2976_v15, %v2852_v26  ;;  %v3116_v18 = vadd.f32 %v2976_v15, %v2856_v2  ;;  %v3120_v31 = vadd.f32 %v2976_v15, %v2860_v39 }
 0x3ae   :  { %v3124_v37 = vadd.f32 %v2976_v15, %v2864_v60  ;;  %v3128_v51 = vadd.f32 %v2976_v15, %v2868_v40  ;;  %v3132_v14 = vadd.f32 %v2976_v15, %v2872_v59  ;;  %v3136_v11 = vadd.f32 %v2976_v15, %v2876_v42 }
 0x3af   :  { %v3140_v26 = vadd.f32 %v2976_v15, %v2880_v52  ;;  %v3144_v2 = vadd.f32 %v2976_v15, %v2884_v61  ;;  %v3148_v39 = vadd.f32 %v2976_v15, %v2888_v7  ;;  %v3152_v60 = vadd.f32 %v2976_v15, %v2892_v16  ;;  %v3648_v7 = vld [vmem:[#allocation3_spill] sm:$0xff] }
 0x3b0   :  { %v3156_v40 = vadd.f32 %v2976_v15, %v2896_v25  ;;  %v3160_v59 = vadd.f32 %v2976_v15, %v2900_v36  ;;  %v3164_v42 = vadd.f32 %v2976_v15, %v2904_v46  ;;  %v3168_v52 = vadd.f32 %v2976_v15, %v2908_v58  ;;  %v3650_v25 = vld [vmem:[#allocation4_spill] sm:$0xff] }
 0x3b1   :  { %v3172_v61 = vadd.f32 %v2976_v15, %v2912_v6  ;;  %v3176_v16 = vadd.f32 %v2976_v15, %v3648_v7  ;;  %v3180_v36 = vadd.f32 %v2976_v15, %v3650_v25  ;;  %v3184_v46 = vadd.f32 %v2976_v15, %v3652_v45 }
 0x3b2   :  { %3645 = vst [vmem:[#allocation16_spill] sm:$0xff] %v3164_v42  ;;  %3646 = vst [vmem:[#allocation18_spill] sm:$0xff] %v3168_v52  ;;  %v3653_v42 = vld [vmem:[#allocation6_spill] sm:$0xff]  ;;  %v3655_v52 = vld [vmem:[#allocation7_spill] sm:$0xff] }
 0x3b3   :  { %3647 = vst [vmem:[#allocation20_spill] sm:$0xff] %v3172_v61  ;;  %3649 = vst [vmem:[#allocation22_spill] sm:$0xff] %v3176_v16  ;;  %v3188_v58 = vadd.f32 %v2976_v15, %v3653_v42  ;;  %v3192_v6 = vadd.f32 %v2976_v15, %v3655_v52  ;;  %v3656_v61 = vld [vmem:[#allocation8_spill] sm:$0xff]  ;;  %v3657_v16 = vld [vmem:[#allocation10_spill] sm:$0xff]  ;;  %v3208_v42 = vadd.f32 %v2976_v15, %v2948_v22 }
 0x3b4   :  { %3651 = vst [vmem:[#allocation24_spill] sm:$0xff] %v3180_v36  ;;  %v3196_v7 = vadd.f32 %v2976_v15, %v3656_v61  ;;  %v3200_v25 = vadd.f32 %v2976_v15, %v3657_v16  ;;  %v3658_v36 = vld [vmem:[#allocation12_spill] sm:$0xff]  ;;  %v3216_v61 = vadd.f32 %v2976_v15, %v2956_v8  ;;  %v3220_v16 = vadd.f32 %v2976_v15, %v2960_v20 }
 0x3b5   :  { %3654 = vst [vmem:[#allocation25_spill] sm:$0xff] %v3188_v58  ;;  %v3204_v45 = vadd.f32 %v2976_v15, %v3658_v36  ;;  %v3659_v58 = vld [vmem:[#allocation14_spill] sm:$0xff]  ;;  %v3224_v36 = vadd.f32 %v2976_v15, %v2964_v34  ;;  %v3228_v22 = vadd.f32 %v2976_v15, %v2968_v49  ;;  %v1394_v8 = vmax.f32 %v2984_v47, 0.0 }
 0x3b6   :  { %v3212_v52 = vadd.f32 %v2976_v15, %v3659_v58  ;;  %3661 = vst [vmem:[#allocation9_spill] sm:$0xff] %v3216_v61  ;;  %3662 = vst [vmem:[#allocation11_spill] sm:$0xff] %v3220_v16  ;;  %v3232_v58 = vadd.f32 %v2976_v15, %v2972_v63  ;;  %v1395_v61 = vmax.f32 %v2988_v4, 0.0  ;;  %v1396_v20 = vmax.f32 %v2992_v55, 0.0 }
 0x3b7   :  { %3663 = vst [vmem:[#allocation13_spill] sm:$0xff] %v3224_v36  ;;  %3664 = vst [vmem:[#allocation15_spill] sm:$0xff] %v3228_v22  ;;  %v1397_v16 = vmax.f32 %v2996_v5, 0.0  ;;  %v1398_v34 = vmax.f32 %v3000_v54, 0.0  ;;  %v1399_v36 = vmax.f32 %v3004_v10, 0.0  ;;  %v1400_v49 = vmax.f32 %v3008_v32, 0.0 }
 0x3b8   :  { %3660 = vst [vmem:[#allocation2_spill] sm:$0xff] %v3212_v52  ;;  %v1393_v52 = vmax.f32 %v2980_v29, 0.0  ;;  %v1401_v22 = vmax.f32 %v3012_v62, 0.0  ;;  %v1402_v63 = vmax.f32 %v3016_v17, 0.0  ;;  %v1403_v15 = vmax.f32 %v3020_v27, 0.0  ;;  %1458 = vst.msk [vmem:[%s3560_s6 + $0x8] sm:$0xff] %vm747_vm1, %v1394_v8 }
 0x3b9   :  { %v1404_v29 = vmax.f32 %v3024_v33, 0.0  ;;  %1459 = vst.msk [vmem:[%s3560_s6 + $0x10] sm:$0xff] %vm747_vm1, %v1395_v61  ;;  %1460 = vst.msk [vmem:[%s3560_s6 + $0x18] sm:$0xff] %vm747_vm1, %v1396_v20  ;;  %v1405_v47 = vmax.f32 %v3028_v38, 0.0  ;;  %v1406_v4 = vmax.f32 %v3032_v48, 0.0  ;;  %v1407_v55 = vmax.f32 %v3036_v0, 0.0 }
 0x3ba   :  { %1457 = vst.msk [vmem:[%s3560_s6] sm:$0xff] %vm747_vm1, %v1393_v52  ;;  %v1408_v5 = vmax.f32 %v3040_v57, 0.0  ;;  %1461 = vst.msk [vmem:[%s3560_s6 + $0x20] sm:$0xff] %vm747_vm1, %v1397_v16  ;;  %v1409_v54 = vmax.f32 %v3044_v3, 0.0  ;;  %v1410_v10 = vmax.f32 %v3048_v12, 0.0  ;;  %v1411_v32 = vmax.f32 %v3052_v21, 0.0 }
 0x3bb   :  { %1462 = vst.msk [vmem:[%s3560_s6 + $0x28] sm:$0xff] %vm747_vm1, %v1398_v34  ;;  %1463 = vst.msk [vmem:[%s3560_s6 + $0x30] sm:$0xff] %vm747_vm1, %v1399_v36  ;;  %v1412_v62 = vmax.f32 %v3056_v30, 0.0  ;;  %v1413_v17 = vmax.f32 %v3060_v41, 0.0  ;;  %v1414_v27 = vmax.f32 %v3064_v53, 0.0  ;;  %v1415_v33 = vmax.f32 %v3068_v1, 0.0 }
 0x3bc   :  { %1464 = vst.msk [vmem:[%s3560_s6 + $0x38] sm:$0xff] %vm747_vm1, %v1400_v49  ;;  %1465 = vst.msk [vmem:[%s3560_s6 + $0x40] sm:$0xff] %vm747_vm1, %v1401_v22  ;;  %v1416_v38 = vmax.f32 %v3072_v13, 0.0  ;;  %v1417_v48 = vmax.f32 %v3076_v28, 0.0  ;;  %v1418_v0 = vmax.f32 %v3080_v43, 0.0  ;;  %v1419_v57 = vmax.f32 %v3084_v56, 0.0 }
 0x3bd   :  { %1466 = vst.msk [vmem:[%s3560_s6 + $0x48] sm:$0xff] %vm747_vm1, %v1402_v63  ;;  %1467 = vst.msk [vmem:[%s3560_s6 + $0x50] sm:$0xff] %vm747_vm1, %v1403_v15  ;;  %v1420_v3 = vmax.f32 %v3088_v9, 0.0  ;;  %v1421_v12 = vmax.f32 %v3092_v23, 0.0  ;;  %v1422_v21 = vmax.f32 %v3096_v24, 0.0  ;;  %v1423_v30 = vmax.f32 %v3100_v19, 0.0 }
 0x3be   :  { %1468 = vst.msk [vmem:[%s3560_s6 + $0x58] sm:$0xff] %vm747_vm1, %v1404_v29  ;;  %1469 = vst.msk [vmem:[%s3560_s6 + $0x60] sm:$0xff] %vm747_vm1, %v1405_v47  ;;  %v1424_v41 = vmax.f32 %v3104_v50, 0.0  ;;  %v1425_v53 = vmax.f32 %v3108_v44, 0.0  ;;  %v1426_v1 = vmax.f32 %v3112_v35, 0.0  ;;  %v1427_v13 = vmax.f32 %v3116_v18, 0.0 }
 0x3bf   :  { %1470 = vst.msk [vmem:[%s3560_s6 + $0x68] sm:$0xff] %vm747_vm1, %v1406_v4  ;;  %1471 = vst.msk [vmem:[%s3560_s6 + $0x70] sm:$0xff] %vm747_vm1, %v1407_v55  ;;  %v1428_v28 = vmax.f32 %v3120_v31, 0.0  ;;  %v1429_v43 = vmax.f32 %v3124_v37, 0.0  ;;  %v1430_v56 = vmax.f32 %v3128_v51, 0.0  ;;  %v1431_v9 = vmax.f32 %v3132_v14, 0.0 }
 0x3c0   :  { %1472 = vst.msk [vmem:[%s3560_s6 + $0x78] sm:$0xff] %vm747_vm1, %v1408_v5  ;;  %1473 = vst.msk [vmem:[%s3560_s6 + $0x80] sm:$0xff] %vm747_vm1, %v1409_v54  ;;  %v1432_v23 = vmax.f32 %v3136_v11, 0.0  ;;  %v1433_v24 = vmax.f32 %v3140_v26, 0.0  ;;  %v1434_v19 = vmax.f32 %v3144_v2, 0.0  ;;  %v1435_v50 = vmax.f32 %v3148_v39, 0.0 }
 0x3c1   :  { %1474 = vst.msk [vmem:[%s3560_s6 + $0x88] sm:$0xff] %vm747_vm1, %v1410_v10  ;;  %1475 = vst.msk [vmem:[%s3560_s6 + $0x90] sm:$0xff] %vm747_vm1, %v1411_v32  ;;  %v1436_v44 = vmax.f32 %v3152_v60, 0.0  ;;  %v1437_v35 = vmax.f32 %v3156_v40, 0.0  ;;  %v1438_v18 = vmax.f32 %v3160_v59, 0.0  ;;  %v3665_v31 = vld [vmem:[#allocation16_spill] sm:$0xff] }
 0x3c2   :  { %1476 = vst.msk [vmem:[%s3560_s6 + $0x98] sm:$0xff] %vm747_vm1, %v1412_v62  ;;  %1477 = vst.msk [vmem:[%s3560_s6 + $0xa0] sm:$0xff] %vm747_vm1, %v1413_v17  ;;  %v1439_v37 = vmax.f32 %v3665_v31, 0.0  ;;  %v3666_v51 = vld [vmem:[#allocation18_spill] sm:$0xff]  ;;  %v3667_v11 = vld [vmem:[#allocation20_spill] sm:$0xff]  ;;  %v1444_v59 = vmax.f32 %v3184_v46, 0.0 }
 0x3c3   :  { %1478 = vst.msk [vmem:[%s3560_s6 + $0xa8] sm:$0xff] %vm747_vm1, %v1414_v27  ;;  %1479 = vst.msk [vmem:[%s3560_s6 + $0xb0] sm:$0xff] %vm747_vm1, %v1415_v33  ;;  %v1440_v14 = vmax.f32 %v3666_v51, 0.0  ;;  %v1441_v26 = vmax.f32 %v3667_v11, 0.0  ;;  %v3668_v2 = vld [vmem:[#allocation22_spill] sm:$0xff]  ;;  %v3669_v60 = vld [vmem:[#allocation24_spill] sm:$0xff] }
 0x3c4   :  { %1480 = vst.msk [vmem:[%s3560_s6 + $0xb8] sm:$0xff] %vm747_vm1, %v1416_v38  ;;  %1481 = vst.msk [vmem:[%s3560_s6 + $0xc0] sm:$0xff] %vm747_vm1, %v1417_v48  ;;  %v1442_v39 = vmax.f32 %v3668_v2, 0.0  ;;  %v1443_v40 = vmax.f32 %v3669_v60, 0.0  ;;  %v3670_v46 = vld [vmem:[#allocation25_spill] sm:$0xff]  ;;  %v1446_v61 = vmax.f32 %v3192_v6, 0.0 }
 0x3c5   :  { %1482 = vst.msk [vmem:[%s3560_s6 + $0xc8] sm:$0xff] %vm747_vm1, %v1418_v0  ;;  %1483 = vst.msk [vmem:[%s3560_s6 + $0xd0] sm:$0xff] %vm747_vm1, %v1419_v57  ;;  %v1445_v52 = vmax.f32 %v3670_v46, 0.0  ;;  %v1447_v16 = vmax.f32 %v3196_v7, 0.0  ;;  %v1448_v36 = vmax.f32 %v3200_v25, 0.0  ;;  %v1449_v6 = vmax.f32 %v3204_v45, 0.0 }
 0x3c6   :  { %1484 = vst.msk [vmem:[%s3560_s6 + $0xd8] sm:$0xff] %vm747_vm1, %v1420_v3  ;;  %1485 = vst.msk [vmem:[%s3560_s6 + $0xe0] sm:$0xff] %vm747_vm1, %v1421_v12  ;;  %v1450_v7 = vmax.f32 %v3208_v42, 0.0  ;;  %v3671_v25 = vld [vmem:[#allocation2_spill] sm:$0xff]  ;;  %v3672_v8 = vld [vmem:[#allocation9_spill] sm:$0xff]  ;;  %v1456_v29 = vmax.f32 %v3232_v58, 0.0 }
 0x3c7   :  { %1486 = vst.msk [vmem:[%s3560_s6 + $0xe8] sm:$0xff] %vm747_vm1, %v1422_v21  ;;  %1487 = vst.msk [vmem:[%s3560_s6 + $0xf0] sm:$0xff] %vm747_vm1, %v1423_v30  ;;  %v1451_v22 = vmax.f32 %v3671_v25, 0.0  ;;  %v1452_v20 = vmax.f32 %v3672_v8, 0.0  ;;  %v3673_v45 = vld [vmem:[#allocation11_spill] sm:$0xff]  ;;  %v3674_v34 = vld [vmem:[#allocation13_spill] sm:$0xff] }
 0x3c8   :  { %1488 = vst.msk [vmem:[%s3560_s6 + $0xf8] sm:$0xff] %vm747_vm1, %v1424_v41  ;;  %1489 = vst.msk [vmem:[%s3560_s6 + $0x100] sm:$0xff] %vm747_vm1, %v1425_v53  ;;  %v1453_v42 = vmax.f32 %v3673_v45, 0.0  ;;  %v1454_v49 = vmax.f32 %v3674_v34, 0.0  ;;  %v3675_v63 = vld [vmem:[#allocation15_spill] sm:$0xff] }
 0x3c9   :  { %1490 = vst.msk [vmem:[%s3560_s6 + $0x108] sm:$0xff] %vm747_vm1, %v1426_v1  ;;  %1491 = vst.msk [vmem:[%s3560_s6 + $0x110] sm:$0xff] %vm747_vm1, %v1427_v13  ;;  %v1455_v15 = vmax.f32 %v3675_v63, 0.0 }
 0x3ca   :  { %1492 = vst.msk [vmem:[%s3560_s6 + $0x118] sm:$0xff] %vm747_vm1, %v1428_v28  ;;  %1493 = vst.msk [vmem:[%s3560_s6 + $0x120] sm:$0xff] %vm747_vm1, %v1429_v43 }
 0x3cb   :  { %1494 = vst.msk [vmem:[%s3560_s6 + $0x128] sm:$0xff] %vm747_vm1, %v1430_v56  ;;  %1495 = vst.msk [vmem:[%s3560_s6 + $0x130] sm:$0xff] %vm747_vm1, %v1431_v9 }
 0x3cc   :  { %1496 = vst.msk [vmem:[%s3560_s6 + $0x138] sm:$0xff] %vm747_vm1, %v1432_v23  ;;  %1497 = vst.msk [vmem:[%s3560_s6 + $0x140] sm:$0xff] %vm747_vm1, %v1433_v24 }
 0x3cd   :  { %1498 = vst.msk [vmem:[%s3560_s6 + $0x148] sm:$0xff] %vm747_vm1, %v1434_v19  ;;  %1499 = vst.msk [vmem:[%s3560_s6 + $0x150] sm:$0xff] %vm747_vm1, %v1435_v50 }
 0x3ce   :  { %1500 = vst.msk [vmem:[%s3560_s6 + $0x158] sm:$0xff] %vm747_vm1, %v1436_v44  ;;  %1501 = vst.msk [vmem:[%s3560_s6 + $0x160] sm:$0xff] %vm747_vm1, %v1437_v35 }
 0x3cf   :  { %1502 = vst.msk [vmem:[%s3560_s6 + $0x168] sm:$0xff] %vm747_vm1, %v1438_v18  ;;  %1503 = vst.msk [vmem:[%s3560_s6 + $0x170] sm:$0xff] %vm747_vm1, %v1439_v37 }
 0x3d0   :  { %1504 = vst.msk [vmem:[%s3560_s6 + $0x178] sm:$0xff] %vm747_vm1, %v1440_v14  ;;  %1505 = vst.msk [vmem:[%s3560_s6 + $0x180] sm:$0xff] %vm747_vm1, %v1441_v26 }
 0x3d1   :  { %1506 = vst.msk [vmem:[%s3560_s6 + $0x188] sm:$0xff] %vm747_vm1, %v1442_v39  ;;  %1507 = vst.msk [vmem:[%s3560_s6 + $0x190] sm:$0xff] %vm747_vm1, %v1443_v40 }
 0x3d2   :  { %1508 = vst.msk [vmem:[%s3560_s6 + $0x198] sm:$0xff] %vm747_vm1, %v1444_v59  ;;  %1509 = vst.msk [vmem:[%s3560_s6 + $0x1a0] sm:$0xff] %vm747_vm1, %v1445_v52 }
 0x3d3   :  { %1510 = vst.msk [vmem:[%s3560_s6 + $0x1a8] sm:$0xff] %vm747_vm1, %v1446_v61  ;;  %1511 = vst.msk [vmem:[%s3560_s6 + $0x1b0] sm:$0xff] %vm747_vm1, %v1447_v16 }
 0x3d4   :  { %1512 = vst.msk [vmem:[%s3560_s6 + $0x1b8] sm:$0xff] %vm747_vm1, %v1448_v36  ;;  %1513 = vst.msk [vmem:[%s3560_s6 + $0x1c0] sm:$0xff] %vm747_vm1, %v1449_v6 }
 0x3d5   :  { %1514 = vst.msk [vmem:[%s3560_s6 + $0x1c8] sm:$0xff] %vm747_vm1, %v1450_v7  ;;  %1515 = vst.msk [vmem:[%s3560_s6 + $0x1d0] sm:$0xff] %vm747_vm1, %v1451_v22 }
 0x3d6   :  { %1516 = vst.msk [vmem:[%s3560_s6 + $0x1d8] sm:$0xff] %vm747_vm1, %v1452_v20  ;;  %1517 = vst.msk [vmem:[%s3560_s6 + $0x1e0] sm:$0xff] %vm747_vm1, %v1453_v42 }
 0x3d7   :  { %1518 = vst.msk [vmem:[%s3560_s6 + $0x1e8] sm:$0xff] %vm747_vm1, %v1454_v49  ;;  %1519 = vst.msk [vmem:[%s3560_s6 + $0x1f0] sm:$0xff] %vm747_vm1, %v1455_v15 }
 0x3d8   :  { %1520 = vst.msk [vmem:[%s3560_s6 + $0x1f8] sm:$0xff] %vm747_vm1, %v1456_v29 }

// kernel: forward.9
= control target key start
LH: loop header
LB: loop body
LE: loop exit
PB: predicated region body
PF: predicated region fallthrough
CT: control target
= control target key end

     0   :  { %vm276_vm0 = vcmask 588800   ;;  %vm2646_vm1 = vcmask 97280   ;;  %s6458_s1 = inlined_call_operand.vmem [shape: f32[72,12], index: 1, kind: input, shape index: {}]   ;;  %s6459_s0 = inlined_call_operand.vmem [shape: f32[2048,72], index: 0, kind: input, shape index: {}]   ;;  %s6460_s2 = inlined_call_operand.vmem [shape: f32[2048,12], index: 2, kind: output, shape index: {}]  }
   0x1   :  { %v267_v0 = vld [vmem:[%s6458_s1] sm:$0xff]  ;;  %v268_v1 = vld [vmem:[%s6458_s1 + $0x8] sm:$0xff]  ;;  %v269_v2 = vld [vmem:[%s6458_s1 + $0x10] sm:$0xff] }
   0x2   :  { %v3830_v3 = vpack.c.bf16 %v268_v1, %v267_v0  ;;  %v270_v4 = vld [vmem:[%s6458_s1 + $0x18] sm:$0xff]  ;;  %v271_v6 = vld [vmem:[%s6458_s1 + $0x20] sm:$0xff]  ;;  %v272_v7 = vld [vmem:[%s6458_s1 + $0x28] sm:$0xff] }
   0x3   :  { %v3834_v5 = vpack.c.bf16 %v270_v4, %v269_v2  ;;  %v11_v8 = vld [vmem:[%s6459_s0] sm:$0xff]  ;;  %v3838_v10 = vpack.c.bf16 %v272_v7, %v271_v6  ;;  %v273_v11 = vld [vmem:[%s6458_s1 + $0x30] sm:$0xff]  ;;  %v274_v12 = vld [vmem:[%s6458_s1 + $0x38] sm:$0xff] }
   0x4   :  { %3831 = vmatprep.subr.bf16.mxu0 %v3830_v3  ;;  %3846 = vmatprep.subr.bf16.mxu1 %v3830_v3  ;;  %v139_v9 = vld [vmem:[%s6459_s0 + $0x400] sm:$0xff]  ;;  %v3842_v13 = vpack.c.bf16 %v274_v12, %v273_v11  ;;  %v12_v15 = vld [vmem:[%s6459_s0 + $0x8] sm:$0xff]  ;;  %v13_v17 = vld [vmem:[%s6459_s0 + $0x10] sm:$0xff] }
   0x5   :  { %3833 = vmatpush3.bf16.msra.mxu0 %v3830_v3  ;;  %3851 = vmatpush3.bf16.msra.mxu1 %v3830_v3  ;;  %v275_v14 = vld [vmem:[%s6458_s1 + $0x40] sm:$0xff]  ;;  %v140_v16 = vld [vmem:[%s6459_s0 + $0x408] sm:$0xff]  ;;  %v141_v18 = vld [vmem:[%s6459_s0 + $0x410] sm:$0xff] }
   0x6   :  { %3835 = vmatprep.subr.bf16.mxu0 %v3834_v5  ;;  %3847 = vmatprep.subr.bf16.mxu1 %v3834_v5  ;;  %v14_v19 = vld [vmem:[%s6459_s0 + $0x18] sm:$0xff]  ;;  %v15_v21 = vld [vmem:[%s6459_s0 + $0x20] sm:$0xff]  ;;  %v16_v23 = vld [vmem:[%s6459_s0 + $0x28] sm:$0xff] }
   0x7   :  { %3446 = vmatprep.mubr.msk.f32.mxu0 %vm276_vm0, %v11_v8  ;;  %3638 = vmatprep.mubr.msk.f32.mxu1 %vm276_vm0, %v139_v9  ;;  %v142_v20 = vld [vmem:[%s6459_s0 + $0x418] sm:$0xff]  ;;  %v143_v22 = vld [vmem:[%s6459_s0 + $0x420] sm:$0xff]  ;;  %v144_v24 = vld [vmem:[%s6459_s0 + $0x428] sm:$0xff] }
   0x8   :  { %v17_v25 = vld [vmem:[%s6459_s0 + $0x30] sm:$0xff]  ;;  %v18_v27 = vld [vmem:[%s6459_s0 + $0x38] sm:$0xff]  ;;  %v19_v29 = vld [vmem:[%s6459_s0 + $0x40] sm:$0xff] }
   0x9   :  { %3837 = vmatpush3.bf16.msra.mxu0 %v3834_v5  ;;  %3852 = vmatpush3.bf16.msra.mxu1 %v3834_v5  ;;  %v145_v26 = vld [vmem:[%s6459_s0 + $0x430] sm:$0xff]  ;;  %v146_v28 = vld [vmem:[%s6459_s0 + $0x438] sm:$0xff]  ;;  %v147_v30 = vld [vmem:[%s6459_s0 + $0x440] sm:$0xff] }
   0xa   :  { %3839 = vmatprep.subr.bf16.mxu0 %v3838_v10  ;;  %3848 = vmatprep.subr.bf16.mxu1 %v3838_v10  ;;  %v20_v31 = vld [vmem:[%s6459_s0 + $0x48] sm:$0xff]  ;;  %v21_v33 = vld [vmem:[%s6459_s0 + $0x50] sm:$0xff]  ;;  %v22_v35 = vld [vmem:[%s6459_s0 + $0x58] sm:$0xff] }
   0xb   :  { %v148_v32 = vld [vmem:[%s6459_s0 + $0x448] sm:$0xff]  ;;  %v149_v34 = vld [vmem:[%s6459_s0 + $0x450] sm:$0xff]  ;;  %v150_v36 = vld [vmem:[%s6459_s0 + $0x458] sm:$0xff] }
   0xc   :  { %v23_v37 = vld [vmem:[%s6459_s0 + $0x60] sm:$0xff]  ;;  %v24_v39 = vld [vmem:[%s6459_s0 + $0x68] sm:$0xff]  ;;  %v25_v41 = vld [vmem:[%s6459_s0 + $0x70] sm:$0xff] }
   0xd   :  { %3841 = vmatpush3.bf16.msra.mxu0 %v3838_v10  ;;  %3853 = vmatpush3.bf16.msra.mxu1 %v3838_v10  ;;  %v151_v38 = vld [vmem:[%s6459_s0 + $0x460] sm:$0xff]  ;;  %v152_v40 = vld [vmem:[%s6459_s0 + $0x468] sm:$0xff]  ;;  %v153_v42 = vld [vmem:[%s6459_s0 + $0x470] sm:$0xff] }
   0xe   :  { %3843 = vmatprep.subr.bf16.mxu0 %v3842_v13  ;;  %3849 = vmatprep.subr.bf16.mxu1 %v3842_v13  ;;  %v26_v43 = vld [vmem:[%s6459_s0 + $0x78] sm:$0xff]  ;;  %v27_v45 = vld [vmem:[%s6459_s0 + $0x80] sm:$0xff]  ;;  %v28_v47 = vld [vmem:[%s6459_s0 + $0x88] sm:$0xff] }
   0xf   :  { %v154_v44 = vld [vmem:[%s6459_s0 + $0x478] sm:$0xff]  ;;  %v155_v46 = vld [vmem:[%s6459_s0 + $0x480] sm:$0xff]  ;;  %v156_v48 = vld [vmem:[%s6459_s0 + $0x488] sm:$0xff] }
  0x10   :  { %v29_v49 = vld [vmem:[%s6459_s0 + $0x90] sm:$0xff]  ;;  %v30_v51 = vld [vmem:[%s6459_s0 + $0x98] sm:$0xff]  ;;  %v31_v53 = vld [vmem:[%s6459_s0 + $0xa0] sm:$0xff] }
  0x11   :  { %3845 = vmatpush3.bf16.msra.mxu0 %v3842_v13  ;;  %3854 = vmatpush3.bf16.msra.mxu1 %v3842_v13  ;;  %v157_v50 = vld [vmem:[%s6459_s0 + $0x490] sm:$0xff]  ;;  %v158_v52 = vld [vmem:[%s6459_s0 + $0x498] sm:$0xff]  ;;  %v159_v54 = vld [vmem:[%s6459_s0 + $0x4a0] sm:$0xff] }
  0x12   :  { %3444 = vmatprep.subr.mxu0 %v275_v14  ;;  %3850 = vmatprep.subr.mxu1 %v275_v14  ;;  %v32_v55 = vld [vmem:[%s6459_s0 + $0xa8] sm:$0xff]  ;;  %v33_v57 = vld [vmem:[%s6459_s0 + $0xb0] sm:$0xff]  ;;  %v34_v59 = vld [vmem:[%s6459_s0 + $0xb8] sm:$0xff] }
  0x13   :  { %v160_v56 = vld [vmem:[%s6459_s0 + $0x4a8] sm:$0xff]  ;;  %v161_v58 = vld [vmem:[%s6459_s0 + $0x4b0] sm:$0xff]  ;;  %v162_v60 = vld [vmem:[%s6459_s0 + $0x4b8] sm:$0xff] }
  0x14   :  { %v35_v61 = vld [vmem:[%s6459_s0 + $0xc0] sm:$0xff]  ;;  %v36_v63 = vld [vmem:[%s6459_s0 + $0xc8] sm:$0xff]  ;;  %v37_v1 = vld [vmem:[%s6459_s0 + $0xd0] sm:$0xff] }
  0x15   :  { %3445 = vmatpush3.msra.mxu0 %v275_v14  ;;  %3855 = vmatpush3.msra.mxu1 %v275_v14  ;;  %v163_v62 = vld [vmem:[%s6459_s0 + $0x4c0] sm:$0xff]  ;;  %v164_v0 = vld [vmem:[%s6459_s0 + $0x4c8] sm:$0xff]  ;;  %v165_v2 = vld [vmem:[%s6459_s0 + $0x4d0] sm:$0xff] }
  0x16   :  { %3447 = vmatmul.mubr.msk.f32.vlgmr.msra.gmra.mrb[0].mxu0 %vm276_vm0, %v12_v15  ;;  %3639 = vmatmul.mubr.msk.f32.vlgmr.msra.gmra.mrb[0].mxu1 %vm276_vm0, %v140_v16  ;;  %v38_v3 = vld [vmem:[%s6459_s0 + $0xd8] sm:$0xff]  ;;  %v39_v5 = vld [vmem:[%s6459_s0 + $0xe0] sm:$0xff]  ;;  %v40_v7 = vld [vmem:[%s6459_s0 + $0xe8] sm:$0xff] }
  0x17   :  { %3449 = vmatprep.mubr.msk.f32.mxu0 %vm276_vm0, %v13_v17  ;;  %3641 = vmatprep.mubr.msk.f32.mxu1 %vm276_vm0, %v141_v18  ;;  %v166_v4 = vld [vmem:[%s6459_s0 + $0x4d8] sm:$0xff]  ;;  %v167_v6 = vld [vmem:[%s6459_s0 + $0x4e0] sm:$0xff]  ;;  %v168_v8 = vld [vmem:[%s6459_s0 + $0x4e8] sm:$0xff] }
  0x18   :  { %v41_v9 = vld [vmem:[%s6459_s0 + $0xf0] sm:$0xff]  ;;  %v42_v11 = vld [vmem:[%s6459_s0 + $0xf8] sm:$0xff]  ;;  %v43_v13 = vld [vmem:[%s6459_s0 + $0x100] sm:$0xff] }
  0x19   :  { %v169_v10 = vld [vmem:[%s6459_s0 + $0x4f0] sm:$0xff]  ;;  %v170_v12 = vld [vmem:[%s6459_s0 + $0x4f8] sm:$0xff]  ;;  %v171_v14 = vld [vmem:[%s6459_s0 + $0x500] sm:$0xff] }
  0x1a   :  { %3450 = vmatmul.mubr.msk.f32.gmra.mrb[2].mxu0 %vm276_vm0, %v14_v19  ;;  %3642 = vmatmul.mubr.msk.f32.gmra.mrb[2].mxu1 %vm276_vm0, %v142_v20  ;;  %v44_v15 = vld [vmem:[%s6459_s0 + $0x108] sm:$0xff]  ;;  %v45_v17 = vld [vmem:[%s6459_s0 + $0x110] sm:$0xff]  ;;  %v46_v19 = vld [vmem:[%s6459_s0 + $0x118] sm:$0xff] }
  0x1b   :  { %3452 = vmatprep.mubr.msk.f32.mxu0 %vm276_vm0, %v15_v21  ;;  %3644 = vmatprep.mubr.msk.f32.mxu1 %vm276_vm0, %v143_v22  ;;  %v172_v16 = vld [vmem:[%s6459_s0 + $0x508] sm:$0xff]  ;;  %v173_v18 = vld [vmem:[%s6459_s0 + $0x510] sm:$0xff]  ;;  %v174_v20 = vld [vmem:[%s6459_s0 + $0x518] sm:$0xff] }
  0x1c   :  { %v47_v21 = vld [vmem:[%s6459_s0 + $0x120] sm:$0xff] }
  0x1d   :  { %v175_v22 = vld [vmem:[%s6459_s0 + $0x520] sm:$0xff] }
  0x1e   :  { %3453 = vmatmul.mubr.msk.f32.gmra.mrb[4].mxu0 %vm276_vm0, %v16_v23  ;;  %3645 = vmatmul.mubr.msk.f32.gmra.mrb[4].mxu1 %vm276_vm0, %v144_v24  ;;  %v48_v23 = vld [vmem:[%s6459_s0 + $0x128] sm:$0xff] }
  0x1f   :  { %3455 = vmatprep.mubr.msk.f32.mxu0 %vm276_vm0, %v17_v25  ;;  %3647 = vmatprep.mubr.msk.f32.mxu1 %vm276_vm0, %v145_v26  ;;  %v176_v24 = vld [vmem:[%s6459_s0 + $0x528] sm:$0xff]  ;;  %v49_v25 = vld [vmem:[%s6459_s0 + $0x130] sm:$0xff] }
  0x20   :  { %v177_v26 = vld [vmem:[%s6459_s0 + $0x530] sm:$0xff] }
  0x22   :  { %3456 = vmatmul.mubr.msk.f32.gmra.mrb[6].mxu0 %vm276_vm0, %v18_v27  ;;  %3648 = vmatmul.mubr.msk.f32.gmra.mrb[6].mxu1 %vm276_vm0, %v146_v28  ;;  %v50_v27 = vld [vmem:[%s6459_s0 + $0x138] sm:$0xff] }
  0x23   :  { %3458 = vmatprep.mubr.msk.f32.mxu0 %vm276_vm0, %v19_v29  ;;  %3650 = vmatprep.mubr.msk.f32.mxu1 %vm276_vm0, %v147_v30  ;;  %v178_v28 = vld [vmem:[%s6459_s0 + $0x538] sm:$0xff]  ;;  %v51_v29 = vld [vmem:[%s6459_s0 + $0x140] sm:$0xff] }
  0x24   :  { %v179_v30 = vld [vmem:[%s6459_s0 + $0x540] sm:$0xff] }
  0x26   :  { %3459 = vmatmul.mubr.msk.f32.gmra.mrb[8].mxu0 %vm276_vm0, %v20_v31  ;;  %3651 = vmatmul.mubr.msk.f32.gmra.mrb[8].mxu1 %vm276_vm0, %v148_v32  ;;  %v52_v31 = vld [vmem:[%s6459_s0 + $0x148] sm:$0xff] }
  0x27   :  { %3461 = vmatprep.mubr.msk.f32.mxu0 %vm276_vm0, %v21_v33  ;;  %3653 = vmatprep.mubr.msk.f32.mxu1 %vm276_vm0, %v149_v34  ;;  %v180_v32 = vld [vmem:[%s6459_s0 + $0x548] sm:$0xff]  ;;  %v53_v33 = vld [vmem:[%s6459_s0 + $0x150] sm:$0xff] }
  0x28   :  { %v181_v34 = vld [vmem:[%s6459_s0 + $0x550] sm:$0xff] }
  0x2a   :  { %3462 = vmatmul.mubr.msk.f32.gmra.mrb[10].mxu0 %vm276_vm0, %v22_v35  ;;  %3654 = vmatmul.mubr.msk.f32.gmra.mrb[10].mxu1 %vm276_vm0, %v150_v36  ;;  %v54_v35 = vld [vmem:[%s6459_s0 + $0x158] sm:$0xff] }
  0x2b   :  { %3464 = vmatprep.mubr.msk.f32.mxu0 %vm276_vm0, %v23_v37  ;;  %3656 = vmatprep.mubr.msk.f32.mxu1 %vm276_vm0, %v151_v38  ;;  %v182_v36 = vld [vmem:[%s6459_s0 + $0x558] sm:$0xff]  ;;  %v55_v37 = vld [vmem:[%s6459_s0 + $0x160] sm:$0xff] }
  0x2c   :  { %v183_v38 = vld [vmem:[%s6459_s0 + $0x560] sm:$0xff] }
  0x2e   :  { %3465 = vmatmul.mubr.msk.f32.gmra.mrb[12].mxu0 %vm276_vm0, %v24_v39  ;;  %3657 = vmatmul.mubr.msk.f32.gmra.mrb[12].mxu1 %vm276_vm0, %v152_v40  ;;  %v56_v39 = vld [vmem:[%s6459_s0 + $0x168] sm:$0xff] }
  0x2f   :  { %3467 = vmatprep.mubr.msk.f32.mxu0 %vm276_vm0, %v25_v41  ;;  %3659 = vmatprep.mubr.msk.f32.mxu1 %vm276_vm0, %v153_v42  ;;  %v184_v40 = vld [vmem:[%s6459_s0 + $0x568] sm:$0xff]  ;;  %v57_v41 = vld [vmem:[%s6459_s0 + $0x170] sm:$0xff] }
  0x30   :  { %v185_v42 = vld [vmem:[%s6459_s0 + $0x570] sm:$0xff] }
  0x32   :  { %3468 = vmatmul.mubr.msk.f32.gmra.mrb[14].mxu0 %vm276_vm0, %v26_v43  ;;  %3660 = vmatmul.mubr.msk.f32.gmra.mrb[14].mxu1 %vm276_vm0, %v154_v44  ;;  %v58_v43 = vld [vmem:[%s6459_s0 + $0x178] sm:$0xff] }
  0x33   :  { %3470 = vmatprep.mubr.msk.f32.mxu0 %vm276_vm0, %v27_v45  ;;  %3662 = vmatprep.mubr.msk.f32.mxu1 %vm276_vm0, %v155_v46  ;;  %v186_v44 = vld [vmem:[%s6459_s0 + $0x578] sm:$0xff]  ;;  %v59_v45 = vld [vmem:[%s6459_s0 + $0x180] sm:$0xff] }
  0x34   :  { %v187_v46 = vld [vmem:[%s6459_s0 + $0x580] sm:$0xff] }
  0x36   :  { %3471 = vmatmul.mubr.msk.f32.gmra.mrb[16].mxu0 %vm276_vm0, %v28_v47  ;;  %3663 = vmatmul.mubr.msk.f32.gmra.mrb[16].mxu1 %vm276_vm0, %v156_v48  ;;  %v60_v47 = vld [vmem:[%s6459_s0 + $0x188] sm:$0xff] }
  0x37   :  { %3473 = vmatprep.mubr.msk.f32.mxu0 %vm276_vm0, %v29_v49  ;;  %3665 = vmatprep.mubr.msk.f32.mxu1 %vm276_vm0, %v157_v50  ;;  %v188_v48 = vld [vmem:[%s6459_s0 + $0x588] sm:$0xff]  ;;  %v61_v49 = vld [vmem:[%s6459_s0 + $0x190] sm:$0xff] }
  0x38   :  { %v189_v50 = vld [vmem:[%s6459_s0 + $0x590] sm:$0xff] }
  0x3a   :  { %3474 = vmatmul.mubr.msk.f32.gmra.mrb[18].mxu0 %vm276_vm0, %v30_v51  ;;  %3666 = vmatmul.mubr.msk.f32.gmra.mrb[18].mxu1 %vm276_vm0, %v158_v52  ;;  %v62_v51 = vld [vmem:[%s6459_s0 + $0x198] sm:$0xff] }
  0x3b   :  { %3476 = vmatprep.mubr.msk.f32.mxu0 %vm276_vm0, %v31_v53  ;;  %3668 = vmatprep.mubr.msk.f32.mxu1 %vm276_vm0, %v159_v54  ;;  %v190_v52 = vld [vmem:[%s6459_s0 + $0x598] sm:$0xff]  ;;  %v63_v53 = vld [vmem:[%s6459_s0 + $0x1a0] sm:$0xff] }
  0x3c   :  { %v191_v54 = vld [vmem:[%s6459_s0 + $0x5a0] sm:$0xff] }
  0x3e   :  { %3477 = vmatmul.mubr.msk.f32.gmra.mrb[20].mxu0 %vm276_vm0, %v32_v55  ;;  %3669 = vmatmul.mubr.msk.f32.gmra.mrb[20].mxu1 %vm276_vm0, %v160_v56  ;;  %v64_v55 = vld [vmem:[%s6459_s0 + $0x1a8] sm:$0xff] }
  0x3f   :  { %3479 = vmatprep.mubr.msk.f32.mxu0 %vm276_vm0, %v33_v57  ;;  %3671 = vmatprep.mubr.msk.f32.mxu1 %vm276_vm0, %v161_v58  ;;  %v192_v56 = vld [vmem:[%s6459_s0 + $0x5a8] sm:$0xff]  ;;  %v65_v57 = vld [vmem:[%s6459_s0 + $0x1b0] sm:$0xff] }
  0x40   :  { %v193_v58 = vld [vmem:[%s6459_s0 + $0x5b0] sm:$0xff] }
  0x42   :  { %3480 = vmatmul.mubr.msk.f32.gmra.mrb[22].mxu0 %vm276_vm0, %v34_v59  ;;  %3672 = vmatmul.mubr.msk.f32.gmra.mrb[22].mxu1 %vm276_vm0, %v162_v60  ;;  %v66_v59 = vld [vmem:[%s6459_s0 + $0x1b8] sm:$0xff] }
  0x43   :  { %3482 = vmatprep.mubr.msk.f32.mxu0 %vm276_vm0, %v35_v61  ;;  %3674 = vmatprep.mubr.msk.f32.mxu1 %vm276_vm0, %v163_v62  ;;  %v194_v60 = vld [vmem:[%s6459_s0 + $0x5b8] sm:$0xff]  ;;  %v67_v61 = vld [vmem:[%s6459_s0 + $0x1c0] sm:$0xff] }
  0x44   :  { %v195_v62 = vld [vmem:[%s6459_s0 + $0x5c0] sm:$0xff] }
  0x46   :  { %3483 = vmatmul.mubr.msk.f32.gmra.mrb[24].mxu0 %vm276_vm0, %v36_v63  ;;  %3675 = vmatmul.mubr.msk.f32.gmra.mrb[24].mxu1 %vm276_vm0, %v164_v0  ;;  %v68_v63 = vld [vmem:[%s6459_s0 + $0x1c8] sm:$0xff] }
  0x47   :  { %3485 = vmatprep.mubr.msk.f32.mxu0 %vm276_vm0, %v37_v1  ;;  %3677 = vmatprep.mubr.msk.f32.mxu1 %vm276_vm0, %v165_v2  ;;  %v196_v0 = vld [vmem:[%s6459_s0 + $0x5c8] sm:$0xff]  ;;  %v69_v1 = vld [vmem:[%s6459_s0 + $0x1d0] sm:$0xff] }
  0x48   :  { %v197_v2 = vld [vmem:[%s6459_s0 + $0x5d0] sm:$0xff] }
  0x4a   :  { %3486 = vmatmul.mubr.msk.f32.gmra.mrb[26].mxu0 %vm276_vm0, %v38_v3  ;;  %3678 = vmatmul.mubr.msk.f32.gmra.mrb[26].mxu1 %vm276_vm0, %v166_v4  ;;  %v70_v3 = vld [vmem:[%s6459_s0 + $0x1d8] sm:$0xff] }
  0x4b   :  { %3488 = vmatprep.mubr.msk.f32.mxu0 %vm276_vm0, %v39_v5  ;;  %3680 = vmatprep.mubr.msk.f32.mxu1 %vm276_vm0, %v167_v6  ;;  %v198_v4 = vld [vmem:[%s6459_s0 + $0x5d8] sm:$0xff]  ;;  %v71_v5 = vld [vmem:[%s6459_s0 + $0x1e0] sm:$0xff] }
  0x4c   :  { %v199_v6 = vld [vmem:[%s6459_s0 + $0x5e0] sm:$0xff] }
  0x4e   :  { %3489 = vmatmul.mubr.msk.f32.gmra.mrb[28].mxu0 %vm276_vm0, %v40_v7  ;;  %3681 = vmatmul.mubr.msk.f32.gmra.mrb[28].mxu1 %vm276_vm0, %v168_v8  ;;  %v72_v7 = vld [vmem:[%s6459_s0 + $0x1e8] sm:$0xff] }
  0x4f   :  { %3491 = vmatprep.mubr.msk.f32.mxu0 %vm276_vm0, %v41_v9  ;;  %3683 = vmatprep.mubr.msk.f32.mxu1 %vm276_vm0, %v169_v10  ;;  %v200_v8 = vld [vmem:[%s6459_s0 + $0x5e8] sm:$0xff]  ;;  %v73_v9 = vld [vmem:[%s6459_s0 + $0x1f0] sm:$0xff] }
  0x50   :  { %v201_v10 = vld [vmem:[%s6459_s0 + $0x5f0] sm:$0xff] }
  0x52   :  { %3492 = vmatmul.mubr.msk.f32.gmra.mrb[30].mxu0 %vm276_vm0, %v42_v11  ;;  %3684 = vmatmul.mubr.msk.f32.gmra.mrb[30].mxu1 %vm276_vm0, %v170_v12  ;;  %v74_v11 = vld [vmem:[%s6459_s0 + $0x1f8] sm:$0xff] }
  0x53   :  { %3494 = vmatprep.mubr.msk.f32.mxu0 %vm276_vm0, %v43_v13  ;;  %3686 = vmatprep.mubr.msk.f32.mxu1 %vm276_vm0, %v171_v14  ;;  %v202_v12 = vld [vmem:[%s6459_s0 + $0x5f8] sm:$0xff]  ;;  %v75_v13 = vld [vmem:[%s6459_s0 + $0x200] sm:$0xff] }
  0x54   :  { %v203_v14 = vld [vmem:[%s6459_s0 + $0x600] sm:$0xff] }
  0x56   :  { %3495 = vmatmul.mubr.msk.f32.gmra.mrb[32].mxu0 %vm276_vm0, %v44_v15  ;;  %3687 = vmatmul.mubr.msk.f32.gmra.mrb[32].mxu1 %vm276_vm0, %v172_v16  ;;  %v76_v15 = vld [vmem:[%s6459_s0 + $0x208] sm:$0xff] }
  0x57   :  { %3497 = vmatprep.mubr.msk.f32.mxu0 %vm276_vm0, %v45_v17  ;;  %3689 = vmatprep.mubr.msk.f32.mxu1 %vm276_vm0, %v173_v18  ;;  %v204_v16 = vld [vmem:[%s6459_s0 + $0x608] sm:$0xff]  ;;  %v77_v17 = vld [vmem:[%s6459_s0 + $0x210] sm:$0xff] }
  0x58   :  { %v205_v18 = vld [vmem:[%s6459_s0 + $0x610] sm:$0xff] }
  0x5a   :  { %3498 = vmatmul.mubr.msk.f32.gmra.mrb[34].mxu0 %vm276_vm0, %v46_v19  ;;  %3690 = vmatmul.mubr.msk.f32.gmra.mrb[34].mxu1 %vm276_vm0, %v174_v20  ;;  %v78_v19 = vld [vmem:[%s6459_s0 + $0x218] sm:$0xff] }
  0x5b   :  { %3500 = vmatprep.mubr.msk.f32.mxu0 %vm276_vm0, %v47_v21  ;;  %3692 = vmatprep.mubr.msk.f32.mxu1 %vm276_vm0, %v175_v22  ;;  %v206_v20 = vld [vmem:[%s6459_s0 + $0x618] sm:$0xff]  ;;  %v79_v21 = vld [vmem:[%s6459_s0 + $0x220] sm:$0xff] }
  0x5c   :  { %v207_v22 = vld [vmem:[%s6459_s0 + $0x620] sm:$0xff] }
  0x5e   :  { %3501 = vmatmul.mubr.msk.f32.gmra.mrb[36].mxu0 %vm276_vm0, %v48_v23  ;;  %3693 = vmatmul.mubr.msk.f32.gmra.mrb[36].mxu1 %vm276_vm0, %v176_v24  ;;  %v80_v23 = vld [vmem:[%s6459_s0 + $0x228] sm:$0xff] }
  0x5f   :  { %3503 = vmatprep.mubr.msk.f32.mxu0 %vm276_vm0, %v49_v25  ;;  %3695 = vmatprep.mubr.msk.f32.mxu1 %vm276_vm0, %v177_v26  ;;  %v208_v24 = vld [vmem:[%s6459_s0 + $0x628] sm:$0xff]  ;;  %v81_v25 = vld [vmem:[%s6459_s0 + $0x230] sm:$0xff] }
  0x60   :  { %v209_v26 = vld [vmem:[%s6459_s0 + $0x630] sm:$0xff] }
  0x62   :  { %3504 = vmatmul.mubr.msk.f32.gmra.mrb[38].mxu0 %vm276_vm0, %v50_v27  ;;  %3696 = vmatmul.mubr.msk.f32.gmra.mrb[38].mxu1 %vm276_vm0, %v178_v28  ;;  %v82_v27 = vld [vmem:[%s6459_s0 + $0x238] sm:$0xff] }
  0x63   :  { %3506 = vmatprep.mubr.msk.f32.mxu0 %vm276_vm0, %v51_v29  ;;  %3698 = vmatprep.mubr.msk.f32.mxu1 %vm276_vm0, %v179_v30  ;;  %v210_v28 = vld [vmem:[%s6459_s0 + $0x638] sm:$0xff]  ;;  %v83_v29 = vld [vmem:[%s6459_s0 + $0x240] sm:$0xff] }
  0x64   :  { %v211_v30 = vld [vmem:[%s6459_s0 + $0x640] sm:$0xff] }
  0x66   :  { %3507 = vmatmul.mubr.msk.f32.gmra.mrb[40].mxu0 %vm276_vm0, %v52_v31  ;;  %3699 = vmatmul.mubr.msk.f32.gmra.mrb[40].mxu1 %vm276_vm0, %v180_v32  ;;  %v84_v31 = vld [vmem:[%s6459_s0 + $0x248] sm:$0xff] }
  0x67   :  { %3509 = vmatprep.mubr.msk.f32.mxu0 %vm276_vm0, %v53_v33  ;;  %3701 = vmatprep.mubr.msk.f32.mxu1 %vm276_vm0, %v181_v34  ;;  %v212_v32 = vld [vmem:[%s6459_s0 + $0x648] sm:$0xff]  ;;  %v85_v33 = vld [vmem:[%s6459_s0 + $0x250] sm:$0xff] }
  0x68   :  { %v213_v34 = vld [vmem:[%s6459_s0 + $0x650] sm:$0xff] }
  0x6a   :  { %3510 = vmatmul.mubr.msk.f32.gmra.mrb[42].mxu0 %vm276_vm0, %v54_v35  ;;  %3702 = vmatmul.mubr.msk.f32.gmra.mrb[42].mxu1 %vm276_vm0, %v182_v36  ;;  %v86_v35 = vld [vmem:[%s6459_s0 + $0x258] sm:$0xff] }
  0x6b   :  { %3512 = vmatprep.mubr.msk.f32.mxu0 %vm276_vm0, %v55_v37  ;;  %3704 = vmatprep.mubr.msk.f32.mxu1 %vm276_vm0, %v183_v38  ;;  %v214_v36 = vld [vmem:[%s6459_s0 + $0x658] sm:$0xff]  ;;  %v87_v37 = vld [vmem:[%s6459_s0 + $0x260] sm:$0xff] }
  0x6c   :  { %v215_v38 = vld [vmem:[%s6459_s0 + $0x660] sm:$0xff] }
  0x6e   :  { %3513 = vmatmul.mubr.msk.f32.gmra.mrb[44].mxu0 %vm276_vm0, %v56_v39  ;;  %3705 = vmatmul.mubr.msk.f32.gmra.mrb[44].mxu1 %vm276_vm0, %v184_v40  ;;  %v88_v39 = vld [vmem:[%s6459_s0 + $0x268] sm:$0xff] }
  0x6f   :  { %3515 = vmatprep.mubr.msk.f32.mxu0 %vm276_vm0, %v57_v41  ;;  %3707 = vmatprep.mubr.msk.f32.mxu1 %vm276_vm0, %v185_v42  ;;  %v216_v40 = vld [vmem:[%s6459_s0 + $0x668] sm:$0xff]  ;;  %v89_v41 = vld [vmem:[%s6459_s0 + $0x270] sm:$0xff] }
  0x70   :  { %v217_v42 = vld [vmem:[%s6459_s0 + $0x670] sm:$0xff] }
  0x72   :  { %3516 = vmatmul.mubr.msk.f32.gmra.mrb[46].mxu0 %vm276_vm0, %v58_v43  ;;  %3708 = vmatmul.mubr.msk.f32.gmra.mrb[46].mxu1 %vm276_vm0, %v186_v44  ;;  %v90_v43 = vld [vmem:[%s6459_s0 + $0x278] sm:$0xff] }
  0x73   :  { %3518 = vmatprep.mubr.msk.f32.mxu0 %vm276_vm0, %v59_v45  ;;  %3710 = vmatprep.mubr.msk.f32.mxu1 %vm276_vm0, %v187_v46  ;;  %v218_v44 = vld [vmem:[%s6459_s0 + $0x678] sm:$0xff]  ;;  %v91_v45 = vld [vmem:[%s6459_s0 + $0x280] sm:$0xff] }
  0x74   :  { %v219_v46 = vld [vmem:[%s6459_s0 + $0x680] sm:$0xff] }
  0x76   :  { %3519 = vmatmul.mubr.msk.f32.gmra.mrb[48].mxu0 %vm276_vm0, %v60_v47  ;;  %3711 = vmatmul.mubr.msk.f32.gmra.mrb[48].mxu1 %vm276_vm0, %v188_v48  ;;  %v92_v47 = vld [vmem:[%s6459_s0 + $0x288] sm:$0xff] }
  0x77   :  { %3521 = vmatprep.mubr.msk.f32.mxu0 %vm276_vm0, %v61_v49  ;;  %3713 = vmatprep.mubr.msk.f32.mxu1 %vm276_vm0, %v189_v50  ;;  %v220_v48 = vld [vmem:[%s6459_s0 + $0x688] sm:$0xff]  ;;  %v93_v49 = vld [vmem:[%s6459_s0 + $0x290] sm:$0xff] }
  0x78   :  { %v221_v50 = vld [vmem:[%s6459_s0 + $0x690] sm:$0xff] }
  0x7a   :  { %3522 = vmatmul.mubr.msk.f32.gmra.mrb[50].mxu0 %vm276_vm0, %v62_v51  ;;  %3714 = vmatmul.mubr.msk.f32.gmra.mrb[50].mxu1 %vm276_vm0, %v190_v52  ;;  %v94_v51 = vld [vmem:[%s6459_s0 + $0x298] sm:$0xff] }
  0x7b   :  { %3524 = vmatprep.mubr.msk.f32.mxu0 %vm276_vm0, %v63_v53  ;;  %3716 = vmatprep.mubr.msk.f32.mxu1 %vm276_vm0, %v191_v54  ;;  %v222_v52 = vld [vmem:[%s6459_s0 + $0x698] sm:$0xff]  ;;  %v95_v53 = vld [vmem:[%s6459_s0 + $0x2a0] sm:$0xff] }
  0x7c   :  { %v223_v54 = vld [vmem:[%s6459_s0 + $0x6a0] sm:$0xff] }
  0x7e   :  { %3525 = vmatmul.mubr.msk.f32.gmra.mrb[52].mxu0 %vm276_vm0, %v64_v55  ;;  %3717 = vmatmul.mubr.msk.f32.gmra.mrb[52].mxu1 %vm276_vm0, %v192_v56  ;;  %v96_v55 = vld [vmem:[%s6459_s0 + $0x2a8] sm:$0xff] }
  0x7f   :  { %3527 = vmatprep.mubr.msk.f32.mxu0 %vm276_vm0, %v65_v57  ;;  %3719 = vmatprep.mubr.msk.f32.mxu1 %vm276_vm0, %v193_v58  ;;  %v224_v56 = vld [vmem:[%s6459_s0 + $0x6a8] sm:$0xff]  ;;  %v97_v57 = vld [vmem:[%s6459_s0 + $0x2b0] sm:$0xff] }
  0x80   :  { %v225_v58 = vld [vmem:[%s6459_s0 + $0x6b0] sm:$0xff] }
  0x82   :  { %3528 = vmatmul.mubr.msk.f32.gmra.mrb[54].mxu0 %vm276_vm0, %v66_v59  ;;  %3720 = vmatmul.mubr.msk.f32.gmra.mrb[54].mxu1 %vm276_vm0, %v194_v60  ;;  %v98_v59 = vld [vmem:[%s6459_s0 + $0x2b8] sm:$0xff] }
  0x83   :  { %3530 = vmatprep.mubr.msk.f32.mxu0 %vm276_vm0, %v67_v61  ;;  %3722 = vmatprep.mubr.msk.f32.mxu1 %vm276_vm0, %v195_v62  ;;  %v226_v60 = vld [vmem:[%s6459_s0 + $0x6b8] sm:$0xff]  ;;  %v99_v61 = vld [vmem:[%s6459_s0 + $0x2c0] sm:$0xff] }
  0x84   :  { %v227_v62 = vld [vmem:[%s6459_s0 + $0x6c0] sm:$0xff] }
  0x86   :  { %3531 = vmatmul.mubr.msk.f32.gmra.mrb[56].mxu0 %vm276_vm0, %v68_v63  ;;  %3723 = vmatmul.mubr.msk.f32.gmra.mrb[56].mxu1 %vm276_vm0, %v196_v0  ;;  %v100_v63 = vld [vmem:[%s6459_s0 + $0x2c8] sm:$0xff] }
  0x87   :  { %3533 = vmatprep.mubr.msk.f32.mxu0 %vm276_vm0, %v69_v1  ;;  %3725 = vmatprep.mubr.msk.f32.mxu1 %vm276_vm0, %v197_v2  ;;  %v228_v0 = vld [vmem:[%s6459_s0 + $0x6c8] sm:$0xff]  ;;  %v101_v1 = vld [vmem:[%s6459_s0 + $0x2d0] sm:$0xff] }
  0x88   :  { %v229_v2 = vld [vmem:[%s6459_s0 + $0x6d0] sm:$0xff] }
  0x8a   :  { %3534 = vmatmul.mubr.msk.f32.gmra.mrb[58].mxu0 %vm276_vm0, %v70_v3  ;;  %3726 = vmatmul.mubr.msk.f32.gmra.mrb[58].mxu1 %vm276_vm0, %v198_v4  ;;  %v102_v3 = vld [vmem:[%s6459_s0 + $0x2d8] sm:$0xff] }
  0x8b   :  { %3536 = vmatprep.mubr.msk.f32.mxu0 %vm276_vm0, %v71_v5  ;;  %3728 = vmatprep.mubr.msk.f32.mxu1 %vm276_vm0, %v199_v6  ;;  %v230_v4 = vld [vmem:[%s6459_s0 + $0x6d8] sm:$0xff]  ;;  %v103_v5 = vld [vmem:[%s6459_s0 + $0x2e0] sm:$0xff] }
  0x8c   :  { %v231_v6 = vld [vmem:[%s6459_s0 + $0x6e0] sm:$0xff] }
  0x8e   :  { %3537 = vmatmul.mubr.msk.f32.gmra.mrb[60].mxu0 %vm276_vm0, %v72_v7  ;;  %3729 = vmatmul.mubr.msk.f32.gmra.mrb[60].mxu1 %vm276_vm0, %v200_v8  ;;  %v104_v7 = vld [vmem:[%s6459_s0 + $0x2e8] sm:$0xff] }
  0x8f   :  { %3539 = vmatprep.mubr.msk.f32.mxu0 %vm276_vm0, %v73_v9  ;;  %3731 = vmatprep.mubr.msk.f32.mxu1 %vm276_vm0, %v201_v10  ;;  %v232_v8 = vld [vmem:[%s6459_s0 + $0x6e8] sm:$0xff]  ;;  %v105_v9 = vld [vmem:[%s6459_s0 + $0x2f0] sm:$0xff] }
  0x90   :  { %v233_v10 = vld [vmem:[%s6459_s0 + $0x6f0] sm:$0xff] }
  0x92   :  { %3540 = vmatmul.mubr.msk.f32.gmra.mrb[62].mxu0 %vm276_vm0, %v74_v11  ;;  %3732 = vmatmul.mubr.msk.f32.gmra.mrb[62].mxu1 %vm276_vm0, %v202_v12  ;;  %v106_v11 = vld [vmem:[%s6459_s0 + $0x2f8] sm:$0xff] }
  0x93   :  { %3542 = vmatprep.mubr.msk.f32.mxu0 %vm276_vm0, %v75_v13  ;;  %3734 = vmatprep.mubr.msk.f32.mxu1 %vm276_vm0, %v203_v14  ;;  %v234_v12 = vld [vmem:[%s6459_s0 + $0x6f8] sm:$0xff]  ;;  %v107_v13 = vld [vmem:[%s6459_s0 + $0x300] sm:$0xff] }
  0x94   :  { %v235_v14 = vld [vmem:[%s6459_s0 + $0x700] sm:$0xff] }
  0x96   :  { %3543 = vmatmul.mubr.msk.f32.gmra.mrb[64].mxu0 %vm276_vm0, %v76_v15  ;;  %3735 = vmatmul.mubr.msk.f32.gmra.mrb[64].mxu1 %vm276_vm0, %v204_v16  ;;  %v108_v15 = vld [vmem:[%s6459_s0 + $0x308] sm:$0xff] }
  0x97   :  { %3545 = vmatprep.mubr.msk.f32.mxu0 %vm276_vm0, %v77_v17  ;;  %3737 = vmatprep.mubr.msk.f32.mxu1 %vm276_vm0, %v205_v18  ;;  %v236_v16 = vld [vmem:[%s6459_s0 + $0x708] sm:$0xff]  ;;  %v109_v17 = vld [vmem:[%s6459_s0 + $0x310] sm:$0xff] }
  0x98   :  { %v237_v18 = vld [vmem:[%s6459_s0 + $0x710] sm:$0xff] }
  0x9a   :  { %3546 = vmatmul.mubr.msk.f32.gmra.mrb[66].mxu0 %vm276_vm0, %v78_v19  ;;  %3738 = vmatmul.mubr.msk.f32.gmra.mrb[66].mxu1 %vm276_vm0, %v206_v20  ;;  %v110_v19 = vld [vmem:[%s6459_s0 + $0x318] sm:$0xff] }
  0x9b   :  { %3548 = vmatprep.mubr.msk.f32.mxu0 %vm276_vm0, %v79_v21  ;;  %3740 = vmatprep.mubr.msk.f32.mxu1 %vm276_vm0, %v207_v22  ;;  %v238_v20 = vld [vmem:[%s6459_s0 + $0x718] sm:$0xff]  ;;  %v111_v21 = vld [vmem:[%s6459_s0 + $0x320] sm:$0xff] }
  0x9c   :  { %v239_v22 = vld [vmem:[%s6459_s0 + $0x720] sm:$0xff] }
  0x9e   :  { %3549 = vmatmul.mubr.msk.f32.gmra.mrb[68].mxu0 %vm276_vm0, %v80_v23  ;;  %3741 = vmatmul.mubr.msk.f32.gmra.mrb[68].mxu1 %vm276_vm0, %v208_v24  ;;  %v112_v23 = vld [vmem:[%s6459_s0 + $0x328] sm:$0xff] }
  0x9f   :  { %3551 = vmatprep.mubr.msk.f32.mxu0 %vm276_vm0, %v81_v25  ;;  %3743 = vmatprep.mubr.msk.f32.mxu1 %vm276_vm0, %v209_v26  ;;  %v240_v24 = vld [vmem:[%s6459_s0 + $0x728] sm:$0xff]  ;;  %v113_v25 = vld [vmem:[%s6459_s0 + $0x330] sm:$0xff] }
  0xa0   :  { %v241_v26 = vld [vmem:[%s6459_s0 + $0x730] sm:$0xff] }
  0xa2   :  { %3552 = vmatmul.mubr.msk.f32.gmra.mrb[70].mxu0 %vm276_vm0, %v82_v27  ;;  %3744 = vmatmul.mubr.msk.f32.gmra.mrb[70].mxu1 %vm276_vm0, %v210_v28  ;;  %v114_v27 = vld [vmem:[%s6459_s0 + $0x338] sm:$0xff] }
  0xa3   :  { %3554 = vmatprep.mubr.msk.f32.mxu0 %vm276_vm0, %v83_v29  ;;  %3746 = vmatprep.mubr.msk.f32.mxu1 %vm276_vm0, %v211_v30  ;;  %v242_v28 = vld [vmem:[%s6459_s0 + $0x738] sm:$0xff]  ;;  %v115_v29 = vld [vmem:[%s6459_s0 + $0x340] sm:$0xff] }
  0xa4   :  { %v243_v30 = vld [vmem:[%s6459_s0 + $0x740] sm:$0xff] }
  0xa6   :  { %3555 = vmatmul.mubr.msk.f32.gmra.mrb[72].mxu0 %vm276_vm0, %v84_v31  ;;  %3747 = vmatmul.mubr.msk.f32.gmra.mrb[72].mxu1 %vm276_vm0, %v212_v32  ;;  %v116_v31 = vld [vmem:[%s6459_s0 + $0x348] sm:$0xff] }
  0xa7   :  { %3557 = vmatprep.mubr.msk.f32.mxu0 %vm276_vm0, %v85_v33  ;;  %3749 = vmatprep.mubr.msk.f32.mxu1 %vm276_vm0, %v213_v34  ;;  %v244_v32 = vld [vmem:[%s6459_s0 + $0x748] sm:$0xff]  ;;  %v117_v33 = vld [vmem:[%s6459_s0 + $0x350] sm:$0xff] }
  0xa8   :  { %v245_v34 = vld [vmem:[%s6459_s0 + $0x750] sm:$0xff] }
  0xaa   :  { %3558 = vmatmul.mubr.msk.f32.gmra.mrb[74].mxu0 %vm276_vm0, %v86_v35  ;;  %3750 = vmatmul.mubr.msk.f32.gmra.mrb[74].mxu1 %vm276_vm0, %v214_v36  ;;  %v118_v35 = vld [vmem:[%s6459_s0 + $0x358] sm:$0xff] }
  0xab   :  { %3560 = vmatprep.mubr.msk.f32.mxu0 %vm276_vm0, %v87_v37  ;;  %3752 = vmatprep.mubr.msk.f32.mxu1 %vm276_vm0, %v215_v38  ;;  %v246_v36 = vld [vmem:[%s6459_s0 + $0x758] sm:$0xff]  ;;  %v119_v37 = vld [vmem:[%s6459_s0 + $0x360] sm:$0xff] }
  0xac   :  { %v247_v38 = vld [vmem:[%s6459_s0 + $0x760] sm:$0xff] }
  0xae   :  { %3561 = vmatmul.mubr.msk.f32.gmra.mrb[76].mxu0 %vm276_vm0, %v88_v39  ;;  %3753 = vmatmul.mubr.msk.f32.gmra.mrb[76].mxu1 %vm276_vm0, %v216_v40 }
  0xaf   :  { %3563 = vmatprep.mubr.msk.f32.mxu0 %vm276_vm0, %v89_v41  ;;  %3755 = vmatprep.mubr.msk.f32.mxu1 %vm276_vm0, %v217_v42 }
  0xb2   :  { %3564 = vmatmul.mubr.msk.f32.gmra.mrb[78].mxu0 %vm276_vm0, %v90_v43  ;;  %3756 = vmatmul.mubr.msk.f32.gmra.mrb[78].mxu1 %vm276_vm0, %v218_v44  ;;  %v120_v43 = vld [vmem:[%s6459_s0 + $0x368] sm:$0xff] }
  0xb3   :  { %3566 = vmatprep.mubr.msk.f32.mxu0 %vm276_vm0, %v91_v45  ;;  %3758 = vmatprep.mubr.msk.f32.mxu1 %vm276_vm0, %v219_v46  ;;  %v248_v44 = vld [vmem:[%s6459_s0 + $0x768] sm:$0xff]  ;;  %v121_v45 = vld [vmem:[%s6459_s0 + $0x370] sm:$0xff] }
  0xb4   :  { %v249_v46 = vld [vmem:[%s6459_s0 + $0x770] sm:$0xff] }
  0xb6   :  { %3567 = vmatmul.mubr.msk.f32.gmra.mrb[80].mxu0 %vm276_vm0, %v92_v47  ;;  %3759 = vmatmul.mubr.msk.f32.gmra.mrb[80].mxu1 %vm276_vm0, %v220_v48 }
  0xb7   :  { %3569 = vmatprep.mubr.msk.f32.mxu0 %vm276_vm0, %v93_v49  ;;  %3761 = vmatprep.mubr.msk.f32.mxu1 %vm276_vm0, %v221_v50 }
  0xba   :  { %3570 = vmatmul.mubr.msk.f32.gmra.mrb[82].mxu0 %vm276_vm0, %v94_v51  ;;  %3762 = vmatmul.mubr.msk.f32.gmra.mrb[82].mxu1 %vm276_vm0, %v222_v52  ;;  %v122_v51 = vld [vmem:[%s6459_s0 + $0x378] sm:$0xff] }
  0xbb   :  { %3572 = vmatprep.mubr.msk.f32.mxu0 %vm276_vm0, %v95_v53  ;;  %3764 = vmatprep.mubr.msk.f32.mxu1 %vm276_vm0, %v223_v54  ;;  %v250_v52 = vld [vmem:[%s6459_s0 + $0x778] sm:$0xff]  ;;  %v123_v53 = vld [vmem:[%s6459_s0 + $0x380] sm:$0xff] }
  0xbc   :  { %v251_v54 = vld [vmem:[%s6459_s0 + $0x780] sm:$0xff] }
  0xbe   :  { %3573 = vmatmul.mubr.msk.f32.gmra.mrb[84].mxu0 %vm276_vm0, %v96_v55  ;;  %3765 = vmatmul.mubr.msk.f32.gmra.mrb[84].mxu1 %vm276_vm0, %v224_v56 }
  0xbf   :  { %3575 = vmatprep.mubr.msk.f32.mxu0 %vm276_vm0, %v97_v57  ;;  %3767 = vmatprep.mubr.msk.f32.mxu1 %vm276_vm0, %v225_v58 }
  0xc2   :  { %3576 = vmatmul.mubr.msk.f32.gmra.mrb[86].mxu0 %vm276_vm0, %v98_v59  ;;  %3768 = vmatmul.mubr.msk.f32.gmra.mrb[86].mxu1 %vm276_vm0, %v226_v60  ;;  %v124_v59 = vld [vmem:[%s6459_s0 + $0x388] sm:$0xff] }
  0xc3   :  { %3578 = vmatprep.mubr.msk.f32.mxu0 %vm276_vm0, %v99_v61  ;;  %3770 = vmatprep.mubr.msk.f32.mxu1 %vm276_vm0, %v227_v62  ;;  %v252_v60 = vld [vmem:[%s6459_s0 + $0x788] sm:$0xff]  ;;  %v125_v62 = vld [vmem:[%s6459_s0 + $0x390] sm:$0xff] }
  0xc6   :  { %3579 = vmatmul.mubr.msk.f32.gmra.mrb[88].mxu0 %vm276_vm0, %v100_v63  ;;  %3771 = vmatmul.mubr.msk.f32.gmra.mrb[88].mxu1 %vm276_vm0, %v228_v0  ;;  %v253_v63 = vld [vmem:[%s6459_s0 + $0x790] sm:$0xff] }
  0xc7   :  { %3581 = vmatprep.mubr.msk.f32.mxu0 %vm276_vm0, %v101_v1  ;;  %3773 = vmatprep.mubr.msk.f32.mxu1 %vm276_vm0, %v229_v2 }
  0xca   :  { %3582 = vmatmul.mubr.msk.f32.gmra.mrb[90].mxu0 %vm276_vm0, %v102_v3  ;;  %3774 = vmatmul.mubr.msk.f32.gmra.mrb[90].mxu1 %vm276_vm0, %v230_v4 }
  0xcb   :  { %3584 = vmatprep.mubr.msk.f32.mxu0 %vm276_vm0, %v103_v5  ;;  %3776 = vmatprep.mubr.msk.f32.mxu1 %vm276_vm0, %v231_v6 }
  0xce   :  { %3585 = vmatmul.mubr.msk.f32.gmra.mrb[92].mxu0 %vm276_vm0, %v104_v7  ;;  %3777 = vmatmul.mubr.msk.f32.gmra.mrb[92].mxu1 %vm276_vm0, %v232_v8  ;;  %v126_v7 = vld [vmem:[%s6459_s0 + $0x398] sm:$0xff] }
  0xcf   :  { %3587 = vmatprep.mubr.msk.f32.mxu0 %vm276_vm0, %v105_v9  ;;  %3779 = vmatprep.mubr.msk.f32.mxu1 %vm276_vm0, %v233_v10  ;;  %v254_v8 = vld [vmem:[%s6459_s0 + $0x798] sm:$0xff]  ;;  %v127_v10 = vld [vmem:[%s6459_s0 + $0x3a0] sm:$0xff] }
  0xd2   :  { %3588 = vmatmul.mubr.msk.f32.gmra.mrb[94].mxu0 %vm276_vm0, %v106_v11  ;;  %3780 = vmatmul.mubr.msk.f32.gmra.mrb[94].mxu1 %vm276_vm0, %v234_v12  ;;  %v255_v11 = vld [vmem:[%s6459_s0 + $0x7a0] sm:$0xff] }
  0xd3   :  { %3590 = vmatprep.mubr.msk.f32.mxu0 %vm276_vm0, %v107_v13  ;;  %3782 = vmatprep.mubr.msk.f32.mxu1 %vm276_vm0, %v235_v14 }
  0xd6   :  { %3591 = vmatmul.mubr.msk.f32.gmra.mrb[96].mxu0 %vm276_vm0, %v108_v15  ;;  %3783 = vmatmul.mubr.msk.f32.gmra.mrb[96].mxu1 %vm276_vm0, %v236_v16 }
  0xd7   :  { %3593 = vmatprep.mubr.msk.f32.mxu0 %vm276_vm0, %v109_v17  ;;  %3785 = vmatprep.mubr.msk.f32.mxu1 %vm276_vm0, %v237_v18 }
  0xda   :  { %3594 = vmatmul.mubr.msk.f32.gmra.mrb[98].mxu0 %vm276_vm0, %v110_v19  ;;  %3786 = vmatmul.mubr.msk.f32.gmra.mrb[98].mxu1 %vm276_vm0, %v238_v20  ;;  %v128_v19 = vld [vmem:[%s6459_s0 + $0x3a8] sm:$0xff] }
  0xdb   :  { %3596 = vmatprep.mubr.msk.f32.mxu0 %vm276_vm0, %v111_v21  ;;  %3788 = vmatprep.mubr.msk.f32.mxu1 %vm276_vm0, %v239_v22  ;;  %v256_v20 = vld [vmem:[%s6459_s0 + $0x7a8] sm:$0xff]  ;;  %v129_v22 = vld [vmem:[%s6459_s0 + $0x3b0] sm:$0xff] }
  0xde   :  { %3597 = vmatmul.mubr.msk.f32.gmra.mrb[100].mxu0 %vm276_vm0, %v112_v23  ;;  %3789 = vmatmul.mubr.msk.f32.gmra.mrb[100].mxu1 %vm276_vm0, %v240_v24  ;;  %v257_v23 = vld [vmem:[%s6459_s0 + $0x7b0] sm:$0xff] }
  0xdf   :  { %3599 = vmatprep.mubr.msk.f32.mxu0 %vm276_vm0, %v113_v25  ;;  %3791 = vmatprep.mubr.msk.f32.mxu1 %vm276_vm0, %v241_v26 }
  0xe2   :  { %3600 = vmatmul.mubr.msk.f32.gmra.mrb[102].mxu0 %vm276_vm0, %v114_v27  ;;  %3792 = vmatmul.mubr.msk.f32.gmra.mrb[102].mxu1 %vm276_vm0, %v242_v28 }
  0xe3   :  { %3602 = vmatprep.mubr.msk.f32.mxu0 %vm276_vm0, %v115_v29  ;;  %3794 = vmatprep.mubr.msk.f32.mxu1 %vm276_vm0, %v243_v30 }
  0xe6   :  { %3603 = vmatmul.mubr.msk.f32.gmra.mrb[104].mxu0 %vm276_vm0, %v116_v31  ;;  %3795 = vmatmul.mubr.msk.f32.gmra.mrb[104].mxu1 %vm276_vm0, %v244_v32  ;;  %v130_v31 = vld [vmem:[%s6459_s0 + $0x3b8] sm:$0xff] }
  0xe7   :  { %3605 = vmatprep.mubr.msk.f32.mxu0 %vm276_vm0, %v117_v33  ;;  %3797 = vmatprep.mubr.msk.f32.mxu1 %vm276_vm0, %v245_v34  ;;  %v258_v32 = vld [vmem:[%s6459_s0 + $0x7b8] sm:$0xff]  ;;  %v131_v34 = vld [vmem:[%s6459_s0 + $0x3c0] sm:$0xff] }
  0xe9   :  { %v3448_v39 = vpop.f32.mrb[0].mxu0  ;;  %v3640_v40 = vpop.f32.mrb[0].mxu1 }
  0xea   :  { %3856 = vtanh.f32 %v3448_v39  ;;  %v1111_v41 = vpop.f32.mrb[1].mxu0  ;;  %3606 = vmatmul.mubr.msk.f32.gmra.mrb[106].mxu0 %vm276_vm0, %v118_v35  ;;  %v1751_v42 = vpop.f32.mrb[1].mxu1  ;;  %3798 = vmatmul.mubr.msk.f32.gmra.mrb[106].mxu1 %vm276_vm0, %v246_v36  ;;  %v259_v35 = vld [vmem:[%s6459_s0 + $0x7c0] sm:$0xff] }
  0xeb   :  { %3858 = vtanh.f32 %v3640_v40  ;;  %3608 = vmatprep.mubr.msk.f32.mxu0 %vm276_vm0, %v119_v37  ;;  %3800 = vmatprep.mubr.msk.f32.mxu1 %vm276_vm0, %v247_v38 }
  0xec   :  { %3860 = vtanh.f32 %v1111_v41 }
  0xed   :  { %3862 = vtanh.f32 %v1751_v42  ;;  %v3451_v47 = vpop.f32.mrb[2].mxu0  ;;  %v3643_v48 = vpop.f32.mrb[2].mxu1 }
  0xee   :  { %3864 = vtanh.f32 %v3451_v47  ;;  %v1121_v49 = vpop.f32.mrb[3].mxu0  ;;  %3609 = vmatmul.mubr.msk.f32.gmra.mrb[108].mxu0 %vm276_vm0, %v120_v43  ;;  %v1761_v50 = vpop.f32.mrb[3].mxu1  ;;  %3801 = vmatmul.mubr.msk.f32.gmra.mrb[108].mxu1 %vm276_vm0, %v248_v44  ;;  %v132_v43 = vld [vmem:[%s6459_s0 + $0x3c8] sm:$0xff]  ;;  %v261_v47 = vld [vmem:[%s6459_s0 + $0x7d0] sm:$0xff] }
  0xef   :  { %3866 = vtanh.f32 %v3643_v48  ;;  %3611 = vmatprep.mubr.msk.f32.mxu0 %vm276_vm0, %v121_v45  ;;  %3803 = vmatprep.mubr.msk.f32.mxu1 %vm276_vm0, %v249_v46  ;;  %v260_v44 = vld [vmem:[%s6459_s0 + $0x7c8] sm:$0xff]  ;;  %v133_v46 = vld [vmem:[%s6459_s0 + $0x3d0] sm:$0xff] }
  0xf0   :  { %3868 = vtanh.f32 %v1121_v49 }
  0xf1   :  { %3870 = vtanh.f32 %v1761_v50  ;;  %v3454_v55 = vpop.f32.mrb[4].mxu0  ;;  %v3646_v56 = vpop.f32.mrb[4].mxu1 }
  0xf2   :  { %3872 = vtanh.f32 %v3454_v55  ;;  %v1131_v57 = vpop.f32.mrb[5].mxu0  ;;  %3612 = vmatmul.mubr.msk.f32.gmra.mrb[110].mxu0 %vm276_vm0, %v122_v51  ;;  %v1771_v58 = vpop.f32.mrb[5].mxu1  ;;  %3804 = vmatmul.mubr.msk.f32.gmra.mrb[110].mxu1 %vm276_vm0, %v250_v52  ;;  %v134_v55 = vld [vmem:[%s6459_s0 + $0x3d8] sm:$0xff] }
  0xf3   :  { %3874 = vtanh.f32 %v3646_v56  ;;  %3614 = vmatprep.mubr.msk.f32.mxu0 %vm276_vm0, %v123_v53  ;;  %3806 = vmatprep.mubr.msk.f32.mxu1 %vm276_vm0, %v251_v54  ;;  %v262_v56 = vld [vmem:[%s6459_s0 + $0x7d8] sm:$0xff] }
  0xf4   :  { %v3857_v61 = vpop.eup %3856  ;;  %3876 = vtanh.f32 %v1131_v57 }
  0xf5   :  { %v3859_v0 = vpop.eup %3858  ;;  %2648 = vst.msk [vmem:[%s6460_s2 + $0x8] sm:$0xff] %vm2646_vm1, %v3857_v61  ;;  %3878 = vtanh.f32 %v1771_v58  ;;  %v3457_v1 = vpop.f32.mrb[6].mxu0  ;;  %v135_v58 = vld [vmem:[%s6459_s0 + $0x3e0] sm:$0xff] }
  0xf6   :  { %v3649_v2 = vpop.f32.mrb[6].mxu1  ;;  %v3861_v3 = vpop.eup %3860  ;;  %2776 = vst.msk [vmem:[%s6460_s2 + $0x408] sm:$0xff] %vm2646_vm1, %v3859_v0  ;;  %3880 = vtanh.f32 %v3457_v1  ;;  %3615 = vmatmul.mubr.msk.f32.gmra.mrb[112].mxu0 %vm276_vm0, %v124_v59  ;;  %3807 = vmatmul.mubr.msk.f32.gmra.mrb[112].mxu1 %vm276_vm0, %v252_v60  ;;  %v263_v59 = vld [vmem:[%s6459_s0 + $0x7e0] sm:$0xff] }
  0xf7   :  { %v1141_v4 = vpop.f32.mrb[7].mxu0  ;;  %v1781_v5 = vpop.f32.mrb[7].mxu1  ;;  %2647 = vst.msk [vmem:[%s6460_s2] sm:$0xff] %vm2646_vm1, %v3861_v3  ;;  %3882 = vtanh.f32 %v3649_v2  ;;  %3617 = vmatprep.mubr.msk.f32.mxu0 %vm276_vm0, %v125_v62  ;;  %3809 = vmatprep.mubr.msk.f32.mxu1 %vm276_vm0, %v253_v63  ;;  %v136_v3 = vld [vmem:[%s6459_s0 + $0x3e8] sm:$0xff] }
  0xf8   :  { %v3863_v6 = vpop.eup %3862  ;;  %3884 = vtanh.f32 %v1141_v4  ;;  %v264_v4 = vld [vmem:[%s6459_s0 + $0x7e8] sm:$0xff] }
  0xf9   :  { %v3865_v9 = vpop.eup %3864  ;;  %2775 = vst.msk [vmem:[%s6460_s2 + $0x400] sm:$0xff] %vm2646_vm1, %v3863_v6  ;;  %3886 = vtanh.f32 %v1781_v5  ;;  %v3460_v13 = vpop.f32.mrb[8].mxu0  ;;  %v137_v6 = vld [vmem:[%s6459_s0 + $0x3f0] sm:$0xff] }
  0xfa   :  { %v3867_v12 = vpop.eup %3866  ;;  %2650 = vst.msk [vmem:[%s6460_s2 + $0x18] sm:$0xff] %vm2646_vm1, %v3865_v9  ;;  %v3652_v14 = vpop.f32.mrb[8].mxu1  ;;  %3888 = vtanh.f32 %v3460_v13  ;;  %3618 = vmatmul.mubr.msk.f32.gmra.mrb[114].mxu0 %vm276_vm0, %v126_v7  ;;  %3810 = vmatmul.mubr.msk.f32.gmra.mrb[114].mxu1 %vm276_vm0, %v254_v8  ;;  %v265_v7 = vld [vmem:[%s6459_s0 + $0x7f0] sm:$0xff] }
  0xfb   :  { %v3869_v15 = vpop.eup %3868  ;;  %2778 = vst.msk [vmem:[%s6460_s2 + $0x418] sm:$0xff] %vm2646_vm1, %v3867_v12  ;;  %v1151_v16 = vpop.f32.mrb[9].mxu0  ;;  %3890 = vtanh.f32 %v3652_v14  ;;  %3620 = vmatprep.mubr.msk.f32.mxu0 %vm276_vm0, %v127_v10  ;;  %3812 = vmatprep.mubr.msk.f32.mxu1 %vm276_vm0, %v255_v11 }
  0xfc   :  { %v1791_v17 = vpop.f32.mrb[9].mxu1  ;;  %v3871_v18 = vpop.eup %3870  ;;  %2649 = vst.msk [vmem:[%s6460_s2 + $0x10] sm:$0xff] %vm2646_vm1, %v3869_v15  ;;  %3892 = vtanh.f32 %v1151_v16  ;;  %v138_v15 = vld [vmem:[%s6459_s0 + $0x3f8] sm:$0xff] }
  0xfd   :  { %v3873_v21 = vpop.eup %3872  ;;  %2777 = vst.msk [vmem:[%s6460_s2 + $0x410] sm:$0xff] %vm2646_vm1, %v3871_v18  ;;  %3894 = vtanh.f32 %v1791_v17  ;;  %v3463_v25 = vpop.f32.mrb[10].mxu0  ;;  %v266_v16 = vld [vmem:[%s6459_s0 + $0x7f8] sm:$0xff] }
  0xfe   :  { %v3875_v24 = vpop.eup %3874  ;;  %2652 = vst.msk [vmem:[%s6460_s2 + $0x28] sm:$0xff] %vm2646_vm1, %v3873_v21  ;;  %v3655_v26 = vpop.f32.mrb[10].mxu1  ;;  %3896 = vtanh.f32 %v3463_v25  ;;  %3621 = vmatmul.mubr.msk.f32.gmra.mrb[116].mxu0 %vm276_vm0, %v128_v19  ;;  %3813 = vmatmul.mubr.msk.f32.gmra.mrb[116].mxu1 %vm276_vm0, %v256_v20 }
  0xff   :  { %v3877_v27 = vpop.eup %3876  ;;  %2780 = vst.msk [vmem:[%s6460_s2 + $0x428] sm:$0xff] %vm2646_vm1, %v3875_v24  ;;  %v1161_v28 = vpop.f32.mrb[11].mxu0  ;;  %3898 = vtanh.f32 %v3655_v26  ;;  %3623 = vmatprep.mubr.msk.f32.mxu0 %vm276_vm0, %v129_v22  ;;  %3815 = vmatprep.mubr.msk.f32.mxu1 %vm276_vm0, %v257_v23 }
 0x100   :  { %v1801_v29 = vpop.f32.mrb[11].mxu1  ;;  %v3879_v30 = vpop.eup %3878  ;;  %2651 = vst.msk [vmem:[%s6460_s2 + $0x20] sm:$0xff] %vm2646_vm1, %v3877_v27  ;;  %3900 = vtanh.f32 %v1161_v28 }
 0x101   :  { %v3881_v33 = vpop.eup %3880  ;;  %2779 = vst.msk [vmem:[%s6460_s2 + $0x420] sm:$0xff] %vm2646_vm1, %v3879_v30  ;;  %3902 = vtanh.f32 %v1801_v29  ;;  %v3466_v37 = vpop.f32.mrb[12].mxu0 }
 0x102   :  { %v3883_v36 = vpop.eup %3882  ;;  %2654 = vst.msk [vmem:[%s6460_s2 + $0x38] sm:$0xff] %vm2646_vm1, %v3881_v33  ;;  %v3658_v38 = vpop.f32.mrb[12].mxu1  ;;  %3904 = vtanh.f32 %v3466_v37  ;;  %3624 = vmatmul.mubr.msk.f32.gmra.mrb[118].mxu0 %vm276_vm0, %v130_v31  ;;  %3816 = vmatmul.mubr.msk.f32.gmra.mrb[118].mxu1 %vm276_vm0, %v258_v32 }
 0x103   :  { %v3885_v39 = vpop.eup %3884  ;;  %2782 = vst.msk [vmem:[%s6460_s2 + $0x438] sm:$0xff] %vm2646_vm1, %v3883_v36  ;;  %v1171_v40 = vpop.f32.mrb[13].mxu0  ;;  %3906 = vtanh.f32 %v3658_v38  ;;  %3626 = vmatprep.mubr.msk.f32.mxu0 %vm276_vm0, %v131_v34  ;;  %3818 = vmatprep.mubr.msk.f32.mxu1 %vm276_vm0, %v259_v35 }
 0x104   :  { %v1811_v41 = vpop.f32.mrb[13].mxu1  ;;  %v3887_v42 = vpop.eup %3886  ;;  %2653 = vst.msk [vmem:[%s6460_s2 + $0x30] sm:$0xff] %vm2646_vm1, %v3885_v39  ;;  %3908 = vtanh.f32 %v1171_v40 }
 0x105   :  { %v3889_v45 = vpop.eup %3888  ;;  %2781 = vst.msk [vmem:[%s6460_s2 + $0x430] sm:$0xff] %vm2646_vm1, %v3887_v42  ;;  %3910 = vtanh.f32 %v1811_v41  ;;  %v3469_v49 = vpop.f32.mrb[14].mxu0 }
 0x106   :  { %v3891_v48 = vpop.eup %3890  ;;  %2656 = vst.msk [vmem:[%s6460_s2 + $0x48] sm:$0xff] %vm2646_vm1, %v3889_v45  ;;  %v3661_v50 = vpop.f32.mrb[14].mxu1  ;;  %3912 = vtanh.f32 %v3469_v49  ;;  %3627 = vmatmul.mubr.msk.f32.gmra.mrb[120].mxu0 %vm276_vm0, %v132_v43  ;;  %3819 = vmatmul.mubr.msk.f32.gmra.mrb[120].mxu1 %vm276_vm0, %v260_v44 }
 0x107   :  { %v3893_v51 = vpop.eup %3892  ;;  %2784 = vst.msk [vmem:[%s6460_s2 + $0x448] sm:$0xff] %vm2646_vm1, %v3891_v48  ;;  %v1181_v52 = vpop.f32.mrb[15].mxu0  ;;  %3914 = vtanh.f32 %v3661_v50  ;;  %3629 = vmatprep.mubr.msk.f32.mxu0 %vm276_vm0, %v133_v46  ;;  %3821 = vmatprep.mubr.msk.f32.mxu1 %vm276_vm0, %v261_v47 }
 0x108   :  { %v1821_v53 = vpop.f32.mrb[15].mxu1  ;;  %v3895_v54 = vpop.eup %3894  ;;  %2655 = vst.msk [vmem:[%s6460_s2 + $0x40] sm:$0xff] %vm2646_vm1, %v3893_v51  ;;  %3916 = vtanh.f32 %v1181_v52 }
 0x109   :  { %v3897_v57 = vpop.eup %3896  ;;  %2783 = vst.msk [vmem:[%s6460_s2 + $0x440] sm:$0xff] %vm2646_vm1, %v3895_v54  ;;  %3918 = vtanh.f32 %v1821_v53  ;;  %v3472_v61 = vpop.f32.mrb[16].mxu0 }
 0x10a   :  { %v3899_v60 = vpop.eup %3898  ;;  %2658 = vst.msk [vmem:[%s6460_s2 + $0x58] sm:$0xff] %vm2646_vm1, %v3897_v57  ;;  %v3664_v62 = vpop.f32.mrb[16].mxu1  ;;  %3920 = vtanh.f32 %v3472_v61  ;;  %3630 = vmatmul.mubr.msk.f32.gmra.mrb[122].mxu0 %vm276_vm0, %v134_v55  ;;  %3822 = vmatmul.mubr.msk.f32.gmra.mrb[122].mxu1 %vm276_vm0, %v262_v56 }
 0x10b   :  { %v3901_v63 = vpop.eup %3900  ;;  %2786 = vst.msk [vmem:[%s6460_s2 + $0x458] sm:$0xff] %vm2646_vm1, %v3899_v60  ;;  %v1191_v0 = vpop.f32.mrb[17].mxu0  ;;  %3922 = vtanh.f32 %v3664_v62  ;;  %3632 = vmatprep.mubr.msk.f32.mxu0 %vm276_vm0, %v135_v58  ;;  %3824 = vmatprep.mubr.msk.f32.mxu1 %vm276_vm0, %v263_v59 }
 0x10c   :  { %v1831_v1 = vpop.f32.mrb[17].mxu1  ;;  %v3903_v2 = vpop.eup %3902  ;;  %2657 = vst.msk [vmem:[%s6460_s2 + $0x50] sm:$0xff] %vm2646_vm1, %v3901_v63  ;;  %3924 = vtanh.f32 %v1191_v0 }
 0x10d   :  { %v3905_v5 = vpop.eup %3904  ;;  %2785 = vst.msk [vmem:[%s6460_s2 + $0x450] sm:$0xff] %vm2646_vm1, %v3903_v2  ;;  %3926 = vtanh.f32 %v1831_v1  ;;  %v3475_v9 = vpop.f32.mrb[18].mxu0 }
 0x10e   :  { %v3907_v8 = vpop.eup %3906  ;;  %2660 = vst.msk [vmem:[%s6460_s2 + $0x68] sm:$0xff] %vm2646_vm1, %v3905_v5  ;;  %v3667_v10 = vpop.f32.mrb[18].mxu1  ;;  %3928 = vtanh.f32 %v3475_v9  ;;  %3633 = vmatmul.mubr.msk.f32.gmra.mrb[124].mxu0 %vm276_vm0, %v136_v3  ;;  %3825 = vmatmul.mubr.msk.f32.gmra.mrb[124].mxu1 %vm276_vm0, %v264_v4 }
 0x10f   :  { %v3909_v11 = vpop.eup %3908  ;;  %2788 = vst.msk [vmem:[%s6460_s2 + $0x468] sm:$0xff] %vm2646_vm1, %v3907_v8  ;;  %v1201_v12 = vpop.f32.mrb[19].mxu0  ;;  %3930 = vtanh.f32 %v3667_v10  ;;  %3635 = vmatprep.mubr.msk.f32.mxu0 %vm276_vm0, %v137_v6  ;;  %3827 = vmatprep.mubr.msk.f32.mxu1 %vm276_vm0, %v265_v7 }
 0x110   :  { %v1841_v13 = vpop.f32.mrb[19].mxu1  ;;  %v3911_v14 = vpop.eup %3910  ;;  %2659 = vst.msk [vmem:[%s6460_s2 + $0x60] sm:$0xff] %vm2646_vm1, %v3909_v11  ;;  %3932 = vtanh.f32 %v1201_v12 }
 0x111   :  { %v3913_v17 = vpop.eup %3912  ;;  %2787 = vst.msk [vmem:[%s6460_s2 + $0x460] sm:$0xff] %vm2646_vm1, %v3911_v14  ;;  %3934 = vtanh.f32 %v1841_v13  ;;  %v3478_v19 = vpop.f32.mrb[20].mxu0 }
 0x112   :  { %v3915_v18 = vpop.eup %3914  ;;  %2662 = vst.msk [vmem:[%s6460_s2 + $0x78] sm:$0xff] %vm2646_vm1, %v3913_v17  ;;  %v3670_v20 = vpop.f32.mrb[20].mxu1  ;;  %3936 = vtanh.f32 %v3478_v19  ;;  %3636 = vmatmul.mubr.msk.f32.gmra.mrb[126].mxu0 %vm276_vm0, %v138_v15  ;;  %3828 = vmatmul.mubr.msk.f32.gmra.mrb[126].mxu1 %vm276_vm0, %v266_v16 }
 0x113   :  { %v3917_v21 = vpop.eup %3916  ;;  %2790 = vst.msk [vmem:[%s6460_s2 + $0x478] sm:$0xff] %vm2646_vm1, %v3915_v18  ;;  %v1211_v22 = vpop.f32.mrb[21].mxu0  ;;  %3938 = vtanh.f32 %v3670_v20 }
 0x114   :  { %v1851_v23 = vpop.f32.mrb[21].mxu1  ;;  %v3919_v24 = vpop.eup %3918  ;;  %2661 = vst.msk [vmem:[%s6460_s2 + $0x70] sm:$0xff] %vm2646_vm1, %v3917_v21  ;;  %3940 = vtanh.f32 %v1211_v22 }
 0x115   :  { %v3921_v25 = vpop.eup %3920  ;;  %2789 = vst.msk [vmem:[%s6460_s2 + $0x470] sm:$0xff] %vm2646_vm1, %v3919_v24  ;;  %3942 = vtanh.f32 %v1851_v23  ;;  %v3481_v27 = vpop.f32.mrb[22].mxu0 }
 0x116   :  { %v3923_v26 = vpop.eup %3922  ;;  %2664 = vst.msk [vmem:[%s6460_s2 + $0x88] sm:$0xff] %vm2646_vm1, %v3921_v25  ;;  %v3673_v28 = vpop.f32.mrb[22].mxu1  ;;  %3944 = vtanh.f32 %v3481_v27 }
 0x117   :  { %v3925_v29 = vpop.eup %3924  ;;  %2792 = vst.msk [vmem:[%s6460_s2 + $0x488] sm:$0xff] %vm2646_vm1, %v3923_v26  ;;  %v1221_v30 = vpop.f32.mrb[23].mxu0  ;;  %3946 = vtanh.f32 %v3673_v28 }
 0x118   :  { %v1861_v31 = vpop.f32.mrb[23].mxu1  ;;  %v3927_v32 = vpop.eup %3926  ;;  %2663 = vst.msk [vmem:[%s6460_s2 + $0x80] sm:$0xff] %vm2646_vm1, %v3925_v29  ;;  %3948 = vtanh.f32 %v1221_v30 }
 0x119   :  { %v3929_v33 = vpop.eup %3928  ;;  %2791 = vst.msk [vmem:[%s6460_s2 + $0x480] sm:$0xff] %vm2646_vm1, %v3927_v32  ;;  %3950 = vtanh.f32 %v1861_v31  ;;  %v3484_v35 = vpop.f32.mrb[24].mxu0 }
 0x11a   :  { %v3931_v34 = vpop.eup %3930  ;;  %2666 = vst.msk [vmem:[%s6460_s2 + $0x98] sm:$0xff] %vm2646_vm1, %v3929_v33  ;;  %v3676_v36 = vpop.f32.mrb[24].mxu1  ;;  %3952 = vtanh.f32 %v3484_v35 }
 0x11b   :  { %v3933_v37 = vpop.eup %3932  ;;  %2794 = vst.msk [vmem:[%s6460_s2 + $0x498] sm:$0xff] %vm2646_vm1, %v3931_v34  ;;  %v1231_v38 = vpop.f32.mrb[25].mxu0  ;;  %3954 = vtanh.f32 %v3676_v36 }
 0x11c   :  { %v1871_v39 = vpop.f32.mrb[25].mxu1  ;;  %v3935_v40 = vpop.eup %3934  ;;  %2665 = vst.msk [vmem:[%s6460_s2 + $0x90] sm:$0xff] %vm2646_vm1, %v3933_v37  ;;  %3956 = vtanh.f32 %v1231_v38 }
 0x11d   :  { %v3937_v41 = vpop.eup %3936  ;;  %2793 = vst.msk [vmem:[%s6460_s2 + $0x490] sm:$0xff] %vm2646_vm1, %v3935_v40  ;;  %3958 = vtanh.f32 %v1871_v39  ;;  %v3487_v43 = vpop.f32.mrb[26].mxu0 }
 0x11e   :  { %v3939_v42 = vpop.eup %3938  ;;  %2668 = vst.msk [vmem:[%s6460_s2 + $0xa8] sm:$0xff] %vm2646_vm1, %v3937_v41  ;;  %v3679_v44 = vpop.f32.mrb[26].mxu1  ;;  %3960 = vtanh.f32 %v3487_v43 }
 0x11f   :  { %v3941_v45 = vpop.eup %3940  ;;  %2796 = vst.msk [vmem:[%s6460_s2 + $0x4a8] sm:$0xff] %vm2646_vm1, %v3939_v42  ;;  %v1241_v46 = vpop.f32.mrb[27].mxu0  ;;  %3962 = vtanh.f32 %v3679_v44 }
 0x120   :  { %v1881_v47 = vpop.f32.mrb[27].mxu1  ;;  %v3943_v48 = vpop.eup %3942  ;;  %2667 = vst.msk [vmem:[%s6460_s2 + $0xa0] sm:$0xff] %vm2646_vm1, %v3941_v45  ;;  %3964 = vtanh.f32 %v1241_v46 }
 0x121   :  { %v3945_v49 = vpop.eup %3944  ;;  %2795 = vst.msk [vmem:[%s6460_s2 + $0x4a0] sm:$0xff] %vm2646_vm1, %v3943_v48  ;;  %3966 = vtanh.f32 %v1881_v47  ;;  %v3490_v51 = vpop.f32.mrb[28].mxu0 }
 0x122   :  { %v3947_v50 = vpop.eup %3946  ;;  %2670 = vst.msk [vmem:[%s6460_s2 + $0xb8] sm:$0xff] %vm2646_vm1, %v3945_v49  ;;  %v3682_v52 = vpop.f32.mrb[28].mxu1  ;;  %3968 = vtanh.f32 %v3490_v51 }
 0x123   :  { %v3949_v53 = vpop.eup %3948  ;;  %2798 = vst.msk [vmem:[%s6460_s2 + $0x4b8] sm:$0xff] %vm2646_vm1, %v3947_v50  ;;  %v1251_v54 = vpop.f32.mrb[29].mxu0  ;;  %3970 = vtanh.f32 %v3682_v52 }
 0x124   :  { %v1891_v55 = vpop.f32.mrb[29].mxu1  ;;  %v3951_v56 = vpop.eup %3950  ;;  %2669 = vst.msk [vmem:[%s6460_s2 + $0xb0] sm:$0xff] %vm2646_vm1, %v3949_v53  ;;  %3972 = vtanh.f32 %v1251_v54 }
 0x125   :  { %v3953_v57 = vpop.eup %3952  ;;  %2797 = vst.msk [vmem:[%s6460_s2 + $0x4b0] sm:$0xff] %vm2646_vm1, %v3951_v56  ;;  %3974 = vtanh.f32 %v1891_v55  ;;  %v3493_v59 = vpop.f32.mrb[30].mxu0 }
 0x126   :  { %v3955_v58 = vpop.eup %3954  ;;  %2672 = vst.msk [vmem:[%s6460_s2 + $0xc8] sm:$0xff] %vm2646_vm1, %v3953_v57  ;;  %v3685_v60 = vpop.f32.mrb[30].mxu1  ;;  %3976 = vtanh.f32 %v3493_v59 }
 0x127   :  { %v3957_v61 = vpop.eup %3956  ;;  %2800 = vst.msk [vmem:[%s6460_s2 + $0x4c8] sm:$0xff] %vm2646_vm1, %v3955_v58  ;;  %v1261_v62 = vpop.f32.mrb[31].mxu0  ;;  %3978 = vtanh.f32 %v3685_v60 }
 0x128   :  { %v1901_v63 = vpop.f32.mrb[31].mxu1  ;;  %v3959_v0 = vpop.eup %3958  ;;  %2671 = vst.msk [vmem:[%s6460_s2 + $0xc0] sm:$0xff] %vm2646_vm1, %v3957_v61  ;;  %3980 = vtanh.f32 %v1261_v62 }
 0x129   :  { %v3961_v1 = vpop.eup %3960  ;;  %2799 = vst.msk [vmem:[%s6460_s2 + $0x4c0] sm:$0xff] %vm2646_vm1, %v3959_v0  ;;  %3982 = vtanh.f32 %v1901_v63  ;;  %v3496_v3 = vpop.f32.mrb[32].mxu0 }
 0x12a   :  { %v3963_v2 = vpop.eup %3962  ;;  %2674 = vst.msk [vmem:[%s6460_s2 + $0xd8] sm:$0xff] %vm2646_vm1, %v3961_v1  ;;  %v3688_v4 = vpop.f32.mrb[32].mxu1  ;;  %3984 = vtanh.f32 %v3496_v3 }
 0x12b   :  { %v3965_v5 = vpop.eup %3964  ;;  %2802 = vst.msk [vmem:[%s6460_s2 + $0x4d8] sm:$0xff] %vm2646_vm1, %v3963_v2  ;;  %v1271_v6 = vpop.f32.mrb[33].mxu0  ;;  %3986 = vtanh.f32 %v3688_v4 }
 0x12c   :  { %v1911_v7 = vpop.f32.mrb[33].mxu1  ;;  %v3967_v8 = vpop.eup %3966  ;;  %2673 = vst.msk [vmem:[%s6460_s2 + $0xd0] sm:$0xff] %vm2646_vm1, %v3965_v5  ;;  %3988 = vtanh.f32 %v1271_v6 }
 0x12d   :  { %v3969_v9 = vpop.eup %3968  ;;  %2801 = vst.msk [vmem:[%s6460_s2 + $0x4d0] sm:$0xff] %vm2646_vm1, %v3967_v8  ;;  %3990 = vtanh.f32 %v1911_v7  ;;  %v3499_v11 = vpop.f32.mrb[34].mxu0 }
 0x12e   :  { %v3971_v10 = vpop.eup %3970  ;;  %2676 = vst.msk [vmem:[%s6460_s2 + $0xe8] sm:$0xff] %vm2646_vm1, %v3969_v9  ;;  %v3691_v12 = vpop.f32.mrb[34].mxu1  ;;  %3992 = vtanh.f32 %v3499_v11 }
 0x12f   :  { %v3973_v13 = vpop.eup %3972  ;;  %2804 = vst.msk [vmem:[%s6460_s2 + $0x4e8] sm:$0xff] %vm2646_vm1, %v3971_v10  ;;  %v1281_v14 = vpop.f32.mrb[35].mxu0  ;;  %3994 = vtanh.f32 %v3691_v12 }
 0x130   :  { %v1921_v15 = vpop.f32.mrb[35].mxu1  ;;  %v3975_v16 = vpop.eup %3974  ;;  %2675 = vst.msk [vmem:[%s6460_s2 + $0xe0] sm:$0xff] %vm2646_vm1, %v3973_v13  ;;  %3996 = vtanh.f32 %v1281_v14 }
 0x131   :  { %v3977_v17 = vpop.eup %3976  ;;  %2803 = vst.msk [vmem:[%s6460_s2 + $0x4e0] sm:$0xff] %vm2646_vm1, %v3975_v16  ;;  %3998 = vtanh.f32 %v1921_v15  ;;  %v3502_v19 = vpop.f32.mrb[36].mxu0 }
 0x132   :  { %v3979_v18 = vpop.eup %3978  ;;  %2678 = vst.msk [vmem:[%s6460_s2 + $0xf8] sm:$0xff] %vm2646_vm1, %v3977_v17  ;;  %v3694_v20 = vpop.f32.mrb[36].mxu1  ;;  %4000 = vtanh.f32 %v3502_v19 }
 0x133   :  { %v3981_v21 = vpop.eup %3980  ;;  %2806 = vst.msk [vmem:[%s6460_s2 + $0x4f8] sm:$0xff] %vm2646_vm1, %v3979_v18  ;;  %v1291_v22 = vpop.f32.mrb[37].mxu0  ;;  %4002 = vtanh.f32 %v3694_v20 }
 0x134   :  { %v1931_v23 = vpop.f32.mrb[37].mxu1  ;;  %v3983_v24 = vpop.eup %3982  ;;  %2677 = vst.msk [vmem:[%s6460_s2 + $0xf0] sm:$0xff] %vm2646_vm1, %v3981_v21  ;;  %4004 = vtanh.f32 %v1291_v22 }
 0x135   :  { %v3985_v25 = vpop.eup %3984  ;;  %2805 = vst.msk [vmem:[%s6460_s2 + $0x4f0] sm:$0xff] %vm2646_vm1, %v3983_v24  ;;  %4006 = vtanh.f32 %v1931_v23  ;;  %v3505_v27 = vpop.f32.mrb[38].mxu0 }
 0x136   :  { %v3987_v26 = vpop.eup %3986  ;;  %2680 = vst.msk [vmem:[%s6460_s2 + $0x108] sm:$0xff] %vm2646_vm1, %v3985_v25  ;;  %v3697_v28 = vpop.f32.mrb[38].mxu1  ;;  %4008 = vtanh.f32 %v3505_v27 }
 0x137   :  { %v3989_v29 = vpop.eup %3988  ;;  %2808 = vst.msk [vmem:[%s6460_s2 + $0x508] sm:$0xff] %vm2646_vm1, %v3987_v26  ;;  %v1301_v30 = vpop.f32.mrb[39].mxu0  ;;  %4010 = vtanh.f32 %v3697_v28 }
 0x138   :  { %v1941_v31 = vpop.f32.mrb[39].mxu1  ;;  %v3991_v32 = vpop.eup %3990  ;;  %2679 = vst.msk [vmem:[%s6460_s2 + $0x100] sm:$0xff] %vm2646_vm1, %v3989_v29  ;;  %4012 = vtanh.f32 %v1301_v30 }
 0x139   :  { %v3993_v33 = vpop.eup %3992  ;;  %2807 = vst.msk [vmem:[%s6460_s2 + $0x500] sm:$0xff] %vm2646_vm1, %v3991_v32  ;;  %4014 = vtanh.f32 %v1941_v31  ;;  %v3508_v35 = vpop.f32.mrb[40].mxu0 }
 0x13a   :  { %v3995_v34 = vpop.eup %3994  ;;  %2682 = vst.msk [vmem:[%s6460_s2 + $0x118] sm:$0xff] %vm2646_vm1, %v3993_v33  ;;  %v3700_v36 = vpop.f32.mrb[40].mxu1  ;;  %4016 = vtanh.f32 %v3508_v35 }
 0x13b   :  { %v3997_v37 = vpop.eup %3996  ;;  %2810 = vst.msk [vmem:[%s6460_s2 + $0x518] sm:$0xff] %vm2646_vm1, %v3995_v34  ;;  %v1311_v38 = vpop.f32.mrb[41].mxu0  ;;  %4018 = vtanh.f32 %v3700_v36 }
 0x13c   :  { %v1951_v39 = vpop.f32.mrb[41].mxu1  ;;  %v3999_v40 = vpop.eup %3998  ;;  %2681 = vst.msk [vmem:[%s6460_s2 + $0x110] sm:$0xff] %vm2646_vm1, %v3997_v37  ;;  %4020 = vtanh.f32 %v1311_v38 }
 0x13d   :  { %v4001_v41 = vpop.eup %4000  ;;  %2809 = vst.msk [vmem:[%s6460_s2 + $0x510] sm:$0xff] %vm2646_vm1, %v3999_v40  ;;  %4022 = vtanh.f32 %v1951_v39  ;;  %v3511_v43 = vpop.f32.mrb[42].mxu0 }
 0x13e   :  { %v4003_v42 = vpop.eup %4002  ;;  %2684 = vst.msk [vmem:[%s6460_s2 + $0x128] sm:$0xff] %vm2646_vm1, %v4001_v41  ;;  %v3703_v44 = vpop.f32.mrb[42].mxu1  ;;  %4024 = vtanh.f32 %v3511_v43 }
 0x13f   :  { %v4005_v45 = vpop.eup %4004  ;;  %2812 = vst.msk [vmem:[%s6460_s2 + $0x528] sm:$0xff] %vm2646_vm1, %v4003_v42  ;;  %v1321_v46 = vpop.f32.mrb[43].mxu0  ;;  %4026 = vtanh.f32 %v3703_v44 }
 0x140   :  { %v1961_v47 = vpop.f32.mrb[43].mxu1  ;;  %v4007_v48 = vpop.eup %4006  ;;  %2683 = vst.msk [vmem:[%s6460_s2 + $0x120] sm:$0xff] %vm2646_vm1, %v4005_v45  ;;  %4028 = vtanh.f32 %v1321_v46 }
 0x141   :  { %v4009_v49 = vpop.eup %4008  ;;  %2811 = vst.msk [vmem:[%s6460_s2 + $0x520] sm:$0xff] %vm2646_vm1, %v4007_v48  ;;  %4030 = vtanh.f32 %v1961_v47  ;;  %v3514_v51 = vpop.f32.mrb[44].mxu0 }
 0x142   :  { %v4011_v50 = vpop.eup %4010  ;;  %2686 = vst.msk [vmem:[%s6460_s2 + $0x138] sm:$0xff] %vm2646_vm1, %v4009_v49  ;;  %v3706_v52 = vpop.f32.mrb[44].mxu1  ;;  %4032 = vtanh.f32 %v3514_v51 }
 0x143   :  { %v4013_v53 = vpop.eup %4012  ;;  %2814 = vst.msk [vmem:[%s6460_s2 + $0x538] sm:$0xff] %vm2646_vm1, %v4011_v50  ;;  %v1331_v54 = vpop.f32.mrb[45].mxu0  ;;  %4034 = vtanh.f32 %v3706_v52 }
 0x144   :  { %v1971_v55 = vpop.f32.mrb[45].mxu1  ;;  %v4015_v56 = vpop.eup %4014  ;;  %2685 = vst.msk [vmem:[%s6460_s2 + $0x130] sm:$0xff] %vm2646_vm1, %v4013_v53  ;;  %4036 = vtanh.f32 %v1331_v54 }
 0x145   :  { %v4017_v57 = vpop.eup %4016  ;;  %2813 = vst.msk [vmem:[%s6460_s2 + $0x530] sm:$0xff] %vm2646_vm1, %v4015_v56  ;;  %4038 = vtanh.f32 %v1971_v55  ;;  %v3517_v59 = vpop.f32.mrb[46].mxu0 }
 0x146   :  { %v4019_v58 = vpop.eup %4018  ;;  %2688 = vst.msk [vmem:[%s6460_s2 + $0x148] sm:$0xff] %vm2646_vm1, %v4017_v57  ;;  %v3709_v60 = vpop.f32.mrb[46].mxu1  ;;  %4040 = vtanh.f32 %v3517_v59 }
 0x147   :  { %v4021_v61 = vpop.eup %4020  ;;  %2816 = vst.msk [vmem:[%s6460_s2 + $0x548] sm:$0xff] %vm2646_vm1, %v4019_v58  ;;  %v1341_v62 = vpop.f32.mrb[47].mxu0  ;;  %4042 = vtanh.f32 %v3709_v60 }
 0x148   :  { %v1981_v63 = vpop.f32.mrb[47].mxu1  ;;  %v4023_v0 = vpop.eup %4022  ;;  %2687 = vst.msk [vmem:[%s6460_s2 + $0x140] sm:$0xff] %vm2646_vm1, %v4021_v61  ;;  %4044 = vtanh.f32 %v1341_v62 }
 0x149   :  { %v4025_v1 = vpop.eup %4024  ;;  %2815 = vst.msk [vmem:[%s6460_s2 + $0x540] sm:$0xff] %vm2646_vm1, %v4023_v0  ;;  %4046 = vtanh.f32 %v1981_v63  ;;  %v3520_v3 = vpop.f32.mrb[48].mxu0 }
 0x14a   :  { %v4027_v2 = vpop.eup %4026  ;;  %2690 = vst.msk [vmem:[%s6460_s2 + $0x158] sm:$0xff] %vm2646_vm1, %v4025_v1  ;;  %v3712_v4 = vpop.f32.mrb[48].mxu1  ;;  %4048 = vtanh.f32 %v3520_v3 }
 0x14b   :  { %v4029_v5 = vpop.eup %4028  ;;  %2818 = vst.msk [vmem:[%s6460_s2 + $0x558] sm:$0xff] %vm2646_vm1, %v4027_v2  ;;  %v1351_v6 = vpop.f32.mrb[49].mxu0  ;;  %4050 = vtanh.f32 %v3712_v4 }
 0x14c   :  { %v1991_v7 = vpop.f32.mrb[49].mxu1  ;;  %v4031_v8 = vpop.eup %4030  ;;  %2689 = vst.msk [vmem:[%s6460_s2 + $0x150] sm:$0xff] %vm2646_vm1, %v4029_v5  ;;  %4052 = vtanh.f32 %v1351_v6 }
 0x14d   :  { %v4033_v9 = vpop.eup %4032  ;;  %2817 = vst.msk [vmem:[%s6460_s2 + $0x550] sm:$0xff] %vm2646_vm1, %v4031_v8  ;;  %4054 = vtanh.f32 %v1991_v7  ;;  %v3523_v11 = vpop.f32.mrb[50].mxu0 }
 0x14e   :  { %v4035_v10 = vpop.eup %4034  ;;  %2692 = vst.msk [vmem:[%s6460_s2 + $0x168] sm:$0xff] %vm2646_vm1, %v4033_v9  ;;  %v3715_v12 = vpop.f32.mrb[50].mxu1  ;;  %4056 = vtanh.f32 %v3523_v11 }
 0x14f   :  { %v4037_v13 = vpop.eup %4036  ;;  %2820 = vst.msk [vmem:[%s6460_s2 + $0x568] sm:$0xff] %vm2646_vm1, %v4035_v10  ;;  %v1361_v14 = vpop.f32.mrb[51].mxu0  ;;  %4058 = vtanh.f32 %v3715_v12 }
 0x150   :  { %v2001_v15 = vpop.f32.mrb[51].mxu1  ;;  %v4039_v16 = vpop.eup %4038  ;;  %2691 = vst.msk [vmem:[%s6460_s2 + $0x160] sm:$0xff] %vm2646_vm1, %v4037_v13  ;;  %4060 = vtanh.f32 %v1361_v14 }
 0x151   :  { %v4041_v17 = vpop.eup %4040  ;;  %2819 = vst.msk [vmem:[%s6460_s2 + $0x560] sm:$0xff] %vm2646_vm1, %v4039_v16  ;;  %4062 = vtanh.f32 %v2001_v15  ;;  %v3526_v19 = vpop.f32.mrb[52].mxu0 }
 0x152   :  { %v4043_v18 = vpop.eup %4042  ;;  %2694 = vst.msk [vmem:[%s6460_s2 + $0x178] sm:$0xff] %vm2646_vm1, %v4041_v17  ;;  %v3718_v20 = vpop.f32.mrb[52].mxu1  ;;  %4064 = vtanh.f32 %v3526_v19 }
 0x153   :  { %v4045_v21 = vpop.eup %4044  ;;  %2822 = vst.msk [vmem:[%s6460_s2 + $0x578] sm:$0xff] %vm2646_vm1, %v4043_v18  ;;  %v1371_v22 = vpop.f32.mrb[53].mxu0  ;;  %4066 = vtanh.f32 %v3718_v20 }
 0x154   :  { %v2011_v23 = vpop.f32.mrb[53].mxu1  ;;  %v4047_v24 = vpop.eup %4046  ;;  %2693 = vst.msk [vmem:[%s6460_s2 + $0x170] sm:$0xff] %vm2646_vm1, %v4045_v21  ;;  %4068 = vtanh.f32 %v1371_v22 }
 0x155   :  { %v4049_v25 = vpop.eup %4048  ;;  %2821 = vst.msk [vmem:[%s6460_s2 + $0x570] sm:$0xff] %vm2646_vm1, %v4047_v24  ;;  %4070 = vtanh.f32 %v2011_v23  ;;  %v3529_v27 = vpop.f32.mrb[54].mxu0 }
 0x156   :  { %v4051_v26 = vpop.eup %4050  ;;  %2696 = vst.msk [vmem:[%s6460_s2 + $0x188] sm:$0xff] %vm2646_vm1, %v4049_v25  ;;  %v3721_v28 = vpop.f32.mrb[54].mxu1  ;;  %4072 = vtanh.f32 %v3529_v27 }
 0x157   :  { %v4053_v29 = vpop.eup %4052  ;;  %2824 = vst.msk [vmem:[%s6460_s2 + $0x588] sm:$0xff] %vm2646_vm1, %v4051_v26  ;;  %v1381_v30 = vpop.f32.mrb[55].mxu0  ;;  %4074 = vtanh.f32 %v3721_v28 }
 0x158   :  { %v2021_v31 = vpop.f32.mrb[55].mxu1  ;;  %v4055_v32 = vpop.eup %4054  ;;  %2695 = vst.msk [vmem:[%s6460_s2 + $0x180] sm:$0xff] %vm2646_vm1, %v4053_v29  ;;  %4076 = vtanh.f32 %v1381_v30 }
 0x159   :  { %v4057_v33 = vpop.eup %4056  ;;  %2823 = vst.msk [vmem:[%s6460_s2 + $0x580] sm:$0xff] %vm2646_vm1, %v4055_v32  ;;  %4078 = vtanh.f32 %v2021_v31  ;;  %v3532_v35 = vpop.f32.mrb[56].mxu0 }
 0x15a   :  { %v4059_v34 = vpop.eup %4058  ;;  %2698 = vst.msk [vmem:[%s6460_s2 + $0x198] sm:$0xff] %vm2646_vm1, %v4057_v33  ;;  %v3724_v36 = vpop.f32.mrb[56].mxu1  ;;  %4080 = vtanh.f32 %v3532_v35 }
 0x15b   :  { %v4061_v37 = vpop.eup %4060  ;;  %2826 = vst.msk [vmem:[%s6460_s2 + $0x598] sm:$0xff] %vm2646_vm1, %v4059_v34  ;;  %v1391_v38 = vpop.f32.mrb[57].mxu0  ;;  %4082 = vtanh.f32 %v3724_v36 }
 0x15c   :  { %v2031_v39 = vpop.f32.mrb[57].mxu1  ;;  %v4063_v40 = vpop.eup %4062  ;;  %2697 = vst.msk [vmem:[%s6460_s2 + $0x190] sm:$0xff] %vm2646_vm1, %v4061_v37  ;;  %4084 = vtanh.f32 %v1391_v38 }
 0x15d   :  { %v4065_v41 = vpop.eup %4064  ;;  %2825 = vst.msk [vmem:[%s6460_s2 + $0x590] sm:$0xff] %vm2646_vm1, %v4063_v40  ;;  %4086 = vtanh.f32 %v2031_v39  ;;  %v3535_v43 = vpop.f32.mrb[58].mxu0 }
 0x15e   :  { %v4067_v42 = vpop.eup %4066  ;;  %2700 = vst.msk [vmem:[%s6460_s2 + $0x1a8] sm:$0xff] %vm2646_vm1, %v4065_v41  ;;  %v3727_v44 = vpop.f32.mrb[58].mxu1  ;;  %4088 = vtanh.f32 %v3535_v43 }
 0x15f   :  { %v4069_v45 = vpop.eup %4068  ;;  %2828 = vst.msk [vmem:[%s6460_s2 + $0x5a8] sm:$0xff] %vm2646_vm1, %v4067_v42  ;;  %v1401_v46 = vpop.f32.mrb[59].mxu0  ;;  %4090 = vtanh.f32 %v3727_v44 }
 0x160   :  { %v2041_v47 = vpop.f32.mrb[59].mxu1  ;;  %v4071_v48 = vpop.eup %4070  ;;  %2699 = vst.msk [vmem:[%s6460_s2 + $0x1a0] sm:$0xff] %vm2646_vm1, %v4069_v45  ;;  %4092 = vtanh.f32 %v1401_v46 }
 0x161   :  { %v4073_v49 = vpop.eup %4072  ;;  %2827 = vst.msk [vmem:[%s6460_s2 + $0x5a0] sm:$0xff] %vm2646_vm1, %v4071_v48  ;;  %4094 = vtanh.f32 %v2041_v47  ;;  %v3538_v51 = vpop.f32.mrb[60].mxu0 }
 0x162   :  { %v4075_v50 = vpop.eup %4074  ;;  %2702 = vst.msk [vmem:[%s6460_s2 + $0x1b8] sm:$0xff] %vm2646_vm1, %v4073_v49  ;;  %v3730_v52 = vpop.f32.mrb[60].mxu1  ;;  %4096 = vtanh.f32 %v3538_v51 }
 0x163   :  { %v4077_v53 = vpop.eup %4076  ;;  %2830 = vst.msk [vmem:[%s6460_s2 + $0x5b8] sm:$0xff] %vm2646_vm1, %v4075_v50  ;;  %v1411_v54 = vpop.f32.mrb[61].mxu0  ;;  %4098 = vtanh.f32 %v3730_v52 }
 0x164   :  { %v2051_v55 = vpop.f32.mrb[61].mxu1  ;;  %v4079_v56 = vpop.eup %4078  ;;  %2701 = vst.msk [vmem:[%s6460_s2 + $0x1b0] sm:$0xff] %vm2646_vm1, %v4077_v53  ;;  %4100 = vtanh.f32 %v1411_v54 }
 0x165   :  { %v4081_v57 = vpop.eup %4080  ;;  %2829 = vst.msk [vmem:[%s6460_s2 + $0x5b0] sm:$0xff] %vm2646_vm1, %v4079_v56  ;;  %4102 = vtanh.f32 %v2051_v55  ;;  %v3541_v59 = vpop.f32.mrb[62].mxu0 }
 0x166   :  { %v4083_v58 = vpop.eup %4082  ;;  %2704 = vst.msk [vmem:[%s6460_s2 + $0x1c8] sm:$0xff] %vm2646_vm1, %v4081_v57  ;;  %v3733_v60 = vpop.f32.mrb[62].mxu1  ;;  %4104 = vtanh.f32 %v3541_v59 }
 0x167   :  { %v4085_v61 = vpop.eup %4084  ;;  %2832 = vst.msk [vmem:[%s6460_s2 + $0x5c8] sm:$0xff] %vm2646_vm1, %v4083_v58  ;;  %v1421_v62 = vpop.f32.mrb[63].mxu0  ;;  %4106 = vtanh.f32 %v3733_v60 }
 0x168   :  { %v2061_v63 = vpop.f32.mrb[63].mxu1  ;;  %v4087_v0 = vpop.eup %4086  ;;  %2703 = vst.msk [vmem:[%s6460_s2 + $0x1c0] sm:$0xff] %vm2646_vm1, %v4085_v61  ;;  %4108 = vtanh.f32 %v1421_v62 }
 0x169   :  { %v4089_v1 = vpop.eup %4088  ;;  %2831 = vst.msk [vmem:[%s6460_s2 + $0x5c0] sm:$0xff] %vm2646_vm1, %v4087_v0  ;;  %4110 = vtanh.f32 %v2061_v63  ;;  %v3544_v3 = vpop.f32.mrb[64].mxu0 }
 0x16a   :  { %v4091_v2 = vpop.eup %4090  ;;  %2706 = vst.msk [vmem:[%s6460_s2 + $0x1d8] sm:$0xff] %vm2646_vm1, %v4089_v1  ;;  %v3736_v4 = vpop.f32.mrb[64].mxu1  ;;  %4112 = vtanh.f32 %v3544_v3 }
 0x16b   :  { %v4093_v5 = vpop.eup %4092  ;;  %2834 = vst.msk [vmem:[%s6460_s2 + $0x5d8] sm:$0xff] %vm2646_vm1, %v4091_v2  ;;  %v1431_v6 = vpop.f32.mrb[65].mxu0  ;;  %4114 = vtanh.f32 %v3736_v4 }
 0x16c   :  { %v2071_v7 = vpop.f32.mrb[65].mxu1  ;;  %v4095_v8 = vpop.eup %4094  ;;  %2705 = vst.msk [vmem:[%s6460_s2 + $0x1d0] sm:$0xff] %vm2646_vm1, %v4093_v5  ;;  %4116 = vtanh.f32 %v1431_v6 }
 0x16d   :  { %v4097_v9 = vpop.eup %4096  ;;  %2833 = vst.msk [vmem:[%s6460_s2 + $0x5d0] sm:$0xff] %vm2646_vm1, %v4095_v8  ;;  %4118 = vtanh.f32 %v2071_v7  ;;  %v3547_v11 = vpop.f32.mrb[66].mxu0 }
 0x16e   :  { %v4099_v10 = vpop.eup %4098  ;;  %2708 = vst.msk [vmem:[%s6460_s2 + $0x1e8] sm:$0xff] %vm2646_vm1, %v4097_v9  ;;  %v3739_v12 = vpop.f32.mrb[66].mxu1  ;;  %4120 = vtanh.f32 %v3547_v11 }
 0x16f   :  { %v4101_v13 = vpop.eup %4100  ;;  %2836 = vst.msk [vmem:[%s6460_s2 + $0x5e8] sm:$0xff] %vm2646_vm1, %v4099_v10  ;;  %v1441_v14 = vpop.f32.mrb[67].mxu0  ;;  %4122 = vtanh.f32 %v3739_v12 }
 0x170   :  { %v2081_v15 = vpop.f32.mrb[67].mxu1  ;;  %v4103_v16 = vpop.eup %4102  ;;  %2707 = vst.msk [vmem:[%s6460_s2 + $0x1e0] sm:$0xff] %vm2646_vm1, %v4101_v13  ;;  %4124 = vtanh.f32 %v1441_v14 }
 0x171   :  { %v4105_v17 = vpop.eup %4104  ;;  %2835 = vst.msk [vmem:[%s6460_s2 + $0x5e0] sm:$0xff] %vm2646_vm1, %v4103_v16  ;;  %4126 = vtanh.f32 %v2081_v15  ;;  %v3550_v19 = vpop.f32.mrb[68].mxu0 }
 0x172   :  { %v4107_v18 = vpop.eup %4106  ;;  %2710 = vst.msk [vmem:[%s6460_s2 + $0x1f8] sm:$0xff] %vm2646_vm1, %v4105_v17  ;;  %v3742_v20 = vpop.f32.mrb[68].mxu1  ;;  %4128 = vtanh.f32 %v3550_v19 }
 0x173   :  { %v4109_v21 = vpop.eup %4108  ;;  %2838 = vst.msk [vmem:[%s6460_s2 + $0x5f8] sm:$0xff] %vm2646_vm1, %v4107_v18  ;;  %v1451_v22 = vpop.f32.mrb[69].mxu0  ;;  %4130 = vtanh.f32 %v3742_v20 }
 0x174   :  { %v2091_v23 = vpop.f32.mrb[69].mxu1  ;;  %v4111_v24 = vpop.eup %4110  ;;  %2709 = vst.msk [vmem:[%s6460_s2 + $0x1f0] sm:$0xff] %vm2646_vm1, %v4109_v21  ;;  %4132 = vtanh.f32 %v1451_v22 }
 0x175   :  { %v4113_v25 = vpop.eup %4112  ;;  %2837 = vst.msk [vmem:[%s6460_s2 + $0x5f0] sm:$0xff] %vm2646_vm1, %v4111_v24  ;;  %4134 = vtanh.f32 %v2091_v23  ;;  %v3553_v27 = vpop.f32.mrb[70].mxu0 }
 0x176   :  { %v4115_v26 = vpop.eup %4114  ;;  %2712 = vst.msk [vmem:[%s6460_s2 + $0x208] sm:$0xff] %vm2646_vm1, %v4113_v25  ;;  %v3745_v28 = vpop.f32.mrb[70].mxu1  ;;  %4136 = vtanh.f32 %v3553_v27 }
 0x177   :  { %v4117_v29 = vpop.eup %4116  ;;  %2840 = vst.msk [vmem:[%s6460_s2 + $0x608] sm:$0xff] %vm2646_vm1, %v4115_v26  ;;  %v1461_v30 = vpop.f32.mrb[71].mxu0  ;;  %4138 = vtanh.f32 %v3745_v28 }
 0x178   :  { %v2101_v31 = vpop.f32.mrb[71].mxu1  ;;  %v4119_v32 = vpop.eup %4118  ;;  %2711 = vst.msk [vmem:[%s6460_s2 + $0x200] sm:$0xff] %vm2646_vm1, %v4117_v29  ;;  %4140 = vtanh.f32 %v1461_v30 }
 0x179   :  { %v4121_v33 = vpop.eup %4120  ;;  %2839 = vst.msk [vmem:[%s6460_s2 + $0x600] sm:$0xff] %vm2646_vm1, %v4119_v32  ;;  %4142 = vtanh.f32 %v2101_v31  ;;  %v3556_v35 = vpop.f32.mrb[72].mxu0 }
 0x17a   :  { %v4123_v34 = vpop.eup %4122  ;;  %2714 = vst.msk [vmem:[%s6460_s2 + $0x218] sm:$0xff] %vm2646_vm1, %v4121_v33  ;;  %v3748_v36 = vpop.f32.mrb[72].mxu1  ;;  %4144 = vtanh.f32 %v3556_v35 }
 0x17b   :  { %v4125_v37 = vpop.eup %4124  ;;  %2842 = vst.msk [vmem:[%s6460_s2 + $0x618] sm:$0xff] %vm2646_vm1, %v4123_v34  ;;  %v1471_v38 = vpop.f32.mrb[73].mxu0  ;;  %4146 = vtanh.f32 %v3748_v36 }
 0x17c   :  { %v2111_v39 = vpop.f32.mrb[73].mxu1  ;;  %v4127_v40 = vpop.eup %4126  ;;  %2713 = vst.msk [vmem:[%s6460_s2 + $0x210] sm:$0xff] %vm2646_vm1, %v4125_v37  ;;  %4148 = vtanh.f32 %v1471_v38 }
 0x17d   :  { %v4129_v41 = vpop.eup %4128  ;;  %2841 = vst.msk [vmem:[%s6460_s2 + $0x610] sm:$0xff] %vm2646_vm1, %v4127_v40  ;;  %4150 = vtanh.f32 %v2111_v39  ;;  %v3559_v43 = vpop.f32.mrb[74].mxu0 }
 0x17e   :  { %v4131_v42 = vpop.eup %4130  ;;  %2716 = vst.msk [vmem:[%s6460_s2 + $0x228] sm:$0xff] %vm2646_vm1, %v4129_v41  ;;  %v3751_v44 = vpop.f32.mrb[74].mxu1  ;;  %4152 = vtanh.f32 %v3559_v43 }
 0x17f   :  { %v4133_v45 = vpop.eup %4132  ;;  %2844 = vst.msk [vmem:[%s6460_s2 + $0x628] sm:$0xff] %vm2646_vm1, %v4131_v42  ;;  %v1481_v46 = vpop.f32.mrb[75].mxu0  ;;  %4154 = vtanh.f32 %v3751_v44 }
 0x180   :  { %v2121_v47 = vpop.f32.mrb[75].mxu1  ;;  %v4135_v48 = vpop.eup %4134  ;;  %2715 = vst.msk [vmem:[%s6460_s2 + $0x220] sm:$0xff] %vm2646_vm1, %v4133_v45  ;;  %4156 = vtanh.f32 %v1481_v46 }
 0x181   :  { %v4137_v49 = vpop.eup %4136  ;;  %2843 = vst.msk [vmem:[%s6460_s2 + $0x620] sm:$0xff] %vm2646_vm1, %v4135_v48  ;;  %4158 = vtanh.f32 %v2121_v47  ;;  %v3562_v51 = vpop.f32.mrb[76].mxu0 }
 0x182   :  { %v4139_v50 = vpop.eup %4138  ;;  %2718 = vst.msk [vmem:[%s6460_s2 + $0x238] sm:$0xff] %vm2646_vm1, %v4137_v49  ;;  %v3754_v52 = vpop.f32.mrb[76].mxu1  ;;  %4160 = vtanh.f32 %v3562_v51 }
 0x183   :  { %v4141_v53 = vpop.eup %4140  ;;  %2846 = vst.msk [vmem:[%s6460_s2 + $0x638] sm:$0xff] %vm2646_vm1, %v4139_v50  ;;  %v1491_v54 = vpop.f32.mrb[77].mxu0  ;;  %4162 = vtanh.f32 %v3754_v52 }
 0x184   :  { %v2131_v55 = vpop.f32.mrb[77].mxu1  ;;  %v4143_v56 = vpop.eup %4142  ;;  %2717 = vst.msk [vmem:[%s6460_s2 + $0x230] sm:$0xff] %vm2646_vm1, %v4141_v53  ;;  %4164 = vtanh.f32 %v1491_v54 }
 0x185   :  { %v4145_v57 = vpop.eup %4144  ;;  %2845 = vst.msk [vmem:[%s6460_s2 + $0x630] sm:$0xff] %vm2646_vm1, %v4143_v56  ;;  %4166 = vtanh.f32 %v2131_v55  ;;  %v3565_v59 = vpop.f32.mrb[78].mxu0 }
 0x186   :  { %v4147_v58 = vpop.eup %4146  ;;  %2720 = vst.msk [vmem:[%s6460_s2 + $0x248] sm:$0xff] %vm2646_vm1, %v4145_v57  ;;  %v3757_v60 = vpop.f32.mrb[78].mxu1  ;;  %4168 = vtanh.f32 %v3565_v59 }
 0x187   :  { %v4149_v61 = vpop.eup %4148  ;;  %2848 = vst.msk [vmem:[%s6460_s2 + $0x648] sm:$0xff] %vm2646_vm1, %v4147_v58  ;;  %v1501_v62 = vpop.f32.mrb[79].mxu0  ;;  %4170 = vtanh.f32 %v3757_v60 }
 0x188   :  { %v2141_v63 = vpop.f32.mrb[79].mxu1  ;;  %v4151_v0 = vpop.eup %4150  ;;  %2719 = vst.msk [vmem:[%s6460_s2 + $0x240] sm:$0xff] %vm2646_vm1, %v4149_v61  ;;  %4172 = vtanh.f32 %v1501_v62 }
 0x189   :  { %v4153_v1 = vpop.eup %4152  ;;  %2847 = vst.msk [vmem:[%s6460_s2 + $0x640] sm:$0xff] %vm2646_vm1, %v4151_v0  ;;  %4174 = vtanh.f32 %v2141_v63  ;;  %v3568_v3 = vpop.f32.mrb[80].mxu0 }
 0x18a   :  { %v4155_v2 = vpop.eup %4154  ;;  %2722 = vst.msk [vmem:[%s6460_s2 + $0x258] sm:$0xff] %vm2646_vm1, %v4153_v1  ;;  %v3760_v4 = vpop.f32.mrb[80].mxu1  ;;  %4176 = vtanh.f32 %v3568_v3 }
 0x18b   :  { %v4157_v5 = vpop.eup %4156  ;;  %2850 = vst.msk [vmem:[%s6460_s2 + $0x658] sm:$0xff] %vm2646_vm1, %v4155_v2  ;;  %v1511_v6 = vpop.f32.mrb[81].mxu0  ;;  %4178 = vtanh.f32 %v3760_v4 }
 0x18c   :  { %v2151_v7 = vpop.f32.mrb[81].mxu1  ;;  %v4159_v8 = vpop.eup %4158  ;;  %2721 = vst.msk [vmem:[%s6460_s2 + $0x250] sm:$0xff] %vm2646_vm1, %v4157_v5  ;;  %4180 = vtanh.f32 %v1511_v6 }
 0x18d   :  { %v4161_v9 = vpop.eup %4160  ;;  %2849 = vst.msk [vmem:[%s6460_s2 + $0x650] sm:$0xff] %vm2646_vm1, %v4159_v8  ;;  %4182 = vtanh.f32 %v2151_v7  ;;  %v3571_v11 = vpop.f32.mrb[82].mxu0 }
 0x18e   :  { %v4163_v10 = vpop.eup %4162  ;;  %2724 = vst.msk [vmem:[%s6460_s2 + $0x268] sm:$0xff] %vm2646_vm1, %v4161_v9  ;;  %v3763_v12 = vpop.f32.mrb[82].mxu1  ;;  %4184 = vtanh.f32 %v3571_v11 }
 0x18f   :  { %v4165_v13 = vpop.eup %4164  ;;  %2852 = vst.msk [vmem:[%s6460_s2 + $0x668] sm:$0xff] %vm2646_vm1, %v4163_v10  ;;  %v1521_v14 = vpop.f32.mrb[83].mxu0  ;;  %4186 = vtanh.f32 %v3763_v12 }
 0x190   :  { %v2161_v15 = vpop.f32.mrb[83].mxu1  ;;  %v4167_v16 = vpop.eup %4166  ;;  %2723 = vst.msk [vmem:[%s6460_s2 + $0x260] sm:$0xff] %vm2646_vm1, %v4165_v13  ;;  %4188 = vtanh.f32 %v1521_v14 }
 0x191   :  { %v4169_v17 = vpop.eup %4168  ;;  %2851 = vst.msk [vmem:[%s6460_s2 + $0x660] sm:$0xff] %vm2646_vm1, %v4167_v16  ;;  %4190 = vtanh.f32 %v2161_v15  ;;  %v3574_v19 = vpop.f32.mrb[84].mxu0 }
 0x192   :  { %v4171_v18 = vpop.eup %4170  ;;  %2726 = vst.msk [vmem:[%s6460_s2 + $0x278] sm:$0xff] %vm2646_vm1, %v4169_v17  ;;  %v3766_v20 = vpop.f32.mrb[84].mxu1  ;;  %4192 = vtanh.f32 %v3574_v19 }
 0x193   :  { %v4173_v21 = vpop.eup %4172  ;;  %2854 = vst.msk [vmem:[%s6460_s2 + $0x678] sm:$0xff] %vm2646_vm1, %v4171_v18  ;;  %v1531_v22 = vpop.f32.mrb[85].mxu0  ;;  %4194 = vtanh.f32 %v3766_v20 }
 0x194   :  { %v2171_v23 = vpop.f32.mrb[85].mxu1  ;;  %v4175_v24 = vpop.eup %4174  ;;  %2725 = vst.msk [vmem:[%s6460_s2 + $0x270] sm:$0xff] %vm2646_vm1, %v4173_v21  ;;  %4196 = vtanh.f32 %v1531_v22 }
 0x195   :  { %v4177_v25 = vpop.eup %4176  ;;  %2853 = vst.msk [vmem:[%s6460_s2 + $0x670] sm:$0xff] %vm2646_vm1, %v4175_v24  ;;  %4198 = vtanh.f32 %v2171_v23  ;;  %v3577_v27 = vpop.f32.mrb[86].mxu0 }
 0x196   :  { %v4179_v26 = vpop.eup %4178  ;;  %2728 = vst.msk [vmem:[%s6460_s2 + $0x288] sm:$0xff] %vm2646_vm1, %v4177_v25  ;;  %v3769_v28 = vpop.f32.mrb[86].mxu1  ;;  %4200 = vtanh.f32 %v3577_v27 }
 0x197   :  { %v4181_v29 = vpop.eup %4180  ;;  %2856 = vst.msk [vmem:[%s6460_s2 + $0x688] sm:$0xff] %vm2646_vm1, %v4179_v26  ;;  %v1541_v30 = vpop.f32.mrb[87].mxu0  ;;  %4202 = vtanh.f32 %v3769_v28 }
 0x198   :  { %v2181_v31 = vpop.f32.mrb[87].mxu1  ;;  %v4183_v32 = vpop.eup %4182  ;;  %2727 = vst.msk [vmem:[%s6460_s2 + $0x280] sm:$0xff] %vm2646_vm1, %v4181_v29  ;;  %4204 = vtanh.f32 %v1541_v30 }
 0x199   :  { %v4185_v33 = vpop.eup %4184  ;;  %2855 = vst.msk [vmem:[%s6460_s2 + $0x680] sm:$0xff] %vm2646_vm1, %v4183_v32  ;;  %4206 = vtanh.f32 %v2181_v31  ;;  %v3580_v35 = vpop.f32.mrb[88].mxu0 }
 0x19a   :  { %v4187_v34 = vpop.eup %4186  ;;  %2730 = vst.msk [vmem:[%s6460_s2 + $0x298] sm:$0xff] %vm2646_vm1, %v4185_v33  ;;  %v3772_v36 = vpop.f32.mrb[88].mxu1  ;;  %4208 = vtanh.f32 %v3580_v35 }
 0x19b   :  { %v4189_v37 = vpop.eup %4188  ;;  %2858 = vst.msk [vmem:[%s6460_s2 + $0x698] sm:$0xff] %vm2646_vm1, %v4187_v34  ;;  %v1551_v38 = vpop.f32.mrb[89].mxu0  ;;  %4210 = vtanh.f32 %v3772_v36 }
 0x19c   :  { %v2191_v39 = vpop.f32.mrb[89].mxu1  ;;  %v4191_v40 = vpop.eup %4190  ;;  %2729 = vst.msk [vmem:[%s6460_s2 + $0x290] sm:$0xff] %vm2646_vm1, %v4189_v37  ;;  %4212 = vtanh.f32 %v1551_v38 }
 0x19d   :  { %v4193_v41 = vpop.eup %4192  ;;  %2857 = vst.msk [vmem:[%s6460_s2 + $0x690] sm:$0xff] %vm2646_vm1, %v4191_v40  ;;  %4214 = vtanh.f32 %v2191_v39  ;;  %v3583_v43 = vpop.f32.mrb[90].mxu0 }
 0x19e   :  { %v4195_v42 = vpop.eup %4194  ;;  %2732 = vst.msk [vmem:[%s6460_s2 + $0x2a8] sm:$0xff] %vm2646_vm1, %v4193_v41  ;;  %v3775_v44 = vpop.f32.mrb[90].mxu1  ;;  %4216 = vtanh.f32 %v3583_v43 }
 0x19f   :  { %v4197_v45 = vpop.eup %4196  ;;  %2860 = vst.msk [vmem:[%s6460_s2 + $0x6a8] sm:$0xff] %vm2646_vm1, %v4195_v42  ;;  %v1561_v46 = vpop.f32.mrb[91].mxu0  ;;  %4218 = vtanh.f32 %v3775_v44 }
 0x1a0   :  { %v2201_v47 = vpop.f32.mrb[91].mxu1  ;;  %v4199_v48 = vpop.eup %4198  ;;  %2731 = vst.msk [vmem:[%s6460_s2 + $0x2a0] sm:$0xff] %vm2646_vm1, %v4197_v45  ;;  %4220 = vtanh.f32 %v1561_v46 }
 0x1a1   :  { %v4201_v49 = vpop.eup %4200  ;;  %2859 = vst.msk [vmem:[%s6460_s2 + $0x6a0] sm:$0xff] %vm2646_vm1, %v4199_v48  ;;  %4222 = vtanh.f32 %v2201_v47  ;;  %v3586_v51 = vpop.f32.mrb[92].mxu0 }
 0x1a2   :  { %v4203_v50 = vpop.eup %4202  ;;  %2734 = vst.msk [vmem:[%s6460_s2 + $0x2b8] sm:$0xff] %vm2646_vm1, %v4201_v49  ;;  %v3778_v52 = vpop.f32.mrb[92].mxu1  ;;  %4224 = vtanh.f32 %v3586_v51 }
 0x1a3   :  { %v4205_v53 = vpop.eup %4204  ;;  %2862 = vst.msk [vmem:[%s6460_s2 + $0x6b8] sm:$0xff] %vm2646_vm1, %v4203_v50  ;;  %v1571_v54 = vpop.f32.mrb[93].mxu0  ;;  %4226 = vtanh.f32 %v3778_v52 }
 0x1a4   :  { %v2211_v55 = vpop.f32.mrb[93].mxu1  ;;  %v4207_v56 = vpop.eup %4206  ;;  %2733 = vst.msk [vmem:[%s6460_s2 + $0x2b0] sm:$0xff] %vm2646_vm1, %v4205_v53  ;;  %4228 = vtanh.f32 %v1571_v54 }
 0x1a5   :  { %v4209_v57 = vpop.eup %4208  ;;  %2861 = vst.msk [vmem:[%s6460_s2 + $0x6b0] sm:$0xff] %vm2646_vm1, %v4207_v56  ;;  %4230 = vtanh.f32 %v2211_v55  ;;  %v3589_v59 = vpop.f32.mrb[94].mxu0 }
 0x1a6   :  { %v4211_v58 = vpop.eup %4210  ;;  %2736 = vst.msk [vmem:[%s6460_s2 + $0x2c8] sm:$0xff] %vm2646_vm1, %v4209_v57  ;;  %v3781_v60 = vpop.f32.mrb[94].mxu1  ;;  %4232 = vtanh.f32 %v3589_v59 }
 0x1a7   :  { %v4213_v61 = vpop.eup %4212  ;;  %2864 = vst.msk [vmem:[%s6460_s2 + $0x6c8] sm:$0xff] %vm2646_vm1, %v4211_v58  ;;  %v1581_v62 = vpop.f32.mrb[95].mxu0  ;;  %4234 = vtanh.f32 %v3781_v60 }
 0x1a8   :  { %v2221_v63 = vpop.f32.mrb[95].mxu1  ;;  %v4215_v0 = vpop.eup %4214  ;;  %2735 = vst.msk [vmem:[%s6460_s2 + $0x2c0] sm:$0xff] %vm2646_vm1, %v4213_v61  ;;  %4236 = vtanh.f32 %v1581_v62 }
 0x1a9   :  { %v4217_v1 = vpop.eup %4216  ;;  %2863 = vst.msk [vmem:[%s6460_s2 + $0x6c0] sm:$0xff] %vm2646_vm1, %v4215_v0  ;;  %4238 = vtanh.f32 %v2221_v63  ;;  %v3592_v3 = vpop.f32.mrb[96].mxu0 }
 0x1aa   :  { %v4219_v2 = vpop.eup %4218  ;;  %2738 = vst.msk [vmem:[%s6460_s2 + $0x2d8] sm:$0xff] %vm2646_vm1, %v4217_v1  ;;  %v3784_v4 = vpop.f32.mrb[96].mxu1  ;;  %4240 = vtanh.f32 %v3592_v3 }
 0x1ab   :  { %v4221_v5 = vpop.eup %4220  ;;  %2866 = vst.msk [vmem:[%s6460_s2 + $0x6d8] sm:$0xff] %vm2646_vm1, %v4219_v2  ;;  %v1591_v6 = vpop.f32.mrb[97].mxu0  ;;  %4242 = vtanh.f32 %v3784_v4 }
 0x1ac   :  { %v2231_v7 = vpop.f32.mrb[97].mxu1  ;;  %v4223_v8 = vpop.eup %4222  ;;  %2737 = vst.msk [vmem:[%s6460_s2 + $0x2d0] sm:$0xff] %vm2646_vm1, %v4221_v5  ;;  %4244 = vtanh.f32 %v1591_v6 }
 0x1ad   :  { %v4225_v9 = vpop.eup %4224  ;;  %2865 = vst.msk [vmem:[%s6460_s2 + $0x6d0] sm:$0xff] %vm2646_vm1, %v4223_v8  ;;  %4246 = vtanh.f32 %v2231_v7  ;;  %v3595_v11 = vpop.f32.mrb[98].mxu0 }
 0x1ae   :  { %v4227_v10 = vpop.eup %4226  ;;  %2740 = vst.msk [vmem:[%s6460_s2 + $0x2e8] sm:$0xff] %vm2646_vm1, %v4225_v9  ;;  %v3787_v12 = vpop.f32.mrb[98].mxu1  ;;  %4248 = vtanh.f32 %v3595_v11 }
 0x1af   :  { %v4229_v13 = vpop.eup %4228  ;;  %2868 = vst.msk [vmem:[%s6460_s2 + $0x6e8] sm:$0xff] %vm2646_vm1, %v4227_v10  ;;  %v1601_v14 = vpop.f32.mrb[99].mxu0  ;;  %4250 = vtanh.f32 %v3787_v12 }
 0x1b0   :  { %v2241_v15 = vpop.f32.mrb[99].mxu1  ;;  %v4231_v16 = vpop.eup %4230  ;;  %2739 = vst.msk [vmem:[%s6460_s2 + $0x2e0] sm:$0xff] %vm2646_vm1, %v4229_v13  ;;  %4252 = vtanh.f32 %v1601_v14 }
 0x1b1   :  { %v4233_v17 = vpop.eup %4232  ;;  %2867 = vst.msk [vmem:[%s6460_s2 + $0x6e0] sm:$0xff] %vm2646_vm1, %v4231_v16  ;;  %4254 = vtanh.f32 %v2241_v15  ;;  %v3598_v19 = vpop.f32.mrb[100].mxu0 }
 0x1b2   :  { %v4235_v18 = vpop.eup %4234  ;;  %2742 = vst.msk [vmem:[%s6460_s2 + $0x2f8] sm:$0xff] %vm2646_vm1, %v4233_v17  ;;  %v3790_v20 = vpop.f32.mrb[100].mxu1  ;;  %4256 = vtanh.f32 %v3598_v19 }
 0x1b3   :  { %v4237_v21 = vpop.eup %4236  ;;  %2870 = vst.msk [vmem:[%s6460_s2 + $0x6f8] sm:$0xff] %vm2646_vm1, %v4235_v18  ;;  %v1611_v22 = vpop.f32.mrb[101].mxu0  ;;  %4258 = vtanh.f32 %v3790_v20 }
 0x1b4   :  { %v2251_v23 = vpop.f32.mrb[101].mxu1  ;;  %v4239_v24 = vpop.eup %4238  ;;  %2741 = vst.msk [vmem:[%s6460_s2 + $0x2f0] sm:$0xff] %vm2646_vm1, %v4237_v21  ;;  %4260 = vtanh.f32 %v1611_v22 }
 0x1b5   :  { %v4241_v25 = vpop.eup %4240  ;;  %2869 = vst.msk [vmem:[%s6460_s2 + $0x6f0] sm:$0xff] %vm2646_vm1, %v4239_v24  ;;  %4262 = vtanh.f32 %v2251_v23  ;;  %v3601_v27 = vpop.f32.mrb[102].mxu0 }
 0x1b6   :  { %v4243_v26 = vpop.eup %4242  ;;  %2744 = vst.msk [vmem:[%s6460_s2 + $0x308] sm:$0xff] %vm2646_vm1, %v4241_v25  ;;  %v3793_v28 = vpop.f32.mrb[102].mxu1  ;;  %4264 = vtanh.f32 %v3601_v27 }
 0x1b7   :  { %v4245_v29 = vpop.eup %4244  ;;  %2872 = vst.msk [vmem:[%s6460_s2 + $0x708] sm:$0xff] %vm2646_vm1, %v4243_v26  ;;  %v1621_v30 = vpop.f32.mrb[103].mxu0  ;;  %4266 = vtanh.f32 %v3793_v28 }
 0x1b8   :  { %v2261_v31 = vpop.f32.mrb[103].mxu1  ;;  %v4247_v32 = vpop.eup %4246  ;;  %2743 = vst.msk [vmem:[%s6460_s2 + $0x300] sm:$0xff] %vm2646_vm1, %v4245_v29  ;;  %4268 = vtanh.f32 %v1621_v30 }
 0x1b9   :  { %v4249_v33 = vpop.eup %4248  ;;  %2871 = vst.msk [vmem:[%s6460_s2 + $0x700] sm:$0xff] %vm2646_vm1, %v4247_v32  ;;  %4270 = vtanh.f32 %v2261_v31  ;;  %v3604_v35 = vpop.f32.mrb[104].mxu0 }
 0x1ba   :  { %v4251_v34 = vpop.eup %4250  ;;  %2746 = vst.msk [vmem:[%s6460_s2 + $0x318] sm:$0xff] %vm2646_vm1, %v4249_v33  ;;  %v3796_v36 = vpop.f32.mrb[104].mxu1  ;;  %4272 = vtanh.f32 %v3604_v35 }
 0x1bb   :  { %v4253_v37 = vpop.eup %4252  ;;  %2874 = vst.msk [vmem:[%s6460_s2 + $0x718] sm:$0xff] %vm2646_vm1, %v4251_v34  ;;  %v1631_v38 = vpop.f32.mrb[105].mxu0  ;;  %4274 = vtanh.f32 %v3796_v36 }
 0x1bc   :  { %v2271_v39 = vpop.f32.mrb[105].mxu1  ;;  %v4255_v40 = vpop.eup %4254  ;;  %2745 = vst.msk [vmem:[%s6460_s2 + $0x310] sm:$0xff] %vm2646_vm1, %v4253_v37  ;;  %4276 = vtanh.f32 %v1631_v38 }
 0x1bd   :  { %v4257_v41 = vpop.eup %4256  ;;  %2873 = vst.msk [vmem:[%s6460_s2 + $0x710] sm:$0xff] %vm2646_vm1, %v4255_v40  ;;  %4278 = vtanh.f32 %v2271_v39  ;;  %v3607_v43 = vpop.f32.mrb[106].mxu0 }
 0x1be   :  { %v4259_v42 = vpop.eup %4258  ;;  %2748 = vst.msk [vmem:[%s6460_s2 + $0x328] sm:$0xff] %vm2646_vm1, %v4257_v41  ;;  %v3799_v44 = vpop.f32.mrb[106].mxu1  ;;  %4280 = vtanh.f32 %v3607_v43 }
 0x1bf   :  { %v4261_v45 = vpop.eup %4260  ;;  %2876 = vst.msk [vmem:[%s6460_s2 + $0x728] sm:$0xff] %vm2646_vm1, %v4259_v42  ;;  %v1641_v46 = vpop.f32.mrb[107].mxu0  ;;  %4282 = vtanh.f32 %v3799_v44 }
 0x1c0   :  { %v2281_v47 = vpop.f32.mrb[107].mxu1  ;;  %v4263_v48 = vpop.eup %4262  ;;  %2747 = vst.msk [vmem:[%s6460_s2 + $0x320] sm:$0xff] %vm2646_vm1, %v4261_v45  ;;  %4284 = vtanh.f32 %v1641_v46 }
 0x1c1   :  { %v4265_v49 = vpop.eup %4264  ;;  %2875 = vst.msk [vmem:[%s6460_s2 + $0x720] sm:$0xff] %vm2646_vm1, %v4263_v48  ;;  %4286 = vtanh.f32 %v2281_v47  ;;  %v3610_v51 = vpop.f32.mrb[108].mxu0 }
 0x1c2   :  { %v4267_v50 = vpop.eup %4266  ;;  %2750 = vst.msk [vmem:[%s6460_s2 + $0x338] sm:$0xff] %vm2646_vm1, %v4265_v49  ;;  %v3802_v52 = vpop.f32.mrb[108].mxu1  ;;  %4288 = vtanh.f32 %v3610_v51 }
 0x1c3   :  { %v4269_v53 = vpop.eup %4268  ;;  %2878 = vst.msk [vmem:[%s6460_s2 + $0x738] sm:$0xff] %vm2646_vm1, %v4267_v50  ;;  %v1651_v54 = vpop.f32.mrb[109].mxu0  ;;  %4290 = vtanh.f32 %v3802_v52 }
 0x1c4   :  { %v2291_v55 = vpop.f32.mrb[109].mxu1  ;;  %v4271_v56 = vpop.eup %4270  ;;  %2749 = vst.msk [vmem:[%s6460_s2 + $0x330] sm:$0xff] %vm2646_vm1, %v4269_v53  ;;  %4292 = vtanh.f32 %v1651_v54 }
 0x1c5   :  { %v4273_v57 = vpop.eup %4272  ;;  %2877 = vst.msk [vmem:[%s6460_s2 + $0x730] sm:$0xff] %vm2646_vm1, %v4271_v56  ;;  %4294 = vtanh.f32 %v2291_v55  ;;  %v3613_v59 = vpop.f32.mrb[110].mxu0 }
 0x1c6   :  { %v4275_v58 = vpop.eup %4274  ;;  %2752 = vst.msk [vmem:[%s6460_s2 + $0x348] sm:$0xff] %vm2646_vm1, %v4273_v57  ;;  %v3805_v60 = vpop.f32.mrb[110].mxu1  ;;  %4296 = vtanh.f32 %v3613_v59 }
 0x1c7   :  { %v4277_v61 = vpop.eup %4276  ;;  %2880 = vst.msk [vmem:[%s6460_s2 + $0x748] sm:$0xff] %vm2646_vm1, %v4275_v58  ;;  %v1661_v62 = vpop.f32.mrb[111].mxu0  ;;  %4298 = vtanh.f32 %v3805_v60 }
 0x1c8   :  { %v2301_v63 = vpop.f32.mrb[111].mxu1  ;;  %v4279_v0 = vpop.eup %4278  ;;  %2751 = vst.msk [vmem:[%s6460_s2 + $0x340] sm:$0xff] %vm2646_vm1, %v4277_v61  ;;  %4300 = vtanh.f32 %v1661_v62 }
 0x1c9   :  { %v4281_v1 = vpop.eup %4280  ;;  %2879 = vst.msk [vmem:[%s6460_s2 + $0x740] sm:$0xff] %vm2646_vm1, %v4279_v0  ;;  %4302 = vtanh.f32 %v2301_v63  ;;  %v3616_v3 = vpop.f32.mrb[112].mxu0 }
 0x1ca   :  { %v4283_v2 = vpop.eup %4282  ;;  %2754 = vst.msk [vmem:[%s6460_s2 + $0x358] sm:$0xff] %vm2646_vm1, %v4281_v1  ;;  %v3808_v4 = vpop.f32.mrb[112].mxu1  ;;  %4304 = vtanh.f32 %v3616_v3 }
 0x1cb   :  { %v4285_v5 = vpop.eup %4284  ;;  %2882 = vst.msk [vmem:[%s6460_s2 + $0x758] sm:$0xff] %vm2646_vm1, %v4283_v2  ;;  %v1671_v6 = vpop.f32.mrb[113].mxu0  ;;  %4306 = vtanh.f32 %v3808_v4 }
 0x1cc   :  { %v2311_v7 = vpop.f32.mrb[113].mxu1  ;;  %v4287_v8 = vpop.eup %4286  ;;  %2753 = vst.msk [vmem:[%s6460_s2 + $0x350] sm:$0xff] %vm2646_vm1, %v4285_v5  ;;  %4308 = vtanh.f32 %v1671_v6 }
 0x1cd   :  { %v4289_v9 = vpop.eup %4288  ;;  %2881 = vst.msk [vmem:[%s6460_s2 + $0x750] sm:$0xff] %vm2646_vm1, %v4287_v8  ;;  %4310 = vtanh.f32 %v2311_v7  ;;  %v3619_v11 = vpop.f32.mrb[114].mxu0 }
 0x1ce   :  { %v4291_v10 = vpop.eup %4290  ;;  %2756 = vst.msk [vmem:[%s6460_s2 + $0x368] sm:$0xff] %vm2646_vm1, %v4289_v9  ;;  %v3811_v12 = vpop.f32.mrb[114].mxu1  ;;  %4312 = vtanh.f32 %v3619_v11 }
 0x1cf   :  { %v4293_v13 = vpop.eup %4292  ;;  %2884 = vst.msk [vmem:[%s6460_s2 + $0x768] sm:$0xff] %vm2646_vm1, %v4291_v10  ;;  %v1681_v14 = vpop.f32.mrb[115].mxu0  ;;  %4314 = vtanh.f32 %v3811_v12 }
 0x1d0   :  { %v2321_v15 = vpop.f32.mrb[115].mxu1  ;;  %v4295_v16 = vpop.eup %4294  ;;  %2755 = vst.msk [vmem:[%s6460_s2 + $0x360] sm:$0xff] %vm2646_vm1, %v4293_v13  ;;  %4316 = vtanh.f32 %v1681_v14 }
 0x1d1   :  { %v4297_v17 = vpop.eup %4296  ;;  %2883 = vst.msk [vmem:[%s6460_s2 + $0x760] sm:$0xff] %vm2646_vm1, %v4295_v16  ;;  %4318 = vtanh.f32 %v2321_v15  ;;  %v3622_v19 = vpop.f32.mrb[116].mxu0 }
 0x1d2   :  { %v4299_v18 = vpop.eup %4298  ;;  %2758 = vst.msk [vmem:[%s6460_s2 + $0x378] sm:$0xff] %vm2646_vm1, %v4297_v17  ;;  %v3814_v20 = vpop.f32.mrb[116].mxu1  ;;  %4320 = vtanh.f32 %v3622_v19 }
 0x1d3   :  { %v4301_v21 = vpop.eup %4300  ;;  %2886 = vst.msk [vmem:[%s6460_s2 + $0x778] sm:$0xff] %vm2646_vm1, %v4299_v18  ;;  %v1691_v22 = vpop.f32.mrb[117].mxu0  ;;  %4322 = vtanh.f32 %v3814_v20 }
 0x1d4   :  { %v2331_v23 = vpop.f32.mrb[117].mxu1  ;;  %v4303_v24 = vpop.eup %4302  ;;  %2757 = vst.msk [vmem:[%s6460_s2 + $0x370] sm:$0xff] %vm2646_vm1, %v4301_v21  ;;  %4324 = vtanh.f32 %v1691_v22 }
 0x1d5   :  { %v4305_v25 = vpop.eup %4304  ;;  %2885 = vst.msk [vmem:[%s6460_s2 + $0x770] sm:$0xff] %vm2646_vm1, %v4303_v24  ;;  %4326 = vtanh.f32 %v2331_v23  ;;  %v3625_v27 = vpop.f32.mrb[118].mxu0 }
 0x1d6   :  { %v4307_v26 = vpop.eup %4306  ;;  %2760 = vst.msk [vmem:[%s6460_s2 + $0x388] sm:$0xff] %vm2646_vm1, %v4305_v25  ;;  %v3817_v28 = vpop.f32.mrb[118].mxu1  ;;  %4328 = vtanh.f32 %v3625_v27 }
 0x1d7   :  { %v4309_v29 = vpop.eup %4308  ;;  %2888 = vst.msk [vmem:[%s6460_s2 + $0x788] sm:$0xff] %vm2646_vm1, %v4307_v26  ;;  %v1701_v30 = vpop.f32.mrb[119].mxu0  ;;  %4330 = vtanh.f32 %v3817_v28 }
 0x1d8   :  { %v2341_v31 = vpop.f32.mrb[119].mxu1  ;;  %v4311_v32 = vpop.eup %4310  ;;  %2759 = vst.msk [vmem:[%s6460_s2 + $0x380] sm:$0xff] %vm2646_vm1, %v4309_v29  ;;  %4332 = vtanh.f32 %v1701_v30 }
 0x1d9   :  { %v4313_v33 = vpop.eup %4312  ;;  %2887 = vst.msk [vmem:[%s6460_s2 + $0x780] sm:$0xff] %vm2646_vm1, %v4311_v32  ;;  %4334 = vtanh.f32 %v2341_v31  ;;  %v3628_v35 = vpop.f32.mrb[120].mxu0 }
 0x1da   :  { %v4315_v34 = vpop.eup %4314  ;;  %2762 = vst.msk [vmem:[%s6460_s2 + $0x398] sm:$0xff] %vm2646_vm1, %v4313_v33  ;;  %v3820_v36 = vpop.f32.mrb[120].mxu1  ;;  %4336 = vtanh.f32 %v3628_v35 }
 0x1db   :  { %v4317_v37 = vpop.eup %4316  ;;  %2890 = vst.msk [vmem:[%s6460_s2 + $0x798] sm:$0xff] %vm2646_vm1, %v4315_v34  ;;  %v1711_v38 = vpop.f32.mrb[121].mxu0  ;;  %4338 = vtanh.f32 %v3820_v36 }
 0x1dc   :  { %v2351_v39 = vpop.f32.mrb[121].mxu1  ;;  %v4319_v40 = vpop.eup %4318  ;;  %2761 = vst.msk [vmem:[%s6460_s2 + $0x390] sm:$0xff] %vm2646_vm1, %v4317_v37  ;;  %4340 = vtanh.f32 %v1711_v38 }
 0x1dd   :  { %v4321_v41 = vpop.eup %4320  ;;  %2889 = vst.msk [vmem:[%s6460_s2 + $0x790] sm:$0xff] %vm2646_vm1, %v4319_v40  ;;  %4342 = vtanh.f32 %v2351_v39  ;;  %v3631_v43 = vpop.f32.mrb[122].mxu0 }
 0x1de   :  { %v4323_v42 = vpop.eup %4322  ;;  %2764 = vst.msk [vmem:[%s6460_s2 + $0x3a8] sm:$0xff] %vm2646_vm1, %v4321_v41  ;;  %v3823_v44 = vpop.f32.mrb[122].mxu1  ;;  %4344 = vtanh.f32 %v3631_v43 }
 0x1df   :  { %v4325_v45 = vpop.eup %4324  ;;  %2892 = vst.msk [vmem:[%s6460_s2 + $0x7a8] sm:$0xff] %vm2646_vm1, %v4323_v42  ;;  %v1721_v46 = vpop.f32.mrb[123].mxu0  ;;  %4346 = vtanh.f32 %v3823_v44 }
 0x1e0   :  { %v2361_v47 = vpop.f32.mrb[123].mxu1  ;;  %v4327_v48 = vpop.eup %4326  ;;  %2763 = vst.msk [vmem:[%s6460_s2 + $0x3a0] sm:$0xff] %vm2646_vm1, %v4325_v45  ;;  %4348 = vtanh.f32 %v1721_v46 }
 0x1e1   :  { %v4329_v49 = vpop.eup %4328  ;;  %2891 = vst.msk [vmem:[%s6460_s2 + $0x7a0] sm:$0xff] %vm2646_vm1, %v4327_v48  ;;  %4350 = vtanh.f32 %v2361_v47  ;;  %v3634_v51 = vpop.f32.mrb[124].mxu0 }
 0x1e2   :  { %v4331_v50 = vpop.eup %4330  ;;  %2766 = vst.msk [vmem:[%s6460_s2 + $0x3b8] sm:$0xff] %vm2646_vm1, %v4329_v49  ;;  %v3826_v52 = vpop.f32.mrb[124].mxu1  ;;  %4352 = vtanh.f32 %v3634_v51 }
 0x1e3   :  { %v4333_v53 = vpop.eup %4332  ;;  %2894 = vst.msk [vmem:[%s6460_s2 + $0x7b8] sm:$0xff] %vm2646_vm1, %v4331_v50  ;;  %v1731_v54 = vpop.f32.mrb[125].mxu0  ;;  %4354 = vtanh.f32 %v3826_v52 }
 0x1e4   :  { %v2371_v55 = vpop.f32.mrb[125].mxu1  ;;  %v4335_v56 = vpop.eup %4334  ;;  %2765 = vst.msk [vmem:[%s6460_s2 + $0x3b0] sm:$0xff] %vm2646_vm1, %v4333_v53  ;;  %4356 = vtanh.f32 %v1731_v54 }
 0x1e5   :  { %v4337_v57 = vpop.eup %4336  ;;  %2893 = vst.msk [vmem:[%s6460_s2 + $0x7b0] sm:$0xff] %vm2646_vm1, %v4335_v56  ;;  %4358 = vtanh.f32 %v2371_v55  ;;  %v3637_v59 = vpop.f32.mrb[126].mxu0 }
 0x1e6   :  { %v4339_v58 = vpop.eup %4338  ;;  %2768 = vst.msk [vmem:[%s6460_s2 + $0x3c8] sm:$0xff] %vm2646_vm1, %v4337_v57  ;;  %v3829_v60 = vpop.f32.mrb[126].mxu1  ;;  %4360 = vtanh.f32 %v3637_v59 }
 0x1e7   :  { %v4341_v61 = vpop.eup %4340  ;;  %2896 = vst.msk [vmem:[%s6460_s2 + $0x7c8] sm:$0xff] %vm2646_vm1, %v4339_v58  ;;  %v1741_v62 = vpop.f32.mrb[127].mxu0  ;;  %4362 = vtanh.f32 %v3829_v60 }
 0x1e8   :  { %v2381_v63 = vpop.f32.mrb[127].mxu1  ;;  %v4343_v0 = vpop.eup %4342  ;;  %2767 = vst.msk [vmem:[%s6460_s2 + $0x3c0] sm:$0xff] %vm2646_vm1, %v4341_v61  ;;  %4364 = vtanh.f32 %v1741_v62 }
 0x1e9   :  { %v4345_v1 = vpop.eup %4344  ;;  %2895 = vst.msk [vmem:[%s6460_s2 + $0x7c0] sm:$0xff] %vm2646_vm1, %v4343_v0  ;;  %4366 = vtanh.f32 %v2381_v63 }
 0x1ea   :  { %v4347_v2 = vpop.eup %4346  ;;  %2770 = vst.msk [vmem:[%s6460_s2 + $0x3d8] sm:$0xff] %vm2646_vm1, %v4345_v1 }
 0x1eb   :  { %v4349_v3 = vpop.eup %4348  ;;  %2898 = vst.msk [vmem:[%s6460_s2 + $0x7d8] sm:$0xff] %vm2646_vm1, %v4347_v2 }
 0x1ec   :  { %v4351_v4 = vpop.eup %4350  ;;  %2769 = vst.msk [vmem:[%s6460_s2 + $0x3d0] sm:$0xff] %vm2646_vm1, %v4349_v3 }
 0x1ed   :  { %v4353_v5 = vpop.eup %4352  ;;  %2897 = vst.msk [vmem:[%s6460_s2 + $0x7d0] sm:$0xff] %vm2646_vm1, %v4351_v4 }
 0x1ee   :  { %v4355_v6 = vpop.eup %4354  ;;  %2772 = vst.msk [vmem:[%s6460_s2 + $0x3e8] sm:$0xff] %vm2646_vm1, %v4353_v5 }
 0x1ef   :  { %v4357_v7 = vpop.eup %4356  ;;  %2900 = vst.msk [vmem:[%s6460_s2 + $0x7e8] sm:$0xff] %vm2646_vm1, %v4355_v6 }
 0x1f0   :  { %v4359_v8 = vpop.eup %4358  ;;  %2771 = vst.msk [vmem:[%s6460_s2 + $0x3e0] sm:$0xff] %vm2646_vm1, %v4357_v7 }
 0x1f1   :  { %v4361_v9 = vpop.eup %4360  ;;  %2899 = vst.msk [vmem:[%s6460_s2 + $0x7e0] sm:$0xff] %vm2646_vm1, %v4359_v8 }
 0x1f2   :  { %v4363_v10 = vpop.eup %4362  ;;  %2774 = vst.msk [vmem:[%s6460_s2 + $0x3f8] sm:$0xff] %vm2646_vm1, %v4361_v9 }
 0x1f3   :  { %v4365_v11 = vpop.eup %4364  ;;  %2902 = vst.msk [vmem:[%s6460_s2 + $0x7f8] sm:$0xff] %vm2646_vm1, %v4363_v10 }
 0x1f4   :  { %v4367_v12 = vpop.eup %4366  ;;  %2773 = vst.msk [vmem:[%s6460_s2 + $0x3f0] sm:$0xff] %vm2646_vm1, %v4365_v11 }
 0x1f5   :  { %2901 = vst.msk [vmem:[%s6460_s2 + $0x7f0] sm:$0xff] %vm2646_vm1, %v4367_v12 }

</bundles_post_ra>
